<compile_context>
chip_gen: v7x
topology: tpu7x:2x2x1
jax: 0.10.0
libtpu: 0.0.40
codegen_flags: <defaults>
</compile_context>

<pallas_src>
import functools

import jax
import jax.numpy as jnp
from jax import lax
from jax.experimental import pallas as pl
from jax.experimental.pallas import tpu as pltpu


MATMUL_DTYPE = jnp.bfloat16        # MXU operand dtype (accumulation is f32)
_BN_EPS = 1e-5
_LN_EPS = 1e-5


# ---------------------------------------------------------------------------
# helpers
# ---------------------------------------------------------------------------
def bn_fold(bn, eps=_BN_EPS):
    """Fold inference-mode BatchNorm into per-channel (scale, bias)."""
    scale = bn['g'] / jnp.sqrt(bn['v'] + eps)
    bias = bn['b'] - bn['m'] * scale
    return scale, bias


def _conv3x3_to_mat(w_oihw):
    """(Cout, Cin, 3, 3) -> (9*Cin, Cout); rows are tap-major / channel-minor,
    matching the in-kernel tap concatenation order."""
    return jnp.concatenate([w_oihw[:, :, kh, kw].T
                            for kh in range(3) for kw in range(3)], axis=0)


# ---------------------------------------------------------------------------
# Fused Bottleneck kernel (one grid step == one batch element)
# ---------------------------------------------------------------------------
def _bottleneck_kernel(x_ref, pre_ref, w1_ref, w2_ref, w2g_ref, w3_ref,
                       sb1_ref, sb2_ref, sb2g_ref, sb3_ref,
                       att0_ref, ln1_ref, ln2_ref,
                       wfc1_ref, sbf_ref, wfc2a_ref, wfc2b_ref,
                       out_ref, att_ref, pad_ref,
                       *, H, W, C, R, row0, col0, mm_dtype):
    f32 = jnp.float32
    HW = H * W

    # ---- conv1 (1x1) + bn1 + relu: single (HW, Cin) @ (Cin, C) matmul ------
    x = x_ref[0]                                                    # (HW, Cin)
    a1 = jnp.dot(x.astype(mm_dtype), w1_ref[...],
                 preferred_element_type=f32)                        # (HW, C)
    o1 = jnp.maximum(a1 * sb1_ref[0:1, :] + sb1_ref[1:2, :], 0.0)

    # ---- write conv1 output into a zero-padded VMEM halo scratch -----------
    # halo of 2 rows/cols covers both the dilation-1 and dilation-2 branch;
    # the 9 shifted taps are read back as static VMEM slices (no HBM im2col).
    pad_ref[...] = jnp.zeros(pad_ref.shape, pad_ref.dtype)
    pad_ref[row0:row0 + H, col0:col0 + W, :] = o1.reshape(H, W, C)

    # ---- both SK branches, each as ONE K = 9*C MXU matmul ------------------
    def sk_branch(dl, w_ref, sb_ref):
        taps = jnp.concatenate(
            [pad_ref[row0 - dl + dl * kh: row0 - dl + dl * kh + H,
                     col0 - dl + dl * kw: col0 - dl + dl * kw + W,
                     :].reshape(HW, C)
             for kh in range(3) for kw in range(3)], axis=-1)       # (HW, 9C)
        acc = jnp.dot(taps.astype(mm_dtype), w_ref[...],
                      preferred_element_type=f32)                   # (HW, C)
        return jnp.maximum(acc * sb_ref[0:1, :] + sb_ref[1:2, :], 0.0)

    d1 = sk_branch(1, w2_ref, sb2_ref)                              # (HW, C)
    d2 = sk_branch(2, w2g_ref, sb2g_ref)

    # ---- fused global average pool -----------------------------------------
    inv_hw = 1.0 / float(HW)
    gap1 = jnp.sum(d1, axis=0, keepdims=True) * inv_hw              # (1, C)
    gap2 = jnp.sum(d2, axis=0, keepdims=True) * inv_hw

    # ---- DCA att_conv{1,2}: Conv2d(2,1,1) + LayerNorm + ReLU ---------------
    # (the pre_att term  aw[1]*pre + bias  is pre-folded in the wrapper)
    def att_gate(gap, pre_eff, a0, ln):
        y = a0 * gap + pre_eff
        mu = jnp.mean(y, axis=-1, keepdims=True)
        var = jnp.mean((y - mu) ** 2, axis=-1, keepdims=True)
        y = (y - mu) * lax.rsqrt(var + _LN_EPS) * ln[0:1, :] + ln[1:2, :]
        return jnp.maximum(y, 0.0)

    g1 = att_gate(gap1, pre_ref[0, 0:1, :], att0_ref[0:1, :], ln1_ref[...])
    g2 = att_gate(gap2, pre_ref[0, 1:2, :], att0_ref[1:2, :], ln2_ref[...])

    # ---- SK gating: conv_fc1 -> bn_fc1 -> relu -> conv_fc2 -> softmax(2) ---
    # tiny (R = planes//16 rows): kept on VPU/EUP, no MXU / no extra launch.
    dg = g1 + g2                                                    # (1, C)
    h = jnp.concatenate(
        [jnp.sum(dg * wfc1_ref[r:r + 1, :], axis=-1, keepdims=True)
         for r in range(R)], axis=-1)                               # (1, R)
    h = jnp.maximum(h * sbf_ref[0:1, :] + sbf_ref[1:2, :], 0.0)
    la = jnp.zeros((1, C), f32)
    lb = jnp.zeros((1, C), f32)
    for r in range(R):
        hr = h[:, r:r + 1]                                          # (1, 1)
        la = la + hr * wfc2a_ref[r:r + 1, :]
        lb = lb + hr * wfc2b_ref[r:r + 1, :]
    m = jnp.maximum(la, lb)
    e1 = jnp.exp(la - m)
    e2 = jnp.exp(lb - m)
    inv = 1.0 / (e1 + e2)
    s1 = e1 * inv                                                   # (1, C)
    s2 = e2 * inv

    # ---- d = d1*s1 + d2*s2 ; conv3 (1x1) ; bn3 ; + identity ; relu ---------
    dsel = d1 * s1 + d2 * s2                                        # (HW, C)
    a3 = jnp.dot(dsel.astype(mm_dtype), w3_ref[...],
                 preferred_element_type=f32)                        # (HW, 4C)
    out_ref[0] = jnp.maximum(a3 * sb3_ref[0:1, :] + sb3_ref[1:2, :] + x, 0.0)

    # ---- att = [avg_pool(d1*s1) ; avg_pool(d2*s2)]  (scale commutes w/ mean)
    att_ref[0] = jnp.concatenate([s1 * gap1, s2 * gap2], axis=0)    # (2, C)


# ---------------------------------------------------------------------------
# Wrapper
# ---------------------------------------------------------------------------
def _full_spec(shape):
    zeros = (0,) * len(shape)
    return pl.BlockSpec(tuple(shape), lambda n, _z=zeros: _z)


def _batched_spec(shape):
    zeros = (0,) * len(shape)
    return pl.BlockSpec((1,) + tuple(shape), lambda n, _z=zeros: (n,) + _z)


@functools.partial(jax.jit, static_argnames=("matmul_dtype",))
def bottleneck_forward(x_nchw, pre_att, p, matmul_dtype=MATMUL_DTYPE):
    N, Cin, H, W = x_nchw.shape
    C = p['w1'].shape[0]               # planes
    C4 = p['w3'].shape[0]              # planes * expansion
    R = p['wfc1'].shape[0]             # planes // 16
    HW = H * W
    if Cin != C4:
        # TODO(synk): downsample / att_fc_{1,2} variants not implemented.
        raise NotImplementedError("identity residual requires inplanes == 4*planes")

    x_nhwc = jnp.transpose(x_nchw, (0, 2, 3, 1)).astype(jnp.float32)
    x3 = x_nhwc.reshape(N, HW, Cin)

    mm = matmul_dtype
    # --- MXU operands (cast once; accumulation stays f32 in-kernel) ---------
    w1m = p['w1'][:, :, 0, 0].T.astype(mm)                 # (Cin, C)
    w2m = _conv3x3_to_mat(p['w2']).astype(mm)              # (9C, C)
    w2gm = _conv3x3_to_mat(p['w2g']).astype(mm)            # (9C, C)
    w3m = p['w3'][:, :, 0, 0].T.astype(mm)                 # (C, 4C)

    # --- folded BN / LayerNorm / gating parameters (f32 epilogues) ----------
    sb1 = jnp.stack(bn_fold(p['bn1']))                     # (2, C)
    sb2 = jnp.stack(bn_fold(p['bn2']))
    sb2g = jnp.stack(bn_fold(p['bn2g']))
    sb3 = jnp.stack(bn_fold(p['bn3']))                     # (2, 4C)
    sbf = jnp.stack(bn_fold(p['bnf']))                     # (2, R)
    ln1 = jnp.stack([p['ln1_g'], p['ln1_b']])              # (2, C)
    ln2 = jnp.stack([p['ln2_g'], p['ln2_b']])
    att0 = jnp.stack([jnp.broadcast_to(p['aw1'][0], (C,)),
                      jnp.broadcast_to(p['aw2'][0], (C,))])          # (2, C)
    pre1 = pre_att[:, :, 0, 0].astype(jnp.float32)
    pre2 = pre_att[:, :, 0, 1].astype(jnp.float32)
    # fold  aw[1]*pre + bias  of the Conv2d(2,1,1) in XLA (scalar*vector only)
    pre_eff = jnp.stack([p['aw1'][1] * pre1 + p['ab1'][0],
                         p['aw2'][1] * pre2 + p['ab2'][0]], axis=1)  # (N, 2, C)
    wfc1t = p['wfc1'][:, :, 0, 0]                          # (R, C)
    wfc2 = p['wfc2'][:, :, 0, 0]                           # (2C, R)
    w2a = wfc2[:C, :].T                                    # (R, C) branch-0 logits
    w2b = wfc2[C:, :].T                                    # (R, C) branch-1 logits

    row0, col0 = 2, 16                 # halo >= 2; col0 keeps the store tile-aligned
    pad_shape = (H + row0 + 2, W + col0 + 2, C)

    kernel = functools.partial(_bottleneck_kernel, H=H, W=W, C=C, R=R,
                               row0=row0, col0=col0, mm_dtype=mm)

    mm_bytes = jnp.dtype(mm).itemsize
    flops = 2 * N * HW * (Cin * C + 2 * 9 * C * C + C * C4)
    bytes_accessed = ((N * HW * Cin + N * HW * C4 + 4 * N * C) * 4
                      + (Cin * C + 2 * 9 * C * C + C * C4) * mm_bytes
                      + (8 * C + 2 * C4 + 4 * R + 2 * R * C) * 4)

    out3, att2 = pl.pallas_call(
        kernel,
        out_shape=(jax.ShapeDtypeStruct((N, HW, C4), jnp.float32),
                   jax.ShapeDtypeStruct((N, 2, C), jnp.float32)),
        grid=(N,),
        in_specs=[_batched_spec((HW, Cin)), _batched_spec((2, C)),
                  _full_spec(w1m.shape), _full_spec(w2m.shape),
                  _full_spec(w2gm.shape), _full_spec(w3m.shape),
                  _full_spec(sb1.shape), _full_spec(sb2.shape),
                  _full_spec(sb2g.shape), _full_spec(sb3.shape),
                  _full_spec(att0.shape), _full_spec(ln1.shape),
                  _full_spec(ln2.shape), _full_spec(wfc1t.shape),
                  _full_spec(sbf.shape), _full_spec(w2a.shape),
                  _full_spec(w2b.shape)],
        out_specs=(_batched_spec((HW, C4)), _batched_spec((2, C))),
        scratch_shapes=[pltpu.VMEM(pad_shape, jnp.float32)],
        compiler_params=pltpu.CompilerParams(
            dimension_semantics=("parallel",),
            vmem_limit_bytes=32 * 1024 * 1024),
        cost_estimate=pl.CostEstimate(flops=flops,
                                      transcendentals=N * (2 * C + 8),
                                      bytes_accessed=bytes_accessed),
    )(x3, pre_eff, w1m, w2m, w2gm, w3m, sb1, sb2, sb2g, sb3,
      att0, ln1, ln2, wfc1t, sbf, w2a, w2b)

    out = jnp.transpose(out3.reshape(N, H, W, C4), (0, 3, 1, 2))     # NCHW
    att = jnp.transpose(att2, (0, 2, 1))[:, :, None, :]              # (N, C, 1, 2)
    return out, att


# ---------------------------------------------------------------------------
# Deterministic parameter init (shapes from the module's __init__)
# ---------------------------------------------------------------------------
def init_params(key, inplanes, planes):
    ks = iter(jax.random.split(key, 48))

    def nrm(shape, s=0.1):
        return s * jax.random.normal(next(ks), shape, jnp.float32)

    def bn(c):
        return dict(g=1.0 + 0.1 * jax.random.normal(next(ks), (c,), jnp.float32),
                    b=nrm((c,)),
                    m=nrm((c,)),
                    v=0.5 + jax.random.uniform(next(ks), (c,), jnp.float32))

    p = {}
    p['w1'] = nrm((planes, inplanes, 1, 1));       p['bn1'] = bn(planes)
    p['w2'] = nrm((planes, planes, 3, 3));         p['bn2'] = bn(planes)
    p['w2g'] = nrm((planes, planes, 3, 3));        p['bn2g'] = bn(planes)
    p['w3'] = nrm((planes * 4, planes, 1, 1));     p['bn3'] = bn(planes * 4)
    p['wfc1'] = nrm((planes // 16, planes, 1, 1)); p['bnf'] = bn(planes // 16)
    p['wfc2'] = nrm((2 * planes, planes // 16, 1, 1))
    p['aw1'] = nrm((2,), 0.5); p['ab1'] = nrm((1,), 0.5)
    p['ln1_g'] = 1.0 + 0.1 * jax.random.normal(next(ks), (planes,), jnp.float32)
    p['ln1_b'] = nrm((planes,))
    p['aw2'] = nrm((2,), 0.5); p['ab2'] = nrm((1,), 0.5)
    p['ln2_g'] = 1.0 + 0.1 * jax.random.normal(next(ks), (planes,), jnp.float32)
    p['ln2_b'] = nrm((planes,))
    return p


# ---------------------------------------------------------------------------
# Pure-JAX reference (faithful transcription of the PyTorch forward).
# `matmul_dtype` applies the same operand quantization as the kernel at the
# three conv sites (standard bf16-in / f32-accumulate inference practice);
# with matmul_dtype=float32 it is the full-precision reference.
# ---------------------------------------------------------------------------
def reference_forward(x_nchw, pre_att, p, matmul_dtype=MATMUL_DTYPE):
    q = lambda t: t.astype(matmul_dtype)
    hp = lax.Precision.HIGHEST
    x = jnp.transpose(x_nchw, (0, 2, 3, 1)).astype(jnp.float32)
    planes = p['w1'].shape[0]

    def conv(inp, w_oihw, dilation=1, padding=0):
        return lax.conv_general_dilated(
            q(inp), q(jnp.transpose(w_oihw, (2, 3, 1, 0))),
            window_strides=(1, 1),
            padding=((padding, padding), (padding, padding)),
            rhs_dilation=(dilation, dilation),
            dimension_numbers=('NHWC', 'HWIO', 'NHWC'),
            preferred_element_type=jnp.float32,
            precision=hp)

    def bn(y, prm):
        sc, bi = bn_fold(prm)
        return y * sc + bi

    relu = lambda t: jnp.maximum(t, 0.0)
    out1 = relu(bn(conv(x, p['w1']), p['bn1']))
    d1 = relu(bn(conv(out1, p['w2'], 1, 1), p['bn2']))
    d2 = relu(bn(conv(out1, p['w2g'], 2, 2), p['bn2g']))
    gap1 = jnp.mean(d1, axis=(1, 2))
    gap2 = jnp.mean(d2, axis=(1, 2))
    pre1 = pre_att[:, :, 0, 0]
    pre2 = pre_att[:, :, 0, 1]

    def att_branch(gap, pre, aw, ab, g, b):
        y = aw[0] * gap + aw[1] * pre + ab[0]
        mu = jnp.mean(y, -1, keepdims=True)
        var = jnp.mean((y - mu) ** 2, -1, keepdims=True)
        return relu((y - mu) / jnp.sqrt(var + _LN_EPS) * g + b)

    g1 = att_branch(gap1, pre1, p['aw1'], p['ab1'], p['ln1_g'], p['ln1_b'])
    g2 = att_branch(gap2, pre2, p['aw2'], p['ab2'], p['ln2_g'], p['ln2_b'])
    d = g1 + g2
    fsc, fbi = bn_fold(p['bnf'])
    h = relu(jnp.dot(d, p['wfc1'][:, :, 0, 0].T, precision=hp) * fsc + fbi)
    logits = jnp.dot(h, p['wfc2'][:, :, 0, 0].T, precision=hp)
    sel = jax.nn.softmax(logits.reshape(-1, 2, planes), axis=1)
    d1s = d1 * sel[:, 0, :][:, None, None, :]
    d2s = d2 * sel[:, 1, :][:, None, None, :]
    ds = d1s + d2s
    out3 = bn(conv(ds, p['w3']), p['bn3'])
    out_final = relu(out3 + x)
    att = jnp.stack([jnp.mean(d1s, (1, 2)), jnp.mean(d2s, (1, 2))], -1)[:, :, None, :]
    return jnp.transpose(out_final, (0, 3, 1, 2)), att


if __name__ == "__main__":
    planes = 32
    inplanes = planes * 4     # identity residual valid; att_fc_{1,2} branch disabled
    N, H, W = 2, 16, 16

    key = jax.random.PRNGKey(0)
    kx, kp, ka = jax.random.split(key, 3)
    x = jax.random.normal(kx, (N, inplanes, H, W), jnp.float32)
    pre_att = jax.random.normal(ka, (N, planes, 1, 2), jnp.float32)
    params = init_params(kp, inplanes, planes)

    # 1) exact-semantics check: f32 operand path vs full-f32 HIGHEST reference
    out32, att32 = bottleneck_forward(x, pre_att, params, matmul_dtype=jnp.float32)
    out32, att32 = jax.block_until_ready((out32, att32))
    r32_out, r32_att = reference_forward(x, pre_att, params, matmul_dtype=jnp.float32)
    assert out32.shape == (N, planes * 4, H, W) and att32.shape == (N, planes, 1, 2)
    assert jnp.allclose(out32, r32_out, rtol=2e-3, atol=2e-3), \
        float(jnp.max(jnp.abs(out32 - r32_out)))
    assert jnp.allclose(att32, r32_att, rtol=2e-3, atol=2e-3), \
        float(jnp.max(jnp.abs(att32 - r32_att)))

    # 2) fast path (default): bf16 MXU operands + f32 accumulation, checked
    #    against the reference with the same operand quantization (looser
    #    tolerance only covers bf16 double-rounding of intermediates).
    outbf, attbf = bottleneck_forward(x, pre_att, params, matmul_dtype=jnp.bfloat16)
    outbf, attbf = jax.block_until_ready((outbf, attbf))
    rbf_out, rbf_att = reference_forward(x, pre_att, params, matmul_dtype=jnp.bfloat16)
    assert jnp.allclose(outbf, rbf_out, rtol=2e-2, atol=2e-2), \
        float(jnp.max(jnp.abs(outbf - rbf_out)))
    assert jnp.allclose(attbf, rbf_att, rtol=2e-2, atol=2e-2), \
        float(jnp.max(jnp.abs(attbf - rbf_att)))

    print("KERNEL_OK")
</pallas_src>

<mosaic_0001>
module attributes {stable_mosaic.version = 11 : i64} {
  func.func @_bottleneck_kernel(%arg0: i32, %arg1: memref<1x256x128xf32, #tpu.memory_space<vmem>>, %arg2: memref<1x2x32xf32, #tpu.memory_space<vmem>>, %arg3: memref<128x32xf32, #tpu.memory_space<vmem>>, %arg4: memref<288x32xf32, #tpu.memory_space<vmem>>, %arg5: memref<288x32xf32, #tpu.memory_space<vmem>>, %arg6: memref<32x128xf32, #tpu.memory_space<vmem>>, %arg7: memref<2x32xf32, #tpu.memory_space<vmem>>, %arg8: memref<2x32xf32, #tpu.memory_space<vmem>>, %arg9: memref<2x32xf32, #tpu.memory_space<vmem>>, %arg10: memref<2x128xf32, #tpu.memory_space<vmem>>, %arg11: memref<2x32xf32, #tpu.memory_space<vmem>>, %arg12: memref<2x32xf32, #tpu.memory_space<vmem>>, %arg13: memref<2x32xf32, #tpu.memory_space<vmem>>, %arg14: memref<2x32xf32, #tpu.memory_space<vmem>>, %arg15: memref<2x2xf32, #tpu.memory_space<vmem>>, %arg16: memref<2x32xf32, #tpu.memory_space<vmem>>, %arg17: memref<2x32xf32, #tpu.memory_space<vmem>>, %arg18: memref<1x256x128xf32, #tpu.memory_space<vmem>>, %arg19: memref<1x2x32xf32, #tpu.memory_space<vmem>>, %arg20: memref<20x34x32xf32, #tpu.memory_space<vmem>>) attributes {dimension_semantics = [#tpu.dimension_semantics<parallel>], iteration_bounds = array<i64: 2>, scalar_prefetch = 0 : i64, scratch_operands = 1 : i64, tpu.core_type = #tpu.core_type<tc>, window_params = [{transform_indices = @transform_0, window_bounds = array<i64: 1, 256, 128>}, {transform_indices = @transform_1, window_bounds = array<i64: 1, 2, 32>}, {pipeline_mode = #tpu.pipeline_mode<synchronous>, transform_indices = @transform_2, window_bounds = array<i64: 128, 32>}, {pipeline_mode = #tpu.pipeline_mode<synchronous>, transform_indices = @transform_3, window_bounds = array<i64: 288, 32>}, {pipeline_mode = #tpu.pipeline_mode<synchronous>, transform_indices = @transform_4, window_bounds = array<i64: 288, 32>}, {pipeline_mode = #tpu.pipeline_mode<synchronous>, transform_indices = @transform_5, window_bounds = array<i64: 32, 128>}, {pipeline_mode = #tpu.pipeline_mode<synchronous>, transform_indices = @transform_6, window_bounds = array<i64: 2, 32>}, {pipeline_mode = #tpu.pipeline_mode<synchronous>, transform_indices = @transform_7, window_bounds = array<i64: 2, 32>}, {pipeline_mode = #tpu.pipeline_mode<synchronous>, transform_indices = @transform_8, window_bounds = array<i64: 2, 32>}, {pipeline_mode = #tpu.pipeline_mode<synchronous>, transform_indices = @transform_9, window_bounds = array<i64: 2, 128>}, {pipeline_mode = #tpu.pipeline_mode<synchronous>, transform_indices = @transform_10, window_bounds = array<i64: 2, 32>}, {pipeline_mode = #tpu.pipeline_mode<synchronous>, transform_indices = @transform_11, window_bounds = array<i64: 2, 32>}, {pipeline_mode = #tpu.pipeline_mode<synchronous>, transform_indices = @transform_12, window_bounds = array<i64: 2, 32>}, {pipeline_mode = #tpu.pipeline_mode<synchronous>, transform_indices = @transform_13, window_bounds = array<i64: 2, 32>}, {pipeline_mode = #tpu.pipeline_mode<synchronous>, transform_indices = @transform_14, window_bounds = array<i64: 2, 2>}, {pipeline_mode = #tpu.pipeline_mode<synchronous>, transform_indices = @transform_15, window_bounds = array<i64: 2, 32>}, {pipeline_mode = #tpu.pipeline_mode<synchronous>, transform_indices = @transform_16, window_bounds = array<i64: 2, 32>}, {transform_indices = @transform_17, window_bounds = array<i64: 1, 256, 128>}, {transform_indices = @transform_18, window_bounds = array<i64: 1, 2, 32>}]} {
    %c0 = arith.constant 0 : index
    %c0_0 = arith.constant 0 : index
    %c0_1 = arith.constant 0 : index
    %0 = vector.load %arg1[%c0, %c0_0, %c0_1] : memref<1x256x128xf32, #tpu.memory_space<vmem>>, vector<1x256x128xf32>
    %1 = vector.shape_cast %0 : vector<1x256x128xf32> to vector<256x128xf32>
    %c0_2 = arith.constant 0 : index
    %c0_3 = arith.constant 0 : index
    %2 = vector.load %arg3[%c0_2, %c0_3] : memref<128x32xf32, #tpu.memory_space<vmem>>, vector<128x32xf32>
    %cst = arith.constant dense<0.000000e+00> : vector<256x32xf32>
    %3 = tpu.matmul %1, %2, %cst {dimension_numbers = #tpu.dot_dimension_numbers<[1], [0], [0], [1], [0, 0, 1, 1], [], []>} : vector<256x128xf32>, vector<128x32xf32>, vector<256x32xf32> -> vector<256x32xf32>
    %c0_4 = arith.constant 0 : index
    %c0_5 = arith.constant 0 : index
    %4 = vector.load %arg7[%c0_4, %c0_5] : memref<2x32xf32, #tpu.memory_space<vmem>>, vector<1x32xf32>
    %5 = vector.broadcast %4 : vector<1x32xf32> to vector<256x32xf32>
    %6 = arith.mulf %3, %5 : vector<256x32xf32>
    %c1 = arith.constant 1 : index
    %c0_6 = arith.constant 0 : index
    %7 = vector.load %arg7[%c1, %c0_6] : memref<2x32xf32, #tpu.memory_space<vmem>>, vector<1x32xf32>
    %8 = vector.broadcast %7 : vector<1x32xf32> to vector<256x32xf32>
    %9 = arith.addf %6, %8 : vector<256x32xf32>
    %cst_7 = arith.constant 0.000000e+00 : f32
    %10 = vector.broadcast %cst_7 : f32 to vector<256x32xf32>
    %11 = arith.maximumf %9, %10 : vector<256x32xf32>
    %cst_8 = arith.constant 0.000000e+00 : f32
    %12 = vector.broadcast %cst_8 : f32 to vector<20x34x32xf32>
    %c0_9 = arith.constant 0 : index
    %c0_10 = arith.constant 0 : index
    %c0_11 = arith.constant 0 : index
    %13 = vector.load %arg20[%c0_9, %c0_10, %c0_11] : memref<20x34x32xf32, #tpu.memory_space<vmem>>, vector<20x34x32xf32>
    tpu.vector_store %arg20[%c0_9, %c0_10, %c0_11], %12 {strides = array<i32>} : memref<20x34x32xf32, #tpu.memory_space<vmem>>, vector<20x34x32xf32>,
    %14 = vector.shape_cast %11 : vector<256x32xf32> to vector<16x16x32xf32>
    %c2 = arith.constant 2 : index
    %c16 = arith.constant 16 : index
    %c0_12 = arith.constant 0 : index
    %15 = vector.load %arg20[%c2, %c16, %c0_12] : memref<20x34x32xf32, #tpu.memory_space<vmem>>, vector<16x16x32xf32>
    tpu.vector_store %arg20[%c2, %c16, %c0_12], %14 {strides = array<i32>} : memref<20x34x32xf32, #tpu.memory_space<vmem>>, vector<16x16x32xf32>,
    %c1_13 = arith.constant 1 : index
    %c15 = arith.constant 15 : index
    %c0_14 = arith.constant 0 : index
    %16 = vector.load %arg20[%c1_13, %c15, %c0_14] : memref<20x34x32xf32, #tpu.memory_space<vmem>>, vector<16x16x32xf32>
    %17 = vector.shape_cast %16 : vector<16x16x32xf32> to vector<256x32xf32>
    %c1_15 = arith.constant 1 : index
    %c16_16 = arith.constant 16 : index
    %c0_17 = arith.constant 0 : index
    %18 = vector.load %arg20[%c1_15, %c16_16, %c0_17] : memref<20x34x32xf32, #tpu.memory_space<vmem>>, vector<16x16x32xf32>
    %19 = vector.shape_cast %18 : vector<16x16x32xf32> to vector<256x32xf32>
    %c1_18 = arith.constant 1 : index
    %c17 = arith.constant 17 : index
    %c0_19 = arith.constant 0 : index
    %20 = vector.load %arg20[%c1_18, %c17, %c0_19] : memref<20x34x32xf32, #tpu.memory_space<vmem>>, vector<16x16x32xf32>
    %21 = vector.shape_cast %20 : vector<16x16x32xf32> to vector<256x32xf32>
    %c2_20 = arith.constant 2 : index
    %c15_21 = arith.constant 15 : index
    %c0_22 = arith.constant 0 : index
    %22 = vector.load %arg20[%c2_20, %c15_21, %c0_22] : memref<20x34x32xf32, #tpu.memory_space<vmem>>, vector<16x16x32xf32>
    %23 = vector.shape_cast %22 : vector<16x16x32xf32> to vector<256x32xf32>
    %c2_23 = arith.constant 2 : index
    %c16_24 = arith.constant 16 : index
    %c0_25 = arith.constant 0 : index
    %24 = vector.load %arg20[%c2_23, %c16_24, %c0_25] : memref<20x34x32xf32, #tpu.memory_space<vmem>>, vector<16x16x32xf32>
    %25 = vector.shape_cast %24 : vector<16x16x32xf32> to vector<256x32xf32>
    %c2_26 = arith.constant 2 : index
    %c17_27 = arith.constant 17 : index
    %c0_28 = arith.constant 0 : index
    %26 = vector.load %arg20[%c2_26, %c17_27, %c0_28] : memref<20x34x32xf32, #tpu.memory_space<vmem>>, vector<16x16x32xf32>
    %27 = vector.shape_cast %26 : vector<16x16x32xf32> to vector<256x32xf32>
    %c3 = arith.constant 3 : index
    %c15_29 = arith.constant 15 : index
    %c0_30 = arith.constant 0 : index
    %28 = vector.load %arg20[%c3, %c15_29, %c0_30] : memref<20x34x32xf32, #tpu.memory_space<vmem>>, vector<16x16x32xf32>
    %29 = vector.shape_cast %28 : vector<16x16x32xf32> to vector<256x32xf32>
    %c3_31 = arith.constant 3 : index
    %c16_32 = arith.constant 16 : index
    %c0_33 = arith.constant 0 : index
    %30 = vector.load %arg20[%c3_31, %c16_32, %c0_33] : memref<20x34x32xf32, #tpu.memory_space<vmem>>, vector<16x16x32xf32>
    %31 = vector.shape_cast %30 : vector<16x16x32xf32> to vector<256x32xf32>
    %c3_34 = arith.constant 3 : index
    %c17_35 = arith.constant 17 : index
    %c0_36 = arith.constant 0 : index
    %32 = vector.load %arg20[%c3_34, %c17_35, %c0_36] : memref<20x34x32xf32, #tpu.memory_space<vmem>>, vector<16x16x32xf32>
    %33 = vector.shape_cast %32 : vector<16x16x32xf32> to vector<256x32xf32>
    %34 = tpu.concatenate %17, %19, %21, %23, %25, %27, %29, %31, %33 in 1 : vector<256x32xf32>, vector<256x32xf32>, vector<256x32xf32>, vector<256x32xf32>, vector<256x32xf32>, vector<256x32xf32>, vector<256x32xf32>, vector<256x32xf32>, vector<256x32xf32> -> vector<256x288xf32>
    %c0_37 = arith.constant 0 : index
    %c0_38 = arith.constant 0 : index
    %35 = vector.load %arg4[%c0_37, %c0_38] : memref<288x32xf32, #tpu.memory_space<vmem>>, vector<288x32xf32>
    %cst_39 = arith.constant dense<0.000000e+00> : vector<256x32xf32>
    %36 = tpu.matmul %34, %35, %cst_39 {dimension_numbers = #tpu.dot_dimension_numbers<[1], [0], [0], [1], [0, 0, 1, 1], [], []>} : vector<256x288xf32>, vector<288x32xf32>, vector<256x32xf32> -> vector<256x32xf32>
    %c0_40 = arith.constant 0 : index
    %c0_41 = arith.constant 0 : index
    %37 = vector.load %arg8[%c0_40, %c0_41] : memref<2x32xf32, #tpu.memory_space<vmem>>, vector<1x32xf32>
    %38 = vector.broadcast %37 : vector<1x32xf32> to vector<256x32xf32>
    %39 = arith.mulf %36, %38 : vector<256x32xf32>
    %c1_42 = arith.constant 1 : index
    %c0_43 = arith.constant 0 : index
    %40 = vector.load %arg8[%c1_42, %c0_43] : memref<2x32xf32, #tpu.memory_space<vmem>>, vector<1x32xf32>
    %41 = vector.broadcast %40 : vector<1x32xf32> to vector<256x32xf32>
    %42 = arith.addf %39, %41 : vector<256x32xf32>
    %cst_44 = arith.constant 0.000000e+00 : f32
    %43 = vector.broadcast %cst_44 : f32 to vector<256x32xf32>
    %44 = arith.maximumf %42, %43 : vector<256x32xf32>
    %c0_45 = arith.constant 0 : index
    %c14 = arith.constant 14 : index
    %c0_46 = arith.constant 0 : index
    %45 = vector.load %arg20[%c0_45, %c14, %c0_46] : memref<20x34x32xf32, #tpu.memory_space<vmem>>, vector<16x16x32xf32>
    %46 = vector.shape_cast %45 : vector<16x16x32xf32> to vector<256x32xf32>
    %c0_47 = arith.constant 0 : index
    %c16_48 = arith.constant 16 : index
    %c0_49 = arith.constant 0 : index
    %47 = vector.load %arg20[%c0_47, %c16_48, %c0_49] : memref<20x34x32xf32, #tpu.memory_space<vmem>>, vector<16x16x32xf32>
    %48 = vector.shape_cast %47 : vector<16x16x32xf32> to vector<256x32xf32>
    %c0_50 = arith.constant 0 : index
    %c18 = arith.constant 18 : index
    %c0_51 = arith.constant 0 : index
    %49 = vector.load %arg20[%c0_50, %c18, %c0_51] : memref<20x34x32xf32, #tpu.memory_space<vmem>>, vector<16x16x32xf32>
    %50 = vector.shape_cast %49 : vector<16x16x32xf32> to vector<256x32xf32>
    %c2_52 = arith.constant 2 : index
    %c14_53 = arith.constant 14 : index
    %c0_54 = arith.constant 0 : index
    %51 = vector.load %arg20[%c2_52, %c14_53, %c0_54] : memref<20x34x32xf32, #tpu.memory_space<vmem>>, vector<16x16x32xf32>
    %52 = vector.shape_cast %51 : vector<16x16x32xf32> to vector<256x32xf32>
    %c2_55 = arith.constant 2 : index
    %c16_56 = arith.constant 16 : index
    %c0_57 = arith.constant 0 : index
    %53 = vector.load %arg20[%c2_55, %c16_56, %c0_57] : memref<20x34x32xf32, #tpu.memory_space<vmem>>, vector<16x16x32xf32>
    %54 = vector.shape_cast %53 : vector<16x16x32xf32> to vector<256x32xf32>
    %c2_58 = arith.constant 2 : index
    %c18_59 = arith.constant 18 : index
    %c0_60 = arith.constant 0 : index
    %55 = vector.load %arg20[%c2_58, %c18_59, %c0_60] : memref<20x34x32xf32, #tpu.memory_space<vmem>>, vector<16x16x32xf32>
    %56 = vector.shape_cast %55 : vector<16x16x32xf32> to vector<256x32xf32>
    %c4 = arith.constant 4 : index
    %c14_61 = arith.constant 14 : index
    %c0_62 = arith.constant 0 : index
    %57 = vector.load %arg20[%c4, %c14_61, %c0_62] : memref<20x34x32xf32, #tpu.memory_space<vmem>>, vector<16x16x32xf32>
    %58 = vector.shape_cast %57 : vector<16x16x32xf32> to vector<256x32xf32>
    %c4_63 = arith.constant 4 : index
    %c16_64 = arith.constant 16 : index
    %c0_65 = arith.constant 0 : index
    %59 = vector.load %arg20[%c4_63, %c16_64, %c0_65] : memref<20x34x32xf32, #tpu.memory_space<vmem>>, vector<16x16x32xf32>
    %60 = vector.shape_cast %59 : vector<16x16x32xf32> to vector<256x32xf32>
    %c4_66 = arith.constant 4 : index
    %c18_67 = arith.constant 18 : index
    %c0_68 = arith.constant 0 : index
    %61 = vector.load %arg20[%c4_66, %c18_67, %c0_68] : memref<20x34x32xf32, #tpu.memory_space<vmem>>, vector<16x16x32xf32>
    %62 = vector.shape_cast %61 : vector<16x16x32xf32> to vector<256x32xf32>
    %63 = tpu.concatenate %46, %48, %50, %52, %54, %56, %58, %60, %62 in 1 : vector<256x32xf32>, vector<256x32xf32>, vector<256x32xf32>, vector<256x32xf32>, vector<256x32xf32>, vector<256x32xf32>, vector<256x32xf32>, vector<256x32xf32>, vector<256x32xf32> -> vector<256x288xf32>
    %c0_69 = arith.constant 0 : index
    %c0_70 = arith.constant 0 : index
    %64 = vector.load %arg5[%c0_69, %c0_70] : memref<288x32xf32, #tpu.memory_space<vmem>>, vector<288x32xf32>
    %cst_71 = arith.constant dense<0.000000e+00> : vector<256x32xf32>
    %65 = tpu.matmul %63, %64, %cst_71 {dimension_numbers = #tpu.dot_dimension_numbers<[1], [0], [0], [1], [0, 0, 1, 1], [], []>} : vector<256x288xf32>, vector<288x32xf32>, vector<256x32xf32> -> vector<256x32xf32>
    %c0_72 = arith.constant 0 : index
    %c0_73 = arith.constant 0 : index
    %66 = vector.load %arg9[%c0_72, %c0_73] : memref<2x32xf32, #tpu.memory_space<vmem>>, vector<1x32xf32>
    %67 = vector.broadcast %66 : vector<1x32xf32> to vector<256x32xf32>
    %68 = arith.mulf %65, %67 : vector<256x32xf32>
    %c1_74 = arith.constant 1 : index
    %c0_75 = arith.constant 0 : index
    %69 = vector.load %arg9[%c1_74, %c0_75] : memref<2x32xf32, #tpu.memory_space<vmem>>, vector<1x32xf32>
    %70 = vector.broadcast %69 : vector<1x32xf32> to vector<256x32xf32>
    %71 = arith.addf %68, %70 : vector<256x32xf32>
    %cst_76 = arith.constant 0.000000e+00 : f32
    %72 = vector.broadcast %cst_76 : f32 to vector<256x32xf32>
    %73 = arith.maximumf %71, %72 : vector<256x32xf32>
    %cst_77 = arith.constant dense<0.000000e+00> : vector<32xf32>
    %74 = vector.multi_reduction <add>, %44, %cst_77 [0] : vector<256x32xf32> to vector<32xf32>
    %75 = vector.shape_cast %74 : vector<32xf32> to vector<1x32xf32>
    %cst_78 = arith.constant 3.906250e-03 : f32
    %76 = vector.broadcast %cst_78 : f32 to vector<1x32xf32>
    %77 = arith.mulf %75, %76 : vector<1x32xf32>
    %cst_79 = arith.constant dense<0.000000e+00> : vector<32xf32>
    %78 = vector.multi_reduction <add>, %73, %cst_79 [0] : vector<256x32xf32> to vector<32xf32>
    %79 = vector.shape_cast %78 : vector<32xf32> to vector<1x32xf32>
    %cst_80 = arith.constant 3.906250e-03 : f32
    %80 = vector.broadcast %cst_80 : f32 to vector<1x32xf32>
    %81 = arith.mulf %79, %80 : vector<1x32xf32>
    %c0_81 = arith.constant 0 : index
    %c0_82 = arith.constant 0 : index
    %c0_83 = arith.constant 0 : index
    %82 = vector.load %arg2[%c0_81, %c0_82, %c0_83] : memref<1x2x32xf32, #tpu.memory_space<vmem>>, vector<1x1x32xf32>
    %83 = vector.shape_cast %82 : vector<1x1x32xf32> to vector<1x32xf32>
    %c0_84 = arith.constant 0 : index
    %c0_85 = arith.constant 0 : index
    %84 = vector.load %arg11[%c0_84, %c0_85] : memref<2x32xf32, #tpu.memory_space<vmem>>, vector<1x32xf32>
    %c0_86 = arith.constant 0 : index
    %c0_87 = arith.constant 0 : index
    %85 = vector.load %arg12[%c0_86, %c0_87] : memref<2x32xf32, #tpu.memory_space<vmem>>, vector<2x32xf32>
    %86 = arith.mulf %84, %77 : vector<1x32xf32>
    %87 = arith.addf %86, %83 : vector<1x32xf32>
    %cst_88 = arith.constant dense<0.000000e+00> : vector<1xf32>
    %88 = vector.multi_reduction <add>, %87, %cst_88 [1] : vector<1x32xf32> to vector<1xf32>
    %89 = vector.shape_cast %88 : vector<1xf32> to vector<1x1xf32>
    %cst_89 = arith.constant 3.200000e+01 : f32
    %90 = vector.broadcast %cst_89 : f32 to vector<1x1xf32>
    %91 = arith.divf %89, %90 : vector<1x1xf32>
    %92 = vector.broadcast %91 : vector<1x1xf32> to vector<1x32xf32>
    %93 = arith.subf %87, %92 : vector<1x32xf32>
    %94 = arith.mulf %93, %93 : vector<1x32xf32>
    %cst_90 = arith.constant dense<0.000000e+00> : vector<1xf32>
    %95 = vector.multi_reduction <add>, %94, %cst_90 [1] : vector<1x32xf32> to vector<1xf32>
    %96 = vector.shape_cast %95 : vector<1xf32> to vector<1x1xf32>
    %cst_91 = arith.constant 3.200000e+01 : f32
    %97 = vector.broadcast %cst_91 : f32 to vector<1x1xf32>
    %98 = arith.divf %96, %97 : vector<1x1xf32>
    %99 = vector.broadcast %91 : vector<1x1xf32> to vector<1x32xf32>
    %100 = arith.subf %87, %99 : vector<1x32xf32>
    %cst_92 = arith.constant 9.99999974E-6 : f32
    %101 = vector.broadcast %cst_92 : f32 to vector<1x1xf32>
    %102 = arith.addf %98, %101 : vector<1x1xf32>
    %103 = math.rsqrt %102 : vector<1x1xf32>
    %104 = vector.broadcast %103 : vector<1x1xf32> to vector<1x32xf32>
    %105 = arith.mulf %100, %104 : vector<1x32xf32>
    %106 = vector.extract_strided_slice %85 {offsets = [0, 0], sizes = [1, 32], strides = [1, 1]} : vector<2x32xf32> to vector<1x32xf32>
    %107 = arith.mulf %105, %106 : vector<1x32xf32>
    %108 = vector.extract_strided_slice %85 {offsets = [1, 0], sizes = [1, 32], strides = [1, 1]} : vector<2x32xf32> to vector<1x32xf32>
    %109 = arith.addf %107, %108 : vector<1x32xf32>
    %cst_93 = arith.constant 0.000000e+00 : f32
    %110 = vector.broadcast %cst_93 : f32 to vector<1x32xf32>
    %111 = arith.maximumf %109, %110 : vector<1x32xf32>
    %c0_94 = arith.constant 0 : index
    %c1_95 = arith.constant 1 : index
    %c0_96 = arith.constant 0 : index
    %112 = vector.load %arg2[%c0_94, %c1_95, %c0_96] : memref<1x2x32xf32, #tpu.memory_space<vmem>>, vector<1x1x32xf32>
    %113 = vector.shape_cast %112 : vector<1x1x32xf32> to vector<1x32xf32>
    %c1_97 = arith.constant 1 : index
    %c0_98 = arith.constant 0 : index
    %114 = vector.load %arg11[%c1_97, %c0_98] : memref<2x32xf32, #tpu.memory_space<vmem>>, vector<1x32xf32>
    %c0_99 = arith.constant 0 : index
    %c0_100 = arith.constant 0 : index
    %115 = vector.load %arg13[%c0_99, %c0_100] : memref<2x32xf32, #tpu.memory_space<vmem>>, vector<2x32xf32>
    %116 = arith.mulf %114, %81 : vector<1x32xf32>
    %117 = arith.addf %116, %113 : vector<1x32xf32>
    %cst_101 = arith.constant dense<0.000000e+00> : vector<1xf32>
    %118 = vector.multi_reduction <add>, %117, %cst_101 [1] : vector<1x32xf32> to vector<1xf32>
    %119 = vector.shape_cast %118 : vector<1xf32> to vector<1x1xf32>
    %cst_102 = arith.constant 3.200000e+01 : f32
    %120 = vector.broadcast %cst_102 : f32 to vector<1x1xf32>
    %121 = arith.divf %119, %120 : vector<1x1xf32>
    %122 = vector.broadcast %121 : vector<1x1xf32> to vector<1x32xf32>
    %123 = arith.subf %117, %122 : vector<1x32xf32>
    %124 = arith.mulf %123, %123 : vector<1x32xf32>
    %cst_103 = arith.constant dense<0.000000e+00> : vector<1xf32>
    %125 = vector.multi_reduction <add>, %124, %cst_103 [1] : vector<1x32xf32> to vector<1xf32>
    %126 = vector.shape_cast %125 : vector<1xf32> to vector<1x1xf32>
    %cst_104 = arith.constant 3.200000e+01 : f32
    %127 = vector.broadcast %cst_104 : f32 to vector<1x1xf32>
    %128 = arith.divf %126, %127 : vector<1x1xf32>
    %129 = vector.broadcast %121 : vector<1x1xf32> to vector<1x32xf32>
    %130 = arith.subf %117, %129 : vector<1x32xf32>
    %cst_105 = arith.constant 9.99999974E-6 : f32
    %131 = vector.broadcast %cst_105 : f32 to vector<1x1xf32>
    %132 = arith.addf %128, %131 : vector<1x1xf32>
    %133 = math.rsqrt %132 : vector<1x1xf32>
    %134 = vector.broadcast %133 : vector<1x1xf32> to vector<1x32xf32>
    %135 = arith.mulf %130, %134 : vector<1x32xf32>
    %136 = vector.extract_strided_slice %115 {offsets = [0, 0], sizes = [1, 32], strides = [1, 1]} : vector<2x32xf32> to vector<1x32xf32>
    %137 = arith.mulf %135, %136 : vector<1x32xf32>
    %138 = vector.extract_strided_slice %115 {offsets = [1, 0], sizes = [1, 32], strides = [1, 1]} : vector<2x32xf32> to vector<1x32xf32>
    %139 = arith.addf %137, %138 : vector<1x32xf32>
    %cst_106 = arith.constant 0.000000e+00 : f32
    %140 = vector.broadcast %cst_106 : f32 to vector<1x32xf32>
    %141 = arith.maximumf %139, %140 : vector<1x32xf32>
    %142 = arith.addf %111, %141 : vector<1x32xf32>
    %c0_107 = arith.constant 0 : index
    %c0_108 = arith.constant 0 : index
    %143 = vector.load %arg14[%c0_107, %c0_108] : memref<2x32xf32, #tpu.memory_space<vmem>>, vector<1x32xf32>
    %144 = arith.mulf %142, %143 : vector<1x32xf32>
    %cst_109 = arith.constant dense<0.000000e+00> : vector<1xf32>
    %145 = vector.multi_reduction <add>, %144, %cst_109 [1] : vector<1x32xf32> to vector<1xf32>
    %146 = vector.shape_cast %145 : vector<1xf32> to vector<1x1xf32>
    %c1_110 = arith.constant 1 : index
    %c0_111 = arith.constant 0 : index
    %147 = vector.load %arg14[%c1_110, %c0_111] : memref<2x32xf32, #tpu.memory_space<vmem>>, vector<1x32xf32>
    %148 = arith.mulf %142, %147 : vector<1x32xf32>
    %cst_112 = arith.constant dense<0.000000e+00> : vector<1xf32>
    %149 = vector.multi_reduction <add>, %148, %cst_112 [1] : vector<1x32xf32> to vector<1xf32>
    %150 = vector.shape_cast %149 : vector<1xf32> to vector<1x1xf32>
    %151 = tpu.concatenate %146, %150 in 1 : vector<1x1xf32>, vector<1x1xf32> -> vector<1x2xf32>
    %c0_113 = arith.constant 0 : index
    %c0_114 = arith.constant 0 : index
    %152 = vector.load %arg15[%c0_113, %c0_114] : memref<2x2xf32, #tpu.memory_space<vmem>>, vector<1x2xf32>
    %153 = arith.mulf %151, %152 : vector<1x2xf32>
    %c1_115 = arith.constant 1 : index
    %c0_116 = arith.constant 0 : index
    %154 = vector.load %arg15[%c1_115, %c0_116] : memref<2x2xf32, #tpu.memory_space<vmem>>, vector<1x2xf32>
    %155 = arith.addf %153, %154 : vector<1x2xf32>
    %cst_117 = arith.constant 0.000000e+00 : f32
    %156 = vector.broadcast %cst_117 : f32 to vector<1x2xf32>
    %157 = arith.maximumf %155, %156 : vector<1x2xf32>
    %cst_118 = arith.constant 0.000000e+00 : f32
    %158 = vector.broadcast %cst_118 : f32 to vector<1x32xf32>
    %cst_119 = arith.constant 0.000000e+00 : f32
    %159 = vector.broadcast %cst_119 : f32 to vector<1x32xf32>
    %160 = vector.extract_strided_slice %157 {offsets = [0, 0], sizes = [1, 1], strides = [1, 1]} : vector<1x2xf32> to vector<1x1xf32>
    %c0_120 = arith.constant 0 : index
    %c0_121 = arith.constant 0 : index
    %161 = vector.load %arg16[%c0_120, %c0_121] : memref<2x32xf32, #tpu.memory_space<vmem>>, vector<1x32xf32>
    %162 = vector.broadcast %160 : vector<1x1xf32> to vector<1x32xf32>
    %163 = arith.mulf %162, %161 : vector<1x32xf32>
    %164 = arith.addf %158, %163 : vector<1x32xf32>
    %c0_122 = arith.constant 0 : index
    %c0_123 = arith.constant 0 : index
    %165 = vector.load %arg17[%c0_122, %c0_123] : memref<2x32xf32, #tpu.memory_space<vmem>>, vector<1x32xf32>
    %166 = vector.broadcast %160 : vector<1x1xf32> to vector<1x32xf32>
    %167 = arith.mulf %166, %165 : vector<1x32xf32>
    %168 = arith.addf %159, %167 : vector<1x32xf32>
    %169 = vector.extract_strided_slice %157 {offsets = [0, 1], sizes = [1, 1], strides = [1, 1]} : vector<1x2xf32> to vector<1x1xf32>
    %c1_124 = arith.constant 1 : index
    %c0_125 = arith.constant 0 : index
    %170 = vector.load %arg16[%c1_124, %c0_125] : memref<2x32xf32, #tpu.memory_space<vmem>>, vector<1x32xf32>
    %171 = vector.broadcast %169 : vector<1x1xf32> to vector<1x32xf32>
    %172 = arith.mulf %171, %170 : vector<1x32xf32>
    %173 = arith.addf %164, %172 : vector<1x32xf32>
    %c1_126 = arith.constant 1 : index
    %c0_127 = arith.constant 0 : index
    %174 = vector.load %arg17[%c1_126, %c0_127] : memref<2x32xf32, #tpu.memory_space<vmem>>, vector<1x32xf32>
    %175 = vector.broadcast %169 : vector<1x1xf32> to vector<1x32xf32>
    %176 = arith.mulf %175, %174 : vector<1x32xf32>
    %177 = arith.addf %168, %176 : vector<1x32xf32>
    %178 = arith.maximumf %173, %177 : vector<1x32xf32>
    %179 = arith.subf %173, %178 : vector<1x32xf32>
    %180 = math.exp %179 : vector<1x32xf32>
    %181 = arith.subf %177, %178 : vector<1x32xf32>
    %182 = math.exp %181 : vector<1x32xf32>
    %183 = arith.addf %180, %182 : vector<1x32xf32>
    %cst_128 = arith.constant 1.000000e+00 : f32
    %184 = vector.broadcast %cst_128 : f32 to vector<1x32xf32>
    %185 = arith.divf %184, %183 : vector<1x32xf32>
    %186 = arith.mulf %180, %185 : vector<1x32xf32>
    %187 = arith.mulf %182, %185 : vector<1x32xf32>
    %188 = vector.broadcast %186 : vector<1x32xf32> to vector<256x32xf32>
    %189 = arith.mulf %44, %188 : vector<256x32xf32>
    %190 = vector.broadcast %187 : vector<1x32xf32> to vector<256x32xf32>
    %191 = arith.mulf %73, %190 : vector<256x32xf32>
    %192 = arith.addf %189, %191 : vector<256x32xf32>
    %c0_129 = arith.constant 0 : index
    %c0_130 = arith.constant 0 : index
    %193 = vector.load %arg6[%c0_129, %c0_130] : memref<32x128xf32, #tpu.memory_space<vmem>>, vector<32x128xf32>
    %cst_131 = arith.constant dense<0.000000e+00> : vector<256x128xf32>
    %194 = tpu.matmul %192, %193, %cst_131 {dimension_numbers = #tpu.dot_dimension_numbers<[1], [0], [0], [1], [0, 0, 1, 1], [], []>} : vector<256x32xf32>, vector<32x128xf32>, vector<256x128xf32> -> vector<256x128xf32>
    %c0_132 = arith.constant 0 : index
    %c0_133 = arith.constant 0 : index
    %195 = vector.load %arg10[%c0_132, %c0_133] : memref<2x128xf32, #tpu.memory_space<vmem>>, vector<1x128xf32>
    %196 = vector.broadcast %195 : vector<1x128xf32> to vector<256x128xf32>
    %197 = arith.mulf %194, %196 : vector<256x128xf32>
    %c1_134 = arith.constant 1 : index
    %c0_135 = arith.constant 0 : index
    %198 = vector.load %arg10[%c1_134, %c0_135] : memref<2x128xf32, #tpu.memory_space<vmem>>, vector<1x128xf32>
    %199 = vector.broadcast %198 : vector<1x128xf32> to vector<256x128xf32>
    %200 = arith.addf %197, %199 : vector<256x128xf32>
    %201 = arith.addf %200, %1 : vector<256x128xf32>
    %cst_136 = arith.constant 0.000000e+00 : f32
    %202 = vector.broadcast %cst_136 : f32 to vector<256x128xf32>
    %203 = arith.maximumf %201, %202 : vector<256x128xf32>
    %c0_137 = arith.constant 0 : index
    %c0_138 = arith.constant 0 : index
    %c0_139 = arith.constant 0 : index
    %204 = vector.load %arg18[%c0_137, %c0_138, %c0_139] : memref<1x256x128xf32, #tpu.memory_space<vmem>>, vector<1x256x128xf32>
    %205 = vector.shape_cast %204 : vector<1x256x128xf32> to vector<256x128xf32>
    %206 = vector.shape_cast %203 : vector<256x128xf32> to vector<1x256x128xf32>
    tpu.vector_store %arg18[%c0_137, %c0_138, %c0_139], %206 {strides = array<i32>} : memref<1x256x128xf32, #tpu.memory_space<vmem>>, vector<1x256x128xf32>,
    %207 = arith.mulf %186, %77 : vector<1x32xf32>
    %208 = arith.mulf %187, %81 : vector<1x32xf32>
    %209 = tpu.concatenate %207, %208 in 0 : vector<1x32xf32>, vector<1x32xf32> -> vector<2x32xf32>
    %c0_140 = arith.constant 0 : index
    %c0_141 = arith.constant 0 : index
    %c0_142 = arith.constant 0 : index
    %210 = vector.load %arg19[%c0_140, %c0_141, %c0_142] : memref<1x2x32xf32, #tpu.memory_space<vmem>>, vector<1x2x32xf32>
    %211 = vector.shape_cast %210 : vector<1x2x32xf32> to vector<2x32xf32>
    %212 = vector.shape_cast %209 : vector<2x32xf32> to vector<1x2x32xf32>
    tpu.vector_store %arg19[%c0_140, %c0_141, %c0_142], %212 {strides = array<i32>} : memref<1x2x32xf32, #tpu.memory_space<vmem>>, vector<1x2x32xf32>,
    return
  }
  func.func @transform_0(%arg0: i32) -> (i32, i32, i32) {
    %c0_i32 = arith.constant 0 : i32
    %c0_i32_0 = arith.constant 0 : i32
    %c0_i32_1 = arith.constant 0 : i32
    return %arg0, %c0_i32, %c0_i32_0 : i32, i32, i32
  }
  func.func @transform_1(%arg0: i32) -> (i32, i32, i32) {
    %c0_i32 = arith.constant 0 : i32
    %c0_i32_0 = arith.constant 0 : i32
    %c0_i32_1 = arith.constant 0 : i32
    return %arg0, %c0_i32, %c0_i32_0 : i32, i32, i32
  }
  func.func @transform_2(%arg0: i32) -> (i32, i32) {
    %c0_i32 = arith.constant 0 : i32
    %c0_i32_0 = arith.constant 0 : i32
    %c0_i32_1 = arith.constant 0 : i32
    return %c0_i32, %c0_i32_0 : i32, i32
  }
  func.func @transform_3(%arg0: i32) -> (i32, i32) {
    %c0_i32 = arith.constant 0 : i32
    %c0_i32_0 = arith.constant 0 : i32
    %c0_i32_1 = arith.constant 0 : i32
    return %c0_i32, %c0_i32_0 : i32, i32
  }
  func.func @transform_4(%arg0: i32) -> (i32, i32) {
    %c0_i32 = arith.constant 0 : i32
    %c0_i32_0 = arith.constant 0 : i32
    %c0_i32_1 = arith.constant 0 : i32
    return %c0_i32, %c0_i32_0 : i32, i32
  }
  func.func @transform_5(%arg0: i32) -> (i32, i32) {
    %c0_i32 = arith.constant 0 : i32
    %c0_i32_0 = arith.constant 0 : i32
    %c0_i32_1 = arith.constant 0 : i32
    return %c0_i32, %c0_i32_0 : i32, i32
  }
  func.func @transform_6(%arg0: i32) -> (i32, i32) {
    %c0_i32 = arith.constant 0 : i32
    %c0_i32_0 = arith.constant 0 : i32
    %c0_i32_1 = arith.constant 0 : i32
    return %c0_i32, %c0_i32_0 : i32, i32
  }
  func.func @transform_7(%arg0: i32) -> (i32, i32) {
    %c0_i32 = arith.constant 0 : i32
    %c0_i32_0 = arith.constant 0 : i32
    %c0_i32_1 = arith.constant 0 : i32
    return %c0_i32, %c0_i32_0 : i32, i32
  }
  func.func @transform_8(%arg0: i32) -> (i32, i32) {
    %c0_i32 = arith.constant 0 : i32
    %c0_i32_0 = arith.constant 0 : i32
    %c0_i32_1 = arith.constant 0 : i32
    return %c0_i32, %c0_i32_0 : i32, i32
  }
  func.func @transform_9(%arg0: i32) -> (i32, i32) {
    %c0_i32 = arith.constant 0 : i32
    %c0_i32_0 = arith.constant 0 : i32
    %c0_i32_1 = arith.constant 0 : i32
    return %c0_i32, %c0_i32_0 : i32, i32
  }
  func.func @transform_10(%arg0: i32) -> (i32, i32) {
    %c0_i32 = arith.constant 0 : i32
    %c0_i32_0 = arith.constant 0 : i32
    %c0_i32_1 = arith.constant 0 : i32
    return %c0_i32, %c0_i32_0 : i32, i32
  }
  func.func @transform_11(%arg0: i32) -> (i32, i32) {
    %c0_i32 = arith.constant 0 : i32
    %c0_i32_0 = arith.constant 0 : i32
    %c0_i32_1 = arith.constant 0 : i32
    return %c0_i32, %c0_i32_0 : i32, i32
  }
  func.func @transform_12(%arg0: i32) -> (i32, i32) {
    %c0_i32 = arith.constant 0 : i32
    %c0_i32_0 = arith.constant 0 : i32
    %c0_i32_1 = arith.constant 0 : i32
    return %c0_i32, %c0_i32_0 : i32, i32
  }
  func.func @transform_13(%arg0: i32) -> (i32, i32) {
    %c0_i32 = arith.constant 0 : i32
    %c0_i32_0 = arith.constant 0 : i32
    %c0_i32_1 = arith.constant 0 : i32
    return %c0_i32, %c0_i32_0 : i32, i32
  }
  func.func @transform_14(%arg0: i32) -> (i32, i32) {
    %c0_i32 = arith.constant 0 : i32
    %c0_i32_0 = arith.constant 0 : i32
    %c0_i32_1 = arith.constant 0 : i32
    return %c0_i32, %c0_i32_0 : i32, i32
  }
  func.func @transform_15(%arg0: i32) -> (i32, i32) {
    %c0_i32 = arith.constant 0 : i32
    %c0_i32_0 = arith.constant 0 : i32
    %c0_i32_1 = arith.constant 0 : i32
    return %c0_i32, %c0_i32_0 : i32, i32
  }
  func.func @transform_16(%arg0: i32) -> (i32, i32) {
    %c0_i32 = arith.constant 0 : i32
    %c0_i32_0 = arith.constant 0 : i32
    %c0_i32_1 = arith.constant 0 : i32
    return %c0_i32, %c0_i32_0 : i32, i32
  }
  func.func @transform_17(%arg0: i32) -> (i32, i32, i32) {
    %c0_i32 = arith.constant 0 : i32
    %c0_i32_0 = arith.constant 0 : i32
    %c0_i32_1 = arith.constant 0 : i32
    return %arg0, %c0_i32, %c0_i32_0 : i32, i32, i32
  }
  func.func @transform_18(%arg0: i32) -> (i32, i32, i32) {
    %c0_i32 = arith.constant 0 : i32
    %c0_i32_0 = arith.constant 0 : i32
    %c0_i32_1 = arith.constant 0 : i32
    return %arg0, %c0_i32, %c0_i32_0 : i32, i32, i32
  }
}

</mosaic_0001>

<bundles_post_ra>
// kernel: bottleneck_forward.1
= control target key start
LH: loop header
LB: loop body
LE: loop exit
PB: predicated region body
PF: predicated region fallthrough
CT: control target
= control target key end

     0   :  { %s11786_s0 = inlined_call_operand.vmem [shape: f32[2,256,128], index: 0, kind: input, shape index: {}]   ;;  %s11787_s1 = inlined_call_operand.vmem [shape: f32[2,2,32], index: 1, kind: input, shape index: {}]   ;;  %s11788_s2 = inlined_call_operand.vmem [shape: f32[128,32], index: 2, kind: input, shape index: {}]   ;;  %s11789_s3 = inlined_call_operand.vmem [shape: f32[288,32], index: 3, kind: input, shape index: {}]   ;;  %s11790_s4 = inlined_call_operand.vmem [shape: f32[288,32], index: 4, kind: input, shape index: {}]   ;;  %s11791_s5 = inlined_call_operand.vmem [shape: f32[32,128], index: 5, kind: input, shape index: {}]   ;;  %s11792_s6 = inlined_call_operand.vmem [shape: f32[2,32], index: 6, kind: input, shape index: {}]   ;;  %s11793_s7 = inlined_call_operand.vmem [shape: f32[2,32], index: 7, kind: input, shape index: {}]   ;;  %s11794_s8 = inlined_call_operand.vmem [shape: f32[2,32], index: 8, kind: input, shape index: {}]   ;;  %s11795_s9 = inlined_call_operand.vmem [shape: f32[2,128], index: 9, kind: input, shape index: {}]   ;;  %s11796_s10 = inlined_call_operand.vmem [shape: f32[2,32], index: 10, kind: input, shape index: {}]   ;;  %s11797_s11 = inlined_call_operand.vmem [shape: f32[2,32], index: 11, kind: input, shape index: {}]   ;;  %s11798_s12 = inlined_call_operand.vmem [shape: f32[2,32], index: 12, kind: input, shape index: {}]   ;;  %s11799_s13 = inlined_call_operand.vmem [shape: f32[2,32], index: 13, kind: input, shape index: {}]   ;;  %s11800_s14 = inlined_call_operand.vmem [shape: f32[2,2], index: 14, kind: input, shape index: {}]   ;;  %s11801_s15 = inlined_call_operand.vmem [shape: f32[2,32], index: 15, kind: input, shape index: {}]   ;;  %s11802_s16 = inlined_call_operand.vmem [shape: f32[2,32], index: 16, kind: input, shape index: {}]   ;;  %s11803_s17 = inlined_call_operand.hbm [shape: f32[2,256,128], index: 17, kind: output, shape index: {0}]   ;;  %s11804_s18 = inlined_call_operand.hbm [shape: f32[2,2,32], index: 18, kind: output, shape index: {1}]  }
   0x1   :  { %11906 = sst [smem:[#allocation40_spill]] %s11786_s0 }
   0x2   :  { %11907 = sst [smem:[#allocation41_spill]] %s11787_s1 }
   0x3   :  { %11908 = sst [smem:[#allocation42_spill]] %s11788_s2 }
   0x4   :  { %11909 = sst [smem:[#allocation43_spill]] %s11789_s3 }
   0x5   :  { %11910 = sst [smem:[#allocation44_spill]] %s11803_s17 }
   0x6   :  { %24 = vsyncpa [#allocation4], 0 }
   0x7   :  { %26 = vsyncpa [#allocation4 + $0x1], 0 }
   0x8   :  { %27 = vsyncpa [#allocation6], 0 }
   0x9   :  { %29 = vsyncpa [#allocation6 + $0x1], 0  ;;  %s7943_s27 = smov 0   ;;  %s7945_s28 = smov 0  }
   0xa   :  { %s7947_s29 = smov 0   ;;  %s7949_s30 = smov 0  }
   0xb LB: > { %11911 = sst [smem:[#allocation9_spill]] %s7823_s27  ;;  %s7964_s0 = sadd.s32 4294967295, %s7835_s30   ;;  %s7835_s30 = sphi %s7949_s30, %s12096_s30   ;;  %s7831_s29 = sphi %s7947_s29, %s12098_s29   ;;  %s7827_s28 = sphi %s7945_s28, %s12100_s28   ;;  %s7823_s27 = sphi %s7943_s27, %s12099_s27  }
   0xc   : > { %11912 = sst [smem:[#allocation10_spill]] %s7831_s29  ;;  %s5947_s19 = sadd.s32 4294967294, %s7835_s30  }
   0xd   : > { %11913 = sst [smem:[#allocation11_spill]] %s7835_s30  ;;  %s7968_s1 = sadd.s32 1, %s7835_s30  }
   0xe   : > { %11914 = sst [smem:[#allocation12_spill]] %s7968_s1  ;;  %s409_s20 = sadd.s32 1, %s7831_s29 }
   0xf   : > { %s406_s21 = ssub.s32 %s7835_s30, %s7968_s1  ;;  %p419_p0 = scmp.ne.s32.totalorder %s7831_s29, %s7827_s28 }
  0x10   : > { %p407_p1 = scmp.eq.s32.totalorder %s406_s21, 0  ;;  %p420_p2 = scmp.eq.s32.totalorder %s7964_s0, 1 }
  0x11   : > { %p425_p3 = scmp.ne.s32.totalorder %s7827_s28, %s7823_s27  ;;  %p426_p4 = scmp.eq.s32.totalorder %s5947_s19, 1 }
  0x12   : > { %s7979_s22 = scalar_select %p407_p1, %s7831_s29, %s409_s20  }
  0x13   : > { %p7981_p5 = por %p420_p2, %p419_p0  ;;  %p7985_p6 = por %p426_p4, %p425_p3 }
  0x14   : > { %11915 = sst [smem:[#allocation13_spill]] %s7979_s22  ;;  %p5950_p7 = scmp.ge.s32.totalorder %s7835_s30, 1 }
  0x15   : > { %s11917_s23 = scalar_select %p7985_p6, 1, 0 }
  0x16   : > { %p530_p8 = scmp.lt.s32.totalorder %s7835_s30, 3 }
  0x17   : > { %11918 = sst [smem:[#allocation14_spill]] %s11917_s23 }
  0x18   : > { %p531_p9 = pnand %p5950_p7, %p530_p8 }
  0x1a   : > { %534 = sbr.rel (%p531_p9) target bundleno = 1982 (0x7be), region = 88 }
  0x21   : > { %s11919_s26 = sld [smem:[#allocation42_spill]]  ;;  %p593_p10 = scmp.lt.s32.totalorder %s7964_s0, 1  ;;  %vm981_vm0 = vcmask 261120   ;;  %v7837_v56 = vmov 0.0   ;;  %vm986_vm1 = vcmask 254976   ;;  %v7838_v59 = vmov 0.0|0.0  }
  0x22   : > { %s11920_s1 = sld [smem:[#allocation40_spill]]  ;;  %996 = vst.msk [vmem:[#allocation2 + $0x68] sm:$0xff] %vm981_vm0, %v7837_v56  ;;  %983 = vst.msk [vmem:[#allocation2 + $0x8] sm:$0xff] %vm981_vm0, %v7837_v56  ;;  %s11921_s3 = sld [smem:[#allocation43_spill]]  ;;  %6625 = vmatprep.subr.bf16.mxu1 %v7838_v59  ;;  %vm2206_vm2 = vcmask 523264   ;;  %vm2239_vm3 = vcmask 785408  }
  0x23   : > { %s8011_s19 = scalar_select %p593_p10, %s7964_s0, 1  ;;  %984 = vst.msk [vmem:[#allocation2 + $0x10] sm:$0xff] %vm981_vm0, %v7837_v56  ;;  %985 = vst.msk [vmem:[#allocation2 + $0x18] sm:$0xff] %vm981_vm0, %v7837_v56  ;;  %vm5106_vm4 = vcmask 253952   ;;  %vm5162_vm5 = vcmask 7168   ;;  %vm5806_vm6 = vcmask 1040384  }
  0x24   : > { %989 = vst.msk [vmem:[#allocation2 + $0x30] sm:$0xff] %vm981_vm0, %v7837_v56  ;;  %990 = vst.msk [vmem:[#allocation2 + $0x38] sm:$0xff] %vm981_vm0, %v7837_v56  ;;  %s7839_s24 = smov 32   ;;  %s11813_s29 = smov 96  }
  0x25   : > { %s6067_s22 = sshll.u32 %s8011_s19, 8  ;;  %991 = vst.msk [vmem:[#allocation2 + $0x40] sm:$0xff] %vm981_vm0, %v7837_v56  ;;  %994 = vst.msk [vmem:[#allocation2 + $0x58] sm:$0xff] %vm981_vm0, %v7837_v56  ;;  %s5955_s30 = sshll.u32 %s8011_s19, 1 }
  0x26   : > { %995 = vst.msk [vmem:[#allocation2 + $0x60] sm:$0xff] %vm981_vm0, %v7837_v56  ;;  %999 = vst.msk [vmem:[#allocation2 + $0x80] sm:$0xff] %vm981_vm0, %v7837_v56  ;;  %s6064_s27 = sshll.u32 %s7964_s0, 5 }
  0x27   : > { %v634_v0 = vld [vmem:[%s11919_s26] sm:$0xff]  ;;  %v635_v1 = vld [vmem:[%s11919_s26 + $0x8] sm:$0xff]  ;;  %v636_v2 = vld [vmem:[%s11919_s26 + $0x10] sm:$0xff]  ;;  %1000 = vst.msk [vmem:[#allocation2 + $0x88] sm:$0xff] %vm981_vm0, %v7837_v56 }
  0x28   : > { %v6473_v3 = vpack.c.bf16 %v635_v1, %v634_v0  ;;  %v637_v4 = vld [vmem:[%s11919_s26 + $0x18] sm:$0xff]  ;;  %v638_v6 = vld [vmem:[%s11919_s26 + $0x20] sm:$0xff]  ;;  %v639_v7 = vld [vmem:[%s11919_s26 + $0x28] sm:$0xff]  ;;  %s8017_s21 = scalar_lea.vmem %s11920_s1, %s6067_s22  ;;  %1001 = vst.msk [vmem:[#allocation2 + $0x90] sm:$0xff] %vm981_vm0, %v7837_v56  ;;  %s7841_s1 = smov 64  }
  0x29   : > { %v6477_v5 = vpack.c.bf16 %v637_v4, %v636_v2  ;;  %v6481_v8 = vpack.c.bf16 %v639_v7, %v638_v6  ;;  %v640_v9 = vld [vmem:[%s11919_s26 + $0x30] sm:$0xff]  ;;  %v641_v10 = vld [vmem:[%s11919_s26 + $0x38] sm:$0xff]  ;;  %v602_v11 = vld [vmem:[%s8017_s21] sm:$0xff]  ;;  %1004 = vst.msk [vmem:[#allocation2 + $0xa8] sm:$0xff] %vm981_vm0, %v7837_v56 }
  0x2a   : > { %6474 = vmatprep.subr.bf16.mxu0 %v6473_v3  ;;  %6257 = vmatprep.mubr.f32.mxu0 %v602_v11  ;;  %v6485_v12 = vpack.c.bf16 %v641_v10, %v640_v9  ;;  %v642_v13 = vld [vmem:[%s11919_s26 + $0x40] sm:$0xff]  ;;  %v643_v14 = vld [vmem:[%s11919_s26 + $0x48] sm:$0xff]  ;;  %v644_v16 = vld [vmem:[%s11919_s26 + $0x50] sm:$0xff]  ;;  %1005 = vst.msk [vmem:[#allocation2 + $0xb0] sm:$0xff] %vm981_vm0, %v7837_v56 }
  0x2b   : > { %6476 = vmatpush3.bf16.msra.mxu0 %v6473_v3  ;;  %v6489_v15 = vpack.c.bf16 %v643_v14, %v642_v13  ;;  %v645_v17 = vld [vmem:[%s11919_s26 + $0x58] sm:$0xff]  ;;  %v646_v19 = vld [vmem:[%s11919_s26 + $0x60] sm:$0xff]  ;;  %v647_v20 = vld [vmem:[%s11919_s26 + $0x68] sm:$0xff]  ;;  %1006 = vst.msk [vmem:[#allocation2 + $0xb8] sm:$0xff] %vm981_vm0, %v7837_v56 }
  0x2c   : > { %6478 = vmatprep.subr.bf16.mxu0 %v6477_v5  ;;  %v6493_v18 = vpack.c.bf16 %v645_v17, %v644_v16  ;;  %v6497_v21 = vpack.c.bf16 %v647_v20, %v646_v19  ;;  %v648_v22 = vld [vmem:[%s11919_s26 + $0x70] sm:$0xff]  ;;  %v649_v23 = vld [vmem:[%s11919_s26 + $0x78] sm:$0xff]  ;;  %v603_v25 = vld [vmem:[%s8017_s21 + $0x8] sm:$0xff]  ;;  %1009 = vst.msk [vmem:[#allocation2 + $0xd0] sm:$0xff] %vm981_vm0, %v7837_v56 }
  0x2d   : > { %v6501_v24 = vpack.c.bf16 %v649_v23, %v648_v22  ;;  %v604_v26 = vld [vmem:[%s8017_s21 + $0x10] sm:$0xff]  ;;  %v605_v27 = vld [vmem:[%s8017_s21 + $0x18] sm:$0xff]  ;;  %v606_v28 = vld [vmem:[%s8017_s21 + $0x20] sm:$0xff]  ;;  %1010 = vst.msk [vmem:[#allocation2 + $0xd8] sm:$0xff] %vm981_vm0, %v7837_v56 }
  0x2e   : > { %v607_v29 = vld [vmem:[%s8017_s21 + $0x28] sm:$0xff]  ;;  %v608_v30 = vld [vmem:[%s8017_s21 + $0x30] sm:$0xff]  ;;  %v609_v31 = vld [vmem:[%s8017_s21 + $0x38] sm:$0xff]  ;;  %1011 = vst.msk [vmem:[#allocation2 + $0xe0] sm:$0xff] %vm981_vm0, %v7837_v56 }
  0x2f   : > { %6480 = vmatpush3.bf16.msra.mxu0 %v6477_v5  ;;  %v610_v32 = vld [vmem:[%s8017_s21 + $0x40] sm:$0xff]  ;;  %v611_v33 = vld [vmem:[%s8017_s21 + $0x48] sm:$0xff]  ;;  %v612_v34 = vld [vmem:[%s8017_s21 + $0x50] sm:$0xff]  ;;  %1014 = vst.msk [vmem:[#allocation2 + $0xf8] sm:$0xff] %vm981_vm0, %v7837_v56 }
  0x30   : > { %6482 = vmatprep.subr.bf16.mxu0 %v6481_v8  ;;  %v613_v35 = vld [vmem:[%s8017_s21 + $0x58] sm:$0xff]  ;;  %v614_v36 = vld [vmem:[%s8017_s21 + $0x60] sm:$0xff]  ;;  %v615_v37 = vld [vmem:[%s8017_s21 + $0x68] sm:$0xff]  ;;  %1015 = vst.msk [vmem:[#allocation2 + $0x100] sm:$0xff] %vm981_vm0, %v7837_v56 }
  0x31   : > { %v616_v38 = vld [vmem:[%s8017_s21 + $0x70] sm:$0xff]  ;;  %v617_v39 = vld [vmem:[%s8017_s21 + $0x78] sm:$0xff]  ;;  %v618_v40 = vld [vmem:[%s8017_s21 + $0x80] sm:$0xff]  ;;  %1016 = vst.msk [vmem:[#allocation2 + $0x108] sm:$0xff] %vm981_vm0, %v7837_v56 }
  0x32   : > { %v619_v41 = vld [vmem:[%s8017_s21 + $0x88] sm:$0xff]  ;;  %v620_v42 = vld [vmem:[%s8017_s21 + $0x90] sm:$0xff]  ;;  %v621_v43 = vld [vmem:[%s8017_s21 + $0x98] sm:$0xff]  ;;  %1019 = vst.msk [vmem:[#allocation2 + $0x120] sm:$0xff] %vm981_vm0, %v7837_v56 }
  0x33   : > { %6484 = vmatpush3.bf16.msra.mxu0 %v6481_v8  ;;  %v622_v44 = vld [vmem:[%s8017_s21 + $0xa0] sm:$0xff]  ;;  %v623_v45 = vld [vmem:[%s8017_s21 + $0xa8] sm:$0xff]  ;;  %v624_v46 = vld [vmem:[%s8017_s21 + $0xb0] sm:$0xff]  ;;  %1020 = vst.msk [vmem:[#allocation2 + $0x128] sm:$0xff] %vm981_vm0, %v7837_v56 }
  0x34   : > { %6486 = vmatprep.subr.bf16.mxu0 %v6485_v12  ;;  %v625_v47 = vld [vmem:[%s8017_s21 + $0xb8] sm:$0xff]  ;;  %v626_v48 = vld [vmem:[%s8017_s21 + $0xc0] sm:$0xff]  ;;  %v627_v49 = vld [vmem:[%s8017_s21 + $0xc8] sm:$0xff]  ;;  %1021 = vst.msk [vmem:[#allocation2 + $0x130] sm:$0xff] %vm981_vm0, %v7837_v56 }
  0x35   : > { %v628_v50 = vld [vmem:[%s8017_s21 + $0xd0] sm:$0xff]  ;;  %v629_v51 = vld [vmem:[%s8017_s21 + $0xd8] sm:$0xff]  ;;  %v630_v52 = vld [vmem:[%s8017_s21 + $0xe0] sm:$0xff]  ;;  %1024 = vst.msk [vmem:[#allocation2 + $0x148] sm:$0xff] %vm981_vm0, %v7837_v56 }
  0x36   : > { %v631_v53 = vld [vmem:[%s8017_s21 + $0xe8] sm:$0xff]  ;;  %v632_v54 = vld [vmem:[%s8017_s21 + $0xf0] sm:$0xff]  ;;  %v633_v55 = vld [vmem:[%s8017_s21 + $0xf8] sm:$0xff]  ;;  %1025 = vst.msk [vmem:[#allocation2 + $0x150] sm:$0xff] %vm981_vm0, %v7837_v56 }
  0x37   : > { %6488 = vmatpush3.bf16.msra.mxu0 %v6485_v12  ;;  %1026 = vst.msk [vmem:[#allocation2 + $0x158] sm:$0xff] %vm981_vm0, %v7837_v56  ;;  %1029 = vst.msk [vmem:[#allocation2 + $0x170] sm:$0xff] %vm981_vm0, %v7837_v56  ;;  %v2368_v57 = vld [vmem:[%s11921_s3] sm:$0xff]  ;;  %v2369_v58 = vld [vmem:[%s11921_s3 + $0x8] sm:$0xff] }
  0x38   : > { %6490 = vmatprep.subr.bf16.mxu0 %v6489_v15  ;;  %1030 = vst.msk [vmem:[#allocation2 + $0x178] sm:$0xff] %vm981_vm0, %v7837_v56  ;;  %1031 = vst.msk [vmem:[#allocation2 + $0x180] sm:$0xff] %vm981_vm0, %v7837_v56  ;;  %v6506_v60 = vpack.c.bf16 %v2369_v58, %v2368_v57  ;;  %v2370_v61 = vld [vmem:[%s11921_s3 + $0x10] sm:$0xff]  ;;  %v2371_v62 = vld [vmem:[%s11921_s3 + $0x18] sm:$0xff] }
  0x39   : > { %1034 = vst.msk [vmem:[#allocation2 + $0x198] sm:$0xff] %vm981_vm0, %v7837_v56  ;;  %1035 = vst.msk [vmem:[#allocation2 + $0x1a0] sm:$0xff] %vm981_vm0, %v7837_v56  ;;  %v6509_v63 = vpack.c.bf16 %v2371_v62, %v2370_v61  ;;  %v2372_v0 = vld [vmem:[%s11921_s3 + $0x20] sm:$0xff]  ;;  %v2373_v1 = vld [vmem:[%s11921_s3 + $0x28] sm:$0xff] }
  0x3a   : > { %1036 = vst.msk [vmem:[#allocation2 + $0x1a8] sm:$0xff] %vm981_vm0, %v7837_v56  ;;  %1039 = vst.msk [vmem:[#allocation2 + $0x1c0] sm:$0xff] %vm981_vm0, %v7837_v56  ;;  %6641 = vmatpush1.bf16.msra.mxu1 %v6506_v60  ;;  %v6512_v2 = vpack.c.bf16 %v2373_v1, %v2372_v0  ;;  %v2374_v3 = vld [vmem:[%s11921_s3 + $0x30] sm:$0xff]  ;;  %v2375_v4 = vld [vmem:[%s11921_s3 + $0x38] sm:$0xff] }
  0x3b   : > { %6492 = vmatpush3.bf16.msra.mxu0 %v6489_v15  ;;  %1040 = vst.msk [vmem:[#allocation2 + $0x1c8] sm:$0xff] %vm981_vm0, %v7837_v56  ;;  %1041 = vst.msk [vmem:[#allocation2 + $0x1d0] sm:$0xff] %vm981_vm0, %v7837_v56  ;;  %6626 = vmatprep.subr.bf16.mxu1 %v7838_v59  ;;  %v6515_v5 = vpack.c.bf16 %v2375_v4, %v2374_v3  ;;  %v2376_v6 = vld [vmem:[%s11921_s3 + $0x40] sm:$0xff]  ;;  %v2377_v7 = vld [vmem:[%s11921_s3 + $0x48] sm:$0xff] }
  0x3c   : > { %6494 = vmatprep.subr.bf16.mxu0 %v6493_v18  ;;  %1044 = vst.msk [vmem:[#allocation2 + $0x1e8] sm:$0xff] %vm981_vm0, %v7837_v56  ;;  %1045 = vst.msk [vmem:[#allocation2 + $0x1f0] sm:$0xff] %vm981_vm0, %v7837_v56  ;;  %v6518_v8 = vpack.c.bf16 %v2377_v7, %v2376_v6  ;;  %v2378_v9 = vld [vmem:[%s11921_s3 + $0x50] sm:$0xff]  ;;  %v2379_v10 = vld [vmem:[%s11921_s3 + $0x58] sm:$0xff] }
  0x3d   : > { %1046 = vst.msk [vmem:[#allocation2 + $0x1f8] sm:$0xff] %vm981_vm0, %v7837_v56  ;;  %1049 = vst.msk [vmem:[#allocation2 + $0x210] sm:$0xff] %vm981_vm0, %v7837_v56  ;;  %v6521_v11 = vpack.c.bf16 %v2379_v10, %v2378_v9  ;;  %v2380_v12 = vld [vmem:[%s11921_s3 + $0x60] sm:$0xff]  ;;  %v2381_v13 = vld [vmem:[%s11921_s3 + $0x68] sm:$0xff] }
  0x3e   : > { %1050 = vst.msk [vmem:[#allocation2 + $0x218] sm:$0xff] %vm981_vm0, %v7837_v56  ;;  %1051 = vst.msk [vmem:[#allocation2 + $0x220] sm:$0xff] %vm981_vm0, %v7837_v56  ;;  %6642 = vmatpush1.bf16.msra.mxu1 %v6509_v63  ;;  %v6524_v14 = vpack.c.bf16 %v2381_v13, %v2380_v12  ;;  %v2382_v15 = vld [vmem:[%s11921_s3 + $0x70] sm:$0xff]  ;;  %v2383_v16 = vld [vmem:[%s11921_s3 + $0x78] sm:$0xff] }
  0x3f   : > { %6496 = vmatpush3.bf16.msra.mxu0 %v6493_v18  ;;  %1054 = vst.msk [vmem:[#allocation2 + $0x238] sm:$0xff] %vm981_vm0, %v7837_v56  ;;  %1055 = vst.msk [vmem:[#allocation2 + $0x240] sm:$0xff] %vm981_vm0, %v7837_v56  ;;  %6627 = vmatprep.subr.bf16.mxu1 %v7838_v59  ;;  %v6527_v17 = vpack.c.bf16 %v2383_v16, %v2382_v15  ;;  %v2384_v18 = vld [vmem:[%s11921_s3 + $0x80] sm:$0xff]  ;;  %v2385_v19 = vld [vmem:[%s11921_s3 + $0x88] sm:$0xff] }
  0x40   : > { %6498 = vmatprep.subr.bf16.mxu0 %v6497_v21  ;;  %1056 = vst.msk [vmem:[#allocation2 + $0x248] sm:$0xff] %vm981_vm0, %v7837_v56  ;;  %1059 = vst.msk [vmem:[#allocation2 + $0x260] sm:$0xff] %vm981_vm0, %v7837_v56  ;;  %v6530_v20 = vpack.c.bf16 %v2385_v19, %v2384_v18  ;;  %v2387_v22 = vld [vmem:[%s11921_s3 + $0x98] sm:$0xff]  ;;  %v1150_v62 = vld [vmem:[#allocation2 + $0x40] sm:$0xff] }
  0x41   : > { %1060 = vst.msk [vmem:[#allocation2 + $0x268] sm:$0xff] %vm981_vm0, %v7837_v56  ;;  %1061 = vst.msk [vmem:[#allocation2 + $0x270] sm:$0xff] %vm981_vm0, %v7837_v56  ;;  %v2396_v3 = vld [vmem:[%s11921_s3 + $0xe0] sm:$0xff]  ;;  %v2397_v4 = vld [vmem:[%s11921_s3 + $0xe8] sm:$0xff] }
  0x42   : > { %1064 = vst.msk [vmem:[#allocation2 + $0x288] sm:$0xff] %vm981_vm0, %v7837_v56  ;;  %1065 = vst.msk [vmem:[#allocation2 + $0x290] sm:$0xff] %vm981_vm0, %v7837_v56  ;;  %6643 = vmatpush1.bf16.msra.mxu1 %v6512_v2  ;;  %v1181_v18 = vld [vmem:[#allocation2 + $0x39] sm:$0xff]  ;;  %v2398_v19 = vld [vmem:[%s11921_s3 + $0xf0] sm:$0xff] }
  0x43   : > { %6500 = vmatpush3.bf16.msra.mxu0 %v6497_v21  ;;  %1066 = vst.msk [vmem:[#allocation2 + $0x298] sm:$0xff] %vm981_vm0, %v7837_v56  ;;  %1069 = vst.msk [vmem:[#allocation2 + $0x2b0] sm:$0xff] %vm981_vm0, %v7837_v56  ;;  %6628 = vmatprep.subr.bf16.mxu1 %v7838_v59  ;;  %v2386_v21 = vld [vmem:[%s11921_s3 + $0x90] sm:$0xff] }
  0x44   : > { %6502 = vmatprep.subr.bf16.mxu0 %v6501_v24  ;;  %1070 = vst.msk [vmem:[#allocation2 + $0x2b8] sm:$0xff] %vm981_vm0, %v7837_v56  ;;  %1071 = vst.msk [vmem:[#allocation2 + $0x2c0] sm:$0xff] %vm981_vm0, %v7837_v56  ;;  %v6533_v23 = vpack.c.bf16 %v2387_v22, %v2386_v21 }
  0x45   : > { %1074 = vst.msk [vmem:[#allocation2 + $0x2d8] sm:$0xff] %vm981_vm0, %v7837_v56  ;;  %1075 = vst.msk [vmem:[#allocation2 + $0x2e0] sm:$0xff] %vm981_vm0, %v7837_v56 }
  0x46   : > { %1076 = vst.msk [vmem:[#allocation2 + $0x2e8] sm:$0xff] %vm981_vm0, %v7837_v56  ;;  %1079 = vst.msk [vmem:[#allocation2 + $0x300] sm:$0xff] %vm981_vm0, %v7837_v56  ;;  %6644 = vmatpush1.bf16.msra.mxu1 %v6515_v5 }
  0x47   : > { %6504 = vmatpush3.bf16.msra.mxu0 %v6501_v24  ;;  %1080 = vst.msk [vmem:[#allocation2 + $0x308] sm:$0xff] %vm981_vm0, %v7837_v56  ;;  %1081 = vst.msk [vmem:[#allocation2 + $0x310] sm:$0xff] %vm981_vm0, %v7837_v56  ;;  %6629 = vmatprep.subr.bf16.mxu1 %v7838_v59  ;;  %v2388_v24 = vld [vmem:[%s11921_s3 + $0xa0] sm:$0xff] }
  0x48   : > { %997 = vst.msk [vmem:[#allocation2 + $0x70] sm:$0x3] %vm986_vm1, %v7837_v56  ;;  %987 = vst.msk [vmem:[#allocation2 + $0x20] sm:$0x3] %vm986_vm1, %v7837_v56  ;;  %6505 = vmatprep.subr.bf16.mxu0 %v7838_v59 }
  0x49   : > { %992 = vst.msk [vmem:[#allocation2 + $0x48] sm:$0x3] %vm986_vm1, %v7837_v56  ;;  %1002 = vst.msk [vmem:[#allocation2 + $0x98] sm:$0x3] %vm986_vm1, %v7837_v56 }
  0x4a   : > { %6258 = vmatmul.mubr.f32.vlgmr.msra.gmra.mrb[0].mxu0 %v603_v25  ;;  %1007 = vst.msk [vmem:[#allocation2 + $0xc0] sm:$0x3] %vm986_vm1, %v7837_v56  ;;  %1012 = vst.msk [vmem:[#allocation2 + $0xe8] sm:$0x3] %vm986_vm1, %v7837_v56  ;;  %6645 = vmatpush1.bf16.msra.mxu1 %v6518_v8  ;;  %v2389_v25 = vld [vmem:[%s11921_s3 + $0xa8] sm:$0xff] }
  0x4b   : > { %6260 = vmatprep.mubr.f32.mxu0 %v604_v26  ;;  %1017 = vst.msk [vmem:[#allocation2 + $0x110] sm:$0x3] %vm986_vm1, %v7837_v56  ;;  %1022 = vst.msk [vmem:[#allocation2 + $0x138] sm:$0x3] %vm986_vm1, %v7837_v56  ;;  %6507 = vmatpush1.bf16.msra.mxu0 %v6506_v60  ;;  %v6536_v26 = vpack.c.bf16 %v2389_v25, %v2388_v24 }
  0x4c   : > { %1027 = vst.msk [vmem:[#allocation2 + $0x160] sm:$0x3] %vm986_vm1, %v7837_v56  ;;  %1032 = vst.msk [vmem:[#allocation2 + $0x188] sm:$0x3] %vm986_vm1, %v7837_v56  ;;  %6508 = vmatprep.subr.bf16.mxu0 %v7838_v59  ;;  %6630 = vmatprep.subr.bf16.mxu1 %v7838_v59 }
  0x4d   : > { %1037 = vst.msk [vmem:[#allocation2 + $0x1b0] sm:$0x3] %vm986_vm1, %v7837_v56  ;;  %1042 = vst.msk [vmem:[#allocation2 + $0x1d8] sm:$0x3] %vm986_vm1, %v7837_v56 }
  0x4e   : > { %6261 = vmatmul.mubr.f32.gmra.mrb[2].mxu0 %v605_v27  ;;  %1047 = vst.msk [vmem:[#allocation2 + $0x200] sm:$0x3] %vm986_vm1, %v7837_v56  ;;  %1052 = vst.msk [vmem:[#allocation2 + $0x228] sm:$0x3] %vm986_vm1, %v7837_v56  ;;  %6646 = vmatpush1.bf16.msra.mxu1 %v6521_v11  ;;  %v8332_v27 = vld [vmem:[%s11792_s6] ss:$0 sm:$0xff] }
  0x4f   : > { %6263 = vmatprep.mubr.f32.mxu0 %v606_v28  ;;  %1057 = vst.msk [vmem:[#allocation2 + $0x250] sm:$0x3] %vm986_vm1, %v7837_v56  ;;  %1062 = vst.msk [vmem:[#allocation2 + $0x278] sm:$0x3] %vm986_vm1, %v7837_v56  ;;  %6510 = vmatpush1.bf16.msra.mxu0 %v6509_v63  ;;  %v2390_v28 = vld [vmem:[%s11921_s3 + $0xb0] sm:$0xff] }
  0x50   : > { %1067 = vst.msk [vmem:[#allocation2 + $0x2a0] sm:$0x3] %vm986_vm1, %v7837_v56  ;;  %1072 = vst.msk [vmem:[#allocation2 + $0x2c8] sm:$0x3] %vm986_vm1, %v7837_v56  ;;  %6511 = vmatprep.subr.bf16.mxu0 %v7838_v59  ;;  %6631 = vmatprep.subr.bf16.mxu1 %v7838_v59 }
  0x51   : > { %1077 = vst.msk [vmem:[#allocation2 + $0x2f0] sm:$0x3] %vm986_vm1, %v7837_v56  ;;  %1082 = vst.msk [vmem:[#allocation2 + $0x318] sm:$0x3] %vm986_vm1, %v7837_v56 }
  0x52   : > { %6264 = vmatmul.mubr.f32.gmra.mrb[4].mxu0 %v607_v29  ;;  %6647 = vmatpush1.bf16.msra.mxu1 %v6524_v14  ;;  %v2391_v29 = vld [vmem:[%s11921_s3 + $0xb8] sm:$0xff] }
  0x53   : > { %6266 = vmatprep.mubr.f32.mxu0 %v608_v30  ;;  %6513 = vmatpush1.bf16.msra.mxu0 %v6512_v2  ;;  %v6539_v30 = vpack.c.bf16 %v2391_v29, %v2390_v28  ;;  %v8380_v2 = vld [vmem:[#allocation2 + $0x38] sm:$0xff] }
  0x54   : > { %6514 = vmatprep.subr.bf16.mxu0 %v7838_v59  ;;  %6632 = vmatprep.subr.bf16.mxu1 %v7838_v59 }
  0x56   : > { %6267 = vmatmul.mubr.f32.gmra.mrb[6].mxu0 %v609_v31  ;;  %6648 = vmatpush1.bf16.msra.mxu1 %v6527_v17 }
  0x57   : > { %6269 = vmatprep.mubr.f32.mxu0 %v610_v32  ;;  %6516 = vmatpush1.bf16.msra.mxu0 %v6515_v5  ;;  %v8345_v32 = vld [vmem:[%s11792_s6 + $0x1] ss:$0 sm:$0xff] }
  0x58   : > { %6517 = vmatprep.subr.bf16.mxu0 %v7838_v59  ;;  %6633 = vmatprep.subr.bf16.mxu1 %v7838_v59 }
  0x5a   : > { %6270 = vmatmul.mubr.f32.gmra.mrb[8].mxu0 %v611_v33  ;;  %6649 = vmatpush1.bf16.msra.mxu1 %v6530_v20 }
  0x5b   : > { %6272 = vmatprep.mubr.f32.mxu0 %v612_v34  ;;  %6519 = vmatpush1.bf16.msra.mxu0 %v6518_v8  ;;  %v6548_v8 = vpack.c.bf16 %v2397_v4, %v2396_v3 }
  0x5c   : > { %6520 = vmatprep.subr.bf16.mxu0 %v7838_v59  ;;  %6634 = vmatprep.subr.bf16.mxu1 %v7838_v59 }
  0x5e   : > { %6273 = vmatmul.mubr.f32.gmra.mrb[10].mxu0 %v613_v35  ;;  %6650 = vmatpush1.bf16.msra.mxu1 %v6533_v23 }
  0x5f   : > { %6275 = vmatprep.mubr.f32.mxu0 %v614_v36  ;;  %6522 = vmatpush1.bf16.msra.mxu0 %v6521_v11 }
  0x60   : > { %6523 = vmatprep.subr.bf16.mxu0 %v7838_v59  ;;  %6635 = vmatprep.subr.bf16.mxu1 %v7838_v59 }
  0x62   : > { %6276 = vmatmul.mubr.f32.gmra.mrb[12].mxu0 %v615_v37  ;;  %6651 = vmatpush1.bf16.msra.mxu1 %v6536_v26  ;;  %v2392_v37 = vld [vmem:[%s11921_s3 + $0xc0] sm:$0xff] }
  0x63   : > { %6278 = vmatprep.mubr.f32.mxu0 %v616_v38  ;;  %6525 = vmatpush1.bf16.msra.mxu0 %v6524_v14  ;;  %v2393_v38 = vld [vmem:[%s11921_s3 + $0xc8] sm:$0xff] }
  0x64   : > { %6526 = vmatprep.subr.bf16.mxu0 %v7838_v59  ;;  %6636 = vmatprep.subr.bf16.mxu1 %v7838_v59 }
  0x66   : > { %6279 = vmatmul.mubr.f32.gmra.mrb[14].mxu0 %v617_v39  ;;  %6652 = vmatpush1.bf16.msra.mxu1 %v6539_v30 }
  0x67   : > { %6281 = vmatprep.mubr.f32.mxu0 %v618_v40  ;;  %6528 = vmatpush1.bf16.msra.mxu0 %v6527_v17 }
  0x68   : > { %6529 = vmatprep.subr.bf16.mxu0 %v7838_v59  ;;  %6637 = vmatprep.subr.bf16.mxu1 %v7838_v59 }
  0x6a   : > { %6282 = vmatmul.mubr.f32.gmra.mrb[16].mxu0 %v619_v41  ;;  %v6542_v41 = vpack.c.bf16 %v2393_v38, %v2392_v37 }
  0x6b   : > { %6284 = vmatprep.mubr.f32.mxu0 %v620_v42  ;;  %6531 = vmatpush1.bf16.msra.mxu0 %v6530_v20  ;;  %v2399_v20 = vld [vmem:[%s11921_s3 + $0xf8] sm:$0xff] }
  0x6c   : > { %6532 = vmatprep.subr.bf16.mxu0 %v7838_v59  ;;  %6653 = vmatpush1.bf16.msra.mxu1 %v6542_v41  ;;  %v6551_v25 = vpack.c.bf16 %v2399_v20, %v2398_v19  ;;  %v2400_v19 = vld [vmem:[%s11921_s3 + $0x100] sm:$0xff]  ;;  %v2401_v20 = vld [vmem:[%s11921_s3 + $0x108] sm:$0xff] }
  0x6d   : > { %6638 = vmatprep.subr.bf16.mxu1 %v7838_v59 }
  0x6e   : > { %6285 = vmatmul.mubr.f32.gmra.mrb[18].mxu0 %v621_v43 }
  0x6f   : > { %6287 = vmatprep.mubr.f32.mxu0 %v622_v44  ;;  %6534 = vmatpush1.bf16.msra.mxu0 %v6533_v23 }
  0x70   : > { %6535 = vmatprep.subr.bf16.mxu0 %v7838_v59 }
  0x72   : > { %6288 = vmatmul.mubr.f32.gmra.mrb[20].mxu0 %v623_v45 }
  0x73   : > { %6290 = vmatprep.mubr.f32.mxu0 %v624_v46  ;;  %6537 = vmatpush1.bf16.msra.mxu0 %v6536_v26 }
  0x74   : > { %6538 = vmatprep.subr.bf16.mxu0 %v7838_v59 }
  0x76   : > { %6291 = vmatmul.mubr.f32.gmra.mrb[22].mxu0 %v625_v47 }
  0x77   : > { %6293 = vmatprep.mubr.f32.mxu0 %v626_v48  ;;  %6540 = vmatpush1.bf16.msra.mxu0 %v6539_v30 }
  0x78   : > { %6541 = vmatprep.subr.bf16.mxu0 %v7838_v59 }
  0x7a   : > { %6294 = vmatmul.mubr.f32.gmra.mrb[24].mxu0 %v627_v49 }
  0x7b   : > { %6296 = vmatprep.mubr.f32.mxu0 %v628_v50  ;;  %6543 = vmatpush1.bf16.msra.mxu0 %v6542_v41 }
  0x7c   : > { %6544 = vmatprep.subr.bf16.mxu0 %v7838_v59 }
  0x7e   : > { %6297 = vmatmul.mubr.f32.gmra.mrb[26].mxu0 %v629_v51 }
  0x7f   : > { %6299 = vmatprep.mubr.f32.mxu0 %v630_v52 }
  0x82   : > { %6300 = vmatmul.mubr.f32.gmra.mrb[28].mxu0 %v631_v53  ;;  %v2394_v53 = vld [vmem:[%s11921_s3 + $0xd0] sm:$0xff] }
  0x83   : > { %6302 = vmatprep.mubr.f32.mxu0 %v632_v54  ;;  %v2395_v54 = vld [vmem:[%s11921_s3 + $0xd8] sm:$0xff] }
  0x84   : > { %v6545_v57 = vpack.c.bf16 %v2395_v54, %v2394_v53 }
  0x86   : > { %6303 = vmatmul.mubr.f32.gmra.mrb[30].mxu0 %v633_v55  ;;  %6654 = vmatpush1.bf16.msra.mxu1 %v6545_v57 }
  0x87   : > { %6546 = vmatpush1.bf16.msra.mxu0 %v6545_v57  ;;  %6639 = vmatprep.subr.bf16.mxu1 %v7838_v59 }
  0x88   : > { %6547 = vmatprep.subr.bf16.mxu0 %v7838_v59 }
  0x8a   : > { %6655 = vmatpush1.bf16.msra.mxu1 %v6548_v8 }
  0x8b   : > { %6549 = vmatpush1.bf16.msra.mxu0 %v6548_v8  ;;  %6640 = vmatprep.subr.bf16.mxu1 %v7838_v59 }
  0x8c   : > { %6550 = vmatprep.subr.bf16.mxu0 %v7838_v59 }
  0x8e   : > { %6656 = vmatpush1.bf16.msra.mxu1 %v6551_v25 }
  0x8f   : > { %6552 = vmatpush1.bf16.msra.mxu0 %v6551_v25 }
 0x11d   : > { %v6259_v31 = vpop.f32.mrb[0].mxu0 }
 0x11e   : > { %v881_v33 = vmul.f32 %v6259_v31, %v8332_v27  ;;  %v716_v34 = vpop.f32.mrb[1].mxu0 }
 0x11f   : > { %v880_v35 = vmul.f32 %v8332_v27, %v716_v34 }
 0x120   : > { %v918_v36 = vadd.f32 %v8345_v32, %v881_v33 }
 0x121   : > { %v917_v39 = vadd.f32 %v8345_v32, %v880_v35  ;;  %v6262_v40 = vpop.f32.mrb[2].mxu0 }
 0x122   : > { %v950_v42 = vmax.f32 %v918_v36, 0.0  ;;  %v883_v43 = vmul.f32 %v6262_v40, %v8332_v27  ;;  %v726_v44 = vpop.f32.mrb[3].mxu0  ;;  %v1182_v36 = vld [vmem:[#allocation2 + $0x41] sm:$0xff] }
 0x123   : > { %v949_v45 = vmax.f32 %v917_v39, 0.0  ;;  %v882_v46 = vmul.f32 %v8332_v27, %v726_v44 }
 0x124   : > { %1085 = vst.msk [vmem:[#allocation2 + $0x68] sm:$0xff] %vm981_vm0, %v950_v42  ;;  %v920_v47 = vadd.f32 %v8345_v32, %v883_v43 }
 0x125   : > { %1084 = vst.msk [vmem:[#allocation2 + $0x60] sm:$0xff] %vm981_vm0, %v949_v45  ;;  %v919_v48 = vadd.f32 %v8345_v32, %v882_v46  ;;  %v6265_v49 = vpop.f32.mrb[4].mxu0 }
 0x126   : > { %v952_v50 = vmax.f32 %v920_v47, 0.0  ;;  %v885_v51 = vmul.f32 %v6265_v49, %v8332_v27  ;;  %v736_v52 = vpop.f32.mrb[5].mxu0 }
 0x127   : > { %v951_v55 = vmax.f32 %v919_v48, 0.0  ;;  %v884_v56 = vmul.f32 %v8332_v27, %v736_v52 }
 0x128   : > { %1087 = vst.msk [vmem:[#allocation2 + $0x90] sm:$0xff] %vm981_vm0, %v952_v50  ;;  %v922_v58 = vadd.f32 %v8345_v32, %v885_v51 }
 0x129   : > { %1086 = vst.msk [vmem:[#allocation2 + $0x88] sm:$0xff] %vm981_vm0, %v951_v55  ;;  %v921_v60 = vadd.f32 %v8345_v32, %v884_v56  ;;  %v6268_v61 = vpop.f32.mrb[6].mxu0 }
 0x12a   : > { %v954_v63 = vmax.f32 %v922_v58, 0.0  ;;  %v887_v0 = vmul.f32 %v6268_v61, %v8332_v27  ;;  %v746_v1 = vpop.f32.mrb[7].mxu0 }
 0x12b   : > { %v953_v5 = vmax.f32 %v921_v60, 0.0  ;;  %v886_v6 = vmul.f32 %v8332_v27, %v746_v1  ;;  %v8391_v7 = vld [vmem:[#allocation2 + $0x69] sm:$0xff] }
 0x12c   : > { %1089 = vst.msk [vmem:[#allocation2 + $0xb8] sm:$0xff] %vm981_vm0, %v954_v63  ;;  %v924_v9 = vadd.f32 %v8345_v32, %v887_v0  ;;  %v6710_v10 = vpack.i.bf16 %v1150_v62, %v8391_v7  ;;  %v8396_v11 = vld [vmem:[#allocation2 + $0x61] sm:$0xff] }
 0x12d   : > { %1088 = vst.msk [vmem:[#allocation2 + $0xb0] sm:$0xff] %vm981_vm0, %v953_v5  ;;  %v923_v12 = vadd.f32 %v8345_v32, %v886_v6  ;;  %v6271_v13 = vpop.f32.mrb[8].mxu0  ;;  %v6715_v14 = vpack.i.bf16 %v8380_v2, %v8396_v11  ;;  %v1214_v23 = vld [vmem:[#allocation2 + $0x67] sm:$0xff]  ;;  %v1213_v54 = vld [vmem:[#allocation2 + $0x5f] sm:$0xff] }
 0x12e   : > { %v956_v15 = vmax.f32 %v924_v9, 0.0  ;;  %v889_v16 = vmul.f32 %v6271_v13, %v8332_v27  ;;  %6711 = vrot.lane.b32.xlu1 %v6710_v10, %s7839_s24  ;;  %v756_v17 = vpop.f32.mrb[9].mxu0  ;;  %v8429_v41 = vld [vmem:[#allocation2 + $0x68] sm:$0xff]  ;;  %v8449_v58 = vld [vmem:[#allocation2 + $0x60] sm:$0xff] }
 0x12f   : > { %v955_v21 = vmax.f32 %v923_v12, 0.0  ;;  %v888_v22 = vmul.f32 %v8332_v27, %v756_v17  ;;  %6716 = vrot.lane.b32.xlu0 %v6715_v14, %s7839_s24  ;;  %v8413_v24 = vld [vmem:[#allocation2 + $0x90] sm:$0xff] }
 0x130   : > { %1091 = vst.msk [vmem:[#allocation2 + $0xe0] sm:$0xff] %vm981_vm0, %v956_v15  ;;  %v926_v26 = vadd.f32 %v8345_v32, %v889_v16  ;;  %v6720_v28 = vpack.i.bf16 %v1214_v23, %v8413_v24  ;;  %v8419_v29 = vld [vmem:[#allocation2 + $0x87] sm:$0xff]  ;;  %v8424_v33 = vld [vmem:[#allocation2 + $0x91] sm:$0xff]  ;;  %v8482_v23 = vpack.c.bf16 %v2401_v20, %v2400_v19 }
 0x131   : > { %1090 = vst.msk [vmem:[#allocation2 + $0xd8] sm:$0xff] %vm981_vm0, %v955_v21  ;;  %v925_v30 = vadd.f32 %v8345_v32, %v888_v22  ;;  %v6730_v31 = vpack.i.bf16 %v1181_v18, %v8419_v29  ;;  %v6274_v34 = vpop.f32.mrb[10].mxu0  ;;  %v1311_v37 = vld [vmem:[#allocation2 + $0x8f] sm:$0xff]  ;;  %v6725_v43 = vpack.i.bf16 %v8429_v41, %v8424_v33 }
 0x132   : > { %v958_v35 = vmax.f32 %v926_v26, 0.0  ;;  %6721 = vrot.lane.b32.xlu1 %v6720_v28, %s11813_s29  ;;  %v891_v38 = vmul.f32 %v6274_v34, %v8332_v27  ;;  %v766_v39 = vpop.f32.mrb[11].mxu0  ;;  %v6740_v45 = vpack.i.bf16 %v1182_v36, %v1311_v37  ;;  %v8438_v48 = vld [vmem:[#allocation2 + $0x88] sm:$0xff]  ;;  %6554 = vmatprep.subr.bf16.mxu0 %v8482_v23 }
 0x133   : > { %v957_v40 = vmax.f32 %v925_v30, 0.0  ;;  %6731 = vrot.lane.b32.xlu0 %v6730_v31, %s7841_s1  ;;  %v890_v42 = vmul.f32 %v8332_v27, %v766_v39  ;;  %v8442_v52 = vld [vmem:[#allocation2 + $0x89] sm:$0xff]  ;;  %v6735_v57 = vpack.i.bf16 %v1213_v54, %v8438_v48  ;;  %v8455_v63 = vld [vmem:[#allocation2 + $0xb8] sm:$0xff] }
 0x134   : > { %1093 = vst.msk [vmem:[#allocation2 + $0x108] sm:$0xff] %vm981_vm0, %v958_v35  ;;  %v928_v44 = vadd.f32 %v8345_v32, %v891_v38  ;;  %v6745_v61 = vpack.i.bf16 %v8449_v58, %v8442_v52  ;;  %v8459_v4 = vld [vmem:[#allocation2 + $0xb0] sm:$0xff]  ;;  %v6750_v9 = vpack.i.bf16 %v1311_v37, %v8455_v63  ;;  %v8470_v14 = vld [vmem:[#allocation2 + $0xb9] sm:$0xff] }
 0x135   : > { %1092 = vst.msk [vmem:[#allocation2 + $0x100] sm:$0xff] %vm981_vm0, %v957_v40  ;;  %v927_v46 = vadd.f32 %v8345_v32, %v890_v42  ;;  %v6277_v47 = vpop.f32.mrb[12].mxu0  ;;  %v6765_v13 = vpack.i.bf16 %v8419_v29, %v8459_v4  ;;  %v1313_v18 = vld [vmem:[#allocation2 + $0xb7] sm:$0xff]  ;;  %v6755_v26 = vpack.i.bf16 %v8413_v24, %v8470_v14  ;;  %v1312_v31 = vld [vmem:[#allocation2 + $0xaf] sm:$0xff] }
 0x136   : > { %6726 = vrot.lane.b32.xlu1 %v6725_v43, %s7839_s24  ;;  %v960_v49 = vmax.f32 %v928_v44, 0.0  ;;  %v893_v50 = vmul.f32 %v6277_v47, %v8332_v27  ;;  %v776_v51 = vpop.f32.mrb[13].mxu0  ;;  %v6770_v30 = vpack.i.bf16 %v8391_v7, %v1313_v18  ;;  %v8494_v37 = vld [vmem:[#allocation2 + $0xb1] sm:$0xff]  ;;  %v6760_v39 = vpack.i.bf16 %v8396_v11, %v1312_v31 }
 0x137   : > { %6741 = vrot.lane.b32.xlu0 %v6740_v45, %s7841_s1  ;;  %v959_v53 = vmax.f32 %v927_v46, 0.0  ;;  %v892_v55 = vmul.f32 %v8332_v27, %v776_v51  ;;  %v6775_v43 = vpack.i.bf16 %v8438_v48, %v8494_v37  ;;  %v8505_v44 = vld [vmem:[#allocation2 + $0xe0] sm:$0xff] }
 0x138   : > { %1095 = vst.msk [vmem:[#allocation2 + $0x130] sm:$0xff] %vm981_vm0, %v960_v49  ;;  %v930_v56 = vadd.f32 %v8345_v32, %v893_v50  ;;  %v8509_v49 = vld [vmem:[#allocation2 + $0xd8] sm:$0xff]  ;;  %v6780_v48 = vpack.i.bf16 %v1313_v18, %v8505_v44 }
 0x139   : > { %1094 = vst.msk [vmem:[#allocation2 + $0x128] sm:$0xff] %vm981_vm0, %v959_v53  ;;  %v929_v60 = vadd.f32 %v8345_v32, %v892_v55  ;;  %v6280_v62 = vpop.f32.mrb[14].mxu0  ;;  %v6795_v55 = vpack.i.bf16 %v1312_v31, %v8509_v49 }
 0x13a   : > { %v962_v0 = vmax.f32 %v930_v56, 0.0  ;;  %6736 = vrot.lane.b32.xlu1 %v6735_v57, %s11813_s29  ;;  %v895_v1 = vmul.f32 %v6280_v62, %v8332_v27  ;;  %v786_v3 = vpop.f32.mrb[15].mxu0  ;;  %v8519_v56 = vld [vmem:[#allocation2 + $0xe1] sm:$0xff] }
 0x13b   : > { %v961_v5 = vmax.f32 %v929_v60, 0.0  ;;  %6746 = vrot.lane.b32.xlu0 %v6745_v61, %s7839_s24  ;;  %v894_v6 = vmul.f32 %v8332_v27, %v786_v3  ;;  %v1315_v62 = vld [vmem:[#allocation2 + $0xdf] sm:$0xff] }
 0x13c   : > { %1097 = vst.msk [vmem:[#allocation2 + $0x158] sm:$0xff] %vm981_vm0, %v962_v0  ;;  %v932_v8 = vadd.f32 %v8345_v32, %v895_v1 }
 0x13d   : > { %1096 = vst.msk [vmem:[#allocation2 + $0x150] sm:$0xff] %vm981_vm0, %v961_v5  ;;  %v931_v10 = vadd.f32 %v8345_v32, %v894_v6  ;;  %v6283_v12 = vpop.f32.mrb[16].mxu0  ;;  %v6785_v5 = vpack.i.bf16 %v8455_v63, %v8519_v56 }
 0x13e   : > { %v964_v15 = vmax.f32 %v932_v8, 0.0  ;;  %v897_v16 = vmul.f32 %v6283_v12, %v8332_v27  ;;  %6751 = vrot.lane.b32.xlu1 %v6750_v9, %s11813_s29  ;;  %v796_v17 = vpop.f32.mrb[17].mxu0  ;;  %v6800_v9 = vpack.i.bf16 %v8424_v33, %v1315_v62 }
 0x13f   : > { %v963_v21 = vmax.f32 %v931_v10, 0.0  ;;  %v896_v22 = vmul.f32 %v8332_v27, %v796_v17  ;;  %6766 = vrot.lane.b32.xlu0 %v6765_v13, %s11813_s29  ;;  %v1314_v10 = vld [vmem:[#allocation2 + $0xd7] sm:$0xff] }
 0x140   : > { %1099 = vst.msk [vmem:[#allocation2 + $0x180] sm:$0xff] %vm981_vm0, %v964_v15  ;;  %v934_v25 = vadd.f32 %v8345_v32, %v897_v16  ;;  %v8534_v16 = vld [vmem:[#allocation2 + $0xd9] sm:$0xff]  ;;  %v6790_v33 = vpack.i.bf16 %v8442_v52, %v1314_v10 }
 0x141   : > { %1098 = vst.msk [vmem:[#allocation2 + $0x178] sm:$0xff] %vm981_vm0, %v963_v21  ;;  %v933_v28 = vadd.f32 %v8345_v32, %v896_v22  ;;  %v6286_v29 = vpop.f32.mrb[18].mxu0  ;;  %v6805_v21 = vpack.i.bf16 %v8459_v4, %v8534_v16  ;;  %v8545_v22 = vld [vmem:[#allocation2 + $0x108] sm:$0xff] }
 0x142   : > { %v966_v34 = vmax.f32 %v934_v25, 0.0  ;;  %v899_v35 = vmul.f32 %v6286_v29, %v8332_v27  ;;  %6756 = vrot.lane.b32.xlu1 %v6755_v26, %s7839_s24  ;;  %v806_v36 = vpop.f32.mrb[19].mxu0  ;;  %v8549_v29 = vld [vmem:[#allocation2 + $0x100] sm:$0xff] }
 0x143   : > { %v965_v38 = vmax.f32 %v933_v28, 0.0  ;;  %v898_v24 = vmul.f32 %v8332_v27, %v806_v36  ;;  %6771 = vrot.lane.b32.xlu0 %v6770_v30, %s7841_s1 }
 0x144   : > { %1101 = vst.msk [vmem:[#allocation2 + $0x1a8] sm:$0xff] %vm981_vm0, %v966_v34  ;;  %v936_v7 = vadd.f32 %v8345_v32, %v899_v35  ;;  %v6810_v34 = vpack.i.bf16 %v1315_v62, %v8545_v22 }
 0x145   : > { %1100 = vst.msk [vmem:[#allocation2 + $0x1a0] sm:$0xff] %vm981_vm0, %v965_v38  ;;  %v935_v40 = vadd.f32 %v8345_v32, %v898_v24  ;;  %v6289_v42 = vpop.f32.mrb[20].mxu0  ;;  %v6825_v38 = vpack.i.bf16 %v1314_v10, %v8549_v29  ;;  %v8559_v24 = vld [vmem:[#allocation2 + $0x109] sm:$0xff] }
 0x146   : > { %v968_v45 = vmax.f32 %v936_v7, 0.0  ;;  %v901_v46 = vmul.f32 %v6289_v42, %v8332_v27  ;;  %6761 = vrot.lane.b32.xlu1 %v6760_v39, %s7841_s1  ;;  %v816_v47 = vpop.f32.mrb[21].mxu0  ;;  %v1317_v42 = vld [vmem:[#allocation2 + $0x107] sm:$0xff] }
 0x147   : > { %v967_v50 = vmax.f32 %v935_v40, 0.0  ;;  %v900_v11 = vmul.f32 %v8332_v27, %v816_v47  ;;  %6776 = vrot.lane.b32.xlu0 %v6775_v43, %s7839_s24  ;;  %v6815_v47 = vpack.i.bf16 %v8505_v44, %v8559_v24 }
 0x148   : > { %1103 = vst.msk [vmem:[#allocation2 + $0x1d0] sm:$0xff] %vm981_vm0, %v968_v45  ;;  %v938_v51 = vadd.f32 %v8345_v32, %v901_v46 }
 0x149   : > { %1102 = vst.msk [vmem:[#allocation2 + $0x1c8] sm:$0xff] %vm981_vm0, %v967_v50  ;;  %v937_v53 = vadd.f32 %v8345_v32, %v900_v11  ;;  %v6292_v54 = vpop.f32.mrb[22].mxu0  ;;  %v6830_v11 = vpack.i.bf16 %v8470_v14, %v1317_v42 }
 0x14a   : > { %v970_v57 = vmax.f32 %v938_v51, 0.0  ;;  %v903_v60 = vmul.f32 %v6292_v54, %v8332_v27  ;;  %6781 = vrot.lane.b32.xlu1 %v6780_v48, %s11813_s29  ;;  %v826_v61 = vpop.f32.mrb[23].mxu0  ;;  %v1316_v48 = vld [vmem:[#allocation2 + $0xff] sm:$0xff] }
 0x14b   : > { %v969_v0 = vmax.f32 %v937_v53, 0.0  ;;  %v902_v1 = vmul.f32 %v8332_v27, %v826_v61  ;;  %6796 = vrot.lane.b32.xlu0 %v6795_v55, %s11813_s29  ;;  %v6820_v14 = vpack.i.bf16 %v8494_v37, %v1316_v48 }
 0x14c   : > { %1105 = vst.msk [vmem:[#allocation2 + $0x1f8] sm:$0xff] %vm981_vm0, %v970_v57  ;;  %v940_v3 = vadd.f32 %v8345_v32, %v903_v60  ;;  %v8574_v57 = vld [vmem:[#allocation2 + $0x101] sm:$0xff] }
 0x14d   : > { %1104 = vst.msk [vmem:[#allocation2 + $0x1f0] sm:$0xff] %vm981_vm0, %v969_v0  ;;  %v939_v6 = vadd.f32 %v8345_v32, %v902_v1  ;;  %v6295_v8 = vpop.f32.mrb[24].mxu0  ;;  %v6835_v0 = vpack.i.bf16 %v8509_v49, %v8574_v57  ;;  %v1351_v1 = vld [vmem:[#allocation2 + $0x130] sm:$0xff] }
 0x14e   : > { %v972_v12 = vmax.f32 %v940_v3, 0.0  ;;  %v905_v13 = vmul.f32 %v6295_v8, %v8332_v27  ;;  %6786 = vrot.lane.b32.xlu1 %v6785_v5, %s7839_s24  ;;  %v836_v15 = vpop.f32.mrb[25].mxu0  ;;  %v1350_v5 = vld [vmem:[#allocation2 + $0x128] sm:$0xff]  ;;  %v1288_v8 = vld [vmem:[#allocation2 + $0x131] sm:$0xff] }
 0x14f   : > { %v971_v17 = vmax.f32 %v939_v6, 0.0  ;;  %v904_v18 = vmul.f32 %v8332_v27, %v836_v15  ;;  %6801 = vrot.lane.b32.xlu0 %v6800_v9, %s7841_s1  ;;  %v6855_v37 = vpack.i.bf16 %v1316_v48, %v1350_v5  ;;  %v6845_v9 = vpack.i.bf16 %v8545_v22, %v1288_v8  ;;  %v1320_v22 = vld [vmem:[#allocation2 + $0x14f] sm:$0xff] }
 0x150   : > { %1107 = vst.msk [vmem:[#allocation2 + $0x220] sm:$0xff] %vm981_vm0, %v972_v12  ;;  %v942_v63 = vadd.f32 %v8345_v32, %v905_v13  ;;  %v1318_v12 = vld [vmem:[#allocation2 + $0x127] sm:$0xff] }
 0x151   : > { %1106 = vst.msk [vmem:[#allocation2 + $0x218] sm:$0xff] %vm981_vm0, %v971_v17  ;;  %v941_v19 = vadd.f32 %v8345_v32, %v904_v18  ;;  %v6298_v20 = vpop.f32.mrb[26].mxu0  ;;  %v8594_v13 = vld [vmem:[#allocation2 + $0x129] sm:$0xff]  ;;  %v6850_v15 = vpack.i.bf16 %v8534_v16, %v1318_v12  ;;  %v8600_v18 = vld [vmem:[#allocation2 + $0x158] sm:$0xff] }
 0x152   : > { %v974_v25 = vmax.f32 %v942_v63, 0.0  ;;  %v907_v26 = vmul.f32 %v6298_v20, %v8332_v27  ;;  %6791 = vrot.lane.b32.xlu1 %v6790_v33, %s7841_s1  ;;  %v846_v28 = vpop.f32.mrb[27].mxu0  ;;  %v6865_v17 = vpack.i.bf16 %v8549_v29, %v8594_v13  ;;  %v8603_v63 = vld [vmem:[#allocation2 + $0x150] sm:$0xff] }
 0x153   : > { %v973_v30 = vmax.f32 %v941_v19, 0.0  ;;  %v906_v52 = vmul.f32 %v8332_v27, %v846_v28  ;;  %6806 = vrot.lane.b32.xlu0 %v6805_v21, %s7839_s24  ;;  %v6885_v33 = vpack.i.bf16 %v1318_v12, %v8603_v63  ;;  %v8608_v19 = vld [vmem:[#allocation2 + $0x159] sm:$0xff]  ;;  %v3088_v28 = vld [vmem:[#allocation2 + $0x10] sm:$0xff] }
 0x154   : > { %1109 = vst.msk [vmem:[#allocation2 + $0x248] sm:$0xff] %vm981_vm0, %v974_v25  ;;  %v944_v31 = vadd.f32 %v8345_v32, %v907_v26  ;;  %v1321_v16 = vld [vmem:[#allocation2 + $0x157] sm:$0xff]  ;;  %v6875_v20 = vpack.i.bf16 %v1351_v1, %v8608_v19  ;;  %v6880_v26 = vpack.i.bf16 %v8574_v57, %v1320_v22  ;;  %v8647_v48 = vld [vmem:[#allocation2 + $0x1a9] sm:$0xff] }
 0x155   : > { %1108 = vst.msk [vmem:[#allocation2 + $0x240] sm:$0xff] %vm981_vm0, %v973_v30  ;;  %v943_v35 = vadd.f32 %v8345_v32, %v906_v52  ;;  %v6301_v36 = vpop.f32.mrb[28].mxu0  ;;  %v6890_v21 = vpack.i.bf16 %v8559_v24, %v1321_v16  ;;  %v8615_v25 = vld [vmem:[#allocation2 + $0x151] sm:$0xff]  ;;  %v8620_v30 = vld [vmem:[#allocation2 + $0x180] sm:$0xff] }
 0x156   : > { %v976_v7 = vmax.f32 %v944_v31, 0.0  ;;  %v909_v39 = vmul.f32 %v6301_v36, %v8332_v27  ;;  %6811 = vrot.lane.b32.xlu1 %v6810_v34, %s11813_s29  ;;  %v856_v40 = vpop.f32.mrb[29].mxu0  ;;  %v6895_v29 = vpack.i.bf16 %v1350_v5, %v8615_v25  ;;  %v6910_v52 = vpack.i.bf16 %v8620_v30, %v3088_v28  ;;  %v8626_v34 = vld [vmem:[#allocation2 + $0x181] sm:$0xff]  ;;  %v8678_v12 = vld [vmem:[#allocation2 + $0x1d0] sm:$0xff] }
 0x157   : > { %v975_v43 = vmax.f32 %v943_v35, 0.0  ;;  %v908_v45 = vmul.f32 %v8332_v27, %v856_v40  ;;  %6826 = vrot.lane.b32.xlu0 %v6825_v38, %s11813_s29  ;;  %v6900_v31 = vpack.i.bf16 %v1321_v16, %v8620_v30  ;;  %v3120_v35 = vld [vmem:[#allocation2 + $0x12] sm:$0xff]  ;;  %v6905_v36 = vpack.i.bf16 %v8600_v18, %v8626_v34  ;;  %v3199_v24 = vld [vmem:[#allocation2 + $0x182] sm:$0xff] }
 0x158   : > { %1111 = vst.msk [vmem:[#allocation2 + $0x270] sm:$0xff] %vm981_vm0, %v976_v7  ;;  %v946_v46 = vadd.f32 %v8345_v32, %v909_v39  ;;  %v6915_v38 = vpack.i.bf16 %v8626_v34, %v3120_v35  ;;  %v8634_v7 = vld [vmem:[#allocation2 + $0x178] sm:$0xff]  ;;  %v6920_v39 = vpack.i.bf16 %v1351_v1, %v3199_v24 }
 0x159   : > { %1110 = vst.msk [vmem:[#allocation2 + $0x268] sm:$0xff] %vm981_vm0, %v975_v43  ;;  %v945_v50 = vadd.f32 %v8345_v32, %v908_v45  ;;  %v6304_v51 = vpop.f32.mrb[30].mxu0  ;;  %v6930_v40 = vpack.i.bf16 %v1320_v22, %v8634_v7  ;;  %v1323_v43 = vld [vmem:[#allocation2 + $0x17f] sm:$0xff]  ;;  %v1117_v24 = vld [vmem:[#allocation2 + $0x37] sm:$0xff] }
 0x15a   : > { %v978_v53 = vmax.f32 %v946_v46, 0.0  ;;  %6816 = vrot.lane.b32.xlu1 %v6815_v47, %s7839_s24  ;;  %v911_v54 = vmul.f32 %v6304_v51, %v8332_v27  ;;  %v866_v55 = vpop.f32.mrb[31].mxu0  ;;  %v6935_v46 = vpack.i.bf16 %v1288_v8, %v1323_v43  ;;  %v1357_v47 = vld [vmem:[#allocation2 + $0x1a8] sm:$0xff]  ;;  %v8662_v5 = vld [vmem:[#allocation2 + $0x19f] sm:$0xff] }
 0x15b   : > { %v977_v60 = vmax.f32 %v945_v50, 0.0  ;;  %6831 = vrot.lane.b32.xlu0 %v6830_v11, %s7841_s1  ;;  %v910_v44 = vmul.f32 %v8332_v27, %v866_v55  ;;  %v6840_v27 = vpack.i.bf16 %v1317_v42, %v1351_v1  ;;  %v1322_v42 = vld [vmem:[#allocation2 + $0x177] sm:$0xff]  ;;  %v6945_v11 = vpack.i.bf16 %v1323_v43, %v1357_v47  ;;  %v8669_v8 = vld [vmem:[#allocation2 + $0x1a6] sm:$0xff] }
 0x15c   : > { %1113 = vst.msk [vmem:[#allocation2 + $0x298] sm:$0xff] %vm981_vm0, %v978_v53  ;;  %v948_v61 = vadd.f32 %v8345_v32, %v911_v54  ;;  %v6925_v45 = vpack.i.bf16 %v8594_v13, %v1322_v42  ;;  %v8642_v50 = vld [vmem:[#allocation2 + $0x179] sm:$0xff]  ;;  %v8651_v53 = vld [vmem:[#allocation2 + $0x62] sm:$0xff]  ;;  %v6955_v55 = vpack.i.bf16 %v1357_v47, %v8380_v2  ;;  %v6975_v2 = vpack.i.bf16 %v8615_v25, %v8662_v5 }
 0x15d   : > { %1112 = vst.msk [vmem:[#allocation2 + $0x290] sm:$0xff] %vm981_vm0, %v977_v60  ;;  %v947_v62 = vadd.f32 %v8345_v32, %v910_v44  ;;  %v1319_v32 = vld [vmem:[#allocation2 + $0x12f] sm:$0xff]  ;;  %v6940_v51 = vpack.i.bf16 %v8603_v63, %v8642_v50  ;;  %v6950_v54 = vpack.i.bf16 %v8647_v48, %v8651_v53  ;;  %v1372_v60 = vld [vmem:[#allocation2 + $0x2e0] sm:$0xff]  ;;  %v3089_v16 = vld [vmem:[#allocation2 + $0x18] sm:$0xff] }
 0x15e   : > { %v980_v3 = vmax.f32 %v948_v61, 0.0  ;;  %6821 = vrot.lane.b32.xlu1 %v6820_v14, %s7841_s1  ;;  %v6860_v10 = vpack.i.bf16 %v8519_v56, %v1319_v32  ;;  %v6870_v56 = vpack.i.bf16 %v1319_v32, %v8600_v18  ;;  %v3122_v44 = vld [vmem:[#allocation2 + $0x3a] sm:$0xff]  ;;  %v6965_v61 = vpack.i.bf16 %v1372_v60, %v1357_v47  ;;  %v3200_v43 = vld [vmem:[#allocation2 + $0x1a2] sm:$0xff] }
 0x15f   : > { %v979_v6 = vmax.f32 %v947_v62, 0.0  ;;  %6836 = vrot.lane.b32.xlu0 %v6835_v0, %s7839_s24  ;;  %v6960_v14 = vpack.i.bf16 %v8647_v48, %v3122_v44  ;;  %v3201_v62 = vld [vmem:[#allocation2 + $0x1aa] sm:$0xff]  ;;  %v1356_v0 = vld [vmem:[#allocation2 + $0x1a0] sm:$0xff]  ;;  %v7015_v60 = vpack.i.bf16 %v8603_v63, %v3200_v43  ;;  %v2403_v63 = vld [vmem:[%s11921_s3 + $0x118] sm:$0xff] }
 0x160   : > { %1115 = vst.msk [vmem:[#allocation2 + $0x2c0] sm:$0xff] %vm981_vm0, %v980_v3  ;;  %v6970_v1 = vpack.i.bf16 %v8600_v18, %v3201_v62  ;;  %v6980_v3 = vpack.i.bf16 %v1322_v42, %v1356_v0  ;;  %v8672_v32 = vld [vmem:[#allocation2 + $0x1a1] sm:$0xff]  ;;  %v7000_v28 = vpack.i.bf16 %v1356_v0, %v3089_v16 }
 0x161   : > { %1114 = vst.msk [vmem:[#allocation2 + $0x2b8] sm:$0xff] %vm981_vm0, %v979_v6  ;;  %v1325_v6 = vld [vmem:[#allocation2 + $0x1a7] sm:$0xff]  ;;  %v3152_v18 = vld [vmem:[#allocation2 + $0x5e] sm:$0xff] }
 0x162   : > { %6841 = vrot.lane.b32.xlu1 %v6840_v27, %s11813_s29  ;;  %v6985_v27 = vpack.i.bf16 %v8608_v19, %v1325_v6  ;;  %v8686_v19 = vld [vmem:[#allocation2 + $0x1d1] sm:$0xff] }
 0x163   : > { %6856 = vrot.lane.b32.xlu0 %v6855_v37, %s11813_s29  ;;  %v1340_v37 = vld [vmem:[#allocation2 + $0x2df] sm:$0xff] }
 0x166   : > { %6846 = vrot.lane.b32.xlu1 %v6845_v9, %s7839_s24  ;;  %v7010_v9 = vpack.i.bf16 %v1340_v37, %v8669_v8 }
 0x167   : > { %6861 = vrot.lane.b32.xlu0 %v6860_v10, %s7841_s1  ;;  %v6990_v10 = vpack.i.bf16 %v8634_v7, %v8672_v32 }
 0x16a   : > { %6851 = vrot.lane.b32.xlu1 %v6850_v15, %s7841_s1 }
 0x16b   : > { %6866 = vrot.lane.b32.xlu0 %v6865_v17, %s7839_s24  ;;  %v7020_v17 = vpack.i.bf16 %v8678_v12, %v8459_v4  ;;  %v3167_v4 = vld [vmem:[#allocation2 + $0x17e] sm:$0xff] }
 0x16e   : > { %6871 = vrot.lane.b32.xlu1 %v6870_v56, %s11813_s29 }
 0x16f   : > { %6886 = vrot.lane.b32.xlu0 %v6885_v33, %s11813_s29  ;;  %v6995_v33 = vpack.i.bf16 %v1325_v6, %v3152_v18 }
 0x172   : > { %6876 = vrot.lane.b32.xlu1 %v6875_v20, %s7839_s24  ;;  %v8690_v20 = vld [vmem:[#allocation2 + $0x8a] sm:$0xff] }
 0x173   : > { %6891 = vrot.lane.b32.xlu0 %v6890_v21, %s7841_s1  ;;  %v7025_v22 = vpack.i.bf16 %v8686_v19, %v8690_v20 }
 0x176   : > { %6881 = vrot.lane.b32.xlu1 %v6880_v26, %s7841_s1 }
 0x177   : > { %6896 = vrot.lane.b32.xlu0 %v6895_v29, %s7839_s24  ;;  %v3121_v29 = vld [vmem:[#allocation2 + $0x1a] sm:$0xff] }
 0x178   : > { %v7005_v42 = vpack.i.bf16 %v8672_v32, %v3121_v29  ;;  %v8745_v29 = vld [vmem:[#allocation2 + $0xae] sm:$0xff] }
 0x17a   : > { %6901 = vrot.lane.b32.xlu1 %v6900_v31, %s11813_s29 }
 0x17b   : > { %6911 = vrot.lane.b32.xlu0 %v6910_v52, %s7839_s24 }
 0x17e   : > { %6906 = vrot.lane.b32.xlu1 %v6905_v36, %s7839_s24  ;;  %v7040_v36 = vpack.i.bf16 %v3167_v4, %v8678_v12 }
 0x17f   : > { %6916 = vrot.lane.b32.xlu0 %v6915_v38, %s7841_s1  ;;  %v3203_v38 = vld [vmem:[#allocation2 + $0x1d2] sm:$0xff] }
 0x182   : > { %6921 = vrot.lane.b32.xlu1 %v6920_v39, %s7839_s24 }
 0x183   : > { %6931 = vrot.lane.b32.xlu0 %v6930_v40, %s11813_s29 }
 0x186   : > { %6926 = vrot.lane.b32.xlu1 %v6925_v45, %s7841_s1 }
 0x187   : > { %6936 = vrot.lane.b32.xlu0 %v6935_v46, %s7841_s1 }
 0x18a   : > { %6946 = vrot.lane.b32.xlu1 %v6945_v11, %s11813_s29  ;;  %v7045_v11 = vpack.i.bf16 %v8620_v30, %v3203_v38  ;;  %v1118_v30 = vld [vmem:[#allocation2 + $0x3f] sm:$0xff]  ;;  %v7035_v38 = vpack.i.bf16 %v8686_v19, %v8651_v53 }
 0x18b   : > { %6941 = vrot.lane.b32.xlu0 %v6940_v51, %s7839_s24 }
 0x18e   : > { %6951 = vrot.lane.b32.xlu1 %v6950_v54, %s7839_s24 }
 0x18f   : > { %6956 = vrot.lane.b32.xlu0 %v6955_v55, %s7839_s24 }
 0x192   : > { %6966 = vrot.lane.b32.xlu1 %v6965_v61, %s11813_s29 }
 0x193   : > { %6961 = vrot.lane.b32.xlu0 %v6960_v14, %s7841_s1 }
 0x196   : > { %6971 = vrot.lane.b32.xlu1 %v6970_v1, %s7839_s24 }
 0x197   : > { %6981 = vrot.lane.b32.xlu0 %v6980_v3, %s11813_s29  ;;  %v2402_v3 = vld [vmem:[%s11921_s3 + $0x110] sm:$0xff] }
 0x19a   : > { %6976 = vrot.lane.b32.xlu1 %v6975_v2, %s7841_s1 }
 0x19b   : > { %6986 = vrot.lane.b32.xlu0 %v6985_v27, %s7841_s1 }
 0x19e   : > { %7011 = vrot.lane.b32.xlu1 %v7010_v9, %s7841_s1 }
 0x19f   : > { %6991 = vrot.lane.b32.xlu0 %v6990_v10, %s7839_s24  ;;  %v8729_v10 = vld [vmem:[#allocation2 + $0x1c7] sm:$0xff] }
 0x1a0   : > { %v8682_v15 = vpop.permute.xlu1 %6711 }
 0x1a1   : > { %v6717_v56 = vpop.permute.xlu0 %6716  ;;  %v6713_v52 = vunpack.i.l.bf16 %v8682_v15  ;;  %v6714_v51 = vunpack.i.h.bf16 %v8682_v15 }
 0x1a2   : > { %7021 = vrot.lane.b32.xlu1 %v7020_v17, %s11813_s29  ;;  %v6719_v31 = vunpack.i.h.bf16 %v6717_v56  ;;  %v6718_v39 = vunpack.i.l.bf16 %v6717_v56  ;;  %v7050_v17 = vpack.i.bf16 %v8642_v50, %v8729_v10  ;;  %v6557_v56 = vpack.c.bf16 %v2403_v63, %v2402_v3 }
 0x1a3   : > { %6996 = vrot.lane.b32.xlu0 %v6995_v33, %s11813_s29  ;;  %v2273_v44 = vsel %vm981_vm0, %v8429_v41, %v6713_v52  ;;  %v2175_v18 = vsel %vm981_vm0, %v1118_v30, %v6714_v51 }
 0x1a4   : > { %v8692_v21 = vpop.permute.xlu1 %6721  ;;  %v2174_v54 = vsel %vm981_vm0, %v1117_v24, %v6719_v31  ;;  %v2272_v1 = vsel %vm981_vm0, %v8449_v58, %v6718_v39  ;;  %v8757_v24 = vld [vmem:[#allocation2 + $0x1c9] sm:$0xff] }
 0x1a5   : > { %v6732_v26 = vpop.permute.xlu0 %6731  ;;  %v6723_v27 = vunpack.i.l.bf16 %v8692_v21  ;;  %v6724_v4 = vunpack.i.h.bf16 %v8692_v21 }
 0x1a6   : > { %7026 = vrot.lane.b32.xlu1 %v7025_v22, %s7839_s24  ;;  %v6734_v45 = vunpack.i.h.bf16 %v6732_v26  ;;  %v6733_v46 = vunpack.i.l.bf16 %v6732_v26  ;;  %v7030_v22 = vpack.i.bf16 %v8678_v12, %v8449_v58 }
 0x1a7   : > { %7001 = vrot.lane.b32.xlu0 %v7000_v28, %s7839_s24  ;;  %v8740_v28 = vld [vmem:[#allocation2 + $0x1cf] sm:$0xff] }
 0x1a8   : > { %v8699_v35 = vpop.permute.xlu1 %6726  ;;  %v2304_v41 = vsel %vm2206_vm2, %v2272_v1, %v6733_v46  ;;  %v2207_v2 = vsel %vm2206_vm2, %v2174_v54, %v6734_v45  ;;  %v7060_v58 = vpack.i.bf16 %v8740_v28, %v8745_v29 }
 0x1a9   : > { %v6742_v40 = vpop.permute.xlu0 %6741  ;;  %v6728_v12 = vunpack.i.l.bf16 %v8699_v35  ;;  %v6729_v43 = vunpack.i.h.bf16 %v8699_v35 }
 0x1aa   : > { %v6743_v47 = vunpack.i.l.bf16 %v6742_v40  ;;  %7041 = vrot.lane.b32.xlu1 %v7040_v36, %s11813_s29  ;;  %v6744_v61 = vunpack.i.h.bf16 %v6742_v40 }
 0x1ab   : > { %7006 = vrot.lane.b32.xlu0 %v7005_v42, %s7841_s1  ;;  %v8764_v42 = vld [vmem:[#allocation2 + $0x6a] sm:$0xff] }
 0x1ac   : > { %v6737_v55 = vpop.permute.xlu1 %6736  ;;  %v2305_v6 = vsel %vm2206_vm2, %v2273_v44, %v6743_v47  ;;  %v2208_v26 = vsel %vm2206_vm2, %v2175_v18, %v6744_v61  ;;  %v7065_v53 = vpack.i.bf16 %v8757_v24, %v8764_v42  ;;  %v8771_v47 = vld [vmem:[#allocation2 + $0x88] sm:$0xff] }
 0x1ad   : > { %v6739_v14 = vunpack.i.h.bf16 %v6737_v55  ;;  %v6738_v62 = vunpack.i.l.bf16 %v6737_v55  ;;  %v8711_v0 = vpop.permute.xlu0 %6746  ;;  %v2337_v16 = vsel %vm2239_vm3, %v2305_v6, %v6723_v27  ;;  %v2241_v31 = vsel %vm2239_vm3, %v2208_v26, %v6724_v4  ;;  %v1341_v44 = vld [vmem:[#allocation2 + $0x2e7] sm:$0xff] }
 0x1ae   : > { %7046 = vrot.lane.b32.xlu1 %v7045_v11, %s7839_s24  ;;  %v6748_v21 = vunpack.i.l.bf16 %v8711_v0  ;;  %v6749_v39 = vunpack.i.h.bf16 %v8711_v0  ;;  %v8773_v11 = vld [vmem:[#allocation2 + $0x90] sm:$0xff]  ;;  %v8780_v61 = vld [vmem:[#allocation2 + $0x1c6] sm:$0xff] }
 0x1af   : > { %7016 = vrot.lane.b32.xlu0 %v7015_v60, %s7839_s24  ;;  %v2336_v37 = vsel %vm2239_vm3, %v2304_v41, %v6738_v62  ;;  %v2240_v9 = vsel %vm2239_vm3, %v2207_v2, %v6739_v14  ;;  %v1119_v60 = vld [vmem:[#allocation2 + $0x5f] sm:$0xff] }
 0x1b0   : > { %2564 = vmatprep.mubr.f32.mxu0 %v2336_v37  ;;  %v8731_v15 = vpop.permute.xlu1 %6751  ;;  %v2274_v35 = vsel %vm981_vm0, %v8771_v47, %v6748_v21  ;;  %v2176_v1 = vsel %vm981_vm0, %v1119_v60, %v6749_v39  ;;  %v7090_v37 = vpack.i.bf16 %v1341_v44, %v8780_v61  ;;  %v8831_v44 = vld [vmem:[#allocation2 + $0xb0] sm:$0xff] }
 0x1b1   : > { %2565 = vmatmul.mubr.f32.vlgmr.msra.gmra.mrb[32].mxu0 %v2240_v9  ;;  %v6767_v33 = vpop.permute.xlu0 %6766  ;;  %v6753_v41 = vunpack.i.l.bf16 %v8731_v15  ;;  %v3153_v9 = vld [vmem:[#allocation2 + $0x66] sm:$0xff]  ;;  %v6754_v4 = vunpack.i.h.bf16 %v8731_v15  ;;  %v8814_v15 = vld [vmem:[#allocation2 + $0x1f8] sm:$0xff] }
 0x1b2   : > { %2569 = vmatprep.mubr.f32.mxu0 %v2337_v16  ;;  %7051 = vrot.lane.b32.xlu1 %v7050_v17, %s7841_s1  ;;  %v6769_v14 = vunpack.i.h.bf16 %v6767_v33  ;;  %v6768_v62 = vunpack.i.l.bf16 %v6767_v33  ;;  %v1120_v17 = vld [vmem:[#allocation2 + $0x67] sm:$0xff] }
 0x1b3   : > { %7031 = vrot.lane.b32.xlu0 %v7030_v22, %s7839_s24  ;;  %6556 = vmatpush3.bf16.msra.mxu0 %v8482_v23  ;;  %v8759_v23 = vld [vmem:[#allocation2 + $0x1c8] sm:$0xff]  ;;  %v2177_v33 = vsel %vm981_vm0, %v1120_v17, %v6729_v43  ;;  %v4273_v43 = vld [vmem:[%s11790_s4] sm:$0xff] }
 0x1b4   : > { %v8748_v52 = vpop.permute.xlu1 %6756  ;;  %6558 = vmatprep.subr.bf16.mxu0 %v6557_v56  ;;  %v7055_v46 = vpack.i.bf16 %v8662_v5, %v8759_v23  ;;  %v2275_v5 = vsel %vm981_vm0, %v8773_v11, %v6728_v12  ;;  %v1373_v16 = vld [vmem:[#allocation2 + $0x2e8] sm:$0xff]  ;;  %v3091_v12 = vld [vmem:[#allocation2 + $0x40] sm:$0xff] }
 0x1b5   : > { %2570 = vmatmul.mubr.f32.gmra.mrb[34].mxu0 %v2241_v31  ;;  %v6772_v36 = vpop.permute.xlu0 %6771  ;;  %v6758_v21 = vunpack.i.l.bf16 %v8748_v52  ;;  %v7080_v60 = vpack.i.bf16 %v8759_v23, %v3091_v12 }
 0x1b6   : > { %7061 = vrot.lane.b32.xlu1 %v7060_v58, %s7841_s1  ;;  %v6773_v40 = vunpack.i.l.bf16 %v6772_v36  ;;  %v6774_v0 = vunpack.i.h.bf16 %v6772_v36  ;;  %v7095_v58 = vpack.i.bf16 %v1373_v16, %v8759_v23 }
 0x1b7   : > { %7036 = vrot.lane.b32.xlu0 %v7035_v38, %s7841_s1  ;;  %6560 = vmatpush3.bf16.msra.mxu0 %v6557_v56  ;;  %v7070_v56 = vpack.i.bf16 %v8729_v10, %v3153_v9  ;;  %v3154_v10 = vld [vmem:[#allocation2 + $0x86] sm:$0xff]  ;;  %v4276_v9 = vld [vmem:[%s11790_s4 + $0x18] sm:$0xff] }
 0x1b8   : > { %v6762_v45 = vpop.permute.xlu1 %6761  ;;  %6561 = vmatprep.subr.bf16.mxu0 %v7838_v59  ;;  %v2307_v63 = vsel %vm2206_vm2, %v2275_v5, %v6773_v40  ;;  %v2210_v26 = vsel %vm2206_vm2, %v2177_v33, %v6774_v0  ;;  %v7075_v40 = vpack.i.bf16 %v8740_v28, %v3154_v10  ;;  %v6759_v28 = vunpack.i.h.bf16 %v8748_v52  ;;  %v3123_v33 = vld [vmem:[#allocation2 + $0x42] sm:$0xff]  ;;  %v1122_v10 = vld [vmem:[#allocation2 + $0x8f] sm:$0xff] }
 0x1b9   : > { %v6764_v51 = vunpack.i.h.bf16 %v6762_v45  ;;  %v6763_v54 = vunpack.i.l.bf16 %v6762_v45  ;;  %v8776_v55 = vpop.permute.xlu0 %6776  ;;  %v2339_v22 = vsel %vm2239_vm3, %v2307_v63, %v6753_v41  ;;  %v2243_v39 = vsel %vm2239_vm3, %v2210_v26, %v6754_v4  ;;  %v4274_v45 = vld [vmem:[%s11790_s4 + $0x8] sm:$0xff] }
 0x1ba   : > { %7066 = vrot.lane.b32.xlu1 %v7065_v53, %s7839_s24  ;;  %v6778_v36 = vunpack.i.l.bf16 %v8776_v55  ;;  %v6779_v53 = vunpack.i.h.bf16 %v8776_v55  ;;  %v8833_v55 = vld [vmem:[#allocation2 + $0xb8] sm:$0xff]  ;;  %v6562_v5 = vpack.c.bf16 %v4274_v45, %v4273_v43  ;;  %v7085_v43 = vpack.i.bf16 %v8757_v24, %v3123_v33  ;;  %v8919_v33 = vld [vmem:[#allocation2 + $0xe0] sm:$0xff] }
 0x1bb   : > { %7056 = vrot.lane.b32.xlu0 %v7055_v46, %s11813_s29  ;;  %v2306_v30 = vsel %vm2206_vm2, %v2274_v35, %v6763_v54  ;;  %v2209_v3 = vsel %vm2206_vm2, %v2176_v1, %v6764_v51  ;;  %v1374_v46 = vld [vmem:[#allocation2 + $0x89] sm:$0xff]  ;;  %v7110_v35 = vpack.i.bf16 %v8814_v15, %v8509_v49  ;;  %v1375_v1 = vld [vmem:[#allocation2 + $0x91] sm:$0xff]  ;;  %v2277_v49 = vsel %vm981_vm0, %v8833_v55, %v6758_v21  ;;  %v1377_v21 = vld [vmem:[#allocation2 + $0xb9] sm:$0xff] }
 0x1bc   : > { %v8791_v2 = vpop.permute.xlu1 %6781  ;;  %v2338_v6 = vsel %vm2239_vm3, %v2306_v30, %v6768_v62  ;;  %v2242_v27 = vsel %vm2239_vm3, %v2209_v3, %v6769_v14  ;;  %v1376_v30 = vld [vmem:[#allocation2 + $0xb1] sm:$0xff]  ;;  %v2276_v52 = vsel %vm981_vm0, %v8831_v44, %v6778_v36  ;;  %v1121_v3 = vld [vmem:[#allocation2 + $0x87] sm:$0xff] }
 0x1bd   : > { %2574 = vmatprep.mubr.f32.mxu0 %v2338_v6  ;;  %v8796_v18 = vpop.permute.xlu0 %6796  ;;  %v2178_v6 = vsel %vm981_vm0, %v1121_v3, %v6779_v53  ;;  %v6783_v16 = vunpack.i.l.bf16 %v8791_v2  ;;  %v4277_v53 = vld [vmem:[%s11790_s4 + $0x20] sm:$0xff]  ;;  %v8896_v3 = vld [vmem:[#allocation2 + $0x1ef] sm:$0xff] }
 0x1be   : > { %2575 = vmatmul.mubr.f32.gmra.mrb[36].mxu0 %v2242_v27  ;;  %7091 = vrot.lane.b32.xlu1 %v7090_v37, %s7841_s1  ;;  %v6799_v23 = vunpack.i.h.bf16 %v8796_v18  ;;  %v6798_v63 = vunpack.i.l.bf16 %v8796_v18  ;;  %v8847_v27 = vld [vmem:[#allocation2 + $0x1f9] sm:$0xff]  ;;  %v4275_v37 = vld [vmem:[%s11790_s4 + $0x10] sm:$0xff] }
 0x1bf   : > { %2579 = vmatprep.mubr.f32.mxu0 %v2339_v22  ;;  %7071 = vrot.lane.b32.xlu0 %v7070_v56, %s11813_s29 }
 0x1c0   : > { %v8805_v31 = vpop.permute.xlu1 %6786 }
 0x1c1   : > { %v8810_v38 = vpop.permute.xlu0 %6801 }
 0x1c2   : > { %2580 = vmatmul.mubr.f32.gmra.mrb[38].mxu0 %v2243_v39  ;;  %7096 = vrot.lane.b32.xlu1 %v7095_v58, %s11813_s29  ;;  %v6803_v51 = vunpack.i.l.bf16 %v8810_v38  ;;  %v6804_v41 = vunpack.i.h.bf16 %v8810_v38  ;;  %v8865_v58 = vld [vmem:[#allocation2 + $0xb2] sm:$0xff]  ;;  %v2179_v38 = vsel %vm981_vm0, %v1122_v10, %v6759_v28  ;;  %v6565_v39 = vpack.c.bf16 %v4276_v9, %v4275_v37 }
 0x1c3   : > { %6313 = vmatprep.mubr.msk.f32.mxu0 %vm981_vm0, %v1374_v46  ;;  %7076 = vrot.lane.b32.xlu0 %v7075_v40, %s11813_s29  ;;  %v7115_v36 = vpack.i.bf16 %v8847_v27, %v8865_v58  ;;  %v4278_v46 = vld [vmem:[%s11790_s4 + $0x28] sm:$0xff]  ;;  %v1378_v28 = vld [vmem:[#allocation2 + $0xd9] sm:$0xff]  ;;  %v6789_v9 = vunpack.i.h.bf16 %v8805_v31 }
 0x1c4   : > { %v6792_v54 = vpop.permute.xlu1 %6791  ;;  %v2309_v56 = vsel %vm2206_vm2, %v2277_v49, %v6803_v51  ;;  %v2212_v45 = vsel %vm2206_vm2, %v2179_v38, %v6804_v41  ;;  %v6784_v51 = vunpack.i.h.bf16 %v8791_v2  ;;  %v6568_v49 = vpack.c.bf16 %v4278_v46, %v4277_v53  ;;  %v8910_v37 = vld [vmem:[#allocation2 + $0xb6] sm:$0xff] }
 0x1c5   : > { %v6794_v14 = vunpack.i.h.bf16 %v6792_v54  ;;  %v6793_v62 = vunpack.i.l.bf16 %v6792_v54  ;;  %v8835_v0 = vpop.permute.xlu0 %6806  ;;  %v2341_v40 = vsel %vm2239_vm3, %v2309_v56, %v6783_v16  ;;  %v3135_v54 = vld [vmem:[#allocation2 + $0x132] sm:$0xff] }
 0x1c6   : > { %6314 = vmatmul.mubr.msk.f32.vlgmr.msra.gmra.mrb[40].mxu0 %vm981_vm0, %v1375_v1  ;;  %7111 = vrot.lane.b32.xlu1 %v7110_v35, %s11813_s29  ;;  %v3232_v35 = vld [vmem:[#allocation2 + $0x1ce] sm:$0xff]  ;;  %v6788_v1 = vunpack.i.l.bf16 %v8805_v31  ;;  %v6808_v2 = vunpack.i.l.bf16 %v8835_v0  ;;  %v8917_v56 = vld [vmem:[#allocation2 + $0xd8] sm:$0xff] }
 0x1c7   : > { %6316 = vmatprep.mubr.msk.f32.mxu0 %vm981_vm0, %v1376_v30  ;;  %7081 = vrot.lane.b32.xlu0 %v7080_v60, %s7839_s24  ;;  %v2308_v17 = vsel %vm2206_vm2, %v2276_v52, %v6793_v62  ;;  %v2211_v18 = vsel %vm2206_vm2, %v2178_v6, %v6794_v14  ;;  %v7130_v14 = vpack.i.bf16 %v8669_v8, %v8814_v15  ;;  %v3202_v62 = vld [vmem:[#allocation2 + $0x1ca] sm:$0xff]  ;;  %v4280_v8 = vld [vmem:[%s11790_s4 + $0x38] sm:$0xff] }
 0x1c8   : > { %v8861_v22 = vpop.permute.xlu1 %6811  ;;  %v2340_v26 = vsel %vm2239_vm3, %v2308_v17, %v6798_v63  ;;  %v2244_v4 = vsel %vm2239_vm3, %v2211_v18, %v6799_v23  ;;  %6563 = vmatpush1.bf16.msra.mxu0 %v6562_v5  ;;  %v1379_v5 = vld [vmem:[#allocation2 + $0xe1] sm:$0xff]  ;;  %v2245_v52 = vsel %vm2239_vm3, %v2212_v45, %v6784_v51  ;;  %v4279_v23 = vld [vmem:[%s11790_s4 + $0x30] sm:$0xff]  ;;  %v6809_v63 = vunpack.i.h.bf16 %v8835_v0 }
 0x1c9   : > { %2584 = vmatprep.mubr.f32.mxu1 %v2340_v26  ;;  %v8867_v12 = vpop.permute.xlu0 %6826  ;;  %6564 = vmatprep.subr.bf16.mxu0 %v7838_v59  ;;  %v7100_v41 = vpack.i.bf16 %v3135_v54, %v3232_v35  ;;  %v7135_v0 = vpack.i.bf16 %v8896_v3, %v8910_v37  ;;  %v7105_v18 = vpack.i.bf16 %v8634_v7, %v3202_v62  ;;  %v1381_v31 = vld [vmem:[#allocation2 + $0x109] sm:$0xff]  ;;  %v6813_v46 = vunpack.i.l.bf16 %v8861_v22  ;;  %v1124_v35 = vld [vmem:[#allocation2 + $0xb7] sm:$0xff] }
 0x1ca   : > { %2585 = vmatmul.mubr.f32.vlgmr.msra.gmra.mrb[0].mxu1 %v2244_v4  ;;  %6317 = vmatmul.mubr.msk.f32.gmra.mrb[42].mxu0 %vm981_vm0, %v1377_v21  ;;  %v6571_v16 = vpack.c.bf16 %v4280_v8, %v4279_v23  ;;  %v2278_v10 = vsel %vm981_vm0, %v8917_v56, %v6808_v2  ;;  %v1123_v21 = vld [vmem:[#allocation2 + $0xaf] sm:$0xff]  ;;  %v6829_v7 = vunpack.i.h.bf16 %v8867_v12  ;;  %v6828_v38 = vunpack.i.l.bf16 %v8867_v12 }
 0x1cb   : > { %7116 = vrot.lane.b32.xlu1 %v7115_v36, %s7839_s24  ;;  %2589 = vmatprep.mubr.f32.mxu1 %v2341_v40  ;;  %v2279_v36 = vsel %vm981_vm0, %v8919_v33, %v6788_v1  ;;  %v2180_v40 = vsel %vm981_vm0, %v1123_v21, %v6809_v63  ;;  %v2181_v62 = vsel %vm981_vm0, %v1124_v35, %v6789_v9  ;;  %v4281_v1 = vld [vmem:[%s11790_s4 + $0x40] sm:$0xff]  ;;  %v4282_v2 = vld [vmem:[%s11790_s4 + $0x48] sm:$0xff]  ;;  %v6814_v23 = vunpack.i.h.bf16 %v8861_v22  ;;  %v9023_v35 = vld [vmem:[#allocation2 + $0x152] sm:$0xff] }
 0x1cc   : > { %6319 = vmatprep.mubr.msk.f32.mxu0 %vm981_vm0, %v1378_v28  ;;  %7086 = vrot.lane.b32.xlu0 %v7085_v43, %s7841_s1  ;;  %v8887_v60 = vpop.permute.xlu1 %6816  ;;  %v8933_v43 = vld [vmem:[#allocation2 + $0x1f0] sm:$0xff]  ;;  %v1385_v63 = vld [vmem:[#allocation2 + $0x159] sm:$0xff] }
 0x1cd   : > { %v8893_v30 = vpop.permute.xlu0 %6831  ;;  %6566 = vmatpush1.bf16.msra.mxu0 %v6565_v39  ;;  %v6819_v21 = vunpack.i.h.bf16 %v8887_v60 }
 0x1ce   : > { %2590 = vmatmul.mubr.f32.gmra.mrb[2].mxu1 %v2245_v52  ;;  %6320 = vmatmul.mubr.msk.f32.gmra.mrb[44].mxu0 %vm981_vm0, %v1379_v5  ;;  %v6833_v6 = vunpack.i.l.bf16 %v8893_v30  ;;  %v6834_v39 = vunpack.i.h.bf16 %v8893_v30  ;;  %v7120_v52 = vpack.i.bf16 %v8814_v15, %v8771_v47  ;;  %v6574_v47 = vpack.c.bf16 %v4282_v2, %v4281_v1 }
 0x1cf   : > { %7131 = vrot.lane.b32.xlu1 %v7130_v14, %s11813_s29  ;;  %6322 = vmatprep.mubr.msk.f32.mxu0 %vm981_vm0, %v8574_v57  ;;  %v7140_v14 = vpack.i.bf16 %v8933_v43, %v8833_v55  ;;  %v6818_v15 = vunpack.i.l.bf16 %v8887_v60 }
 0x1d0   : > { %7101 = vrot.lane.b32.xlu0 %v7100_v41, %s7841_s1  ;;  %v6822_v17 = vpop.permute.xlu1 %6821  ;;  %6567 = vmatprep.subr.bf16.mxu0 %v7838_v59  ;;  %v2311_v12 = vsel %vm2206_vm2, %v2279_v36, %v6833_v6  ;;  %v2214_v55 = vsel %vm2206_vm2, %v2181_v62, %v6834_v39  ;;  %v8973_v41 = vld [vmem:[#allocation2 + $0xd6] sm:$0xff] }
 0x1d1   : > { %v6824_v57 = vunpack.i.h.bf16 %v6822_v17  ;;  %v6823_v26 = vunpack.i.l.bf16 %v6822_v17  ;;  %v8922_v4 = vpop.permute.xlu0 %6836  ;;  %6569 = vmatpush1.bf16.msra.mxu0 %v6568_v49  ;;  %v2343_v30 = vsel %vm2239_vm3, %v2311_v12, %v6813_v46  ;;  %v8964_v49 = vld [vmem:[#allocation2 + $0x1f7] sm:$0xff]  ;;  %v2247_v22 = vsel %vm2239_vm3, %v2214_v55, %v6814_v23 }
 0x1d2   : > { %6323 = vmatmul.mubr.msk.f32.gmra.mrb[46].mxu0 %vm981_vm0, %v1381_v31  ;;  %6570 = vmatprep.subr.bf16.mxu0 %v7838_v59  ;;  %v6838_v6 = vunpack.i.l.bf16 %v8922_v4  ;;  %v7145_v17 = vpack.i.bf16 %v8964_v49, %v8973_v41  ;;  %v8999_v31 = vld [vmem:[#allocation2 + $0x92] sm:$0xff] }
 0x1d3   : > { %7136 = vrot.lane.b32.xlu1 %v7135_v0, %s7841_s1  ;;  %6325 = vmatprep.mubr.msk.f32.mxu0 %vm981_vm0, %v8594_v13  ;;  %v2310_v45 = vsel %vm2206_vm2, %v2278_v10, %v6823_v26  ;;  %v2213_v53 = vsel %vm2206_vm2, %v2180_v40, %v6824_v57  ;;  %v1383_v13 = vld [vmem:[#allocation2 + $0x131] sm:$0xff]  ;;  %v7125_v57 = vpack.i.bf16 %v8847_v27, %v8690_v20 }
 0x1d4   : > { %7106 = vrot.lane.b32.xlu0 %v7105_v18, %s7839_s24  ;;  %v8944_v51 = vpop.permute.xlu1 %6841  ;;  %v2342_v28 = vsel %vm2239_vm3, %v2310_v45, %v6828_v38  ;;  %v2246_v54 = vsel %vm2239_vm3, %v2213_v53, %v6829_v7  ;;  %v4283_v0 = vld [vmem:[%s11790_s4 + $0x50] sm:$0xff]  ;;  %v4284_v18 = vld [vmem:[%s11790_s4 + $0x58] sm:$0xff]  ;;  %v9006_v7 = vld [vmem:[#allocation2 + $0x100] sm:$0xff] }
 0x1d5   : > { %2594 = vmatprep.mubr.f32.mxu1 %v2342_v28  ;;  %v8948_v5 = vpop.permute.xlu0 %6856  ;;  %6572 = vmatpush1.bf16.msra.mxu0 %v6571_v16  ;;  %v6839_v16 = vunpack.i.h.bf16 %v8922_v4  ;;  %v3155_v10 = vld [vmem:[#allocation2 + $0x8e] sm:$0xff]  ;;  %v6577_v39 = vpack.c.bf16 %v4284_v18, %v4283_v0  ;;  %v2280_v60 = vsel %vm981_vm0, %v9006_v7, %v6838_v6  ;;  %v1125_v53 = vld [vmem:[#allocation2 + $0xd7] sm:$0xff]  ;;  %v6843_v1 = vunpack.i.l.bf16 %v8944_v51 }
 0x1d6   : > { %2595 = vmatmul.mubr.f32.gmra.mrb[4].mxu1 %v2246_v54  ;;  %6326 = vmatmul.mubr.msk.f32.gmra.mrb[48].mxu0 %vm981_vm0, %v1383_v13  ;;  %v7155_v20 = vpack.i.bf16 %v8896_v3, %v3155_v10  ;;  %v9008_v38 = vld [vmem:[#allocation2 + $0x108] sm:$0xff]  ;;  %v6859_v3 = vunpack.i.h.bf16 %v8948_v5  ;;  %v6858_v46 = vunpack.i.l.bf16 %v8948_v5  ;;  %v7160_v6 = vpack.i.bf16 %v8964_v49, %v8745_v29  ;;  %v4288_v10 = vld [vmem:[%s11790_s4 + $0x78] sm:$0xff] }
 0x1d7   : > { %7141 = vrot.lane.b32.xlu1 %v7140_v14, %s11813_s29  ;;  %2599 = vmatprep.mubr.f32.mxu1 %v2343_v30  ;;  %v2281_v12 = vsel %vm981_vm0, %v9008_v38, %v6818_v15  ;;  %v2182_v54 = vsel %vm981_vm0, %v1125_v53, %v6839_v16  ;;  %v3233_v13 = vld [vmem:[#allocation2 + $0x1ee] sm:$0xff] }
 0x1d8   : > { %6328 = vmatprep.mubr.msk.f32.mxu0 %vm981_vm0, %v8615_v25  ;;  %7121 = vrot.lane.b32.xlu0 %v7120_v52, %s7839_s24  ;;  %v8971_v8 = vpop.permute.xlu1 %6846  ;;  %v8982_v25 = vld [vmem:[#allocation2 + $0x1f1] sm:$0xff]  ;;  %v1126_v52 = vld [vmem:[#allocation2 + $0xdf] sm:$0xff]  ;;  %v3093_v0 = vld [vmem:[#allocation2 + $0x68] sm:$0xff] }
 0x1d9   : > { %v8977_v9 = vpop.permute.xlu0 %6861  ;;  %6573 = vmatprep.subr.bf16.mxu0 %v7838_v59  ;;  %v7150_v36 = vpack.i.bf16 %v8982_v25, %v8999_v31  ;;  %v2183_v23 = vsel %vm981_vm0, %v1126_v52, %v6819_v21  ;;  %v6848_v29 = vunpack.i.l.bf16 %v8971_v8 }
 0x1da   : > { %2600 = vmatmul.mubr.f32.gmra.mrb[6].mxu1 %v2247_v22  ;;  %6329 = vmatmul.mubr.msk.f32.gmra.mrb[50].mxu0 %vm981_vm0, %v1385_v63  ;;  %v6863_v26 = vunpack.i.l.bf16 %v8977_v9  ;;  %v6864_v28 = vunpack.i.h.bf16 %v8977_v9  ;;  %v4285_v63 = vld [vmem:[%s11790_s4 + $0x60] sm:$0xff] }
 0x1db   : > { %7146 = vrot.lane.b32.xlu1 %v7145_v17, %s7841_s1  ;;  %6331 = vmatprep.mubr.msk.f32.mxu0 %vm981_vm0, %v8642_v50  ;;  %v9053_v22 = vld [vmem:[#allocation2 + $0x220] sm:$0xff]  ;;  %v6844_v17 = vunpack.i.h.bf16 %v8944_v51 }
 0x1dc   : > { %7126 = vrot.lane.b32.xlu0 %v7125_v57, %s7841_s1  ;;  %v6852_v4 = vpop.permute.xlu1 %6851  ;;  %6575 = vmatpush1.bf16.msra.mxu0 %v6574_v47  ;;  %v2313_v5 = vsel %vm2206_vm2, %v2281_v12, %v6863_v26  ;;  %v4286_v47 = vld [vmem:[%s11790_s4 + $0x68] sm:$0xff]  ;;  %v2216_v9 = vsel %vm2206_vm2, %v2183_v23, %v6864_v28  ;;  %v7190_v57 = vpack.i.bf16 %v9053_v22, %v9006_v7  ;;  %v1127_v28 = vld [vmem:[#allocation2 + $0xff] sm:$0xff] }
 0x1dd   : > { %v6854_v50 = vunpack.i.h.bf16 %v6852_v4  ;;  %v6853_v40 = vunpack.i.l.bf16 %v6852_v4  ;;  %v9010_v45 = vpop.permute.xlu0 %6866  ;;  %6576 = vmatprep.subr.bf16.mxu0 %v7838_v59  ;;  %v2345_v15 = vsel %vm2239_vm3, %v2313_v5, %v6843_v1  ;;  %v6580_v18 = vpack.c.bf16 %v4286_v47, %v4285_v63  ;;  %v9069_v26 = vld [vmem:[#allocation2 + $0x221] sm:$0xff]  ;;  %v9113_v5 = vld [vmem:[#allocation2 + $0x217] sm:$0xff] }
 0x1de   : > { %6332 = vmatmul.mubr.msk.f32.gmra.mrb[52].mxu0 %vm981_vm0, %v8626_v34  ;;  %v6868_v49 = vunpack.i.l.bf16 %v9010_v45  ;;  %v2249_v51 = vsel %vm2239_vm3, %v2216_v9, %v6844_v17  ;;  %v6869_v21 = vunpack.i.h.bf16 %v9010_v45  ;;  %v7165_v4 = vpack.i.bf16 %v8933_v43, %v3093_v0  ;;  %v9094_v45 = vld [vmem:[#allocation2 + $0x128] sm:$0xff] }
 0x1df   : > { %7151 = vrot.lane.b32.xlu1 %v7150_v36, %s7839_s24  ;;  %6334 = vmatprep.mubr.msk.f32.mxu0 %vm981_vm0, %v8672_v32  ;;  %v2312_v14 = vsel %vm2206_vm2, %v2280_v60, %v6853_v40  ;;  %v2215_v62 = vsel %vm2206_vm2, %v2182_v54, %v6854_v50  ;;  %v7175_v32 = vpack.i.bf16 %v9023_v35, %v3233_v13  ;;  %v9096_v60 = vld [vmem:[#allocation2 + $0x130] sm:$0xff]  ;;  %v1128_v47 = vld [vmem:[#allocation2 + $0x107] sm:$0xff] }
 0x1e0   : > { %7156 = vrot.lane.b32.xlu0 %v7155_v20, %s11813_s29  ;;  %v9033_v34 = vpop.permute.xlu1 %6871  ;;  %v2344_v2 = vsel %vm2239_vm3, %v2312_v14, %v6858_v46  ;;  %v2248_v30 = vsel %vm2239_vm3, %v2215_v62, %v6859_v3  ;;  %6578 = vmatpush1.bf16.msra.mxu0 %v6577_v39  ;;  %v9086_v20 = vld [vmem:[#allocation2 + $0xda] sm:$0xff]  ;;  %v6849_v39 = vunpack.i.h.bf16 %v8971_v8  ;;  %v2282_v8 = vsel %vm981_vm0, %v9094_v45, %v6868_v49 }
 0x1e1   : > { %2604 = vmatprep.mubr.f32.mxu1 %v2344_v2  ;;  %v9037_v55 = vpop.permute.xlu0 %6886  ;;  %6579 = vmatprep.subr.bf16.mxu0 %v7838_v59  ;;  %v7195_v40 = vpack.i.bf16 %v9069_v26, %v9086_v20  ;;  %v2283_v54 = vsel %vm981_vm0, %v9096_v60, %v6848_v29  ;;  %v9110_v14 = vld [vmem:[#allocation2 + $0x219] sm:$0xff]  ;;  %v2184_v62 = vsel %vm981_vm0, %v1127_v28, %v6869_v21 }
 0x1e2   : > { %2605 = vmatmul.mubr.f32.gmra.mrb[8].mxu1 %v2248_v30  ;;  %6335 = vmatmul.mubr.msk.f32.gmra.mrb[54].mxu0 %vm981_vm0, %v8647_v48  ;;  %v9120_v30 = vld [vmem:[#allocation2 + $0xde] sm:$0xff]  ;;  %v2185_v0 = vsel %vm981_vm0, %v1128_v47, %v6849_v39 }
 0x1e3   : > { %7176 = vrot.lane.b32.xlu1 %v7175_v32, %s7841_s1  ;;  %2609 = vmatprep.mubr.f32.mxu1 %v2345_v15  ;;  %v4289_v15 = vld [vmem:[%s11790_s4 + $0x80] sm:$0xff]  ;;  %v7210_v17 = vpack.i.bf16 %v9113_v5, %v9120_v30 }
 0x1e4   : > { %6337 = vmatprep.mubr.msk.f32.mxu0 %vm981_vm0, %v8757_v24  ;;  %7161 = vrot.lane.b32.xlu0 %v7160_v6, %s11813_s29  ;;  %v9060_v48 = vpop.permute.xlu1 %6876  ;;  %v4287_v24 = vld [vmem:[%s11790_s4 + $0x70] sm:$0xff]  ;;  %v4290_v6 = vld [vmem:[%s11790_s4 + $0x88] sm:$0xff] }
 0x1e5   : > { %v9064_v16 = vpop.permute.xlu0 %6891  ;;  %6581 = vmatpush1.bf16.msra.mxu0 %v6580_v18  ;;  %v6583_v53 = vpack.c.bf16 %v4288_v10, %v4287_v24  ;;  %v3234_v24 = vld [vmem:[#allocation2 + $0x1f6] sm:$0xff]  ;;  %v9149_v10 = vld [vmem:[#allocation2 + $0x241] sm:$0xff]  ;;  %v6586_v21 = vpack.c.bf16 %v4290_v6, %v4289_v15  ;;  %v6879_v47 = vunpack.i.h.bf16 %v9060_v48 }
 0x1e6   : > { %2610 = vmatmul.mubr.f32.gmra.mrb[10].mxu1 %v2249_v51  ;;  %6338 = vmatmul.mubr.msk.f32.gmra.mrb[56].mxu0 %vm981_vm0, %v8686_v19  ;;  %v6893_v36 = vunpack.i.l.bf16 %v9064_v16  ;;  %v7170_v19 = vpack.i.bf16 %v8982_v25, %v8764_v42  ;;  %v6889_v42 = vunpack.i.h.bf16 %v9037_v55  ;;  %v6894_v13 = vunpack.i.h.bf16 %v9064_v16  ;;  %v9145_v16 = vld [vmem:[#allocation2 + $0x218] sm:$0xff] }
 0x1e7   : > { %7191 = vrot.lane.b32.xlu1 %v7190_v57, %s11813_s29  ;;  %6340 = vmatprep.mubr.msk.f32.mxu0 %vm981_vm0, %v8982_v25  ;;  %v6888_v25 = vunpack.i.l.bf16 %v9037_v55  ;;  %v6873_v55 = vunpack.i.l.bf16 %v9033_v34  ;;  %v6874_v51 = vunpack.i.h.bf16 %v9033_v34  ;;  %v3137_v57 = vld [vmem:[#allocation2 + $0x15a] sm:$0xff] }
 0x1e8   : > { %7166 = vrot.lane.b32.xlu0 %v7165_v4, %s7839_s24  ;;  %v6882_v50 = vpop.permute.xlu1 %6881  ;;  %6582 = vmatprep.subr.bf16.mxu0 %v7838_v59  ;;  %v2315_v52 = vsel %vm2206_vm2, %v2283_v54, %v6893_v36  ;;  %v2218_v49 = vsel %vm2206_vm2, %v2185_v0, %v6894_v13  ;;  %v4292_v34 = vld [vmem:[%s11790_s4 + $0x98] sm:$0xff]  ;;  %v4294_v54 = vld [vmem:[%s11790_s4 + $0xa8] sm:$0xff] }
 0x1e9   : > { %v6884_v12 = vunpack.i.h.bf16 %v6882_v50  ;;  %v6883_v3 = vunpack.i.l.bf16 %v6882_v50  ;;  %v9098_v46 = vpop.permute.xlu0 %6896  ;;  %6584 = vmatpush1.bf16.msra.mxu0 %v6583_v53  ;;  %v2347_v18 = vsel %vm2239_vm3, %v2315_v52, %v6873_v55  ;;  %v2251_v39 = vsel %vm2239_vm3, %v2218_v49, %v6874_v51  ;;  %v9170_v53 = vld [vmem:[#allocation2 + $0x21f] sm:$0xff]  ;;  %v9201_v52 = vld [vmem:[#allocation2 + $0x271] sm:$0xff] }
 0x1ea   : > { %6341 = vmatmul.mubr.msk.f32.gmra.mrb[58].mxu0 %vm981_vm0, %v8847_v27  ;;  %v3168_v27 = vld [vmem:[#allocation2 + $0x19e] sm:$0xff]  ;;  %v7215_v50 = vpack.i.bf16 %v9145_v16, %v8919_v33  ;;  %6585 = vmatprep.subr.bf16.mxu0 %v7838_v59  ;;  %v6899_v13 = vunpack.i.h.bf16 %v9098_v46  ;;  %v7200_v55 = vpack.i.bf16 %v9053_v22, %v8831_v44  ;;  %v7205_v44 = vpack.i.bf16 %v9069_v26, %v8865_v58  ;;  %v9217_v22 = vld [vmem:[#allocation2 + $0x150] sm:$0xff] }
 0x1eb   : > { %7196 = vrot.lane.b32.xlu1 %v7195_v40, %s7839_s24  ;;  %6343 = vmatprep.mubr.msk.f32.mxu0 %vm981_vm0, %v9110_v14  ;;  %v2314_v1 = vsel %vm2206_vm2, %v2282_v8, %v6883_v3  ;;  %v2217_v2 = vsel %vm2206_vm2, %v2184_v62, %v6884_v12  ;;  %v7180_v29 = vpack.i.bf16 %v3168_v27, %v8933_v43  ;;  %v4291_v43 = vld [vmem:[%s11790_s4 + $0x90] sm:$0xff]  ;;  %v9175_v12 = vld [vmem:[#allocation2 + $0xfe] sm:$0xff]  ;;  %v6898_v62 = vunpack.i.l.bf16 %v9098_v46 }
 0x1ec   : > { %7171 = vrot.lane.b32.xlu0 %v7170_v19, %s7841_s1  ;;  %v9125_v32 = vpop.permute.xlu1 %6901  ;;  %v2346_v23 = vsel %vm2239_vm3, %v2314_v1, %v6888_v25  ;;  %v2250_v63 = vsel %vm2239_vm3, %v2217_v2, %v6889_v42  ;;  %v9167_v40 = vld [vmem:[#allocation2 + $0x249] sm:$0xff]  ;;  %v7185_v19 = vpack.i.bf16 %v3137_v57, %v3234_v24  ;;  %v6589_v3 = vpack.c.bf16 %v4292_v34, %v4291_v43  ;;  %v4293_v33 = vld [vmem:[%s11790_s4 + $0xa0] sm:$0xff]  ;;  %v9220_v0 = vld [vmem:[#allocation2 + $0x291] sm:$0xff] }
 0x1ed   : > { %2614 = vmatprep.mubr.f32.mxu1 %v2346_v23  ;;  %v9135_v9 = vpop.permute.xlu0 %6911  ;;  %6587 = vmatpush1.bf16.msra.mxu0 %v6586_v21  ;;  %v9180_v8 = vld [vmem:[#allocation2 + $0x269] sm:$0xff]  ;;  %v4305_v42 = vld [vmem:[%s11790_s4 + $0x100] sm:$0xff]  ;;  %v7220_v2 = vpack.i.bf16 %v9170_v53, %v9175_v12  ;;  %v6878_v23 = vunpack.i.l.bf16 %v9060_v48  ;;  %v2284_v48 = vsel %vm981_vm0, %v9217_v22, %v6898_v62  ;;  %v4296_v58 = vld [vmem:[%s11790_s4 + $0xb8] sm:$0xff] }
 0x1ee   : > { %2615 = vmatmul.mubr.f32.gmra.mrb[12].mxu1 %v2250_v63  ;;  %6344 = vmatmul.mubr.msk.f32.gmra.mrb[60].mxu0 %vm981_vm0, %v9069_v26  ;;  %v4306_v25 = vld [vmem:[%s11790_s4 + $0x108] sm:$0xff]  ;;  %v9209_v46 = vld [vmem:[#allocation2 + $0xba] sm:$0xff]  ;;  %v6592_v63 = vpack.c.bf16 %v4294_v54, %v4293_v33  ;;  %v4295_v57 = vld [vmem:[%s11790_s4 + $0xb0] sm:$0xff] }
 0x1ef   : > { %7211 = vrot.lane.b32.xlu1 %v7210_v17, %s7841_s1  ;;  %2619 = vmatprep.mubr.f32.mxu1 %v2347_v18  ;;  %v6609_v27 = vpack.c.bf16 %v4306_v25, %v4305_v42  ;;  %v7225_v6 = vpack.i.bf16 %v9110_v14, %v9209_v46  ;;  %v1129_v17 = vld [vmem:[#allocation2 + $0x127] sm:$0xff]  ;;  %v9233_v26 = vld [vmem:[#allocation2 + $0x299] sm:$0xff] }
 0x1f0   : > { %7181 = vrot.lane.b32.xlu0 %v7180_v29, %s11813_s29  ;;  %v9152_v4 = vpop.permute.xlu1 %6906  ;;  %6346 = vmatprep.mubr.msk.f32.mxu0 %vm981_vm0, %v9149_v10  ;;  %v2186_v51 = vsel %vm981_vm0, %v1129_v17, %v6899_v13  ;;  %v9265_v17 = vld [vmem:[#allocation2 + $0x2b9] sm:$0xff] }
 0x1f1   : > { %v9162_v36 = vpop.permute.xlu0 %6916  ;;  %6588 = vmatprep.subr.bf16.mxu0 %v7838_v59  ;;  %6610 = vmatprep.subr.bf16.mxu1 %v6609_v27 }
 0x1f2   : > { %2620 = vmatmul.mubr.f32.gmra.mrb[14].mxu1 %v2251_v39  ;;  %6347 = vmatmul.mubr.msk.f32.gmra.mrb[62].mxu0 %vm981_vm0, %v9167_v40  ;;  %v9235_v39 = vld [vmem:[#allocation2 + $0x17a] sm:$0xff] }
 0x1f3   : > { %7216 = vrot.lane.b32.xlu1 %v7215_v50, %s11813_s29  ;;  %6349 = vmatprep.mubr.msk.f32.mxu0 %vm981_vm0, %v9180_v8  ;;  %v3235_v50 = vld [vmem:[#allocation2 + $0x216] sm:$0xff]  ;;  %s11922_s29 = smov 96  }
 0x1f4   : > { %7186 = vrot.lane.b32.xlu0 %v7185_v19, %s7841_s1  ;;  %v9183_v28 = vpop.permute.xlu1 %6921  ;;  %6590 = vmatpush1.bf16.msra.mxu0 %v6589_v3  ;;  %v9237_v19 = vld [vmem:[#allocation2 + $0x158] sm:$0xff]  ;;  %v6903_v3 = vunpack.i.l.bf16 %v9125_v32 }
 0x1f5   : > { %v6932_v1 = vpop.permute.xlu0 %6931  ;;  %6591 = vmatprep.subr.bf16.mxu0 %v7838_v59  ;;  %6612 = vmatpush3.bf16.msra.mxu1 %v6609_v27  ;;  %v2285_v42 = vsel %vm981_vm0, %v9237_v19, %v6878_v23  ;;  %v6595_v27 = vpack.c.bf16 %v4296_v58, %v4295_v57 }
 0x1f6   : > { %6350 = vmatmul.mubr.msk.f32.gmra.mrb[64].mxu0 %vm981_vm0, %v9201_v52  ;;  %v6934_v24 = vunpack.i.h.bf16 %v6932_v1  ;;  %v6933_v21 = vunpack.i.l.bf16 %v6932_v1 }
 0x1f7   : > { %7221 = vrot.lane.b32.xlu1 %v7220_v2, %s7841_s1  ;;  %6352 = vmatprep.mubr.msk.f32.mxu0 %vm981_vm0, %v9220_v0  ;;  %v1130_v2 = vld [vmem:[#allocation2 + $0x12f] sm:$0xff] }
 0x1f8   : > { %7201 = vrot.lane.b32.xlu0 %v7200_v55, %s7839_s24  ;;  %v6927_v15 = vpop.permute.xlu1 %6926  ;;  %6593 = vmatpush1.bf16.msra.mxu0 %v6592_v63  ;;  %v2187_v63 = vsel %vm981_vm0, %v1130_v2, %v6879_v47  ;;  %v6904_v47 = vunpack.i.h.bf16 %v9125_v32  ;;  %v9324_v2 = vld [vmem:[#allocation2 + $0x106] sm:$0xff] }
 0x1f9   : > { %v6929_v18 = vunpack.i.h.bf16 %v6927_v15  ;;  %v6928_v29 = vunpack.i.l.bf16 %v6927_v15  ;;  %v6937_v49 = vpop.permute.xlu0 %6936  ;;  %v7250_v15 = vpack.i.bf16 %v9235_v39, %v3235_v50  ;;  %6594 = vmatprep.subr.bf16.mxu0 %v7838_v59 }
 0x1fa   : > { %v6939_v43 = vunpack.i.h.bf16 %v6937_v49  ;;  %v6938_v34 = vunpack.i.l.bf16 %v6937_v49  ;;  %6353 = vmatmul.mubr.msk.f32.gmra.mrb[66].mxu0 %vm981_vm0, %v9233_v26  ;;  %v1404_v49 = vld [vmem:[#allocation2 + $0x2e1] sm:$0xff] }
 0x1fb   : > { %7226 = vrot.lane.b32.xlu1 %v7225_v6, %s7839_s24  ;;  %v2316_v33 = vsel %vm2206_vm2, %v2284_v48, %v6928_v29  ;;  %v2219_v54 = vsel %vm2206_vm2, %v2186_v51, %v6929_v18  ;;  %v4297_v6 = vld [vmem:[%s11790_s4 + $0xc0] sm:$0xff]  ;;  %v7230_v18 = vpack.i.bf16 %v9113_v5, %v8910_v37  ;;  %6355 = vmatprep.mubr.msk.f32.mxu0 %vm981_vm0, %v9265_v17  ;;  %v9277_v51 = vld [vmem:[#allocation2 + $0x248] sm:$0xff] }
 0x1fc   : > { %7206 = vrot.lane.b32.xlu0 %v7205_v44, %s7841_s1  ;;  %v9248_v25 = vpop.permute.xlu1 %6946  ;;  %v2348_v13 = vsel %vm2239_vm3, %v2316_v33, %v6933_v21  ;;  %v2252_v62 = vsel %vm2239_vm3, %v2219_v54, %v6934_v24  ;;  %v2317_v1 = vsel %vm2206_vm2, %v2285_v42, %v6938_v34  ;;  %v4298_v44 = vld [vmem:[%s11790_s4 + $0xc8] sm:$0xff]  ;;  %v2220_v29 = vsel %vm2206_vm2, %v2187_v63, %v6939_v43  ;;  %v4299_v24 = vld [vmem:[%s11790_s4 + $0xd0] sm:$0xff]  ;;  %v4300_v21 = vld [vmem:[%s11790_s4 + $0xd8] sm:$0xff] }
 0x1fd   : > { %2624 = vmatprep.mubr.f32.mxu1 %v2348_v13  ;;  %v9253_v55 = vpop.permute.xlu0 %6941  ;;  %v2349_v23 = vsel %vm2239_vm3, %v2317_v1, %v6903_v3  ;;  %6596 = vmatpush1.bf16.msra.mxu0 %v6595_v27  ;;  %v6598_v57 = vpack.c.bf16 %v4298_v44, %v4297_v6  ;;  %v9279_v37 = vld [vmem:[#allocation2 + $0x2c1] sm:$0xff]  ;;  %v2253_v58 = vsel %vm2239_vm3, %v2220_v29, %v6904_v47  ;;  %v1405_v34 = vld [vmem:[#allocation2 + $0x2e9] sm:$0xff]  ;;  %v6909_v47 = vunpack.i.h.bf16 %v9152_v4 }
 0x1fe   : > { %2625 = vmatmul.mubr.f32.gmra.mrb[16].mxu1 %v2252_v62  ;;  %v7265_v32 = vpack.i.bf16 %v9277_v51, %v9094_v45  ;;  %6597 = vmatprep.subr.bf16.mxu0 %v7838_v59  ;;  %v7235_v43 = vpack.i.bf16 %v9170_v53, %v8973_v41  ;;  %v9302_v3 = vld [vmem:[#allocation2 + $0x102] sm:$0xff]  ;;  %v6601_v33 = vpack.c.bf16 %v4300_v21, %v4299_v24  ;;  %v4303_v44 = vld [vmem:[%s11790_s4 + $0xf0] sm:$0xff] }
 0x1ff   : > { %7251 = vrot.lane.b32.xlu1 %v7250_v15, %s7841_s1  ;;  %2629 = vmatprep.mubr.f32.mxu1 %v2349_v23  ;;  %v7270_v42 = vpack.i.bf16 %v9167_v40, %v9302_v3  ;;  %v4301_v41 = vld [vmem:[%s11790_s4 + $0xe0] sm:$0xff]  ;;  %v4302_v53 = vld [vmem:[%s11790_s4 + $0xe8] sm:$0xff]  ;;  %v7240_v13 = vpack.i.bf16 %v9145_v16, %v8773_v11  ;;  %v6944_v15 = vunpack.i.h.bf16 %v9253_v55  ;;  %v6943_v23 = vunpack.i.l.bf16 %v9253_v55 }
 0x200   : > { %7231 = vrot.lane.b32.xlu0 %v7230_v18, %s11922_s29  ;;  %v9275_v48 = vpop.permute.xlu1 %6951  ;;  %6356 = vmatmul.mubr.msk.f32.gmra.mrb[68].mxu0 %vm981_vm0, %v9279_v37  ;;  %v9318_v62 = vld [vmem:[#allocation2 + $0x23f] sm:$0xff]  ;;  %v6604_v27 = vpack.c.bf16 %v4302_v53, %v4301_v41  ;;  %v7245_v29 = vpack.i.bf16 %v9110_v14, %v8999_v31  ;;  %v6908_v55 = vunpack.i.l.bf16 %v9152_v4  ;;  %v1131_v24 = vld [vmem:[#allocation2 + $0x14f] sm:$0xff]  ;;  %v6948_v53 = vunpack.i.l.bf16 %v9248_v25 }
 0x201   : > { %v9281_v5 = vpop.permute.xlu0 %6956  ;;  %6358 = vmatprep.mubr.msk.f32.mxu0 %vm981_vm0, %v1404_v49  ;;  %6599 = vmatpush1.bf16.msra.mxu0 %v6598_v57  ;;  %v7285_v11 = vpack.i.bf16 %v9318_v62, %v9324_v2  ;;  %v9330_v6 = vld [vmem:[#allocation2 + $0x240] sm:$0xff]  ;;  %v4304_v18 = vld [vmem:[%s11790_s4 + $0xf8] sm:$0xff] }
 0x202   : > { %2630 = vmatmul.mubr.f32.gmra.mrb[18].mxu1 %v2253_v58  ;;  %6600 = vmatprep.subr.bf16.mxu0 %v7838_v59  ;;  %v7290_v57 = vpack.i.bf16 %v9330_v6, %v9008_v38  ;;  %v7255_v58 = vpack.i.bf16 %v8780_v61, %v9145_v16  ;;  %v6607_v31 = vpack.c.bf16 %v4304_v18, %v4303_v44  ;;  %v9355_v61 = vld [vmem:[#allocation2 + $0x126] sm:$0xff] }
 0x203   : > { %7266 = vrot.lane.b32.xlu1 %v7265_v32, %s11922_s29  ;;  %v9349_v32 = vld [vmem:[#allocation2 + $0x178] sm:$0xff]  ;;  %v9357_v16 = vld [vmem:[#allocation2 + $0x180] sm:$0xff] }
 0x204   : > { %7236 = vrot.lane.b32.xlu0 %v7235_v43, %s11922_s29  ;;  %v9300_v50 = vpop.permute.xlu1 %6966  ;;  %6359 = vmatmul.mubr.msk.f32.gmra.mrb[70].mxu0 %vm981_vm0, %v1405_v34  ;;  %v2286_v4 = vsel %vm981_vm0, %v9349_v32, %v6943_v23  ;;  %v2188_v34 = vsel %vm981_vm0, %v1131_v24, %v6944_v15  ;;  %v2287_v15 = vsel %vm981_vm0, %v9357_v16, %v6908_v55  ;;  %v3236_v23 = vld [vmem:[#allocation2 + $0x21e] sm:$0xff]  ;;  %v1333_v18 = vld [vmem:[#allocation2 + $0x247] sm:$0xff] }
 0x205   : > { %v9304_v54 = vpop.permute.xlu0 %6961  ;;  %6602 = vmatpush1.bf16.msra.mxu0 %v6601_v33  ;;  %v7295_v24 = vpack.i.bf16 %v1333_v18, %v9355_v61 }
 0x206   : > { %6603 = vmatprep.subr.bf16.mxu0 %v7838_v59 }
 0x207   : > { %7271 = vrot.lane.b32.xlu1 %v7270_v42, %s7839_s24 }
 0x208   : > { %7241 = vrot.lane.b32.xlu0 %v7240_v13, %s7839_s24  ;;  %v9322_v1 = vpop.permute.xlu1 %6971 }
 0x209   : > { %11923 = vst [vmem:[#allocation15_spill] sm:$0xff] %v9322_v1  ;;  %v6982_v63 = vpop.permute.xlu0 %6981  ;;  %6605 = vmatpush1.bf16.msra.mxu0 %v6604_v27  ;;  %v9465_v1 = vld [vmem:[#allocation2 + $0x10a] sm:$0xff] }
 0x20a   : > { %6606 = vmatprep.subr.bf16.mxu0 %v7838_v59  ;;  %v6984_v33 = vunpack.i.h.bf16 %v6982_v63  ;;  %v6983_v38 = vunpack.i.l.bf16 %v6982_v63  ;;  %v3139_v59 = vld [vmem:[#allocation2 + $0x182] sm:$0xff] }
 0x20b   : > { %7286 = vrot.lane.b32.xlu1 %v7285_v11, %s7841_s1 }
 0x20c   : > { %7246 = vrot.lane.b32.xlu0 %v7245_v29, %s7841_s1  ;;  %v6977_v49 = vpop.permute.xlu1 %6976 }
 0x20d   : > { %v6979_v14 = vunpack.i.h.bf16 %v6977_v49  ;;  %v6978_v21 = vunpack.i.l.bf16 %v6977_v49  ;;  %v6987_v43 = vpop.permute.xlu0 %6986  ;;  %v1132_v49 = vld [vmem:[#allocation2 + $0x157] sm:$0xff]  ;;  %6608 = vmatpush1.bf16.msra.mxu0 %v6607_v31 }
 0x20e   : > { %v6989_v42 = vunpack.i.h.bf16 %v6987_v43  ;;  %v6988_v41 = vunpack.i.l.bf16 %v6987_v43  ;;  %v6949_v43 = vunpack.i.h.bf16 %v9248_v25  ;;  %v7275_v25 = vpack.i.bf16 %v9277_v51, %v8917_v56 }
 0x20f   : > { %7291 = vrot.lane.b32.xlu1 %v7290_v57, %s11922_s29  ;;  %v2318_v13 = vsel %vm2206_vm2, %v2286_v4, %v6978_v21  ;;  %v2221_v27 = vsel %vm2206_vm2, %v2188_v34, %v6979_v14  ;;  %v2189_v14 = vsel %vm981_vm0, %v1132_v49, %v6909_v47  ;;  %v9382_v34 = vld [vmem:[#allocation2 + $0xe2] sm:$0xff] }
 0x210   : > { %7256 = vrot.lane.b32.xlu0 %v7255_v58, %s11922_s29  ;;  %v9366_v63 = vpop.permute.xlu1 %7011  ;;  %v2350_v11 = vsel %vm2239_vm3, %v2318_v13, %v6983_v38  ;;  %v2254_v44 = vsel %vm2239_vm3, %v2221_v27, %v6984_v33  ;;  %v2319_v29 = vsel %vm2206_vm2, %v2287_v15, %v6988_v41  ;;  %v7260_v58 = vpack.i.bf16 %v3139_v59, %v3236_v23  ;;  %v9403_v27 = vld [vmem:[#allocation2 + $0x12a] sm:$0xff] }
 0x211   : > { %2634 = vmatprep.mubr.f32.mxu1 %v2350_v11  ;;  %v9371_v57 = vpop.permute.xlu0 %6991  ;;  %v2351_v55 = vsel %vm2239_vm3, %v2319_v29, %v6948_v53  ;;  %v2222_v21 = vsel %vm2206_vm2, %v2189_v14, %v6989_v42  ;;  %v7300_v31 = vpack.i.bf16 %v9149_v10, %v9382_v34  ;;  %v9395_v42 = vld [vmem:[#allocation2 + $0x270] sm:$0xff]  ;;  %v7280_v13 = vpack.i.bf16 %v9167_v40, %v9086_v20  ;;  %v9428_v29 = vld [vmem:[#allocation2 + $0x268] sm:$0xff] }
 0x212   : > { %2635 = vmatmul.mubr.f32.gmra.mrb[20].mxu1 %v2254_v44  ;;  %v2255_v47 = vsel %vm2239_vm3, %v2222_v21, %v6949_v43  ;;  %v7325_v53 = vpack.i.bf16 %v9395_v42, %v9217_v22  ;;  %v7330_v15 = vpack.i.bf16 %v9201_v52, %v9403_v27  ;;  %v7305_v59 = vpack.i.bf16 %v9318_v62, %v9120_v30  ;;  %v9415_v22 = vld [vmem:[#allocation2 + $0x267] sm:$0xff]  ;;  %v9442_v21 = vld [vmem:[#allocation2 + $0x26f] sm:$0xff] }
 0x213   : > { %7296 = vrot.lane.b32.xlu1 %v7295_v24, %s7841_s1  ;;  %2639 = vmatprep.mubr.f32.mxu1 %v2351_v55  ;;  %v9417_v23 = vld [vmem:[#allocation2 + $0x12e] sm:$0xff]  ;;  %v7310_v44 = vpack.i.bf16 %v1333_v18, %v9175_v12  ;;  %v6913_v62 = vunpack.i.l.bf16 %v9135_v9  ;;  %v7350_v24 = vpack.i.bf16 %v9428_v29, %v9096_v60  ;;  %v3097_v55 = vld [vmem:[#allocation2 + $0xb8] sm:$0xff]  ;;  %v6953_v12 = vunpack.i.l.bf16 %v9275_v48 }
 0x214   : > { %7261 = vrot.lane.b32.xlu0 %v7260_v58, %s7841_s1  ;;  %v9380_v4 = vpop.permute.xlu1 %7021  ;;  %v7345_v11 = vpack.i.bf16 %v9415_v22, %v9417_v23  ;;  %v9437_v14 = vld [vmem:[#allocation2 + $0x14e] sm:$0xff]  ;;  %v7315_v18 = vpack.i.bf16 %v9330_v6, %v3097_v55  ;;  %v6918_v43 = vunpack.i.l.bf16 %v9162_v36  ;;  %v7682_v55 = vld [vmem:[#allocation2 + $0x60] sm:$0xff] }
 0x215   : > { %v9384_v33 = vpop.permute.xlu0 %6996  ;;  %v3056_v58 = vld [vmem:[#allocation2 + $0xe] sm:$0xff]  ;;  %v7355_v60 = vpack.i.bf16 %v9442_v21, %v9437_v14 }
 0x216   : > { %2640 = vmatmul.mubr.f32.gmra.mrb[22].mxu1 %v2255_v47 }
 0x217   : > { %7301 = vrot.lane.b32.xlu1 %v7300_v31, %s7839_s24  ;;  %v7320_v31 = vpack.i.bf16 %v9149_v10, %v9209_v46 }
 0x218   : > { %7276 = vrot.lane.b32.xlu0 %v7275_v25, %s7839_s24  ;;  %v9393_v38 = vpop.permute.xlu1 %7026  ;;  %v4081_v25 = vsel %vm981_vm0, %v3056_v58, %v6913_v62 }
 0x219   : > { %v9397_v41 = vpop.permute.xlu0 %7001 }
 0x21b   : > { %7326 = vrot.lane.b32.xlu1 %v7325_v53, %s11922_s29  ;;  %v6954_v53 = vunpack.i.h.bf16 %v9275_v48 }
 0x21c   : > { %7281 = vrot.lane.b32.xlu0 %v7280_v13, %s7841_s1  ;;  %v9407_v56 = vpop.permute.xlu1 %7041  ;;  %v6998_v13 = vunpack.i.l.bf16 %v9384_v33 }
 0x21d   : > { %11924 = vst [vmem:[#allocation16_spill] sm:$0xff] %v9407_v56  ;;  %v9409_v51 = vpop.permute.xlu0 %7006 }
 0x21f   : > { %7331 = vrot.lane.b32.xlu1 %v7330_v15, %s7839_s24 }
 0x220   : > { %7306 = vrot.lane.b32.xlu0 %v7305_v59, %s11922_s29  ;;  %v9421_v20 = vpop.permute.xlu1 %7046 }
 0x221   : > { %11925 = vst [vmem:[#allocation17_spill] sm:$0xff] %v9421_v20  ;;  %v9423_v40 = vpop.permute.xlu0 %7016 }
 0x222   : > { %11926 = vst [vmem:[#allocation18_spill] sm:$0xff] %v9423_v40  ;;  %v9468_v40 = vld [vmem:[#allocation2 + $0x1a8] sm:$0xff] }
 0x223   : > { %7346 = vrot.lane.b32.xlu1 %v7345_v11, %s7841_s1  ;;  %v6994_v11 = vunpack.i.h.bf16 %v9371_v57 }
 0x224   : > { %7311 = vrot.lane.b32.xlu0 %v7310_v44, %s11922_s29  ;;  %v7052_v30 = vpop.permute.xlu1 %7051  ;;  %v6993_v44 = vunpack.i.l.bf16 %v9371_v57  ;;  %v4113_v57 = vsel %vm2206_vm2, %v4081_v25, %v6918_v43 }
 0x225   : > { %v9433_v49 = vpop.permute.xlu0 %7031  ;;  %v7054_v20 = vunpack.i.h.bf16 %v7052_v30  ;;  %v7053_v10 = vunpack.i.l.bf16 %v7052_v30  ;;  %v7360_v30 = vpack.i.bf16 %v9180_v8, %v9465_v1 }
 0x227   : > { %7351 = vrot.lane.b32.xlu1 %v7350_v24, %s11922_s29  ;;  %v7023_v24 = vunpack.i.l.bf16 %v9380_v4 }
 0x228   : > { %7316 = vrot.lane.b32.xlu0 %v7315_v18, %s7839_s24  ;;  %v7062_v47 = vpop.permute.xlu1 %7061  ;;  %v4177_v18 = vsel %vm981_vm0, %v7682_v55, %v6953_v12 }
 0x229   : > { %v7063_v15 = vunpack.i.l.bf16 %v7062_v47  ;;  %v9453_v59 = vpop.permute.xlu0 %7036  ;;  %v7064_v46 = vunpack.i.h.bf16 %v7062_v47  ;;  %v4145_v47 = vsel %vm2239_vm3, %v4113_v57, %v6998_v13  ;;  %v7024_v57 = vunpack.i.h.bf16 %v9380_v4 }
 0x22b   : > { %7356 = vrot.lane.b32.xlu1 %v7355_v60, %s7841_s1  ;;  %v4209_v48 = vsel %vm2206_vm2, %v4177_v18, %v7063_v15  ;;  %v7335_v60 = vpack.i.bf16 %v9395_v42, %v9006_v7  ;;  %v1133_v15 = vld [vmem:[#allocation2 + $0x177] sm:$0xff] }
 0x22c   : > { %7321 = vrot.lane.b32.xlu0 %v7320_v31, %s7841_s1  ;;  %v9462_v62 = vpop.permute.xlu1 %7066  ;;  %v4241_v58 = vsel %vm2239_vm3, %v4209_v48, %v7023_v24  ;;  %v9475_v31 = vld [vmem:[#allocation2 + $0x1a0] sm:$0xff]  ;;  %v2289_v24 = vsel %vm981_vm0, %v9468_v40, %v6954_v53  ;;  %v2190_v18 = vsel %vm981_vm0, %v1133_v15, %v6994_v11  ;;  %v6914_v48 = vunpack.i.h.bf16 %v9135_v9 }
 0x22d   : > { %v7057_v12 = vpop.permute.xlu0 %7056  ;;  %4469 = vmatprep.mubr.f32.mxu0 %v4241_v58  ;;  %v2288_v25 = vsel %vm981_vm0, %v9475_v31, %v6993_v44  ;;  %v2223_v13 = vsel %vm2206_vm2, %v2190_v18, %v7054_v20  ;;  %v2321_v58 = vsel %vm2206_vm2, %v2289_v24, %v7064_v46  ;;  %v6919_v53 = vunpack.i.h.bf16 %v9162_v36  ;;  %v9494_v44 = vld [vmem:[#allocation2 + $0x298] sm:$0xff] }
 0x22e   : > { %v7059_v55 = vunpack.i.h.bf16 %v7057_v12  ;;  %v7058_v43 = vunpack.i.l.bf16 %v7057_v12  ;;  %4470 = vmatmul.mubr.f32.vlgmr.msra.gmra.mrb[72].mxu0 %v4145_v47  ;;  %v2320_v7 = vsel %vm2206_vm2, %v2288_v25, %v7053_v10  ;;  %v6999_v10 = vunpack.i.h.bf16 %v9384_v33  ;;  %v9523_v25 = vld [vmem:[#allocation2 + $0x156] sm:$0xff] }
 0x22f   : > { %7361 = vrot.lane.b32.xlu1 %v7360_v30, %s7839_s24  ;;  %v7385_v36 = vpack.i.bf16 %v9494_v44, %v9349_v32  ;;  %v2353_v4 = vsel %vm2239_vm3, %v2321_v58, %v7024_v57  ;;  %v7340_v46 = vpack.i.bf16 %v9201_v52, %v9302_v3  ;;  %v1134_v30 = vld [vmem:[#allocation2 + $0x17f] sm:$0xff]  ;;  %v4307_v32 = vld [vmem:[%s11790_s4 + $0x110] sm:$0xff]  ;;  %v7390_v24 = vpack.i.bf16 %v9233_v26, %v9023_v35 }
 0x230   : > { %7336 = vrot.lane.b32.xlu0 %v7335_v60, %s7839_s24  ;;  %v9490_v12 = vpop.permute.xlu1 %7091  ;;  %v2352_v11 = vsel %vm2239_vm3, %v2320_v7, %v7058_v43  ;;  %v2256_v9 = vsel %vm2239_vm3, %v2223_v13, %v7059_v55  ;;  %v2191_v47 = vsel %vm981_vm0, %v1134_v30, %v6914_v48  ;;  %v4308_v52 = vld [vmem:[%s11790_s4 + $0x118] sm:$0xff]  ;;  %v7365_v43 = vpack.i.bf16 %v9415_v22, %v9324_v2  ;;  %v9529_v48 = vld [vmem:[#allocation2 + $0x28f] sm:$0xff] }
 0x231   : > { %2644 = vmatprep.mubr.f32.mxu1 %v2352_v11  ;;  %v9497_v20 = vpop.permute.xlu0 %7071  ;;  %v2224_v60 = vsel %vm2206_vm2, %v2191_v47, %v6919_v53  ;;  %v6613_v55 = vpack.c.bf16 %v4308_v52, %v4307_v32  ;;  %v7405_v35 = vpack.i.bf16 %v9529_v48, %v9523_v25  ;;  %v7370_v2 = vpack.i.bf16 %v9442_v21, %v9355_v61  ;;  %v9539_v22 = vld [vmem:[#allocation2 + $0x290] sm:$0xff]  ;;  %v3099_v53 = vld [vmem:[#allocation2 + $0xe0] sm:$0xff] }
 0x232   : > { %2645 = vmatmul.mubr.f32.gmra.mrb[24].mxu1 %v2256_v9  ;;  %v2257_v15 = vsel %vm2239_vm3, %v2224_v60, %v6999_v10  ;;  %v7410_v58 = vpack.i.bf16 %v9539_v22, %v9237_v19  ;;  %v7375_v11 = vpack.i.bf16 %v9428_v29, %v3099_v53  ;;  %v9548_v9 = vld [vmem:[#allocation2 + $0x176] sm:$0xff]  ;;  %v7380_v19 = vpack.i.bf16 %v9180_v8, %v9382_v34 }
 0x233   : > { %7386 = vrot.lane.b32.xlu1 %v7385_v36, %s11922_s29  ;;  %2649 = vmatprep.mubr.f32.mxu1 %v2353_v4  ;;  %v9552_v61 = vld [vmem:[#allocation2 + $0x297] sm:$0xff]  ;;  %v9562_v4 = vld [vmem:[#allocation2 + $0x2c0] sm:$0xff]  ;;  %v7395_v60 = vpack.i.bf16 %v9494_v44, %v9094_v45  ;;  %v7400_v52 = vpack.i.bf16 %v9233_v26, %v9403_v27  ;;  %v7450_v8 = vpack.i.bf16 %v9279_v37, %v9235_v39  ;;  %v7069_v34 = vunpack.i.h.bf16 %v9462_v62 }
 0x234   : > { %7341 = vrot.lane.b32.xlu0 %v7340_v46, %s7841_s1  ;;  %v9507_v33 = vpop.permute.xlu1 %7096  ;;  %6614 = vmatprep.subr.bf16.mxu1 %v6613_v55  ;;  %v7415_v10 = vpack.i.bf16 %v9552_v61, %v9548_v9  ;;  %v3195_v46 = vld [vmem:[#allocation2 + $0x132] sm:$0xff]  ;;  %v7445_v32 = vpack.i.bf16 %v9562_v4, %v9475_v31  ;;  %v6959_v39 = vunpack.i.h.bf16 %v9281_v5  ;;  %v6958_v37 = vunpack.i.l.bf16 %v9281_v5 }
 0x235   : > { %v9516_v3 = vpop.permute.xlu0 %7076  ;;  %6616 = vmatpush3.bf16.msra.mxu1 %v6613_v55  ;;  %v7420_v30 = vpack.i.bf16 %v9220_v0, %v3195_v46  ;;  %v7425_v55 = vpack.i.bf16 %v9529_v48, %v9417_v23  ;;  %v3057_v23 = vld [vmem:[#allocation2 + $0x16] sm:$0xff]  ;;  %v7029_v48 = vunpack.i.h.bf16 %v9393_v38  ;;  %v7073_v53 = vunpack.i.l.bf16 %v9497_v20 }
 0x236   : > { %2650 = vmatmul.mubr.f32.gmra.mrb[26].mxu1 %v2257_v15  ;;  %v7068_v15 = vunpack.i.l.bf16 %v9462_v62  ;;  %v7009_v62 = vunpack.i.h.bf16 %v9409_v51 }
 0x237   : > { %7391 = vrot.lane.b32.xlu1 %v7390_v24, %s7839_s24 }
 0x238   : > { %7366 = vrot.lane.b32.xlu0 %v7365_v43, %s11922_s29  ;;  %v9527_v18 = vpop.permute.xlu1 %7111  ;;  %v7004_v43 = vunpack.i.h.bf16 %v9397_v41 }
 0x239   : > { %v9531_v7 = vpop.permute.xlu0 %7081 }
 0x23b   : > { %7406 = vrot.lane.b32.xlu1 %v7405_v35, %s7841_s1  ;;  %v7003_v35 = vunpack.i.l.bf16 %v9397_v41  ;;  %v7074_v41 = vunpack.i.h.bf16 %v9497_v20 }
 0x23c   : > { %7371 = vrot.lane.b32.xlu0 %v7370_v2, %s11922_s29  ;;  %v7008_v2 = vunpack.i.l.bf16 %v9409_v51 }
 0x23d   : > { %v9541_v13 = vpop.permute.xlu1 %7116 }
 0x23e   : > { %v9545_v57 = vpop.permute.xlu0 %7086 }
 0x23f   : > { %7411 = vrot.lane.b32.xlu1 %v7410_v58, %s11922_s29  ;;  %v7028_v58 = vunpack.i.l.bf16 %v9393_v38 }
 0x240   : > { %7376 = vrot.lane.b32.xlu0 %v7375_v11, %s7839_s24 }
 0x241   : > { %v9554_v21 = vpop.permute.xlu1 %7131 }
 0x242   : > { %11927 = vst [vmem:[#allocation19_spill] sm:$0xff] %v9554_v21  ;;  %v9558_v36 = vpop.permute.xlu0 %7101  ;;  %v4082_v21 = vsel %vm981_vm0, %v3057_v23, %v7003_v35  ;;  %v7078_v23 = vunpack.i.l.bf16 %v9516_v3 }
 0x243   : > { %7416 = vrot.lane.b32.xlu1 %v7415_v10, %s7841_s1  ;;  %v9595_v10 = vld [vmem:[#allocation2 + $0x1c8] sm:$0xff] }
 0x244   : > { %7381 = vrot.lane.b32.xlu0 %v7380_v19, %s7841_s1  ;;  %v2290_v51 = vsel %vm981_vm0, %v9595_v10, %v7069_v34 }
 0x245   : > { %v7137_v47 = vpop.permute.xlu1 %7136 }
 0x246   : > { %v9577_v24 = vpop.permute.xlu0 %7106  ;;  %v7139_v26 = vunpack.i.h.bf16 %v7137_v47  ;;  %v7138_v27 = vunpack.i.l.bf16 %v7137_v47 }
 0x247   : > { %7421 = vrot.lane.b32.xlu1 %v7420_v30, %s7839_s24  ;;  %v7683_v30 = vld [vmem:[#allocation2 + $0x68] sm:$0xff] }
 0x248   : > { %7396 = vrot.lane.b32.xlu0 %v7395_v60, %s7839_s24  ;;  %v4178_v47 = vsel %vm981_vm0, %v7683_v30, %v7068_v15  ;;  %v1135_v60 = vld [vmem:[#allocation2 + $0x19f] sm:$0xff]  ;;  %v2322_v38 = vsel %vm2206_vm2, %v2290_v51, %v7139_v26  ;;  %v4114_v15 = vsel %vm2206_vm2, %v4082_v21, %v7008_v2  ;;  %v6963_v26 = vunpack.i.l.bf16 %v9304_v54  ;;  %v9620_v21 = vld [vmem:[#allocation2 + $0x1d0] sm:$0xff] }
 0x249   : > { %v7142_v11 = vpop.permute.xlu1 %7141  ;;  %v4210_v20 = vsel %vm2206_vm2, %v4178_v47, %v7138_v27  ;;  %v2192_v45 = vsel %vm981_vm0, %v1135_v60, %v7004_v43  ;;  %v4146_v35 = vsel %vm2239_vm3, %v4114_v15, %v7073_v53  ;;  %v7079_v27 = vunpack.i.h.bf16 %v9516_v3  ;;  %v1136_v53 = vld [vmem:[#allocation2 + $0x1a7] sm:$0xff]  ;;  %v9646_v15 = vld [vmem:[#allocation2 + $0x2b8] sm:$0xff] }
 0x24a   : > { %v7144_v19 = vunpack.i.h.bf16 %v7142_v11  ;;  %v7143_v5 = vunpack.i.l.bf16 %v7142_v11  ;;  %v9597_v46 = vpop.permute.xlu0 %7121  ;;  %v2225_v56 = vsel %vm2206_vm2, %v2192_v45, %v7009_v62  ;;  %v7113_v2 = vunpack.i.l.bf16 %v9527_v18 }
 0x24b   : > { %7446 = vrot.lane.b32.xlu1 %v7445_v32, %s11922_s29  ;;  %v6964_v32 = vunpack.i.h.bf16 %v9304_v54  ;;  %v2258_v43 = vsel %vm2239_vm3, %v2225_v56, %v7074_v41  ;;  %v7114_v54 = vunpack.i.h.bf16 %v9527_v18  ;;  %v2291_v56 = vsel %vm981_vm0, %v9620_v21, %v7029_v48  ;;  %v7684_v41 = vld [vmem:[#allocation2 + $0x88] sm:$0xff] }
 0x24c   : > { %7401 = vrot.lane.b32.xlu0 %v7400_v52, %s7841_s1  ;;  %v2354_v11 = vsel %vm2239_vm3, %v2322_v38, %v7144_v19  ;;  %v4242_v34 = vsel %vm2239_vm3, %v4210_v20, %v7143_v5  ;;  %v3058_v52 = vld [vmem:[#allocation2 + $0x36] sm:$0xff]  ;;  %v4179_v3 = vsel %vm981_vm0, %v7684_v41, %v7028_v58  ;;  %v3228_v5 = vld [vmem:[#allocation2 + $0x17e] sm:$0xff]  ;;  %v2193_v60 = vsel %vm981_vm0, %v1136_v53, %v6959_v39  ;;  %v3171_v53 = vld [vmem:[#allocation2 + $0x1ce] sm:$0xff] }
 0x24d   : > { %v7147_v51 = vpop.permute.xlu1 %7146  ;;  %2654 = vmatprep.mubr.f32.mxu1 %v2354_v11  ;;  %4474 = vmatprep.mubr.f32.mxu0 %v4242_v34  ;;  %v4083_v18 = vsel %vm981_vm0, %v3058_v52, %v6958_v37  ;;  %v2226_v58 = vsel %vm2206_vm2, %v2193_v60, %v6964_v32  ;;  %v9639_v11 = vld [vmem:[#allocation2 + $0x2b7] sm:$0xff]  ;;  %v11928_v32 = vpack.i.bf16 %v9552_v61, %v9437_v14  ;;  %v7084_v60 = vunpack.i.h.bf16 %v9531_v7 }
 0x24e   : > { %v7149_v19 = vunpack.i.h.bf16 %v7147_v51  ;;  %v7148_v45 = vunpack.i.l.bf16 %v7147_v51  ;;  %v9618_v62 = vpop.permute.xlu0 %7126  ;;  %2655 = vmatmul.mubr.f32.gmra.mrb[28].mxu1 %v2258_v43  ;;  %4475 = vmatmul.mubr.f32.gmra.mrb[74].mxu0 %v4146_v35  ;;  %v4115_v20 = vsel %vm2206_vm2, %v4083_v18, %v6963_v26  ;;  %v2259_v39 = vsel %vm2239_vm3, %v2226_v58, %v7079_v27  ;;  %v3101_v51 = vld [vmem:[#allocation2 + $0x108] sm:$0xff]  ;;  %v3229_v27 = vld [vmem:[#allocation2 + $0x19e] sm:$0xff] }
 0x24f   : > { %7451 = vrot.lane.b32.xlu1 %v7450_v8, %s7839_s24  ;;  %v4147_v37 = vsel %vm2239_vm3, %v4115_v20, %v7078_v23  ;;  %v7455_v34 = vpack.i.bf16 %v9639_v11, %v3228_v5  ;;  %v7460_v35 = vpack.i.bf16 %v9646_v15, %v9357_v16  ;;  %v7435_v52 = vpack.i.bf16 %v9539_v22, %v3101_v51  ;;  %v9671_v16 = vld [vmem:[#allocation2 + $0x1f2] sm:$0xff]  ;;  %v9682_v5 = vld [vmem:[#allocation2 + $0x220] sm:$0xff]  ;;  %v9700_v20 = vld [vmem:[#allocation2 + $0x1aa] sm:$0xff] }
 0x250   : > { %7426 = vrot.lane.b32.xlu0 %v7425_v55, %s11922_s29  ;;  %v2323_v30 = vsel %vm2206_vm2, %v2291_v56, %v7149_v19  ;;  %v4211_v47 = vsel %vm2206_vm2, %v4179_v3, %v7148_v45  ;;  %v9664_v19 = vld [vmem:[#allocation2 + $0x2bf] sm:$0xff]  ;;  %v7440_v45 = vpack.i.bf16 %v9220_v0, %v9465_v1  ;;  %v7480_v3 = vpack.i.bf16 %v9475_v31, %v9671_v16 }
 0x251   : > { %v9633_v38 = vpop.permute.xlu1 %7151  ;;  %v2355_v8 = vsel %vm2239_vm3, %v2323_v30, %v7114_v54  ;;  %v4243_v48 = vsel %vm2239_vm3, %v4211_v47, %v7113_v2  ;;  %v7465_v61 = vpack.i.bf16 %v9664_v19, %v3229_v27  ;;  %v3197_v54 = vld [vmem:[#allocation2 + $0x15a] sm:$0xff]  ;;  %v3140_v0 = vld [vmem:[#allocation2 + $0x1a2] sm:$0xff]  ;;  %v7034_v47 = vunpack.i.h.bf16 %v9433_v49 }
 0x252   : > { %2659 = vmatprep.mubr.f32.mxu1 %v2355_v8  ;;  %v9641_v55 = vpop.permute.xlu0 %7156  ;;  %4479 = vmatprep.mubr.f32.mxu0 %v4243_v48  ;;  %v7470_v41 = vpack.i.bf16 %v9265_v17, %v3197_v54  ;;  %v9684_v1 = vld [vmem:[#allocation2 + $0x23e] sm:$0xff]  ;;  %v9692_v17 = vld [vmem:[#allocation2 + $0x1ee] sm:$0xff]  ;;  %v7083_v31 = vunpack.i.l.bf16 %v9531_v7  ;;  %v7475_v8 = vpack.i.bf16 %v3171_v53, %v9682_v5  ;;  %v7490_v48 = vpack.i.bf16 %v9639_v11, %v9523_v25 }
 0x253   : > { %2660 = vmatmul.mubr.f32.gmra.mrb[30].mxu1 %v2259_v39  ;;  %4480 = vmatmul.mubr.f32.gmra.mrb[76].mxu0 %v4147_v37  ;;  %v9686_v30 = vld [vmem:[#allocation2 + $0x1fa] sm:$0xff]  ;;  %v7495_v58 = vpack.i.bf16 %v9664_v19, %v9548_v9  ;;  %v9702_v39 = vld [vmem:[#allocation2 + $0x246] sm:$0xff]  ;;  %v7154_v37 = vunpack.i.h.bf16 %v9633_v38  ;;  %v7485_v7 = vpack.i.bf16 %v3140_v0, %v9684_v1  ;;  %v7089_v25 = vunpack.i.h.bf16 %v9545_v57  ;;  %v1138_v19 = vld [vmem:[#allocation2 + $0x1cf] sm:$0xff] }
 0x254   : > { %7456 = vrot.lane.b32.xlu1 %v7455_v34, %s7841_s1  ;;  %7431 = vrot.lane.b32.xlu0 %v11928_v32, %s11922_s29  ;;  %v7153_v34 = vunpack.i.l.bf16 %v9633_v38  ;;  %v3059_v51 = vld [vmem:[#allocation2 + $0x3e] sm:$0xff]  ;;  %v7500_v27 = vpack.i.bf16 %v9692_v17, %v9330_v6  ;;  %v7119_v54 = vunpack.i.h.bf16 %v9541_v13  ;;  %v7158_v6 = vunpack.i.l.bf16 %v9641_v55  ;;  %v9724_v53 = vld [vmem:[#allocation2 + $0x1f0] sm:$0xff] }
 0x255   : > { %v9653_v26 = vpop.permute.xlu1 %7176 }
 0x256   : > { %11929 = vst [vmem:[#allocation20_spill] sm:$0xff] %v9653_v26  ;;  %v9655_v43 = vpop.permute.xlu0 %7161 }
 0x258   : > { %7461 = vrot.lane.b32.xlu1 %v7460_v35, %s11922_s29  ;;  %7436 = vrot.lane.b32.xlu0 %v7435_v52, %s7839_s24  ;;  %v7505_v35 = vpack.i.bf16 %v9468_v40, %v9686_v30  ;;  %v1137_v52 = vld [vmem:[#allocation2 + $0x1c7] sm:$0xff]  ;;  %v7510_v40 = vpack.i.bf16 %v9700_v20, %v9702_v39 }
 0x259   : > { %v9662_v23 = vpop.permute.xlu1 %7191  ;;  %v2194_v38 = vsel %vm981_vm0, %v1137_v52, %v7084_v60  ;;  %v7685_v60 = vld [vmem:[#allocation2 + $0x90] sm:$0xff] }
 0x25a   : > { %v9666_v14 = vpop.permute.xlu0 %7166 }
 0x25c   : > { %7466 = vrot.lane.b32.xlu1 %v7465_v61, %s7841_s1  ;;  %7441 = vrot.lane.b32.xlu0 %v7440_v45, %s7841_s1  ;;  %v7088_v61 = vunpack.i.l.bf16 %v9545_v57  ;;  %v2195_v45 = vsel %vm981_vm0, %v1138_v19, %v7034_v47  ;;  %v4084_v57 = vsel %vm981_vm0, %v3059_v51, %v7083_v31  ;;  %v2292_v47 = vsel %vm981_vm0, %v9724_v53, %v7154_v37 }
 0x25d   : > { %v9675_v2 = vpop.permute.xlu1 %7196  ;;  %v2227_v19 = vsel %vm2206_vm2, %v2194_v38, %v7089_v25  ;;  %v7033_v31 = vunpack.i.l.bf16 %v9433_v49 }
 0x25e   : > { %v9677_v56 = vpop.permute.xlu0 %7171 }
 0x260   : > { %7471 = vrot.lane.b32.xlu1 %v7470_v41, %s7839_s24  ;;  %7481 = vrot.lane.b32.xlu0 %v7480_v3, %s7839_s24  ;;  %v7159_v41 = vunpack.i.h.bf16 %v9641_v55 }
 0x261   : > { %v7212_v18 = vpop.permute.xlu1 %7211 }
 0x262   : > { %v9706_v32 = vpop.permute.xlu0 %7181  ;;  %v7214_v11 = vunpack.i.h.bf16 %v7212_v18  ;;  %v7213_v9 = vunpack.i.l.bf16 %v7212_v18  ;;  %v2260_v25 = vsel %vm2239_vm3, %v2227_v19, %v7159_v41 }
 0x263   : > { %11930 = vst [vmem:[#allocation21_spill] sm:$0xff] %v9706_v32 }
 0x264   : > { %7476 = vrot.lane.b32.xlu1 %v7475_v8, %s11922_s29  ;;  %7491 = vrot.lane.b32.xlu0 %v7490_v48, %s11922_s29  ;;  %v4180_v8 = vsel %vm981_vm0, %v7685_v60, %v7153_v34  ;;  %v7118_v48 = vunpack.i.l.bf16 %v9541_v13  ;;  %v2324_v52 = vsel %vm2206_vm2, %v2292_v47, %v7214_v11  ;;  %v4116_v34 = vsel %vm2206_vm2, %v4084_v57, %v7088_v61  ;;  %v9750_v61 = vld [vmem:[#allocation2 + $0x1f8] sm:$0xff]  ;;  %v9757_v60 = vld [vmem:[#allocation2 + $0x248] sm:$0xff] }
 0x265   : > { %v7217_v3 = vpop.permute.xlu1 %7216  ;;  %v4212_v55 = vsel %vm2206_vm2, %v4180_v8, %v7213_v9  ;;  %v7039_v13 = vunpack.i.h.bf16 %v9453_v59  ;;  %v7038_v11 = vunpack.i.l.bf16 %v9453_v59  ;;  %v4148_v49 = vsel %vm2239_vm3, %v4116_v34, %v7158_v6  ;;  %v7686_v6 = vld [vmem:[#allocation2 + $0xb0] sm:$0xff]  ;;  %v3060_v47 = vld [vmem:[#allocation2 + $0x5e] sm:$0xff] }
 0x266   : > { %v7219_v0 = vunpack.i.h.bf16 %v7217_v3  ;;  %v7218_v17 = vunpack.i.l.bf16 %v7217_v3  ;;  %v9727_v18 = vpop.permute.xlu0 %7186  ;;  %v7194_v59 = vunpack.i.h.bf16 %v9662_v23  ;;  %v7193_v57 = vunpack.i.l.bf16 %v9662_v23  ;;  %v3142_v34 = vld [vmem:[#allocation2 + $0x1ca] sm:$0xff] }
 0x267   : > { %11931 = vst [vmem:[#allocation22_spill] sm:$0xff] %v9727_v18  ;;  %v2293_v41 = vsel %vm981_vm0, %v9750_v61, %v7119_v54  ;;  %v4085_v23 = vsel %vm981_vm0, %v3060_v47, %v7033_v31  ;;  %v2228_v19 = vsel %vm2206_vm2, %v2195_v45, %v7039_v13  ;;  %v9808_v47 = vld [vmem:[#allocation2 + $0x24a] sm:$0xff] }
 0x268   : > { %7486 = vrot.lane.b32.xlu1 %v7485_v7, %s7841_s1  ;;  %7496 = vrot.lane.b32.xlu0 %v7495_v58, %s11922_s29  ;;  %v2356_v51 = vsel %vm2239_vm3, %v2324_v52, %v7219_v0  ;;  %v4244_v37 = vsel %vm2239_vm3, %v4212_v55, %v7218_v17  ;;  %v7164_v7 = vunpack.i.h.bf16 %v9655_v43  ;;  %v7163_v58 = vunpack.i.l.bf16 %v9655_v43  ;;  %v3173_v43 = vld [vmem:[#allocation2 + $0x1f6] sm:$0xff] }
 0x269   : > { %v7222_v3 = vpop.permute.xlu1 %7221  ;;  %2664 = vmatprep.mubr.f32.mxu1 %v2356_v51  ;;  %4484 = vmatprep.mubr.f32.mxu0 %v4244_v37  ;;  %v4181_v17 = vsel %vm981_vm0, %v7686_v6, %v7118_v48  ;;  %v4117_v51 = vsel %vm2206_vm2, %v4085_v23, %v7038_v11  ;;  %v7515_v31 = vpack.i.bf16 %v3173_v43, %v9757_v60  ;;  %v3175_v6 = vld [vmem:[#allocation2 + $0x21e] sm:$0xff]  ;;  %v7108_v43 = vunpack.i.l.bf16 %v9577_v24 }
 0x26a   : > { %v7224_v9 = vunpack.i.h.bf16 %v7222_v3  ;;  %v7223_v38 = vunpack.i.l.bf16 %v7222_v3  ;;  %v9748_v0 = vpop.permute.xlu0 %7201  ;;  %2665 = vmatmul.mubr.f32.gmra.mrb[32].mxu1 %v2260_v25  ;;  %4485 = vmatmul.mubr.f32.gmra.mrb[78].mxu0 %v4148_v49  ;;  %v9775_v3 = vld [vmem:[#allocation2 + $0x266] sm:$0xff]  ;;  %v9777_v25 = vld [vmem:[#allocation2 + $0x21a] sm:$0xff] }
 0x26b   : > { %v7525_v11 = vpack.i.bf16 %v3142_v34, %v9775_v3  ;;  %v7520_v49 = vpack.i.bf16 %v9595_v10, %v9777_v25 }
 0x26c   : > { %7506 = vrot.lane.b32.xlu1 %v7505_v35, %s7839_s24  ;;  %7501 = vrot.lane.b32.xlu0 %v7500_v27, %s11922_s29  ;;  %v2325_v8 = vsel %vm2206_vm2, %v2293_v41, %v7224_v9  ;;  %v4213_v52 = vsel %vm2206_vm2, %v4181_v17, %v7223_v38  ;;  %v2261_v35 = vsel %vm2239_vm3, %v2228_v19, %v7164_v7  ;;  %v9791_v7 = vld [vmem:[#allocation2 + $0x222] sm:$0xff]  ;;  %v9804_v41 = vld [vmem:[#allocation2 + $0x28e] sm:$0xff] }
 0x26d   : > { %v9764_v55 = vpop.permute.xlu1 %7226  ;;  %v2357_v54 = vsel %vm2239_vm3, %v2325_v8, %v7194_v59  ;;  %v4245_v48 = vsel %vm2239_vm3, %v4213_v52, %v7193_v57  ;;  %v4149_v27 = vsel %vm2239_vm3, %v4117_v51, %v7163_v58  ;;  %v3174_v58 = vld [vmem:[#allocation2 + $0x216] sm:$0xff]  ;;  %v9802_v57 = vld [vmem:[#allocation2 + $0x26e] sm:$0xff]  ;;  %v9806_v17 = vld [vmem:[#allocation2 + $0x242] sm:$0xff]  ;;  %v7545_v51 = vpack.i.bf16 %v3175_v6, %v9395_v42 }
 0x26e   : > { %v9770_v37 = vpop.permute.xlu0 %7206  ;;  %2669 = vmatprep.mubr.f32.mxu1 %v2357_v54  ;;  %4489 = vmatprep.mubr.f32.mxu0 %v4245_v48  ;;  %v7530_v38 = vpack.i.bf16 %v3174_v58, %v9428_v29  ;;  %v3143_v59 = vld [vmem:[#allocation2 + $0x1d2] sm:$0xff]  ;;  %v7109_v29 = vunpack.i.h.bf16 %v9577_v24  ;;  %v7555_v54 = vpack.i.bf16 %v9671_v16, %v9804_v41  ;;  %v7124_v48 = vunpack.i.h.bf16 %v9597_v46 }
 0x26f   : > { %2670 = vmatmul.mubr.f32.gmra.mrb[34].mxu1 %v2261_v35  ;;  %4490 = vmatmul.mubr.f32.gmra.mrb[80].mxu0 %v4149_v27  ;;  %v9813_v8 = vld [vmem:[#allocation2 + $0x296] sm:$0xff]  ;;  %v7540_v23 = vpack.i.bf16 %v3143_v59, %v9802_v57  ;;  %v7550_v35 = vpack.i.bf16 %v9724_v53, %v9806_v17  ;;  %v7565_v27 = vpack.i.bf16 %v9750_v61, %v9808_v47  ;;  %v7169_v24 = vunpack.i.h.bf16 %v9666_v14 }
 0x270   : > { %7516 = vrot.lane.b32.xlu1 %v7515_v31, %s11922_s29  ;;  %7511 = vrot.lane.b32.xlu0 %v7510_v40, %s7841_s1  ;;  %v7535_v40 = vpack.i.bf16 %v9620_v21, %v9791_v7  ;;  %v9815_v21 = vld [vmem:[#allocation2 + $0x2b6] sm:$0xff]  ;;  %v7168_v31 = vunpack.i.l.bf16 %v9666_v14  ;;  %v7560_v42 = vpack.i.bf16 %v9684_v1, %v9539_v22  ;;  %v4195_v14 = vsel %vm981_vm0, %v9595_v10, %v7108_v43  ;;  %v3061_v43 = vld [vmem:[#allocation2 + $0x66] sm:$0xff] }
 0x271   : > { %v9784_v45 = vpop.permute.xlu1 %7251  ;;  %v3074_v61 = vld [vmem:[#allocation2 + $0x176] sm:$0xff]  ;;  %v7229_v58 = vunpack.i.h.bf16 %v9764_v55 }
 0x272   : > { %v9786_v13 = vpop.permute.xlu0 %7231  ;;  %v1140_v59 = vld [vmem:[#allocation2 + $0x1f7] sm:$0xff]  ;;  %v4099_v6 = vsel %vm981_vm0, %v3074_v61, %v7109_v29  ;;  %v7254_v22 = vunpack.i.h.bf16 %v9784_v45  ;;  %v7253_v1 = vunpack.i.l.bf16 %v9784_v45  ;;  %v1139_v10 = vld [vmem:[#allocation2 + $0x1ef] sm:$0xff]  ;;  %v4086_v53 = vsel %vm981_vm0, %v3061_v43, %v7168_v31 }
 0x273   : > { %v7199_v29 = vunpack.i.h.bf16 %v9675_v2  ;;  %v7198_v61 = vunpack.i.l.bf16 %v9675_v2  ;;  %v9865_v45 = vld [vmem:[#allocation2 + $0x218] sm:$0xff] }
 0x274   : > { %7526 = vrot.lane.b32.xlu1 %v7525_v11, %s7841_s1  ;;  %7521 = vrot.lane.b32.xlu0 %v7520_v49, %s7839_s24  ;;  %v7174_v11 = vunpack.i.h.bf16 %v9677_v56  ;;  %v7173_v49 = vunpack.i.l.bf16 %v9677_v56  ;;  %v9856_v56 = vsel %vm981_vm0, %v1140_v59, %v7124_v48  ;;  %v7687_v31 = vld [vmem:[#allocation2 + $0xb8] sm:$0xff]  ;;  %v4131_v32 = vsel %vm2206_vm2, %v4099_v6, %v7254_v22 }
 0x275   : > { %v9795_v9 = vpop.permute.xlu1 %7266  ;;  %v7128_v6 = vunpack.i.l.bf16 %v9618_v62 }
 0x276   : > { %v9797_v20 = vpop.permute.xlu0 %7236  ;;  %v4118_v2 = vsel %vm2206_vm2, %v4086_v53, %v7173_v49 }
 0x278   : > { %7536 = vrot.lane.b32.xlu1 %v7535_v40, %s7839_s24  ;;  %7531 = vrot.lane.b32.xlu0 %v7530_v38, %s11922_s29  ;;  %v7228_v40 = vunpack.i.l.bf16 %v9764_v55  ;;  %v2196_v55 = vsel %vm981_vm0, %v1139_v10, %v7169_v24  ;;  %v2294_v24 = vsel %vm981_vm0, %v9865_v45, %v7229_v58  ;;  %v7129_v58 = vunpack.i.h.bf16 %v9618_v62 }
 0x279   : > { %v9818_v52 = vpop.permute.xlu1 %7271  ;;  %v2229_v48 = vsel %vm2206_vm2, %v2196_v55, %v7174_v11  ;;  %v7269_v62 = vunpack.i.h.bf16 %v9795_v9 }
 0x27a   : > { %v9824_v19 = vpop.permute.xlu0 %7241  ;;  %v4182_v10 = vsel %vm981_vm0, %v7687_v31, %v7228_v40  ;;  %v7688_v31 = vld [vmem:[#allocation2 + $0xd8] sm:$0xff] }
 0x27c   : > { %7546 = vrot.lane.b32.xlu1 %v7545_v51, %s11922_s29  ;;  %7541 = vrot.lane.b32.xlu0 %v7540_v23, %s7841_s1  ;;  %v7234_v23 = vunpack.i.h.bf16 %v9786_v13 }
 0x27d   : > { %v7287_v38 = vpop.permute.xlu1 %7286 }
 0x27e   : > { %v9853_v51 = vpop.permute.xlu0 %7246  ;;  %v7289_v16 = vunpack.i.h.bf16 %v7287_v38  ;;  %v7288_v34 = vunpack.i.l.bf16 %v7287_v38  ;;  %v7233_v38 = vunpack.i.l.bf16 %v9786_v13  ;;  %v2262_v40 = vsel %vm2239_vm3, %v2229_v48, %v7234_v23 }
 0x280   : > { %7556 = vrot.lane.b32.xlu1 %v7555_v54, %s7841_s1  ;;  %7551 = vrot.lane.b32.xlu0 %v7550_v35, %s7839_s24  ;;  %v4227_v35 = vsel %vm2206_vm2, %v4195_v14, %v7253_v1  ;;  %v2326_v13 = vsel %vm2206_vm2, %v2294_v24, %v7289_v16  ;;  %v4214_v55 = vsel %vm2206_vm2, %v4182_v10, %v7288_v34  ;;  %v7239_v1 = vunpack.i.h.bf16 %v9797_v20  ;;  %v9902_v10 = vld [vmem:[#allocation2 + $0x26a] sm:$0xff] }
 0x281   : > { %v7292_v59 = vpop.permute.xlu1 %7291  ;;  %v4150_v16 = vsel %vm2239_vm3, %v4118_v2, %v7233_v38  ;;  %v7268_v38 = vunpack.i.l.bf16 %v9795_v9  ;;  %v2295_v24 = vsel %vm981_vm0, %v9682_v5, %v7199_v29  ;;  %v11933_v2 = vpack.i.bf16 %v9686_v30, %v9813_v8 }
 0x282   : > { %v7294_v43 = vunpack.i.h.bf16 %v7292_v59  ;;  %v7293_v18 = vunpack.i.l.bf16 %v7292_v59  ;;  %v7257_v54 = vpop.permute.xlu0 %7256  ;;  %v2230_v30 = vsel %vm2206_vm2, %v9856_v56, %v7129_v58  ;;  %v11935_v56 = vpack.i.bf16 %v9777_v25, %v9815_v21 }
 0x283   : > { %v7259_v26 = vunpack.i.h.bf16 %v7257_v54  ;;  %v7258_v11 = vunpack.i.l.bf16 %v7257_v54 }
 0x284   : > { %7566 = vrot.lane.b32.xlu1 %v7565_v27, %s7839_s24  ;;  %7561 = vrot.lane.b32.xlu0 %v7560_v42, %s11922_s29  ;;  %v9880_v53 = vpop.f32.mrb[32].mxu0  ;;  %v2358_v49 = vsel %vm2239_vm3, %v2326_v13, %v7294_v43  ;;  %v4246_v14 = vsel %vm2239_vm3, %v4214_v55, %v7293_v18  ;;  %v7238_v18 = vunpack.i.l.bf16 %v9797_v20  ;;  %v11932_v20 = vpack.i.bf16 %v9702_v39, %v9494_v44 }
 0x285   : > { %v7297_v22 = vpop.permute.xlu1 %7296  ;;  %2674 = vmatprep.mubr.f32.mxu1 %v2358_v49  ;;  %4494 = vmatprep.mubr.f32.mxu0 %v4246_v14  ;;  %v2568_v34 = vpop.f32.mrb[33].mxu0  ;;  %v9888_v27 = vsel %vm2239_vm3, %v4227_v35, %v7258_v11  ;;  %v9891_v42 = vsel %vm2239_vm3, %v4131_v32, %v7259_v26  ;;  %v4183_v26 = vsel %vm981_vm0, %v7688_v31, %v7198_v61  ;;  %v3062_v32 = vld [vmem:[#allocation2 + $0x86] sm:$0xff]  ;;  %v11934_v61 = vunpack.i.l.bf16 %v9597_v46 }
 0x286   : > { %v7299_v59 = vunpack.i.h.bf16 %v7297_v22  ;;  %v7298_v23 = vunpack.i.l.bf16 %v7297_v22  ;;  %v9895_v48 = vpop.permute.xlu0 %7261  ;;  %2675 = vmatmul.mubr.f32.gmra.mrb[36].mxu1 %v2262_v40  ;;  %4495 = vmatmul.mubr.f32.gmra.mrb[82].mxu0 %v4150_v16  ;;  %v2263_v46 = vsel %vm2239_vm3, %v2230_v30, %v7239_v1  ;;  %v7580_v14 = vpack.i.bf16 %v9865_v45, %v9902_v10  ;;  %v9932_v40 = vld [vmem:[#allocation2 + $0x272] sm:$0xff]  ;;  %v9947_v34 = vld [vmem:[#allocation2 + $0x2be] sm:$0xff] }
 0x287   : > { %v4087_v54 = vsel %vm981_vm0, %v3062_v32, %v11934_v61  ;;  %v7595_v22 = vpack.i.bf16 %v9682_v5, %v9932_v40  ;;  %v7590_v45 = vpack.i.bf16 %v9775_v3, %v9646_v15  ;;  %v3245_v1 = vld [vmem:[#allocation2 + $0x2de] sm:$0xff]  ;;  %v7605_v15 = vpack.i.bf16 %v9802_v57, %v9562_v4  ;;  %v9965_v32 = vld [vmem:[#allocation2 + $0x2e8] sm:$0xff] }
 0x288   : > { %7576 = vrot.lane.b32.xlu1 %v11932_v20, %s11922_s29  ;;  %7571 = vrot.lane.b32.xlu0 %v11933_v2, %s7841_s1  ;;  %v9912_v9 = vpop.f32.mrb[34].mxu0  ;;  %v2327_v29 = vsel %vm2206_vm2, %v2295_v24, %v7299_v59  ;;  %v4215_v43 = vsel %vm2206_vm2, %v4183_v26, %v7298_v23  ;;  %v4119_v13 = vsel %vm2206_vm2, %v4087_v54, %v7128_v6  ;;  %v3212_v59 = vld [vmem:[#allocation2 + $0x292] sm:$0xff]  ;;  %v7204_v23 = vunpack.i.h.bf16 %v9748_v0  ;;  %v9962_v24 = vld [vmem:[#allocation2 + $0x2e6] sm:$0xff] }
 0x289   : > { %v9919_v35 = vpop.permute.xlu1 %7301  ;;  %v2573_v11 = vpop.f32.mrb[35].mxu0  ;;  %v2359_v44 = vsel %vm2239_vm3, %v2327_v29, %v7269_v62  ;;  %v4247_v39 = vsel %vm2239_vm3, %v4215_v43, %v7268_v38  ;;  %v4151_v49 = vsel %vm2239_vm3, %v4119_v13, %v7238_v18  ;;  %v3116_v18 = vld [vmem:[#allocation2 + $0x240] sm:$0xff]  ;;  %v7600_v3 = vpack.i.bf16 %v9791_v7, %v9947_v34  ;;  %v3064_v13 = vld [vmem:[#allocation2 + $0xae] sm:$0xff] }
 0x28a   : > { %v9926_v55 = vpop.permute.xlu0 %7276  ;;  %2679 = vmatprep.mubr.f32.mxu1 %v2359_v44  ;;  %4499 = vmatprep.mubr.f32.mxu0 %v4247_v39  ;;  %v3213_v38 = vld [vmem:[#allocation2 + $0x29a] sm:$0xff]  ;;  %v7203_v31 = vunpack.i.l.bf16 %v9748_v0  ;;  %v7244_v20 = vunpack.i.h.bf16 %v9824_v19  ;;  %v7615_v2 = vpack.i.bf16 %v9806_v17, %v3245_v1  ;;  %v7610_v4 = vpack.i.bf16 %v3116_v18, %v3212_v59  ;;  %v3063_v59 = vld [vmem:[#allocation2 + $0x8e] sm:$0xff] }
 0x28b   : > { %2680 = vmatmul.mubr.f32.gmra.mrb[38].mxu1 %v2263_v46  ;;  %4500 = vmatmul.mubr.f32.gmra.mrb[84].mxu0 %v4151_v49  ;;  %v3277_v26 = vld [vmem:[#allocation2 + $0x2e0] sm:$0xff]  ;;  %v7243_v57 = vunpack.i.l.bf16 %v9824_v19  ;;  %v7304_v7 = vunpack.i.h.bf16 %v9919_v35  ;;  %v7625_v0 = vpack.i.bf16 %v9757_v60, %v3213_v38  ;;  %v7630_v61 = vpack.i.bf16 %v9808_v47, %v9962_v24 }
 0x28c   : > { %7586 = vrot.lane.b32.xlu1 %v11935_v56, %s7841_s1  ;;  %7581 = vrot.lane.b32.xlu0 %v7580_v14, %s7839_s24  ;;  %v1142_v54 = vld [vmem:[#allocation2 + $0x21f] sm:$0xff]  ;;  %v7303_v11 = vunpack.i.l.bf16 %v9919_v35  ;;  %v7620_v17 = vpack.i.bf16 %v9804_v41, %v3277_v26  ;;  %v7635_v19 = vpack.i.bf16 %v9813_v8, %v9965_v32  ;;  %v7249_v46 = vunpack.i.h.bf16 %v9853_v51  ;;  %v1141_v56 = vld [vmem:[#allocation2 + $0x217] sm:$0xff] }
 0x28d   : > { %v9939_v58 = vpop.permute.xlu1 %7326  ;;  %v9985_v30 = vsel %vm981_vm0, %v1142_v54, %v7204_v23  ;;  %v7274_v35 = vunpack.i.h.bf16 %v9818_v52  ;;  %v7248_v41 = vunpack.i.l.bf16 %v9853_v51  ;;  %v2198_v1 = vsel %vm981_vm0, %v1141_v56, %v7244_v20  ;;  %v7689_v20 = vld [vmem:[#allocation2 + $0xe0] sm:$0xff] }
 0x28e   : > { %v9941_v6 = vpop.permute.xlu0 %7281  ;;  %v2296_v38 = vsel %vm981_vm0, %v3116_v18, %v7304_v7  ;;  %v7209_v7 = vunpack.i.h.bf16 %v9770_v37 }
 0x290   : > { %7596 = vrot.lane.b32.xlu1 %v7595_v22, %s7839_s24  ;;  %7591 = vrot.lane.b32.xlu0 %v7590_v45, %s11922_s29  ;;  %v9989_v22 = vsel %vm981_vm0, %v3064_v13, %v7203_v31  ;;  %v7273_v45 = vunpack.i.l.bf16 %v9818_v52  ;;  %v4088_v31 = vsel %vm981_vm0, %v3063_v59, %v7243_v57  ;;  %v2231_v57 = vsel %vm2206_vm2, %v2198_v1, %v7249_v46 }
 0x291   : > { %v9951_v25 = vpop.permute.xlu1 %7331  ;;  %v9953_v16 = vpop.f32.mrb[36].mxu0  ;;  %v2232_v32 = vsel %vm2206_vm2, %v9985_v30, %v7209_v7 }
 0x292   : > { %v9956_v62 = vpop.permute.xlu0 %7306  ;;  %v2578_v5 = vpop.f32.mrb[37].mxu0 }
 0x293   : > { %v7309_v23 = vunpack.i.h.bf16 %v9956_v62  ;;  %v7308_v5 = vunpack.i.l.bf16 %v9956_v62 }
 0x294   : > { %7606 = vrot.lane.b32.xlu1 %v7605_v15, %s11922_s29  ;;  %7601 = vrot.lane.b32.xlu0 %v7600_v3, %s7841_s1 }
 0x295   : > { %v7347_v29 = vpop.permute.xlu1 %7346  ;;  %v9973_v43 = vpop.f32.mrb[38].mxu0  ;;  %v2264_v46 = vsel %vm2239_vm3, %v2231_v57, %v7309_v23  ;;  %v7328_v23 = vunpack.i.l.bf16 %v9939_v58  ;;  %v10063_v57 = vld [vmem:[#allocation2 + $0x270] sm:$0xff] }
 0x296   : > { %v9979_v44 = vpop.permute.xlu0 %7311  ;;  %v2583_v39 = vpop.f32.mrb[39].mxu0  ;;  %v7349_v49 = vunpack.i.h.bf16 %v7347_v29  ;;  %v7348_v14 = vunpack.i.l.bf16 %v7347_v29  ;;  %v4184_v29 = vsel %vm981_vm0, %v7689_v20, %v7303_v11  ;;  %v4120_v11 = vsel %vm2206_vm2, %v4088_v31, %v7248_v41 }
 0x297   : > { %v7313_v56 = vunpack.i.l.bf16 %v9979_v44 }
 0x298   : > { %7616 = vrot.lane.b32.xlu1 %v7615_v2, %s7841_s1  ;;  %7611 = vrot.lane.b32.xlu0 %v7610_v4, %s7839_s24  ;;  %v2328_v62 = vsel %vm2206_vm2, %v2296_v38, %v7349_v49  ;;  %v4216_v18 = vsel %vm2206_vm2, %v4184_v29, %v7348_v14  ;;  %v4152_v14 = vsel %vm2239_vm3, %v4120_v11, %v7308_v5 }
 0x299   : > { %v7352_v15 = vpop.permute.xlu1 %7351  ;;  %v6315_v3 = vpop.f32.mrb[40].mxu0 }
 0x29a   : > { %v7354_v52 = vunpack.i.h.bf16 %v7352_v15  ;;  %v7353_v26 = vunpack.i.l.bf16 %v7352_v15  ;;  %v10001_v51 = vpop.permute.xlu0 %7316  ;;  %v10004_v2 = vadd.f32 %v6315_v3, %v9912_v9  ;;  %v2791_v4 = vpop.f32.mrb[41].mxu0  ;;  %v7329_v15 = vunpack.i.h.bf16 %v9939_v58 }
 0x29b   : > { %v10008_v54 = vadd.f32 %v2791_v4, %v9880_v53  ;;  %v7208_v53 = vunpack.i.l.bf16 %v9770_v37 }
 0x29c   : > { %7626 = vrot.lane.b32.xlu1 %v7625_v0, %s7839_s24  ;;  %7621 = vrot.lane.b32.xlu0 %v7620_v17, %s11922_s29  ;;  %v2360_v9 = vsel %vm2239_vm3, %v2328_v62, %v7354_v52  ;;  %v4248_v39 = vsel %vm2239_vm3, %v4216_v18, %v7353_v26  ;;  %v2297_v0 = vsel %vm981_vm0, %v9757_v60, %v7274_v35  ;;  %v7314_v17 = vunpack.i.h.bf16 %v9979_v44  ;;  %v7690_v35 = vld [vmem:[#allocation2 + $0x100] sm:$0xff]  ;;  %v10047_v52 = vld [vmem:[#allocation2 + $0x268] sm:$0xff] }
 0x29d   : > { %v7357_v13 = vpop.permute.xlu1 %7356  ;;  %2684 = vmatprep.mubr.f32.mxu1 %v2360_v9  ;;  %4504 = vmatprep.mubr.f32.mxu0 %v4248_v39  ;;  %v2586_v49 = vpop.f32.mrb[0].mxu1  ;;  %v4185_v38 = vsel %vm981_vm0, %v7690_v35, %v7273_v45  ;;  %v3247_v44 = vld [vmem:[#allocation2 + $0x306] sm:$0xff]  ;;  %v3214_v45 = vld [vmem:[#allocation2 + $0x2ba] sm:$0xff]  ;;  %v4121_v47 = vsel %vm2206_vm2, %v9989_v22, %v7208_v53 }
 0x29e   : > { %v7359_v1 = vunpack.i.h.bf16 %v7357_v13  ;;  %v7358_v59 = vunpack.i.l.bf16 %v7357_v13  ;;  %v10026_v41 = vpop.permute.xlu0 %7321  ;;  %2685 = vmatmul.mubr.f32.gmra.mrb[40].mxu1 %v2264_v46  ;;  %v6318_v37 = vpop.f32.mrb[42].mxu0  ;;  %4505 = vmatmul.mubr.f32.gmra.mrb[86].mxu0 %v4152_v14  ;;  %v4153_v20 = vsel %vm2239_vm3, %v4121_v47, %v7313_v56  ;;  %v7645_v29 = vpack.i.bf16 %v9902_v10, %v3247_v44  ;;  %v3215_v22 = vld [vmem:[#allocation2 + $0x2c2] sm:$0xff] }
 0x29f   : > { %v10031_v5 = vadd.f32 %v6318_v37, %v9973_v43  ;;  %v2588_v3 = vpop.f32.mrb[1].mxu1  ;;  %v2801_v60 = vpop.f32.mrb[43].mxu0  ;;  %v7640_v30 = vpack.i.bf16 %v10047_v52, %v3214_v45  ;;  %v3279_v39 = vld [vmem:[#allocation2 + $0x308] sm:$0xff]  ;;  %v7655_v46 = vpack.i.bf16 %v10063_v57, %v3215_v22 }
 0x2a0   : > { %v10035_v31 = vadd.f32 %v2801_v60, %v9953_v16  ;;  %7636 = vrot.lane.b32.xlu1 %v7635_v19, %s11922_s29  ;;  %7631 = vrot.lane.b32.xlu0 %v7630_v61, %s7841_s1  ;;  %v2329_v58 = vsel %vm2206_vm2, %v2297_v0, %v7359_v1  ;;  %v4217_v43 = vsel %vm2206_vm2, %v4185_v38, %v7358_v59  ;;  %v3280_v0 = vld [vmem:[#allocation2 + $0x310] sm:$0xff]  ;;  %v7279_v38 = vunpack.i.h.bf16 %v9926_v55 }
 0x2a1   : > { %v10049_v26 = vpop.permute.xlu1 %7361  ;;  %v2591_v16 = vpop.f32.mrb[2].mxu1  ;;  %v2361_v4 = vsel %vm2239_vm3, %v2329_v58, %v7329_v15  ;;  %v4249_v8 = vsel %vm2239_vm3, %v4217_v43, %v7328_v23  ;;  %v2265_v19 = vsel %vm2239_vm3, %v2232_v32, %v7314_v17  ;;  %v7650_v14 = vpack.i.bf16 %v9815_v21, %v3279_v39 }
 0x2a2   : > { %v10057_v24 = vpop.permute.xlu0 %7336  ;;  %2689 = vmatprep.mubr.f32.mxu1 %v2361_v4  ;;  %v6321_v61 = vpop.f32.mrb[44].mxu0  ;;  %4509 = vmatprep.mubr.f32.mxu0 %v4249_v8  ;;  %v7665_v37 = vpack.i.bf16 %v9947_v34, %v3280_v0  ;;  %v7364_v44 = vunpack.i.h.bf16 %v10049_v26  ;;  %v7363_v58 = vunpack.i.l.bf16 %v10049_v26  ;;  %v7324_v26 = vunpack.i.h.bf16 %v10026_v41  ;;  %v7691_v0 = vld [vmem:[#allocation2 + $0x108] sm:$0xff] }
 0x2a3   : > { %v2593_v62 = vpop.f32.mrb[3].mxu1  ;;  %2690 = vmatmul.mubr.f32.gmra.mrb[42].mxu1 %v2265_v19  ;;  %v2811_v18 = vpop.f32.mrb[45].mxu0  ;;  %4510 = vmatmul.mubr.f32.gmra.mrb[88].mxu0 %v4153_v20  ;;  %v10065_v7 = vadd.f32 %v6321_v61, %v2591_v16  ;;  %v7318_v16 = vunpack.i.l.bf16 %v10001_v51  ;;  %v7278_v61 = vunpack.i.l.bf16 %v9926_v55  ;;  %v7284_v19 = vunpack.i.h.bf16 %v9941_v6 }
 0x2a4   : > { %v10067_v9 = vadd.f32 %v2811_v18, %v2586_v49  ;;  %7646 = vrot.lane.b32.xlu1 %v7645_v29, %s7841_s1  ;;  %7641 = vrot.lane.b32.xlu0 %v7640_v30, %s7839_s24  ;;  %v3248_v49 = vld [vmem:[#allocation2 + $0x30e] sm:$0xff]  ;;  %v7323_v20 = vunpack.i.l.bf16 %v10026_v41  ;;  %v7334_v29 = vunpack.i.h.bf16 %v9951_v25  ;;  %v7333_v62 = vunpack.i.l.bf16 %v9951_v25 }
 0x2a5   : > { %11936 = vst [vmem:[#allocation23_spill] sm:$0xff] %v10065_v7  ;;  %v10071_v11 = vpop.permute.xlu1 %7386  ;;  %v6324_v10 = vpop.f32.mrb[46].mxu0  ;;  %v7660_v21 = vpack.i.bf16 %v9932_v40, %v3248_v49  ;;  %v7319_v40 = vunpack.i.h.bf16 %v10001_v51  ;;  %v4186_v41 = vsel %vm981_vm0, %v7691_v0, %v7363_v58  ;;  %v1143_v49 = vld [vmem:[#allocation2 + $0x23f] sm:$0xff] }
 0x2a6   : > { %v10073_v53 = vpop.permute.xlu0 %7341  ;;  %v2821_v13 = vpop.f32.mrb[47].mxu0 }
 0x2a8   : > { %7656 = vrot.lane.b32.xlu1 %v7655_v46, %s7839_s24  ;;  %7651 = vrot.lane.b32.xlu0 %v7650_v14, %s11922_s29  ;;  %v2298_v14 = vsel %vm981_vm0, %v10047_v52, %v7364_v44  ;;  %v7283_v44 = vunpack.i.l.bf16 %v9941_v6  ;;  %s11984_s24 = sld [smem:[#allocation41_spill]] }
 0x2a9   : > { %v10079_v17 = vpop.permute.xlu1 %7391  ;;  %v2596_v56 = vpop.f32.mrb[4].mxu1 }
 0x2aa   : > { %v7367_v1 = vpop.permute.xlu0 %7366  ;;  %v10081_v59 = vpop.f32.mrb[48].mxu0  ;;  %v10084_v15 = vadd.f32 %v2821_v13, %v2596_v56  ;;  %v3065_v56 = vld [vmem:[#allocation2 + $0xb6] sm:$0xff] }
 0x2ab   : > { %v2598_v23 = vpop.f32.mrb[5].mxu1  ;;  %v2831_v3 = vpop.f32.mrb[49].mxu0  ;;  %v7369_v18 = vunpack.i.h.bf16 %v7367_v1  ;;  %v7368_v30 = vunpack.i.l.bf16 %v7367_v1 }
 0x2ac   : > { %11937 = vst [vmem:[#allocation24_spill] sm:$0xff] %v10084_v15  ;;  %7666 = vrot.lane.b32.xlu1 %v7665_v37, %s11922_s29  ;;  %7661 = vrot.lane.b32.xlu0 %v7660_v21, %s7841_s1  ;;  %v2200_v37 = vsel %vm981_vm0, %v1143_v49, %v7319_v40  ;;  %v4090_v23 = vsel %vm981_vm0, %v3065_v56, %v7318_v16  ;;  %v3066_v49 = vld [vmem:[#allocation2 + $0xd6] sm:$0xff] }
 0x2ad   : > { %v7407_v60 = vpop.permute.xlu1 %7406  ;;  %v2601_v35 = vpop.f32.mrb[6].mxu1  ;;  %v4122_v52 = vsel %vm2206_vm2, %v4090_v23, %v7323_v20  ;;  %v7389_v20 = vunpack.i.h.bf16 %v10071_v11 }
 0x2ae   : > { %v10092_v43 = vadd.f32 %v6324_v10, %v2601_v35  ;;  %v10094_v34 = vpop.permute.xlu0 %7371  ;;  %v10096_v45 = vpop.f32.mrb[50].mxu0  ;;  %v7409_v4 = vunpack.i.h.bf16 %v7407_v60  ;;  %v7408_v8 = vunpack.i.l.bf16 %v7407_v60  ;;  %v2233_v35 = vsel %vm2206_vm2, %v2200_v37, %v7324_v26  ;;  %s11042_s1 = scalar_lea.vmem %s11984_s24, %s5955_s30  ;;  %s11575_s30 = scalar_lea.hbm %s11804_s18, %s6064_s27 }
 0x2af   : > { %v2603_v32 = vpop.f32.mrb[7].mxu1  ;;  %v10100_v47 = vpop.f32.mrb[51].mxu0  ;;  %v7374_v58 = vunpack.i.h.bf16 %v10094_v34  ;;  %v2266_v40 = vsel %vm2239_vm3, %v2233_v35, %v7369_v18  ;;  %v4154_v16 = vsel %vm2239_vm3, %v4122_v52, %v7368_v30  ;;  %v7692_v30 = vld [vmem:[#allocation2 + $0x128] sm:$0xff]  ;;  %s7844_s24 = smov [#allocation5]  }
 0x2b0   : > { %11938 = vst [vmem:[#allocation25_spill] sm:$0xff] %v10092_v43  ;;  %v2330_v25 = vsel %vm2206_vm2, %v2298_v14, %v7409_v4  ;;  %v4218_v1 = vsel %vm2206_vm2, %v4186_v41, %v7408_v8  ;;  %v7373_v8 = vunpack.i.l.bf16 %v10094_v34  ;;  %v7388_v14 = vunpack.i.l.bf16 %v10071_v11  ;;  %v1144_v41 = vld [vmem:[#allocation2 + $0x247] sm:$0xff] }
 0x2b1   : > { %v7412_v51 = vpop.permute.xlu1 %7411  ;;  %v10108_v22 = vpop.f32.mrb[52].mxu0  ;;  %v2299_v34 = vsel %vm981_vm0, %v10063_v57, %v7334_v29  ;;  %v4091_v11 = vsel %vm981_vm0, %v3066_v49, %v7278_v61  ;;  %v7339_v49 = vunpack.i.h.bf16 %v10057_v24 }
 0x2b2   : > { %v7414_v39 = vunpack.i.h.bf16 %v7412_v51  ;;  %v7413_v10 = vunpack.i.l.bf16 %v7412_v51  ;;  %v10110_v13 = vpop.permute.xlu0 %7376  ;;  %v10112_v46 = vpop.f32.mrb[53].mxu0 }
 0x2b4   : > { %v2362_v21 = vsel %vm2239_vm3, %v2330_v25, %v7414_v39  ;;  %v4250_v60 = vsel %vm2239_vm3, %v4218_v1, %v7413_v10  ;;  %v2201_v1 = vsel %vm981_vm0, %v1144_v41, %v7279_v38  ;;  %v3068_v41 = vld [vmem:[#allocation2 + $0xfe] sm:$0xff] }
 0x2b5   : > { %v7417_v32 = vpop.permute.xlu1 %7416  ;;  %2694 = vmatprep.mubr.f32.mxu1 %v2362_v21  ;;  %4514 = vmatprep.mubr.f32.mxu0 %v4250_v60  ;;  %v2606_v4 = vpop.f32.mrb[8].mxu1  ;;  %v4123_v21 = vsel %vm2206_vm2, %v4091_v11, %v7283_v44  ;;  %v7379_v11 = vunpack.i.h.bf16 %v10110_v13 }
 0x2b6   : > { %v7419_v51 = vunpack.i.h.bf16 %v7417_v32  ;;  %v7418_v39 = vunpack.i.l.bf16 %v7417_v32  ;;  %v10130_v10 = vadd.f32 %v2831_v3, %v2606_v4  ;;  %v10132_v26 = vpop.permute.xlu0 %7381  ;;  %2695 = vmatmul.mubr.f32.gmra.mrb[44].mxu1 %v2266_v40  ;;  %v10134_v6 = vpop.f32.mrb[54].mxu0  ;;  %4515 = vmatmul.mubr.f32.gmra.mrb[90].mxu0 %v4154_v16  ;;  %v4187_v3 = vsel %vm981_vm0, %v7692_v30, %v7333_v62 }
 0x2b7   : > { %v2608_v0 = vpop.f32.mrb[9].mxu1  ;;  %v10138_v18 = vpop.f32.mrb[55].mxu0  ;;  %v2234_v62 = vsel %vm2206_vm2, %v2201_v1, %v7284_v19  ;;  %v4155_v61 = vsel %vm2239_vm3, %v4123_v21, %v7373_v8  ;;  %v7338_v1 = vunpack.i.l.bf16 %v10057_v24  ;;  %v7384_v21 = vunpack.i.h.bf16 %v10132_v26 }
 0x2b8   : > { %11939 = vst [vmem:[#allocation26_spill] sm:$0xff] %v10130_v10  ;;  %v2331_v56 = vsel %vm2206_vm2, %v2299_v34, %v7419_v51  ;;  %v4219_v25 = vsel %vm2206_vm2, %v4187_v3, %v7418_v39  ;;  %v2267_v38 = vsel %vm2239_vm3, %v2234_v62, %v7374_v58  ;;  %v7378_v62 = vunpack.i.l.bf16 %v10110_v13 }
 0x2b9   : > { %v10149_v37 = vpop.permute.xlu1 %7421  ;;  %v2611_v23 = vpop.f32.mrb[10].mxu1  ;;  %v2363_v57 = vsel %vm2239_vm3, %v2331_v56, %v7389_v20  ;;  %v4251_v29 = vsel %vm2239_vm3, %v4219_v25, %v7388_v14  ;;  %v7343_v24 = vunpack.i.l.bf16 %v10073_v53  ;;  %v7383_v13 = vunpack.i.l.bf16 %v10132_v26 }
 0x2ba   : > { %v10156_v60 = vadd.f32 %v10081_v59, %v2611_v23  ;;  %v10158_v35 = vpop.permute.xlu0 %7396  ;;  %2699 = vmatprep.mubr.f32.mxu1 %v2363_v57  ;;  %v10160_v55 = vpop.f32.mrb[56].mxu0  ;;  %4519 = vmatprep.mubr.f32.mxu0 %v4251_v29  ;;  %v7423_v39 = vunpack.i.l.bf16 %v10149_v37  ;;  %v1146_v29 = vld [vmem:[#allocation2 + $0x26f] sm:$0xff]  ;;  %v7394_v3 = vunpack.i.h.bf16 %v10079_v17 }
 0x2bb   : > { %v2613_v52 = vpop.f32.mrb[11].mxu1  ;;  %2700 = vmatmul.mubr.f32.gmra.mrb[46].mxu1 %v2267_v38  ;;  %v10164_v32 = vpop.f32.mrb[57].mxu0  ;;  %4520 = vmatmul.mubr.f32.gmra.mrb[92].mxu0 %v4155_v61 }
 0x2bc   : > { %11940 = vst [vmem:[#allocation27_spill] sm:$0xff] %v10156_v60 }
 0x2bd   : > { %v10166_v19 = vpop.permute.xlu1 %7446  ;;  %v10168_v44 = vpop.f32.mrb[58].mxu0 }
 0x2be   : > { %v10170_v59 = vpop.permute.xlu0 %7401  ;;  %v10172_v4 = vpop.f32.mrb[59].mxu0 }
 0x2c1   : > { %v10174_v40 = vpop.permute.xlu1 %7451  ;;  %v2616_v16 = vpop.f32.mrb[12].mxu1 }
 0x2c2   : > { %v10177_v58 = vadd.f32 %v10100_v47, %v2616_v16  ;;  %v10179_v8 = vpop.permute.xlu0 %7426  ;;  %v10181_v51 = vpop.f32.mrb[60].mxu0  ;;  %v7344_v16 = vunpack.i.h.bf16 %v10073_v53  ;;  %v7393_v53 = vunpack.i.l.bf16 %v10079_v17  ;;  %v3067_v47 = vld [vmem:[#allocation2 + $0xde] sm:$0xff] }
 0x2c3   : > { %v2618_v34 = vpop.f32.mrb[13].mxu1  ;;  %v10187_v30 = vpop.f32.mrb[61].mxu0  ;;  %v7428_v26 = vunpack.i.l.bf16 %v10179_v8  ;;  %v4092_v17 = vsel %vm981_vm0, %v3067_v47, %v7378_v62  ;;  %v7453_v47 = vunpack.i.l.bf16 %v10174_v40 }
 0x2c4   : > { %11941 = vst [vmem:[#allocation28_spill] sm:$0xff] %v10177_v58  ;;  %v7424_v34 = vunpack.i.h.bf16 %v10149_v37  ;;  %v4093_v37 = vsel %vm981_vm0, %v3068_v41, %v7338_v1  ;;  %v7693_v1 = vld [vmem:[#allocation2 + $0x130] sm:$0xff] }
 0x2c5   : > { %v2621_v23 = vpop.f32.mrb[14].mxu1  ;;  %v10197_v57 = vpop.f32.mrb[62].mxu0 }
 0x2c6   : > { %v7457_v38 = vpop.permute.xlu1 %7456  ;;  %v10203_v61 = vadd.f32 %v10096_v45, %v2621_v23  ;;  %v10205_v52 = vpop.permute.xlu0 %7431  ;;  %v1145_v45 = vld [vmem:[#allocation2 + $0x267] sm:$0xff]  ;;  %v2203_v23 = vsel %vm981_vm0, %v1146_v29, %v7339_v49  ;;  %v10225_v49 = vld [vmem:[#allocation2 + $0x290] sm:$0xff] }
 0x2c7   : > { %v2623_v25 = vpop.f32.mrb[15].mxu1  ;;  %v10211_v56 = vpop.f32.mrb[63].mxu0  ;;  %v7459_v14 = vunpack.i.h.bf16 %v7457_v38  ;;  %v7458_v20 = vunpack.i.l.bf16 %v7457_v38  ;;  %v2202_v0 = vsel %vm981_vm0, %v1145_v45, %v7379_v11  ;;  %v2300_v41 = vsel %vm981_vm0, %v10225_v49, %v7424_v34 }
 0x2c8   : > { %11942 = vst [vmem:[#allocation29_spill] sm:$0xff] %v10203_v61  ;;  %v7429_v61 = vunpack.i.h.bf16 %v10179_v8  ;;  %v2235_v29 = vsel %vm2206_vm2, %v2202_v0, %v7384_v21  ;;  %v4188_v45 = vsel %vm981_vm0, %v7693_v1, %v7423_v39  ;;  %v7454_v8 = vunpack.i.h.bf16 %v10174_v40 }
 0x2c9   : > { %v10219_v25 = vpop.f32.mrb[64].mxu0  ;;  %v2332_v43 = vsel %vm2206_vm2, %v2300_v41, %v7459_v14  ;;  %v4220_v15 = vsel %vm2206_vm2, %v4188_v45, %v7458_v20  ;;  %v4124_v0 = vsel %vm2206_vm2, %v4092_v17, %v7383_v13  ;;  %v7434_v62 = vunpack.i.h.bf16 %v10205_v52  ;;  %v7694_v13 = vld [vmem:[#allocation2 + $0x150] sm:$0xff] }
 0x2ca   : > { %v7462_v38 = vpop.permute.xlu1 %7461  ;;  %v10223_v58 = vpop.permute.xlu0 %7436  ;;  %v7433_v1 = vunpack.i.l.bf16 %v10205_v52  ;;  %v2268_v14 = vsel %vm2239_vm3, %v2235_v29, %v7429_v61  ;;  %v4156_v40 = vsel %vm2239_vm3, %v4124_v0, %v7428_v26  ;;  %v4189_v17 = vsel %vm981_vm0, %v7694_v13, %v7393_v53 }
 0x2cb   : > { %v7464_v60 = vunpack.i.h.bf16 %v7462_v38  ;;  %v7463_v11 = vunpack.i.l.bf16 %v7462_v38  ;;  %v10232_v10 = vpop.f32.mrb[65].mxu0  ;;  %v10242_v38 = vld [vmem:[#allocation2 + $0x298] sm:$0xff]  ;;  %v2236_v52 = vsel %vm2206_vm2, %v2203_v23, %v7344_v16  ;;  %v7449_v61 = vunpack.i.h.bf16 %v10166_v19 }
 0x2cc   : > { %v7448_v26 = vunpack.i.l.bf16 %v10166_v19  ;;  %v4125_v29 = vsel %vm2206_vm2, %v4093_v37, %v7343_v24  ;;  %v2269_v16 = vsel %vm2239_vm3, %v2236_v52, %v7434_v62  ;;  %v7695_v23 = vld [vmem:[#allocation2 + $0x178] sm:$0xff] }
 0x2cd   : > { %v2364_v21 = vsel %vm2239_vm3, %v2332_v43, %v7464_v60  ;;  %v4252_v34 = vsel %vm2239_vm3, %v4220_v15, %v7463_v11  ;;  %v10244_v39 = vpop.f32.mrb[66].mxu0  ;;  %v2301_v43 = vsel %vm981_vm0, %v10242_v38, %v7394_v3  ;;  %v10255_v11 = vld [vmem:[#allocation2 + $0x2c0] sm:$0xff]  ;;  %v4191_v0 = vsel %vm981_vm0, %v7695_v23, %v7453_v47 }
 0x2ce   : > { %v7467_v7 = vpop.permute.xlu1 %7466  ;;  %2704 = vmatprep.mubr.f32.mxu1 %v2364_v21  ;;  %4524 = vmatprep.mubr.f32.mxu0 %v4252_v34  ;;  %v10247_v20 = vpop.permute.xlu0 %7441  ;;  %v11945_v23 = vunpack.i.h.bf16 %v9366_v63 }
 0x2cf   : > { %v7469_v60 = vunpack.i.h.bf16 %v7467_v7  ;;  %v7468_v15 = vunpack.i.l.bf16 %v7467_v7  ;;  %2705 = vmatmul.mubr.f32.gmra.mrb[48].mxu1 %v2268_v14  ;;  %4525 = vmatmul.mubr.f32.gmra.mrb[94].mxu0 %v4156_v40  ;;  %v10257_v41 = vpop.f32.mrb[67].mxu0  ;;  %v2303_v7 = vsel %vm981_vm0, %v10255_v11, %v7454_v8  ;;  %v4157_v8 = vsel %vm2239_vm3, %v4125_v29, %v7433_v1  ;;  %v10282_v1 = vld [vmem:[#allocation2 + $0x2b8] sm:$0xff] }
 0x2d0   : > { %v7439_v14 = vunpack.i.h.bf16 %v10223_v58  ;;  %v7438_v40 = vunpack.i.l.bf16 %v10223_v58  ;;  %v7443_v13 = vunpack.i.l.bf16 %v10247_v20  ;;  %v7404_v58 = vunpack.i.h.bf16 %v10170_v59 }
 0x2d1   : > { %v2626_v3 = vpop.f32.mrb[16].mxu1  ;;  %v2333_v45 = vsel %vm2206_vm2, %v2301_v43, %v7469_v60  ;;  %v4221_v53 = vsel %vm2206_vm2, %v4189_v17, %v7468_v15  ;;  %v7398_v60 = vunpack.i.l.bf16 %v10158_v35  ;;  %v7444_v15 = vunpack.i.h.bf16 %v10247_v20 }
 0x2d2   : > { %v7472_v21 = vpop.permute.xlu1 %7471  ;;  %v10269_v34 = vadd.f32 %v10112_v46, %v2626_v3  ;;  %v10271_v19 = vpop.permute.xlu0 %7481  ;;  %v2365_v24 = vsel %vm2239_vm3, %v2333_v45, %v7449_v61  ;;  %v4253_v37 = vsel %vm2239_vm3, %v4221_v53, %v7448_v26  ;;  %v7399_v46 = vunpack.i.h.bf16 %v10158_v35  ;;  %v7696_v26 = vld [vmem:[#allocation2 + $0x158] sm:$0xff] }
 0x2d3   : > { %v7474_v62 = vunpack.i.h.bf16 %v7472_v21  ;;  %v7473_v43 = vunpack.i.l.bf16 %v7472_v21  ;;  %2709 = vmatprep.mubr.f32.mxu1 %v2365_v24  ;;  %4529 = vmatprep.mubr.f32.mxu0 %v4253_v37  ;;  %v2628_v47 = vpop.f32.mrb[17].mxu1  ;;  %v10284_v17 = vpop.f32.mrb[68].mxu0  ;;  %v11944_v35 = vunpack.i.h.bf16 %v9490_v12  ;;  %v11946_v24 = vunpack.i.l.bf16 %v9366_v63 }
 0x2d4   : > { %2710 = vmatmul.mubr.f32.gmra.mrb[50].mxu1 %v2269_v16  ;;  %4530 = vmatmul.mubr.f32.gmra.mrb[96].mxu0 %v4157_v8  ;;  %11943 = vst [vmem:[#allocation30_spill] sm:$0xff] %v10284_v17  ;;  %v10293_v20 = vpop.f32.mrb[69].mxu0  ;;  %v1147_v8 = vld [vmem:[#allocation2 + $0x28f] sm:$0xff]  ;;  %v11948_v17 = vunpack.i.h.bf16 %v9300_v50  ;;  %v11949_v63 = vunpack.i.l.bf16 %v9300_v50  ;;  %v6924_v50 = vunpack.i.h.bf16 %v9183_v28 }
 0x2d5   : > { %v2631_v52 = vpop.f32.mrb[18].mxu1  ;;  %v2302_v61 = vsel %vm981_vm0, %v10282_v1, %v7474_v62  ;;  %v4190_v29 = vsel %vm981_vm0, %v7696_v26, %v7473_v43  ;;  %v2335_v3 = vsel %vm2206_vm2, %v2303_v7, %v11944_v35  ;;  %v3069_v62 = vld [vmem:[#allocation2 + $0x106] sm:$0xff]  ;;  %v11947_v7 = vunpack.i.l.bf16 %v9490_v12 }
 0x2d6   : > { %v10295_v45 = vpop.permute.xlu1 %7476  ;;  %v10298_v53 = vadd.f32 %v10108_v22, %v2631_v52  ;;  %v7492_v16 = vpop.permute.xlu0 %7491  ;;  %v2334_v21 = vsel %vm2206_vm2, %v2302_v61, %v11945_v23  ;;  %v4222_v37 = vsel %vm2206_vm2, %v4190_v29, %v11946_v24  ;;  %v2204_v22 = vsel %vm981_vm0, %v1147_v8, %v7439_v14  ;;  %v1148_v8 = vld [vmem:[#allocation2 + $0x297] sm:$0xff] }
 0x2d7   : > { %v4223_v43 = vsel %vm2206_vm2, %v4191_v0, %v11947_v7  ;;  %v7494_v47 = vunpack.i.h.bf16 %v7492_v16  ;;  %v7493_v26 = vunpack.i.l.bf16 %v7492_v16  ;;  %v2633_v35 = vpop.f32.mrb[19].mxu1  ;;  %v4094_v52 = vsel %vm981_vm0, %v3069_v62, %v7438_v40  ;;  %v10319_v0 = vpop.f32.mrb[70].mxu0 }
 0x2d8   : > { %v2366_v61 = vsel %vm2239_vm3, %v2334_v21, %v11948_v17  ;;  %v4254_v29 = vsel %vm2239_vm3, %v4222_v37, %v11949_v63  ;;  %v2237_v23 = vsel %vm2206_vm2, %v2204_v22, %v7444_v15  ;;  %v4126_v12 = vsel %vm2206_vm2, %v4094_v52, %v7443_v13  ;;  %v10324_v24 = vpop.f32.mrb[71].mxu0  ;;  %v7697_v35 = vld [vmem:[#allocation2 + $0x180] sm:$0xff] }
 0x2d9   : > { %v7403_v16 = vunpack.i.l.bf16 %v10170_v59  ;;  %2714 = vmatprep.mubr.f32.mxu1 %v2366_v61  ;;  %4534 = vmatprep.mubr.f32.mxu0 %v4254_v29  ;;  %v2270_v14 = vsel %vm2239_vm3, %v2237_v23, %v7494_v47  ;;  %v4158_v40 = vsel %vm2239_vm3, %v4126_v12, %v7493_v26  ;;  %v11950_v15 = vunpack.i.h.bf16 %v9507_v33  ;;  %v3070_v26 = vld [vmem:[#allocation2 + $0x126] sm:$0xff]  ;;  %v11955_v12 = vld [vmem:[#allocation18_spill] sm:$0xff] }
 0x2da   : > { %v10327_v17 = vpop.permute.xlu1 %7486  ;;  %v7497_v21 = vpop.permute.xlu0 %7496  ;;  %2715 = vmatmul.mubr.f32.gmra.mrb[52].mxu1 %v2270_v14  ;;  %4535 = vmatmul.mubr.f32.gmra.mrb[98].mxu0 %v4158_v40  ;;  %v11951_v59 = vunpack.i.l.bf16 %v9507_v33  ;;  %v7104_v62 = vunpack.i.h.bf16 %v9558_v36  ;;  %v2205_v47 = vsel %vm981_vm0, %v1148_v8, %v7399_v46  ;;  %v11952_v22 = vunpack.i.l.bf16 %v9183_v28  ;;  %v11954_v29 = vld [vmem:[#allocation16_spill] sm:$0xff] }
 0x2db   : > { %v2367_v13 = vsel %vm2239_vm3, %v2335_v3, %v11950_v15  ;;  %v7499_v7 = vunpack.i.h.bf16 %v7497_v21  ;;  %v7498_v61 = vunpack.i.l.bf16 %v7497_v21  ;;  %v2238_v3 = vsel %vm2206_vm2, %v2205_v47, %v7404_v58  ;;  %v3071_v28 = vld [vmem:[#allocation2 + $0x12e] sm:$0xff] }
 0x2dc   : > { %v4255_v37 = vsel %vm2239_vm3, %v4223_v43, %v11951_v59  ;;  %2719 = vmatprep.mubr.f32.mxu1 %v2367_v13  ;;  %v4192_v52 = vsel %vm981_vm0, %v7697_v35, %v11952_v22  ;;  %v4095_v33 = vsel %vm981_vm0, %v3070_v26, %v7398_v60  ;;  %v11953_v43 = vunpack.i.l.bf16 %v9558_v36  ;;  %v11956_v15 = vld [vmem:[#allocation20_spill] sm:$0xff]  ;;  %v11958_v47 = vld [vmem:[#allocation21_spill] sm:$0xff] }
 0x2dd   : > { %4539 = vmatprep.mubr.f32.mxu0 %v4255_v37  ;;  %v7043_v23 = vunpack.i.l.bf16 %v11954_v29  ;;  %v7018_v14 = vunpack.i.l.bf16 %v11955_v12  ;;  %v2271_v46 = vsel %vm2239_vm3, %v2238_v3, %v7499_v7  ;;  %v4127_v40 = vsel %vm2206_vm2, %v4095_v33, %v7403_v16  ;;  %v3281_v60 = vld [vmem:[#allocation2 + $0xb2] sm:$0xff]  ;;  %v11957_v37 = vld [vmem:[#allocation15_spill] sm:$0xff]  ;;  %v3282_v3 = vld [vmem:[#allocation2 + $0xba] sm:$0xff] }
 0x2de   : > { %v4224_v63 = vsel %vm2206_vm2, %v4192_v52, %v11953_v43  ;;  %v7178_v13 = vunpack.i.l.bf16 %v11956_v15  ;;  %v10350_v21 = vpop.permute.xlu1 %7506  ;;  %v10352_v58 = vpop.permute.xlu0 %7501  ;;  %2720 = vmatmul.mubr.f32.gmra.mrb[54].mxu1 %v2271_v46  ;;  %v4159_v36 = vsel %vm2239_vm3, %v4127_v40, %v7498_v61  ;;  %v4096_v59 = vsel %vm981_vm0, %v3071_v28, %v6924_v50  ;;  %v11959_v52 = vld [vmem:[#allocation22_spill] sm:$0xff] }
 0x2df   : > { %v6973_v8 = vunpack.i.l.bf16 %v11957_v37  ;;  %v7183_v26 = vunpack.i.l.bf16 %v11958_v47  ;;  %4540 = vmatmul.mubr.f32.gmra.mrb[100].mxu0 %v4159_v36  ;;  %v4256_v16 = vsel %vm2239_vm3, %v4224_v63, %v7043_v23  ;;  %6369 = vmatprep.mubr.msk.f32.mxu1 %vm981_vm0, %v3281_v60  ;;  %v4128_v7 = vsel %vm2206_vm2, %v4096_v59, %v7104_v62  ;;  %v7698_v33 = vld [vmem:[#allocation2 + $0x1a0] sm:$0xff]  ;;  %v7699_v36 = vld [vmem:[#allocation2 + $0x1a8] sm:$0xff] }
 0x2e0   : > { %v7044_v35 = vunpack.i.h.bf16 %v11954_v29  ;;  %v7019_v22 = vunpack.i.h.bf16 %v11955_v12  ;;  %v7188_v61 = vunpack.i.l.bf16 %v11959_v52  ;;  %4544 = vmatprep.mubr.f32.mxu0 %v4256_v16  ;;  %v7179_v50 = vunpack.i.h.bf16 %v11956_v15  ;;  %v3283_v40 = vld [vmem:[#allocation2 + $0xda] sm:$0xff]  ;;  %v3072_v15 = vld [vmem:[#allocation2 + $0x14e] sm:$0xff] }
 0x2e1   : > { %v4193_v43 = vsel %vm981_vm0, %v7698_v33, %v7018_v14  ;;  %v6974_v46 = vunpack.i.h.bf16 %v11957_v37  ;;  %v7184_v63 = vunpack.i.h.bf16 %v11958_v47  ;;  %v7189_v28 = vunpack.i.h.bf16 %v11959_v52  ;;  %v11960_v47 = vld [vmem:[#allocation19_spill] sm:$0xff]  ;;  %v3073_v52 = vld [vmem:[#allocation2 + $0x156] sm:$0xff] }
 0x2e2   : > { %v10368_v23 = vpop.permute.xlu1 %7516  ;;  %v10370_v62 = vpop.permute.xlu0 %7511  ;;  %v4160_v29 = vsel %vm2239_vm3, %v4128_v7, %v7044_v35  ;;  %6370 = vmatmul.mubr.msk.f32.vlgmr.msra.gmra.mrb[56].mxu1 %vm981_vm0, %v3282_v3  ;;  %v4225_v12 = vsel %vm2206_vm2, %v4193_v43, %v7178_v13  ;;  %v4194_v60 = vsel %vm981_vm0, %v7699_v36, %v6973_v8  ;;  %v4097_v59 = vsel %vm981_vm0, %v3072_v15, %v7019_v22  ;;  %v3284_v35 = vld [vmem:[#allocation2 + $0xe2] sm:$0xff] }
 0x2e3   : > { %4545 = vmatmul.mubr.f32.gmra.mrb[102].mxu0 %v4160_v29  ;;  %v4257_v14 = vsel %vm2239_vm3, %v4225_v12, %v7183_v26  ;;  %6372 = vmatprep.mubr.msk.f32.mxu1 %vm981_vm0, %v3283_v40  ;;  %v4226_v37 = vsel %vm2206_vm2, %v4194_v60, %v7188_v61  ;;  %v7133_v16 = vunpack.i.l.bf16 %v11960_v47  ;;  %v4129_v7 = vsel %vm2206_vm2, %v4097_v59, %v7179_v50  ;;  %v3285_v22 = vld [vmem:[#allocation2 + $0x102] sm:$0xff]  ;;  %v11961_v12 = vld [vmem:[#allocation17_spill] sm:$0xff] }
 0x2e4   : > { %4549 = vmatprep.mubr.f32.mxu0 %v4257_v14  ;;  %v4161_v8 = vsel %vm2239_vm3, %v4129_v7, %v7184_v63  ;;  %v4098_v61 = vsel %vm981_vm0, %v3073_v52, %v6974_v46  ;;  %v7048_v40 = vunpack.i.l.bf16 %v11961_v12  ;;  %v3286_v63 = vld [vmem:[#allocation2 + $0x10a] sm:$0xff]  ;;  %v7263_v15 = vunpack.i.l.bf16 %v9895_v48  ;;  %v3288_v7 = vld [vmem:[#allocation2 + $0x132] sm:$0xff] }
 0x2e5   : > { %v2636_v13 = vpop.f32.mrb[20].mxu1  ;;  %v4258_v50 = vsel %vm2239_vm3, %v4226_v37, %v7133_v16  ;;  %v4130_v29 = vsel %vm2206_vm2, %v4098_v61, %v7189_v28  ;;  %v3287_v28 = vld [vmem:[#allocation2 + $0x12a] sm:$0xff]  ;;  %v7478_v37 = vunpack.i.l.bf16 %v10295_v45  ;;  %v7049_v16 = vunpack.i.h.bf16 %v11961_v12 }
 0x2e6   : > { %v10383_v3 = vpop.permute.xlu1 %7526  ;;  %v10386_v26 = vadd.f32 %v10138_v18, %v2636_v13  ;;  %v10388_v33 = vpop.permute.xlu0 %7521  ;;  %6373 = vmatmul.mubr.msk.f32.gmra.mrb[58].mxu1 %vm981_vm0, %v3284_v35  ;;  %v7134_v18 = vunpack.i.h.bf16 %v11960_v47  ;;  %v7483_v13 = vunpack.i.l.bf16 %v10271_v19  ;;  %v7700_v35 = vld [vmem:[#allocation2 + $0x1d0] sm:$0xff]  ;;  %v7484_v12 = vunpack.i.h.bf16 %v10271_v19 }
 0x2e7   : > { %4550 = vmatmul.mubr.f32.gmra.mrb[104].mxu0 %v4161_v8  ;;  %v2638_v43 = vpop.f32.mrb[21].mxu1  ;;  %6375 = vmatprep.mubr.msk.f32.mxu1 %vm981_vm0, %v3285_v22  ;;  %v4196_v52 = vsel %vm981_vm0, %v7700_v35, %v7048_v40  ;;  %v7479_v8 = vunpack.i.h.bf16 %v10295_v45  ;;  %v7488_v22 = vunpack.i.l.bf16 %v10327_v17  ;;  %v3075_v45 = vld [vmem:[#allocation2 + $0x17e] sm:$0xff]  ;;  %v7513_v40 = vunpack.i.l.bf16 %v10370_v62 }
 0x2e8   : > { %4554 = vmatprep.mubr.f32.mxu0 %v4258_v50  ;;  %v4162_v59 = vsel %vm2239_vm3, %v4130_v29, %v7134_v18  ;;  %v3289_v50 = vld [vmem:[#allocation2 + $0x152] sm:$0xff]  ;;  %v7503_v29 = vunpack.i.l.bf16 %v10352_v58 }
 0x2e9   : > { %v2641_v14 = vpop.f32.mrb[22].mxu1 }
 0x2ea   : > { %v10399_v36 = vpop.permute.xlu1 %7536  ;;  %v10402_v46 = vadd.f32 %v10134_v6, %v2641_v14  ;;  %v10404_v60 = vpop.permute.xlu0 %7531  ;;  %6376 = vmatmul.mubr.msk.f32.gmra.mrb[60].mxu1 %vm981_vm0, %v3286_v63  ;;  %v7264_v6 = vunpack.i.h.bf16 %v9895_v48  ;;  %v7508_v48 = vunpack.i.l.bf16 %v10350_v21  ;;  %v4100_v14 = vsel %vm981_vm0, %v3075_v45, %v7049_v16  ;;  %v3292_v45 = vld [vmem:[#allocation2 + $0x182] sm:$0xff] }
 0x2eb   : > { %4555 = vmatmul.mubr.f32.gmra.mrb[106].mxu0 %v4162_v59  ;;  %v2643_v47 = vpop.f32.mrb[23].mxu1  ;;  %6378 = vmatprep.mubr.msk.f32.mxu1 %vm981_vm0, %v3287_v28  ;;  %v7489_v63 = vunpack.i.h.bf16 %v10327_v17  ;;  %v3290_v28 = vld [vmem:[#allocation2 + $0x15a] sm:$0xff] }
 0x2ec   : > { %4559 = vmatprep.mubr.f32.mxu0 %v9888_v27  ;;  %v4228_v27 = vsel %vm2206_vm2, %v4196_v52, %v7263_v15  ;;  %v7509_v15 = vunpack.i.h.bf16 %v10350_v21  ;;  %v4132_v59 = vsel %vm2206_vm2, %v4100_v14, %v7264_v6  ;;  %v7504_v47 = vunpack.i.h.bf16 %v10352_v58  ;;  %v3291_v21 = vld [vmem:[#allocation2 + $0x17a] sm:$0xff] }
 0x2ed   : > { %v4260_v18 = vsel %vm2239_vm3, %v4228_v27, %v7478_v37  ;;  %v4164_v16 = vsel %vm2239_vm3, %v4132_v59, %v7479_v8  ;;  %v7523_v6 = vunpack.i.l.bf16 %v10388_v33  ;;  %v3076_v58 = vld [vmem:[#allocation2 + $0x19e] sm:$0xff]  ;;  %v7524_v59 = vunpack.i.h.bf16 %v10388_v33 }
 0x2ee   : > { %v10417_v61 = vpop.permute.xlu1 %7546  ;;  %v10419_v43 = vpop.permute.xlu0 %7541  ;;  %6379 = vmatmul.mubr.msk.f32.gmra.mrb[62].mxu1 %vm981_vm0, %v3288_v7  ;;  %v7514_v7 = vunpack.i.h.bf16 %v10370_v62  ;;  %v7702_v62 = vld [vmem:[#allocation2 + $0x1f8] sm:$0xff]  ;;  %v4101_v27 = vsel %vm981_vm0, %v3076_v58, %v7484_v12  ;;  %v7534_v58 = vunpack.i.h.bf16 %v10404_v60 }
 0x2ef   : > { %4560 = vmatmul.mubr.f32.gmra.mrb[108].mxu0 %v9891_v42  ;;  %6381 = vmatprep.mubr.msk.f32.mxu1 %vm981_vm0, %v3289_v50  ;;  %v7701_v42 = vld [vmem:[#allocation2 + $0x1f0] sm:$0xff]  ;;  %v4198_v52 = vsel %vm981_vm0, %v7702_v62, %v7508_v48  ;;  %v3077_v50 = vld [vmem:[#allocation2 + $0x1a6] sm:$0xff]  ;;  %v7703_v33 = vld [vmem:[#allocation2 + $0x218] sm:$0xff]  ;;  %v7544_v62 = vunpack.i.h.bf16 %v10419_v43 }
 0x2f0   : > { %4564 = vmatprep.mubr.f32.mxu0 %v4260_v18  ;;  %v4197_v37 = vsel %vm981_vm0, %v7701_v42, %v7483_v13  ;;  %v4230_v8 = vsel %vm2206_vm2, %v4198_v52, %v7513_v40  ;;  %v4133_v18 = vsel %vm2206_vm2, %v4101_v27, %v7489_v63  ;;  %v4102_v14 = vsel %vm981_vm0, %v3077_v50, %v7509_v15  ;;  %v3293_v40 = vld [vmem:[#allocation2 + $0x1a2] sm:$0xff] }
 0x2f1   : > { %v4229_v17 = vsel %vm2206_vm2, %v4197_v37, %v7488_v22  ;;  %v7518_v22 = vunpack.i.l.bf16 %v10368_v23  ;;  %v4165_v12 = vsel %vm2239_vm3, %v4133_v18, %v7504_v47  ;;  %v4134_v42 = vsel %vm2206_vm2, %v4102_v14, %v7514_v7  ;;  %v3079_v14 = vld [vmem:[#allocation2 + $0x1ce] sm:$0xff] }
 0x2f2   : > { %v10437_v19 = vpop.permute.xlu1 %7556  ;;  %v10439_v35 = vpop.permute.xlu0 %7551  ;;  %6382 = vmatmul.mubr.msk.f32.gmra.mrb[64].mxu1 %vm981_vm0, %v3290_v28  ;;  %v4261_v13 = vsel %vm2239_vm3, %v4229_v17, %v7503_v29  ;;  %v7519_v29 = vunpack.i.h.bf16 %v10368_v23  ;;  %v7538_v63 = vunpack.i.l.bf16 %v10399_v36  ;;  %v7533_v37 = vunpack.i.l.bf16 %v10404_v60 }
 0x2f3   : > { %4565 = vmatmul.mubr.f32.gmra.mrb[110].mxu0 %v4164_v16  ;;  %6384 = vmatprep.mubr.msk.f32.mxu1 %vm981_vm0, %v3291_v21  ;;  %v4262_v23 = vsel %vm2239_vm3, %v4230_v8, %v7518_v22  ;;  %v4199_v15 = vsel %vm981_vm0, %v7703_v33, %v7523_v6  ;;  %v7528_v16 = vunpack.i.l.bf16 %v10383_v3  ;;  %v7543_v47 = vunpack.i.l.bf16 %v10419_v43  ;;  %v3294_v21 = vld [vmem:[#allocation2 + $0x1aa] sm:$0xff]  ;;  %v7704_v43 = vld [vmem:[#allocation2 + $0x220] sm:$0xff]  ;;  %v3297_v33 = vld [vmem:[#allocation2 + $0x1f2] sm:$0xff] }
 0x2f4   : > { %4569 = vmatprep.mubr.f32.mxu0 %v4261_v13  ;;  %v7539_v17 = vunpack.i.h.bf16 %v10399_v36  ;;  %v4166_v7 = vsel %vm2239_vm3, %v4134_v42, %v7519_v29  ;;  %v3078_v13 = vld [vmem:[#allocation2 + $0x1c6] sm:$0xff]  ;;  %v7529_v36 = vunpack.i.h.bf16 %v10383_v3  ;;  %v7553_v22 = vunpack.i.l.bf16 %v10439_v35 }
 0x2f5   : > { %v4231_v6 = vsel %vm2206_vm2, %v4199_v15, %v7528_v16  ;;  %v3295_v8 = vld [vmem:[#allocation2 + $0x1ca] sm:$0xff]  ;;  %v4103_v50 = vsel %vm981_vm0, %v3078_v13, %v7524_v59  ;;  %v4200_v18 = vsel %vm981_vm0, %v7704_v43, %v7538_v63  ;;  %v7548_v29 = vunpack.i.l.bf16 %v10417_v61 }
 0x2f6   : > { %v10455_v28 = vpop.permute.xlu1 %7566  ;;  %v10457_v48 = vpop.permute.xlu0 %7561  ;;  %6385 = vmatmul.mubr.msk.f32.gmra.mrb[66].mxu1 %vm981_vm0, %v3292_v45  ;;  %v4263_v60 = vsel %vm2239_vm3, %v4231_v6, %v7533_v37  ;;  %v4232_v45 = vsel %vm2206_vm2, %v4200_v18, %v7543_v47  ;;  %v4135_v59 = vsel %vm2206_vm2, %v4103_v50, %v7529_v36  ;;  %v4104_v3 = vsel %vm981_vm0, %v3079_v14, %v7539_v17  ;;  %v3298_v6 = vld [vmem:[#allocation2 + $0x1fa] sm:$0xff] }
 0x2f7   : > { %4570 = vmatmul.mubr.f32.gmra.mrb[112].mxu0 %v4165_v12  ;;  %6387 = vmatprep.mubr.msk.f32.mxu1 %vm981_vm0, %v3293_v40  ;;  %v3296_v12 = vld [vmem:[#allocation2 + $0x1d2] sm:$0xff]  ;;  %v7549_v40 = vunpack.i.h.bf16 %v10417_v61  ;;  %v7554_v42 = vunpack.i.h.bf16 %v10439_v35  ;;  %v4167_v63 = vsel %vm2239_vm3, %v4135_v59, %v7534_v58  ;;  %v4136_v15 = vsel %vm2206_vm2, %v4104_v3, %v7544_v62  ;;  %v7705_v35 = vld [vmem:[#allocation2 + $0x240] sm:$0xff] }
 0x2f8   : > { %4574 = vmatprep.mubr.f32.mxu0 %v4262_v23  ;;  %v7568_v16 = vunpack.i.l.bf16 %v10455_v28  ;;  %v7563_v47 = vunpack.i.l.bf16 %v10457_v48  ;;  %v4264_v61 = vsel %vm2239_vm3, %v4232_v45, %v7548_v29  ;;  %v4201_v17 = vsel %vm981_vm0, %v7705_v35, %v7553_v22  ;;  %v3299_v18 = vld [vmem:[#allocation2 + $0x21a] sm:$0xff] }
 0x2f9   : > { %v7569_v13 = vunpack.i.h.bf16 %v10455_v28  ;;  %v4168_v62 = vsel %vm2239_vm3, %v4136_v15, %v7549_v40  ;;  %v7564_v50 = vunpack.i.h.bf16 %v10457_v48  ;;  %v7559_v45 = vunpack.i.h.bf16 %v10437_v19  ;;  %v3081_v3 = vld [vmem:[#allocation2 + $0x1f6] sm:$0xff] }
 0x2fa   : > { %v10473_v52 = vpop.permute.xlu1 %7576  ;;  %v10475_v27 = vpop.permute.xlu0 %7571  ;;  %6388 = vmatmul.mubr.msk.f32.gmra.mrb[68].mxu1 %vm981_vm0, %v3294_v21 }
 0x2fb   : > { %4575 = vmatmul.mubr.f32.gmra.mrb[114].mxu0 %v4166_v7  ;;  %6390 = vmatprep.mubr.msk.f32.mxu1 %vm981_vm0, %v3295_v8  ;;  %v7558_v7 = vunpack.i.l.bf16 %v10437_v19  ;;  %v7573_v21 = vunpack.i.l.bf16 %v10475_v27  ;;  %v3080_v8 = vld [vmem:[#allocation2 + $0x1ee] sm:$0xff]  ;;  %v7574_v36 = vunpack.i.h.bf16 %v10475_v27  ;;  %v7578_v40 = vunpack.i.l.bf16 %v10473_v52 }
 0x2fc   : > { %4579 = vmatprep.mubr.f32.mxu0 %v4263_v60  ;;  %v4105_v28 = vsel %vm981_vm0, %v3080_v8, %v7554_v42  ;;  %v7706_v27 = vld [vmem:[#allocation2 + $0x248] sm:$0xff]  ;;  %v4106_v15 = vsel %vm981_vm0, %v3081_v3, %v7569_v13 }
 0x2fd   : > { %v4233_v43 = vsel %vm2206_vm2, %v4201_v17, %v7558_v7  ;;  %v4202_v59 = vsel %vm981_vm0, %v7706_v27, %v7568_v16  ;;  %v3301_v7 = vld [vmem:[#allocation2 + $0x242] sm:$0xff] }
 0x2fe   : > { %v10491_v37 = vpop.permute.xlu1 %7586  ;;  %v10493_v23 = vpop.permute.xlu0 %7581  ;;  %6391 = vmatmul.mubr.msk.f32.gmra.mrb[70].mxu1 %vm981_vm0, %v3296_v12  ;;  %v4265_v48 = vsel %vm2239_vm3, %v4233_v43, %v7563_v47  ;;  %v4234_v12 = vsel %vm2206_vm2, %v4202_v59, %v7573_v21  ;;  %v7579_v47 = vunpack.i.h.bf16 %v10473_v52  ;;  %v3082_v43 = vld [vmem:[#allocation2 + $0x216] sm:$0xff] }
 0x2ff   : > { %4580 = vmatmul.mubr.f32.gmra.mrb[116].mxu0 %v4167_v63  ;;  %6393 = vmatprep.mubr.msk.f32.mxu1 %vm981_vm0, %v3297_v33  ;;  %v7583_v14 = vunpack.i.l.bf16 %v10493_v23  ;;  %v7584_v42 = vunpack.i.h.bf16 %v10493_v23  ;;  %v4137_v63 = vsel %vm2206_vm2, %v4105_v28, %v7559_v45  ;;  %v3300_v33 = vld [vmem:[#allocation2 + $0x222] sm:$0xff]  ;;  %v4138_v23 = vsel %vm2206_vm2, %v4106_v15, %v7574_v36  ;;  %v3302_v45 = vld [vmem:[#allocation2 + $0x24a] sm:$0xff] }
 0x300   : > { %4584 = vmatprep.mubr.f32.mxu0 %v4264_v61  ;;  %v4169_v17 = vsel %vm2239_vm3, %v4137_v63, %v7564_v50  ;;  %v4266_v52 = vsel %vm2239_vm3, %v4234_v12, %v7578_v40  ;;  %v7588_v8 = vunpack.i.l.bf16 %v10491_v37  ;;  %v4170_v28 = vsel %vm2239_vm3, %v4138_v23, %v7579_v47  ;;  %v3303_v40 = vld [vmem:[#allocation2 + $0x26a] sm:$0xff]  ;;  %v3083_v15 = vld [vmem:[#allocation2 + $0x21e] sm:$0xff] }
 0x301   : > { %v10506_v58 = vpop.f32.mrb[72].mxu0 }
 0x302   : > { %v10511_v60 = vpop.permute.xlu1 %7596  ;;  %v10513_v22 = vpop.permute.xlu0 %7591  ;;  %6394 = vmatmul.mubr.msk.f32.gmra.mrb[72].mxu1 %vm981_vm0, %v3298_v6 }
 0x303   : > { %4585 = vmatmul.mubr.f32.gmra.mrb[118].mxu0 %v4168_v62  ;;  %v4473_v29 = vpop.f32.mrb[73].mxu0  ;;  %6396 = vmatprep.mubr.msk.f32.mxu1 %vm981_vm0, %v3299_v18  ;;  %v7598_v21 = vunpack.i.l.bf16 %v10511_v60  ;;  %v7593_v62 = vunpack.i.l.bf16 %v10513_v22  ;;  %v7599_v36 = vunpack.i.h.bf16 %v10511_v60  ;;  %v7589_v60 = vunpack.i.h.bf16 %v10491_v37 }
 0x304   : > { %4589 = vmatprep.mubr.f32.mxu0 %v4265_v48  ;;  %v4107_v29 = vsel %vm981_vm0, %v3082_v43, %v7584_v42  ;;  %v7594_v48 = vunpack.i.h.bf16 %v10513_v22  ;;  %v7708_v22 = vld [vmem:[#allocation2 + $0x270] sm:$0xff] }
 0x305   : > { %v2646_v19 = vpop.f32.mrb[24].mxu1  ;;  %v4108_v37 = vsel %vm981_vm0, %v3083_v15, %v7599_v36 }
 0x306   : > { %v10529_v61 = vpop.permute.xlu1 %7606  ;;  %v10532_v16 = vadd.f32 %v10164_v32, %v2646_v19  ;;  %v7602_v35 = vpop.permute.xlu0 %7601  ;;  %6397 = vmatmul.mubr.msk.f32.gmra.mrb[74].mxu1 %vm981_vm0, %v3300_v33  ;;  %v7707_v32 = vld [vmem:[#allocation2 + $0x268] sm:$0xff]  ;;  %v4204_v33 = vsel %vm981_vm0, %v7708_v22, %v7598_v21 }
 0x307   : > { %4590 = vmatmul.mubr.f32.gmra.mrb[120].mxu0 %v4169_v17  ;;  %v2648_v13 = vpop.f32.mrb[25].mxu1  ;;  %6399 = vmatprep.mubr.msk.f32.mxu1 %vm981_vm0, %v3301_v7  ;;  %v4203_v6 = vsel %vm981_vm0, %v7707_v32, %v7583_v14  ;;  %v7603_v50 = vunpack.i.l.bf16 %v7602_v35  ;;  %v7604_v27 = vunpack.i.h.bf16 %v7602_v35  ;;  %v7608_v47 = vunpack.i.l.bf16 %v10529_v61  ;;  %v3304_v17 = vld [vmem:[#allocation2 + $0x272] sm:$0xff] }
 0x308   : > { %4594 = vmatprep.mubr.f32.mxu0 %v4266_v52  ;;  %v4235_v3 = vsel %vm2206_vm2, %v4203_v6, %v7588_v8  ;;  %v4139_v35 = vsel %vm2206_vm2, %v4107_v29, %v7589_v60  ;;  %v3305_v52 = vld [vmem:[#allocation2 + $0x292] sm:$0xff]  ;;  %v7609_v6 = vunpack.i.h.bf16 %v10529_v61  ;;  %v3084_v29 = vld [vmem:[#allocation2 + $0x23e] sm:$0xff] }
 0x309   : > { %v2651_v18 = vpop.f32.mrb[26].mxu1  ;;  %v4267_v42 = vsel %vm2239_vm3, %v4235_v3, %v7593_v62  ;;  %v4171_v62 = vsel %vm2239_vm3, %v4139_v35, %v7594_v48  ;;  %v4140_v21 = vsel %vm2206_vm2, %v4108_v37, %v7604_v27  ;;  %v3307_v3 = vld [vmem:[#allocation2 + $0x2ba] sm:$0xff] }
 0x30a   : > { %v7617_v59 = vpop.permute.xlu1 %7616  ;;  %v10548_v12 = vadd.f32 %v10160_v55, %v2651_v18  ;;  %v7612_v14 = vpop.permute.xlu0 %7611  ;;  %6400 = vmatmul.mubr.msk.f32.gmra.mrb[76].mxu1 %vm981_vm0, %v3302_v45  ;;  %v4236_v55 = vsel %vm2206_vm2, %v4204_v33, %v7603_v50  ;;  %v4172_v18 = vsel %vm2239_vm3, %v4140_v21, %v7609_v6  ;;  %v3086_v6 = vld [vmem:[#allocation2 + $0x266] sm:$0xff] }
 0x30b   : > { %v7613_v19 = vunpack.i.l.bf16 %v7612_v14  ;;  %4595 = vmatmul.mubr.f32.gmra.mrb[122].mxu0 %v4170_v28  ;;  %v2653_v63 = vpop.f32.mrb[27].mxu1  ;;  %6402 = vmatprep.mubr.msk.f32.mxu1 %vm981_vm0, %v3303_v40  ;;  %v7614_v7 = vunpack.i.h.bf16 %v7612_v14  ;;  %v7618_v8 = vunpack.i.l.bf16 %v7617_v59  ;;  %v4268_v50 = vsel %vm2239_vm3, %v4236_v55, %v7608_v47  ;;  %v3306_v28 = vld [vmem:[#allocation2 + $0x29a] sm:$0xff]  ;;  %v3308_v55 = vld [vmem:[#allocation2 + $0x2c2] sm:$0xff] }
 0x30c   : > { %4599 = vmatprep.mubr.f32.mxu0 %v4267_v42  ;;  %v7619_v60 = vunpack.i.h.bf16 %v7617_v59  ;;  %v3309_v42 = vld [vmem:[#allocation2 + $0x2e2] sm:$0xff] }
 0x30d   : > { %v4205_v32 = vsel %vm981_vm0, %v10225_v49, %v7613_v19  ;;  %v4109_v40 = vsel %vm981_vm0, %v3084_v29, %v7614_v7  ;;  %v3085_v47 = vld [vmem:[#allocation2 + $0x246] sm:$0xff]  ;;  %v3312_v29 = vld [vmem:[#allocation2 + $0x312] sm:$0xff] }
 0x30e   : > { %v7627_v23 = vpop.permute.xlu1 %7626  ;;  %v7622_v13 = vpop.permute.xlu0 %7621  ;;  %6403 = vmatmul.mubr.msk.f32.gmra.mrb[78].mxu1 %vm981_vm0, %v3304_v17  ;;  %v4237_v45 = vsel %vm2206_vm2, %v4205_v32, %v7618_v8  ;;  %v4141_v33 = vsel %vm2206_vm2, %v4109_v40, %v7619_v60  ;;  %v3311_v32 = vld [vmem:[#allocation2 + $0x30a] sm:$0xff] }
 0x30f   : > { %4600 = vmatmul.mubr.f32.gmra.mrb[124].mxu0 %v4171_v62  ;;  %6405 = vmatprep.mubr.msk.f32.mxu1 %vm981_vm0, %v3305_v52  ;;  %v7623_v43 = vunpack.i.l.bf16 %v7622_v13  ;;  %v7628_v36 = vunpack.i.l.bf16 %v7627_v23  ;;  %v7629_v48 = vunpack.i.h.bf16 %v7627_v23  ;;  %v7624_v27 = vunpack.i.h.bf16 %v7622_v13  ;;  %v3310_v62 = vld [vmem:[#allocation2 + $0x2ea] sm:$0xff] }
 0x310   : > { %4604 = vmatprep.mubr.f32.mxu0 %v4268_v50 }
 0x311   : > { %v4269_v61 = vsel %vm2239_vm3, %v4237_v45, %v7623_v43  ;;  %v4206_v15 = vsel %vm981_vm0, %v10242_v38, %v7628_v36  ;;  %v4173_v17 = vsel %vm2239_vm3, %v4141_v33, %v7624_v27  ;;  %v4110_v37 = vsel %vm981_vm0, %v3085_v47, %v7629_v48 }
 0x312   : > { %v7637_v49 = vpop.permute.xlu1 %7636  ;;  %v7632_v14 = vpop.permute.xlu0 %7631  ;;  %6406 = vmatmul.mubr.msk.f32.gmra.mrb[80].mxu1 %vm981_vm0, %v3306_v28 }
 0x313   : > { %v7634_v19 = vunpack.i.h.bf16 %v7632_v14  ;;  %4605 = vmatmul.mubr.f32.gmra.mrb[126].mxu0 %v4172_v18  ;;  %6408 = vmatprep.mubr.msk.f32.mxu1 %vm981_vm0, %v3307_v3  ;;  %v7633_v63 = vunpack.i.l.bf16 %v7632_v14  ;;  %v7638_v22 = vunpack.i.l.bf16 %v7637_v49  ;;  %v7639_v38 = vunpack.i.h.bf16 %v7637_v49 }
 0x314   : > { %4609 = vmatprep.mubr.f32.mxu0 %v4269_v61 }
 0x315   : > { %v4238_v59 = vsel %vm2206_vm2, %v4206_v15, %v7633_v63  ;;  %v4142_v13 = vsel %vm2206_vm2, %v4110_v37, %v7634_v19 }
 0x316   : > { %v7647_v35 = vpop.permute.xlu1 %7646  ;;  %6409 = vmatmul.mubr.msk.f32.gmra.mrb[82].mxu1 %vm981_vm0, %v3308_v55  ;;  %v7642_v7 = vpop.permute.xlu0 %7641  ;;  %v4270_v23 = vsel %vm2239_vm3, %v4238_v59, %v7638_v22  ;;  %v4174_v50 = vsel %vm2239_vm3, %v4142_v13, %v7639_v38  ;;  %v3087_v22 = vld [vmem:[#allocation2 + $0x26e] sm:$0xff] }
 0x317   : > { %4610 = vmatmul.mubr.f32.gmra.mrb[128].mxu0 %v4173_v17  ;;  %6411 = vmatprep.mubr.msk.f32.mxu1 %vm981_vm0, %v3309_v42  ;;  %v7644_v52 = vunpack.i.h.bf16 %v7642_v7  ;;  %v7643_v21 = vunpack.i.l.bf16 %v7642_v7  ;;  %v7649_v18 = vunpack.i.h.bf16 %v7647_v35  ;;  %v7648_v28 = vunpack.i.l.bf16 %v7647_v35 }
 0x318   : > { %4614 = vmatprep.mubr.f32.mxu0 %v4270_v23 }
 0x319   : > { %v4207_v43 = vsel %vm981_vm0, %v10282_v1, %v7643_v21  ;;  %v4111_v36 = vsel %vm981_vm0, %v3086_v6, %v7644_v52 }
 0x31a   : > { %v7657_v8 = vpop.permute.xlu1 %7656  ;;  %6412 = vmatmul.mubr.msk.f32.gmra.mrb[84].mxu1 %vm981_vm0, %v3310_v62  ;;  %v7652_v45 = vpop.permute.xlu0 %7651  ;;  %v4239_v61 = vsel %vm2206_vm2, %v4207_v43, %v7648_v28  ;;  %v4143_v3 = vsel %vm2206_vm2, %v4111_v36, %v7649_v18 }
 0x31b   : > { %4615 = vmatmul.mubr.f32.gmra.mrb[130].mxu0 %v4174_v50  ;;  %6414 = vmatprep.mubr.msk.f32.mxu1 %vm981_vm0, %v3311_v32  ;;  %v7654_v48 = vunpack.i.h.bf16 %v7652_v45  ;;  %v7653_v27 = vunpack.i.l.bf16 %v7652_v45  ;;  %v7659_v49 = vunpack.i.h.bf16 %v7657_v8  ;;  %v7658_v14 = vunpack.i.l.bf16 %v7657_v8 }
 0x31d   : > { %v4271_v1 = vsel %vm2239_vm3, %v4239_v61, %v7653_v27  ;;  %v4175_v60 = vsel %vm2239_vm3, %v4143_v3, %v7654_v48  ;;  %v4208_v35 = vsel %vm981_vm0, %v10255_v11, %v7658_v14  ;;  %v4112_v17 = vsel %vm981_vm0, %v3087_v22, %v7659_v49 }
 0x31e   : > { %v7667_v40 = vpop.permute.xlu1 %7666  ;;  %6415 = vmatmul.mubr.msk.f32.gmra.mrb[86].mxu1 %vm981_vm0, %v3312_v29  ;;  %v7662_v19 = vpop.permute.xlu0 %7661  ;;  %4619 = vmatprep.mubr.f32.mxu0 %v4271_v1 }
 0x31f   : > { %v7664_v63 = vunpack.i.h.bf16 %v7662_v19  ;;  %v7663_v42 = vunpack.i.l.bf16 %v7662_v19  ;;  %4620 = vmatmul.mubr.f32.gmra.mrb[132].mxu0 %v4175_v60  ;;  %v7669_v33 = vunpack.i.h.bf16 %v7667_v40  ;;  %v7668_v55 = vunpack.i.l.bf16 %v7667_v40 }
 0x321   : > { %v2656_v15 = vpop.f32.mrb[28].mxu1  ;;  %v10595_v47 = vpop.f32.mrb[74].mxu0  ;;  %v4240_v23 = vsel %vm2206_vm2, %v4208_v35, %v7663_v42  ;;  %v4144_v13 = vsel %vm2206_vm2, %v4112_v17, %v7664_v63  ;;  %v10644_v63 = vld [vmem:[%s11793_s7 + $0x1] ss:$0 sm:$0xff] }
 0x322   : > { %v10601_v59 = vadd.f32 %v10172_v4, %v2656_v15  ;;  %v2658_v37 = vpop.f32.mrb[29].mxu1  ;;  %v4478_v7 = vpop.f32.mrb[75].mxu0  ;;  %v4272_v62 = vsel %vm2239_vm3, %v4240_v23, %v7668_v55  ;;  %v4176_v38 = vsel %vm2239_vm3, %v4144_v13, %v7669_v33 }
 0x323   : > { %4624 = vmatprep.mubr.f32.mxu0 %v4272_v62 }
 0x324   : > { %4625 = vmatmul.mubr.f32.gmra.mrb[134].mxu0 %v4176_v38 }
 0x326   : > { %v2661_v52 = vpop.f32.mrb[30].mxu1  ;;  %v10607_v21 = vpop.f32.mrb[76].mxu0 }
 0x327   : > { %v10610_v11 = vadd.f32 %v10168_v44, %v2661_v52  ;;  %v2663_v4 = vpop.f32.mrb[31].mxu1  ;;  %v4483_v32 = vpop.f32.mrb[77].mxu0 }
 0x33d   : > { %v2666_v6 = vpop.f32.mrb[32].mxu1  ;;  %v10612_v8 = vpop.f32.mrb[78].mxu0 }
 0x33e   : > { %v10615_v50 = vadd.f32 %v10187_v30, %v2666_v6  ;;  %v2668_v43 = vpop.f32.mrb[33].mxu1  ;;  %v4488_v36 = vpop.f32.mrb[79].mxu0 }
 0x342   : > { %v2671_v18 = vpop.f32.mrb[34].mxu1  ;;  %v10617_v28 = vpop.f32.mrb[80].mxu0 }
 0x343   : > { %v10620_v45 = vadd.f32 %v10181_v51, %v2671_v18  ;;  %v2673_v29 = vpop.f32.mrb[35].mxu1  ;;  %v4493_v48 = vpop.f32.mrb[81].mxu0  ;;  %v10635_v51 = vld [vmem:[%s11793_s7] ss:$0 sm:$0xff]  ;;  %v11962_v18 = vld [vmem:[#allocation23_spill] sm:$0xff] }
 0x344   : > { %v2956_v19 = vmul.f32 %v10635_v51, %v10004_v2  ;;  %v2958_v35 = vmul.f32 %v10635_v51, %v10031_v5  ;;  %v2959_v23 = vmul.f32 %v10635_v51, %v10067_v9  ;;  %v2960_v29 = vmul.f32 %v10635_v51, %v11962_v18  ;;  %v11963_v48 = vld [vmem:[#allocation24_spill] sm:$0xff] }
 0x346   : > { %v10649_v42 = vadd.f32 %v10644_v63, %v2956_v19  ;;  %v10676_v5 = vadd.f32 %v10644_v63, %v2958_v35  ;;  %v10687_v6 = vadd.f32 %v10644_v63, %v2959_v23 }
 0x348   : > { %v11842_v36 = vmax.f32 %v10676_v5, 0.0 }
 0x34a   : > { %v4966_v19 = vsel %vm981_vm0, %v11842_v36, 0.0 }
 0x359   : > { %v2676_v44 = vpop.f32.mrb[36].mxu1  ;;  %v10622_v27 = vpop.f32.mrb[82].mxu0 }
 0x35a   : > { %v10625_v49 = vadd.f32 %v10211_v56, %v2676_v44  ;;  %v2678_v14 = vpop.f32.mrb[37].mxu1  ;;  %v4498_v61 = vpop.f32.mrb[83].mxu0  ;;  %v2955_v56 = vmul.f32 %v10635_v51, %v10008_v54  ;;  %v11845_v54 = vmax.f32 %v10649_v42, 0.0  ;;  %v2961_v44 = vmul.f32 %v10635_v51, %v11963_v48 }
 0x35b   : > { %v11839_v14 = vmax.f32 %v10687_v6, 0.0  ;;  %v11964_v61 = vld [vmem:[#allocation25_spill] sm:$0xff] }
 0x35c   : > { %v10652_v22 = vadd.f32 %v10644_v63, %v2955_v56  ;;  %v4962_v13 = vsel %vm981_vm0, %v11845_v54, 0.0  ;;  %v10703_v56 = vadd.f32 %v10644_v63, %v2960_v29  ;;  %v11968_v29 = vld [vmem:[#allocation29_spill] sm:$0xff] }
 0x35d   : > { %v4968_v35 = vsel %vm981_vm0, %v11839_v14, 0.0  ;;  %v2966_v48 = vmul.f32 %v10635_v51, %v11968_v29 }
 0x35e   : > { %v2681_v30 = vpop.f32.mrb[38].mxu1  ;;  %v10627_v3 = vpop.f32.mrb[84].mxu0  ;;  %v11848_v15 = vmax.f32 %v10652_v22, 0.0 }
 0x35f   : > { %v10630_v40 = vadd.f32 %v10197_v57, %v2681_v30  ;;  %v2683_v1 = vpop.f32.mrb[39].mxu1  ;;  %v4503_v60 = vpop.f32.mrb[85].mxu0  ;;  %v2957_v57 = vmul.f32 %v10635_v51, %v10035_v31  ;;  %v2962_v30 = vmul.f32 %v10635_v51, %v11964_v61 }
 0x360   : > { %v4961_v62 = vsel %vm981_vm0, %v11848_v15, 0.0  ;;  %v11965_v1 = vld [vmem:[#allocation26_spill] sm:$0xff] }
 0x361   : > { %v10655_v33 = vadd.f32 %v10644_v63, %v2957_v57  ;;  %v4963_v43 = vadd.f32 %v4962_v13, %v4961_v62  ;;  %v2963_v60 = vmul.f32 %v10635_v51, %v11965_v1  ;;  %v10706_v57 = vadd.f32 %v10644_v63, %v2961_v44 }
 0x362   : > { %v11826_v62 = vmax.f32 %v10703_v56, 0.0  ;;  %v2967_v1 = vmul.f32 %v10635_v51, %v10269_v34 }
 0x363   : > { %v11843_v7 = vmax.f32 %v10655_v33, 0.0  ;;  %v10717_v13 = vadd.f32 %v10644_v63, %v2963_v60 }
 0x364   : > { %v10757_v29 = vadd.f32 %v10644_v63, %v2967_v1  ;;  %v2970_v1 = vmul.f32 %v10635_v51, %v10402_v46 }
 0x365   : > { %v4964_v9 = vsel %vm981_vm0, %v11843_v7, 0.0  ;;  %v11823_v44 = vmax.f32 %v10717_v13, 0.0 }
 0x371   : > { %v2686_v2 = vpop.f32.mrb[40].mxu1  ;;  %v10657_v55 = vpop.f32.mrb[86].mxu0 }
 0x372   : > { %v10664_v31 = vadd.f32 %v10232_v10, %v2686_v2  ;;  %v2688_v17 = vpop.f32.mrb[41].mxu1  ;;  %v4508_v37 = vpop.f32.mrb[87].mxu0 }
 0x373   : > { %v10712_v17 = vadd.f32 %v10644_v63, %v2962_v30  ;;  %v11966_v37 = vld [vmem:[#allocation27_spill] sm:$0xff] }
 0x374   : > { %v2964_v23 = vmul.f32 %v10635_v51, %v11966_v37  ;;  %v2968_v37 = vmul.f32 %v10635_v51, %v10298_v53 }
 0x376   : > { %v2691_v10 = vpop.f32.mrb[42].mxu1  ;;  %v10678_v38 = vpop.f32.mrb[88].mxu0  ;;  %v10725_v18 = vadd.f32 %v10644_v63, %v2964_v23 }
 0x377   : > { %v10681_v52 = vadd.f32 %v10219_v25, %v2691_v10  ;;  %v2693_v4 = vpop.f32.mrb[43].mxu1  ;;  %v4513_v32 = vpop.f32.mrb[89].mxu0  ;;  %v4965_v25 = vadd.f32 %v4964_v9, %v4963_v43  ;;  %v11825_v10 = vmax.f32 %v10706_v57, 0.0  ;;  %v11824_v43 = vmax.f32 %v10712_v17, 0.0 }
 0x378   : > { %v11967_v4 = vld [vmem:[#allocation28_spill] sm:$0xff] }
 0x379   : > { %v4967_v2 = vadd.f32 %v4966_v19, %v4965_v25  ;;  %v2965_v32 = vmul.f32 %v10635_v51, %v11967_v4  ;;  %v4970_v25 = vsel %vm981_vm0, %v11826_v62, 0.0  ;;  %v4972_v61 = vsel %vm981_vm0, %v11825_v10, 0.0 }
 0x37a   : > { %v4974_v19 = vsel %vm981_vm0, %v11824_v43, 0.0  ;;  %v4976_v4 = vsel %vm981_vm0, %v11823_v44, 0.0  ;;  %v10769_v10 = vadd.f32 %v10644_v63, %v2968_v37 }
 0x37b   : > { %v4969_v9 = vadd.f32 %v4968_v35, %v4967_v2  ;;  %v10737_v30 = vadd.f32 %v10644_v63, %v2965_v32  ;;  %v11828_v2 = vmax.f32 %v10725_v18, 0.0  ;;  %v10746_v35 = vadd.f32 %v10644_v63, %v2966_v48 }
 0x37c   : > { %v2969_v48 = vmul.f32 %v10635_v51, %v10386_v26  ;;  %v11836_v26 = vmax.f32 %v10757_v29, 0.0 }
 0x37d   : > { %v4971_v60 = vadd.f32 %v4970_v25, %v4969_v9  ;;  %v11827_v9 = vmax.f32 %v10737_v30, 0.0  ;;  %v4978_v44 = vsel %vm981_vm0, %v11828_v2, 0.0  ;;  %v11837_v43 = vmax.f32 %v10746_v35, 0.0 }
 0x37f   : > { %v4973_v23 = vadd.f32 %v4972_v61, %v4971_v60 }
 0x381   : > { %v4975_v60 = vadd.f32 %v4974_v19, %v4973_v23  ;;  %v10778_v19 = vadd.f32 %v10644_v63, %v2969_v48  ;;  %v2971_v23 = vmul.f32 %v10635_v51, %v10532_v16  ;;  %v10790_v48 = vadd.f32 %v10644_v63, %v2970_v1 }
 0x382   : > { %v2972_v16 = vmul.f32 %v10635_v51, %v10548_v12 }
 0x383   : > { %v4977_v62 = vadd.f32 %v4976_v4, %v4975_v60  ;;  %v4982_v60 = vsel %vm981_vm0, %v11837_v43, 0.0  ;;  %v11831_v12 = vmax.f32 %v10790_v48, 0.0 }
 0x385   : > { %v4979_v37 = vadd.f32 %v4978_v44, %v4977_v62  ;;  %v4984_v62 = vsel %vm981_vm0, %v11836_v26, 0.0  ;;  %v10799_v44 = vadd.f32 %v10644_v63, %v2971_v23 }
 0x389   : > { %v2696_v32 = vpop.f32.mrb[44].mxu1  ;;  %v10753_v34 = vpop.f32.mrb[90].mxu0 }
 0x38a   : > { %v10762_v25 = vadd.f32 %v10257_v41, %v2696_v32  ;;  %v2698_v53 = vpop.f32.mrb[45].mxu1  ;;  %v4518_v61 = vpop.f32.mrb[91].mxu0  ;;  %v4980_v41 = vsel %vm981_vm0, %v11827_v9, 0.0  ;;  %v11829_v9 = vmax.f32 %v10769_v10, 0.0 }
 0x38b   : > { %v4981_v2 = vadd.f32 %v4980_v41, %v4979_v37  ;;  %v10808_v41 = vadd.f32 %v10644_v63, %v2972_v16  ;;  %v2974_v37 = vmul.f32 %v10635_v51, %v10610_v11  ;;  %v4990_v16 = vsel %vm981_vm0, %v11831_v12, 0.0 }
 0x38c   : > { %v4986_v1 = vsel %vm981_vm0, %v11829_v9, 0.0 }
 0x38d   : > { %v11833_v11 = vmax.f32 %v10808_v41, 0.0 }
 0x38e   : > { %v2701_v32 = vpop.f32.mrb[46].mxu1  ;;  %v10782_v53 = vpop.f32.mrb[92].mxu0 }
 0x38f   : > { %v2927_v61 = vadd.f32 %v10244_v39, %v2701_v32  ;;  %v2703_v46 = vpop.f32.mrb[47].mxu1  ;;  %v4523_v4 = vpop.f32.mrb[93].mxu0  ;;  %v11830_v39 = vmax.f32 %v10778_v19, 0.0  ;;  %v2973_v32 = vmul.f32 %v10635_v51, %v10601_v59  ;;  %v11832_v59 = vmax.f32 %v10799_v44, 0.0 }
 0x390   : > { %v4983_v46 = vadd.f32 %v4982_v60, %v4981_v2  ;;  %v2975_v60 = vmul.f32 %v10635_v51, %v10615_v50 }
 0x391   : > { %v4988_v23 = vsel %vm981_vm0, %v11830_v39, 0.0  ;;  %v10817_v2 = vadd.f32 %v10644_v63, %v2973_v32  ;;  %v4992_v32 = vsel %vm981_vm0, %v11832_v59, 0.0  ;;  %v2982_v14 = vmul.f32 %v10635_v51, %v2927_v61 }
 0x392   : > { %v4985_v4 = vadd.f32 %v4984_v62, %v4983_v46  ;;  %v10826_v62 = vadd.f32 %v10644_v63, %v2974_v37  ;;  %v2976_v46 = vmul.f32 %v10635_v51, %v10620_v45  ;;  %v4994_v37 = vsel %vm981_vm0, %v11833_v11, 0.0 }
 0x393   : > { %v11834_v50 = vmax.f32 %v10817_v2, 0.0 }
 0x394   : > { %v4987_v9 = vadd.f32 %v4986_v1, %v4985_v4  ;;  %11969 = vst [vmem:[#allocation16_spill] sm:$0xff] %v10826_v62  ;;  %v10835_v1 = vadd.f32 %v10644_v63, %v2975_v60  ;;  %v2977_v4 = vmul.f32 %v10635_v51, %v10625_v49  ;;  %v11835_v45 = vmax.f32 %v10826_v62, 0.0 }
 0x395   : > { %v4996_v60 = vsel %vm981_vm0, %v11834_v50, 0.0 }
 0x396   : > { %v4989_v39 = vadd.f32 %v4988_v23, %v4987_v9  ;;  %11970 = vst [vmem:[#allocation18_spill] sm:$0xff] %v10835_v1  ;;  %v10844_v9 = vadd.f32 %v10644_v63, %v2976_v46  ;;  %v2978_v23 = vmul.f32 %v10635_v51, %v10630_v40  ;;  %v11838_v49 = vmax.f32 %v10835_v1, 0.0 }
 0x397   : > { %v4998_v46 = vsel %vm981_vm0, %v11835_v45, 0.0 }
 0x398   : > { %v4991_v12 = vadd.f32 %v4990_v16, %v4989_v39  ;;  %11971 = vst [vmem:[#allocation20_spill] sm:$0xff] %v10844_v9  ;;  %v10853_v39 = vadd.f32 %v10644_v63, %v2977_v4  ;;  %v2979_v16 = vmul.f32 %v10635_v51, %v10664_v31  ;;  %v11840_v40 = vmax.f32 %v10844_v9, 0.0 }
 0x399   : > { %v5000_v4 = vsel %vm981_vm0, %v11838_v49, 0.0 }
 0x39a   : > { %v4993_v59 = vadd.f32 %v4992_v32, %v4991_v12  ;;  %11972 = vst [vmem:[#allocation15_spill] sm:$0xff] %v10853_v39  ;;  %v10862_v12 = vadd.f32 %v10644_v63, %v2978_v23  ;;  %v2980_v32 = vmul.f32 %v10635_v51, %v10681_v52  ;;  %v11841_v31 = vmax.f32 %v10853_v39, 0.0 }
 0x39c   : > { %v4995_v11 = vadd.f32 %v4994_v37, %v4993_v59  ;;  %11973 = vst [vmem:[#allocation21_spill] sm:$0xff] %v10862_v12  ;;  %v10871_v59 = vadd.f32 %v10644_v63, %v2979_v16  ;;  %v2981_v37 = vmul.f32 %v10635_v51, %v10762_v25  ;;  %v11844_v49 = vmax.f32 %v10862_v12, 0.0 }
 0x39d   : > { %v10883_v16 = vadd.f32 %v10644_v63, %v2980_v32 }
 0x39e   : > { %v4997_v50 = vadd.f32 %v4996_v60, %v4995_v11  ;;  %11974 = vst [vmem:[#allocation22_spill] sm:$0xff] %v10871_v59  ;;  %v5002_v60 = vsel %vm981_vm0, %v11840_v40, 0.0  ;;  %v5006_v61 = vsel %vm981_vm0, %v11844_v49, 0.0 }
 0x39f   : > { %11975 = vst [vmem:[#allocation19_spill] sm:$0xff] %v10883_v16  ;;  %v11846_v32 = vmax.f32 %v10883_v16, 0.0 }
 0x3a0   : > { %v4999_v23 = vadd.f32 %v4998_v46, %v4997_v50  ;;  %v5004_v50 = vsel %vm981_vm0, %v11841_v31, 0.0 }
 0x3a2   : > { %v2706_v45 = vpop.f32.mrb[48].mxu1  ;;  %v10875_v26 = vpop.f32.mrb[94].mxu0  ;;  %v5001_v25 = vadd.f32 %v5000_v4, %v4999_v23  ;;  %v10901_v4 = vadd.f32 %v10644_v63, %v2982_v14  ;;  %v11978_v23 = vld [vmem:[#allocation30_spill] sm:$0xff]  ;;  %v5010_v14 = vsel %vm981_vm0, %v11846_v32, 0.0 }
 0x3a3   : > { %v2932_v43 = vadd.f32 %v10293_v20, %v2706_v45  ;;  %v2708_v52 = vpop.f32.mrb[49].mxu1  ;;  %v4528_v11 = vpop.f32.mrb[95].mxu0  ;;  %v11847_v20 = vmax.f32 %v10871_v59, 0.0  ;;  %v10891_v45 = vadd.f32 %v10644_v63, %v2981_v37 }
 0x3a4   : > { %v5003_v52 = vadd.f32 %v5002_v60, %v5001_v25  ;;  %11977 = vst [vmem:[#allocation23_spill] sm:$0xff] %v10901_v4 }
 0x3a5   : > { %11976 = vst [vmem:[#allocation17_spill] sm:$0xff] %v10891_v45  ;;  %v2983_v46 = vmul.f32 %v10635_v51, %v2932_v43  ;;  %v5008_v43 = vsel %vm981_vm0, %v11847_v20, 0.0  ;;  %v11849_v60 = vmax.f32 %v10891_v45, 0.0 }
 0x3a6   : > { %v5005_v7 = vadd.f32 %v5004_v50, %v5003_v52 }
 0x3a7   : > { %v2711_v11 = vpop.f32.mrb[50].mxu1  ;;  %v10894_v40 = vpop.f32.mrb[96].mxu0  ;;  %v10909_v25 = vadd.f32 %v10644_v63, %v2983_v46  ;;  %v5012_v46 = vsel %vm981_vm0, %v11849_v60, 0.0 }
 0x3a8   : > { %v2937_v31 = vadd.f32 %v11978_v23, %v2711_v11  ;;  %v2713_v36 = vpop.f32.mrb[51].mxu1  ;;  %v4533_v37 = vpop.f32.mrb[97].mxu0  ;;  %v5007_v54 = vadd.f32 %v5006_v61, %v5005_v7 }
 0x3a9   : > { %11979 = vst [vmem:[#allocation24_spill] sm:$0xff] %v10909_v25  ;;  %v11855_v36 = vmax.f32 %v10901_v4, 0.0 }
 0x3aa   : > { %v2984_v49 = vmul.f32 %v10635_v51, %v2937_v31  ;;  %v5009_v52 = vadd.f32 %v5008_v43, %v5007_v54  ;;  %v11851_v31 = vmax.f32 %v10909_v25, 0.0 }
 0x3ac   : > { %v10917_v50 = vadd.f32 %v10644_v63, %v2984_v49  ;;  %v5011_v32 = vadd.f32 %v5010_v14, %v5009_v52  ;;  %v5014_v49 = vsel %vm981_vm0, %v11855_v36, 0.0  ;;  %v5016_v60 = vsel %vm981_vm0, %v11851_v31, 0.0 }
 0x3ad   : > { %v2716_v11 = vpop.f32.mrb[52].mxu1  ;;  %v10919_v23 = vpop.f32.mrb[98].mxu0 }
 0x3ae   : > { %11980 = vst [vmem:[#allocation25_spill] sm:$0xff] %v10917_v50  ;;  %v2942_v7 = vadd.f32 %v10324_v24, %v2716_v11  ;;  %v2718_v61 = vpop.f32.mrb[53].mxu1  ;;  %v4538_v37 = vpop.f32.mrb[99].mxu0  ;;  %v11853_v54 = vmax.f32 %v10917_v50, 0.0  ;;  %v5013_v20 = vadd.f32 %v5012_v46, %v5011_v32 }
 0x3b0   : > { %v2985_v43 = vmul.f32 %v10635_v51, %v2942_v7  ;;  %v5015_v11 = vadd.f32 %v5014_v49, %v5013_v20  ;;  %v5018_v7 = vsel %vm981_vm0, %v11853_v54, 0.0 }
 0x3b1   : > { %v2721_v15 = vpop.f32.mrb[54].mxu1 }
 0x3b2   : > { %v10935_v45 = vadd.f32 %v10644_v63, %v2985_v43  ;;  %v2947_v24 = vadd.f32 %v10319_v0, %v2721_v15  ;;  %v10938_v14 = vpop.f32.mrb[100].mxu0  ;;  %v2723_v52 = vpop.f32.mrb[55].mxu1  ;;  %v5017_v37 = vadd.f32 %v5016_v60, %v5015_v11  ;;  %v10948_v43 = vld [vmem:[%s11794_s8] ss:$0 sm:$0xff]  ;;  %v10962_v60 = vld [vmem:[%s11794_s8 + $0x1] ss:$0 sm:$0xff] }
 0x3b3   : > { %v4543_v61 = vpop.f32.mrb[101].mxu0 }
 0x3b4   : > { %11981 = vst [vmem:[#allocation26_spill] sm:$0xff] %v10935_v45  ;;  %v11852_v32 = vmax.f32 %v10935_v45, 0.0  ;;  %v2986_v46 = vmul.f32 %v10635_v51, %v2947_v24  ;;  %v5019_v51 = vadd.f32 %v5018_v7, %v5017_v37 }
 0x3b5   : > { %v6371_v31 = vpop.f32.mrb[56].mxu1 }
 0x3b6   : > { %v5020_v0 = vsel %vm981_vm0, %v11852_v32, 0.0  ;;  %v10954_v15 = vadd.f32 %v10644_v63, %v2986_v46  ;;  %v10956_v20 = vpop.f32.mrb[102].mxu0  ;;  %v4702_v49 = vadd.f32 %v6371_v31, %v10595_v47  ;;  %v4696_v52 = vpop.f32.mrb[57].mxu1 }
 0x3b7   : > { %v4548_v24 = vpop.f32.mrb[103].mxu0  ;;  %v4697_v11 = vadd.f32 %v4696_v52, %v10506_v58  ;;  %v5021_v63 = vadd.f32 %v5020_v0, %v5019_v51 }
 0x3b8   : > { %11982 = vst [vmem:[#allocation27_spill] sm:$0xff] %v10954_v15  ;;  %v11854_v61 = vmax.f32 %v10954_v15, 0.0  ;;  %v4861_v32 = vmul.f32 %v10948_v43, %v4702_v49 }
 0x3b9   : > { %v4860_v46 = vmul.f32 %v10948_v43, %v4697_v11  ;;  %v6374_v54 = vpop.f32.mrb[58].mxu1 }
 0x3ba   : > { %v5022_v47 = vsel %vm981_vm0, %v11854_v61, 0.0  ;;  %v10972_v31 = vadd.f32 %v10962_v60, %v4861_v32  ;;  %v10974_v7 = vpop.f32.mrb[104].mxu0  ;;  %v4712_v37 = vadd.f32 %v6374_v54, %v10612_v8  ;;  %v4706_v58 = vpop.f32.mrb[59].mxu1 }
 0x3bb   : > { %v5023_v52 = vadd.f32 %v5022_v47, %v5021_v63  ;;  %v10978_v24 = vadd.f32 %v10962_v60, %v4860_v46  ;;  %v4553_v0 = vpop.f32.mrb[105].mxu0  ;;  %v4707_v49 = vadd.f32 %v4706_v58, %v10607_v21 }
 0x3bc   : > { %v11857_v51 = vmax.f32 %v10972_v31, 0.0  ;;  %v4863_v11 = vmul.f32 %v10948_v43, %v4712_v37 }
 0x3bd   : > { %v5024_v61 = vrot.slane %v5023_v52, 4  ;;  %v11860_v32 = vmax.f32 %v10978_v24, 0.0  ;;  %v4862_v36 = vmul.f32 %v10948_v43, %v4707_v49  ;;  %v6377_v15 = vpop.f32.mrb[60].mxu1 }
 0x3be   : > { %v5032_v8 = vsel %vm981_vm0, %v11857_v51, 0.0  ;;  %v10989_v54 = vadd.f32 %v10962_v60, %v4863_v11  ;;  %v10991_v63 = vpop.f32.mrb[106].mxu0  ;;  %v4722_v21 = vadd.f32 %v6377_v15, %v10622_v27  ;;  %v4716_v46 = vpop.f32.mrb[61].mxu1 }
 0x3bf   : > { %v5025_v47 = vadd.f32 %v5024_v61, %v5023_v52  ;;  %v5031_v37 = vsel %vm981_vm0, %v11860_v32, 0.0  ;;  %v10998_v58 = vadd.f32 %v10962_v60, %v4862_v36  ;;  %v4558_v0 = vpop.f32.mrb[107].mxu0  ;;  %v4717_v49 = vadd.f32 %v4716_v46, %v10617_v28 }
 0x3c0   : > { %v4865_v11 = vmul.f32 %v10948_v43, %v4722_v21  ;;  %v5033_v61 = vadd.f32 %v5032_v8, %v5031_v37  ;;  %v11983_v8 = vmax.f32 %v10989_v54, 0.0 }
 0x3c1   : > { %v5026_v45 = vrot.slane %v5025_v47, 2  ;;  %v11862_v50 = vmax.f32 %v10998_v58, 0.0  ;;  %v4864_v27 = vmul.f32 %v10948_v43, %v4717_v49  ;;  %v6380_v15 = vpop.f32.mrb[62].mxu1 }
 0x3c2   : > { %v11006_v52 = vadd.f32 %v10962_v60, %v4865_v11  ;;  %v11008_v36 = vpop.f32.mrb[108].mxu0  ;;  %v4732_v0 = vadd.f32 %v6380_v15, %v10657_v55  ;;  %v4726_v28 = vpop.f32.mrb[63].mxu1  ;;  %v5036_v37 = vsel %vm981_vm0, %v11983_v8, 0.0 }
 0x3c3   : > { %v5034_v21 = vsel %vm981_vm0, %v11862_v50, 0.0  ;;  %v11015_v46 = vadd.f32 %v10962_v60, %v4864_v27  ;;  %v4563_v32 = vpop.f32.mrb[109].mxu0  ;;  %v4727_v49 = vadd.f32 %v4726_v28, %v10627_v3  ;;  %v5027_v51 = vadd.f32 %v5026_v45, %v5025_v47 }
 0x3c4   : > { %v5035_v11 = vadd.f32 %v5034_v21, %v5033_v61  ;;  %v4867_v25 = vmul.f32 %v10948_v43, %v4732_v0  ;;  %v11865_v55 = vmax.f32 %v11006_v52, 0.0 }
 0x3c5   : > { %v11864_v15 = vmax.f32 %v11015_v46, 0.0  ;;  %v4866_v50 = vmul.f32 %v10948_v43, %v4727_v49  ;;  %v6383_v27 = vpop.f32.mrb[64].mxu1  ;;  %v5028_v4 = vrot.slane %v5027_v51, 1 }
 0x3c6   : > { %v5037_v32 = vadd.f32 %v5036_v37, %v5035_v11  ;;  %v11027_v3 = vadd.f32 %v10962_v60, %v4867_v25  ;;  %v11029_v45 = vpop.f32.mrb[110].mxu0  ;;  %v4742_v47 = vadd.f32 %v6383_v27, %v10753_v34  ;;  %v4736_v61 = vpop.f32.mrb[65].mxu1 }
 0x3c7   : > { %v5038_v0 = vsel %vm981_vm0, %v11864_v15, 0.0  ;;  %v11036_v28 = vadd.f32 %v10962_v60, %v4866_v50  ;;  %v4568_v21 = vpop.f32.mrb[111].mxu0  ;;  %v4737_v49 = vadd.f32 %v4736_v61, %v10678_v38  ;;  %v5029_v25 = vadd.f32 %v5028_v4, %v5027_v51  ;;  %v5102_v50 = vld [vmem:[%s11796_s10] sm:$0x1] }
 0x3c8   : > { %v5039_v8 = vadd.f32 %v5038_v0, %v5037_v32  ;;  %v4869_v37 = vmul.f32 %v10948_v43, %v4742_v47  ;;  %v5040_v38 = vsel %vm981_vm0, %v11865_v55, 0.0  ;;  %v5101_v15 = vld [vmem:[%s11042_s1] sm:$0x1] }
 0x3c9   : > { %v11867_v11 = vmax.f32 %v11036_v28, 0.0  ;;  %v4868_v27 = vmul.f32 %v10948_v43, %v4737_v49  ;;  %v6386_v61 = vpop.f32.mrb[66].mxu1  ;;  %v11054_v21 = vmul.f32 0.00390625, %v5029_v25 }
 0x3ca   : > { %v5041_v4 = vadd.f32 %v5040_v38, %v5039_v8  ;;  %v11057_v51 = vadd.f32 %v10962_v60, %v4869_v37  ;;  %v11059_v32 = vpop.f32.mrb[112].mxu0  ;;  %v4752_v47 = vadd.f32 %v6386_v61, %v10875_v26  ;;  %v4746_v0 = vpop.f32.mrb[67].mxu1  ;;  %v11985_v37 = vmax.f32 %v11027_v3, 0.0 }
 0x3cb   : > { %v5042_v55 = vsel %vm981_vm0, %v11867_v11, 0.0  ;;  %v11067_v34 = vadd.f32 %v10962_v60, %v4868_v27  ;;  %v4573_v49 = vpop.f32.mrb[113].mxu0  ;;  %v4747_v25 = vadd.f32 %v4746_v0, %v10782_v53  ;;  %v5104_v8 = vmul.f32 %v5102_v50, %v11054_v21 }
 0x3cc   : > { %v5044_v38 = vsel %vm981_vm0, %v11985_v37, 0.0  ;;  %v5043_v16 = vadd.f32 %v5042_v55, %v5041_v4  ;;  %v4871_v26 = vmul.f32 %v10948_v43, %v4752_v47  ;;  %v11870_v61 = vmax.f32 %v11057_v51, 0.0 }
 0x3cd   : > { %v11869_v11 = vmax.f32 %v11067_v34, 0.0  ;;  %v4870_v27 = vmul.f32 %v10948_v43, %v4747_v25  ;;  %v6389_v59 = vpop.f32.mrb[68].mxu1  ;;  %v11078_v49 = vadd.f32 %v5104_v8, %v5101_v15 }
 0x3ce   : > { %v5045_v53 = vadd.f32 %v5044_v38, %v5043_v16  ;;  %v11081_v50 = vadd.f32 %v10962_v60, %v4871_v26  ;;  %v11083_v0 = vpop.f32.mrb[114].mxu0  ;;  %v4762_v55 = vadd.f32 %v6389_v59, %v10919_v23  ;;  %v4756_v4 = vpop.f32.mrb[69].mxu1  ;;  %v5048_v59 = vsel %vm981_vm0, %v11870_v61, 0.0 }
 0x3cf   : > { %v5046_v47 = vsel %vm981_vm0, %v11869_v11, 0.0  ;;  %v11090_v37 = vadd.f32 %v10962_v60, %v4870_v27  ;;  %v4578_v25 = vpop.f32.mrb[115].mxu0  ;;  %v4757_v15 = vadd.f32 %v4756_v4, %v10894_v40  ;;  %v5107_v16 = vsel %vm5106_vm4, %v11078_v49, 0.0 }
 0x3d0   : > { %v5047_v8 = vadd.f32 %v5046_v47, %v5045_v53  ;;  %v4873_v38 = vmul.f32 %v10948_v43, %v4762_v55  ;;  %5108 = vadd.xlane.f32.xlu0 %v5107_v16 }
 0x3d1   : > { %v11872_v26 = vmax.f32 %v11090_v37, 0.0  ;;  %v4872_v27 = vmul.f32 %v10948_v43, %v4757_v15  ;;  %v6392_v25 = vpop.f32.mrb[70].mxu1 }
 0x3d2   : > { %v5049_v11 = vadd.f32 %v5048_v59, %v5047_v8  ;;  %v11103_v40 = vadd.f32 %v10962_v60, %v4873_v38  ;;  %v11105_v4 = vpop.f32.mrb[116].mxu0  ;;  %v4772_v53 = vadd.f32 %v6392_v25, %v10956_v20  ;;  %v4766_v55 = vpop.f32.mrb[71].mxu1  ;;  %v11986_v38 = vmax.f32 %v11081_v50, 0.0 }
 0x3d3   : > { %v5050_v47 = vsel %vm981_vm0, %v11872_v26, 0.0  ;;  %v11112_v16 = vadd.f32 %v10962_v60, %v4872_v27  ;;  %v4583_v61 = vpop.f32.mrb[117].mxu0  ;;  %v4767_v15 = vadd.f32 %v4766_v55, %v10938_v14 }
 0x3d4   : > { %v5051_v23 = vadd.f32 %v5050_v47, %v5049_v11  ;;  %v4875_v8 = vmul.f32 %v10948_v43, %v4772_v53  ;;  %v5052_v59 = vsel %vm981_vm0, %v11986_v38, 0.0  ;;  %v11876_v20 = vmax.f32 %v11103_v40, 0.0 }
 0x3d5   : > { %v11874_v25 = vmax.f32 %v11112_v16, 0.0  ;;  %v4874_v12 = vmul.f32 %v10948_v43, %v4767_v15  ;;  %v6395_v26 = vpop.f32.mrb[72].mxu1 }
 0x3d6   : > { %v5053_v39 = vadd.f32 %v5052_v59, %v5051_v23  ;;  %v11123_v27 = vadd.f32 %v10962_v60, %v4875_v8  ;;  %v4586_v61 = vpop.f32.mrb[118].mxu0  ;;  %v4782_v14 = vadd.f32 %v6395_v26, %v10991_v63  ;;  %v4776_v11 = vpop.f32.mrb[73].mxu1  ;;  %v5056_v8 = vsel %vm981_vm0, %v11876_v20, 0.0 }
 0x3d7   : > { %v5054_v53 = vsel %vm981_vm0, %v11874_v25, 0.0  ;;  %v11130_v55 = vadd.f32 %v10962_v60, %v4874_v12  ;;  %v4588_v47 = vpop.f32.mrb[119].mxu0  ;;  %v4777_v38 = vadd.f32 %v4776_v11, %v10974_v7 }
 0x3d8   : > { %v5055_v15 = vadd.f32 %v5054_v53, %v5053_v39  ;;  %v4877_v23 = vmul.f32 %v10948_v43, %v4782_v14  ;;  %v11879_v63 = vmax.f32 %v11123_v27, 0.0 }
 0x3d9   : > { %v11877_v26 = vmax.f32 %v11130_v55, 0.0  ;;  %v4876_v59 = vmul.f32 %v10948_v43, %v4777_v38  ;;  %v6398_v25 = vpop.f32.mrb[74].mxu1 }
 0x3da   : > { %v5057_v9 = vadd.f32 %v5056_v8, %v5055_v15  ;;  %v11141_v12 = vadd.f32 %v10962_v60, %v4877_v23  ;;  %v4591_v47 = vpop.f32.mrb[120].mxu0  ;;  %v4792_v39 = vadd.f32 %v6398_v25, %v11029_v45  ;;  %v4786_v7 = vpop.f32.mrb[75].mxu1  ;;  %v5060_v23 = vsel %vm981_vm0, %v11879_v63, 0.0 }
 0x3db   : > { %v5058_v14 = vsel %vm981_vm0, %v11877_v26, 0.0  ;;  %v11148_v11 = vadd.f32 %v10962_v60, %v4876_v59  ;;  %v4593_v53 = vpop.f32.mrb[121].mxu0  ;;  %v4787_v20 = vadd.f32 %v4786_v7, %v11008_v36 }
 0x3dc   : > { %v5059_v38 = vadd.f32 %v5058_v14, %v5057_v9  ;;  %v4879_v15 = vmul.f32 %v10948_v43, %v4792_v39  ;;  %v11882_v45 = vmax.f32 %v11141_v12, 0.0 }
 0x3dd   : > { %v11880_v25 = vmax.f32 %v11148_v11, 0.0  ;;  %v4878_v8 = vmul.f32 %v10948_v43, %v4787_v20  ;;  %v6401_v26 = vpop.f32.mrb[76].mxu1 }
 0x3de   : > { %v5061_v1 = vadd.f32 %v5060_v23, %v5059_v38  ;;  %v11159_v59 = vadd.f32 %v10962_v60, %v4879_v15  ;;  %v4596_v53 = vpop.f32.mrb[122].mxu0  ;;  %v4802_v9 = vadd.f32 %v6401_v26, %v11083_v0  ;;  %v4796_v36 = vpop.f32.mrb[77].mxu1  ;;  %v5064_v15 = vsel %vm981_vm0, %v11882_v45, 0.0 }
 0x3df   : > { %v5062_v39 = vsel %vm981_vm0, %v11880_v25, 0.0  ;;  %v11166_v7 = vadd.f32 %v10962_v60, %v4878_v8  ;;  %v4598_v14 = vpop.f32.mrb[123].mxu0  ;;  %v4797_v63 = vadd.f32 %v4796_v36, %v11059_v32 }
 0x3e0   : > { %v5063_v20 = vadd.f32 %v5062_v39, %v5061_v1  ;;  %v4881_v38 = vmul.f32 %v10948_v43, %v4802_v9 }
 0x3e1   : > { %11987 = vst [vmem:[#allocation28_spill] sm:$0xff] %v11166_v7  ;;  %v11883_v26 = vmax.f32 %v11166_v7, 0.0  ;;  %v4880_v23 = vmul.f32 %v10948_v43, %v4797_v63  ;;  %v6404_v25 = vpop.f32.mrb[78].mxu1 }
 0x3e2   : > { %v5065_v62 = vadd.f32 %v5064_v15, %v5063_v20  ;;  %v11177_v8 = vadd.f32 %v10962_v60, %v4881_v38  ;;  %v4601_v14 = vpop.f32.mrb[124].mxu0  ;;  %v4812_v32 = vadd.f32 %v6404_v25, %v4586_v61  ;;  %v4806_v1 = vpop.f32.mrb[79].mxu1  ;;  %v11990_v20 = vmax.f32 %v11159_v59, 0.0 }
 0x3e3   : > { %v5066_v9 = vsel %vm981_vm0, %v11883_v26, 0.0  ;;  %v11183_v36 = vadd.f32 %v10962_v60, %v4880_v23  ;;  %v4603_v39 = vpop.f32.mrb[125].mxu0  ;;  %v4807_v45 = vadd.f32 %v4806_v1, %v11105_v4 }
 0x3e4   : > { %11988 = vst [vmem:[#allocation29_spill] sm:$0xff] %v11177_v8  ;;  %v5067_v0 = vadd.f32 %v5066_v9, %v5065_v62  ;;  %v4883_v63 = vmul.f32 %v10948_v43, %v4812_v32  ;;  %v5068_v38 = vsel %vm981_vm0, %v11990_v20, 0.0 }
 0x3e5   : > { %11989 = vst [vmem:[#allocation30_spill] sm:$0xff] %v11183_v36  ;;  %v11886_v25 = vmax.f32 %v11183_v36, 0.0  ;;  %v4882_v15 = vmul.f32 %v10948_v43, %v4807_v45  ;;  %v6407_v26 = vpop.f32.mrb[80].mxu1 }
 0x3e6   : > { %v5069_v7 = vadd.f32 %v5068_v38, %v5067_v0  ;;  %v11194_v23 = vadd.f32 %v10962_v60, %v4883_v63  ;;  %v4606_v39 = vpop.f32.mrb[126].mxu0  ;;  %v4822_v4 = vadd.f32 %v6407_v26, %v4596_v53  ;;  %v4816_v62 = vpop.f32.mrb[81].mxu1  ;;  %v11993_v0 = vmax.f32 %v11177_v8, 0.0 }
 0x3e7   : > { %v5070_v32 = vsel %vm981_vm0, %v11886_v25, 0.0  ;;  %v11200_v1 = vadd.f32 %v10962_v60, %v4882_v15  ;;  %v4608_v9 = vpop.f32.mrb[127].mxu0  ;;  %v4817_v20 = vadd.f32 %v4816_v62, %v4591_v47 }
 0x3e8   : > { %11991 = vst [vmem:[#allocation31_spill] sm:$0xff] %v11194_v23  ;;  %v5071_v61 = vadd.f32 %v5070_v32, %v5069_v7  ;;  %v4885_v45 = vmul.f32 %v10948_v43, %v4822_v4  ;;  %v5072_v63 = vsel %vm981_vm0, %v11993_v0, 0.0 }
 0x3e9   : > { %11992 = vst [vmem:[#allocation32_spill] sm:$0xff] %v11200_v1  ;;  %v11888_v53 = vmax.f32 %v11200_v1, 0.0  ;;  %v4884_v26 = vmul.f32 %v10948_v43, %v4817_v20  ;;  %v6410_v36 = vpop.f32.mrb[82].mxu1 }
 0x3ea   : > { %v5073_v25 = vadd.f32 %v5072_v63, %v5071_v61  ;;  %v11210_v15 = vadd.f32 %v10962_v60, %v4885_v45  ;;  %v4611_v9 = vpop.f32.mrb[128].mxu0  ;;  %v4832_v47 = vadd.f32 %v6410_v36, %v4606_v39  ;;  %v4826_v7 = vpop.f32.mrb[83].mxu1  ;;  %v11995_v45 = vmax.f32 %v11194_v23, 0.0 }
 0x3eb   : > { %v5074_v4 = vsel %vm981_vm0, %v11888_v53, 0.0  ;;  %v11216_v62 = vadd.f32 %v10962_v60, %v4884_v26  ;;  %v4613_v32 = vpop.f32.mrb[129].mxu0  ;;  %v4827_v0 = vadd.f32 %v4826_v7, %v4601_v14 }
 0x3ec   : > { %v5075_v38 = vadd.f32 %v5074_v4, %v5073_v25  ;;  %v11899_v20 = vmax.f32 %v11210_v15, 0.0  ;;  %v4887_v61 = vmul.f32 %v10948_v43, %v4832_v47  ;;  %v5076_v63 = vsel %vm981_vm0, %v11995_v45, 0.0 }
 0x3ed   : > { %11994 = vst [vmem:[#allocation33_spill] sm:$0xff] %v11216_v62  ;;  %v11891_v36 = vmax.f32 %v11216_v62, 0.0  ;;  %v4886_v39 = vmul.f32 %v10948_v43, %v4827_v0  ;;  %v6413_v1 = vpop.f32.mrb[84].mxu1 }
 0x3ee   : > { %v5077_v53 = vadd.f32 %v5076_v63, %v5075_v38  ;;  %v11226_v26 = vadd.f32 %v10962_v60, %v4887_v61  ;;  %v4616_v32 = vpop.f32.mrb[130].mxu0  ;;  %v4836_v14 = vpop.f32.mrb[85].mxu1  ;;  %v5080_v0 = vsel %vm981_vm0, %v11899_v20, 0.0 }
 0x3ef   : > { %v5078_v25 = vsel %vm981_vm0, %v11891_v36, 0.0  ;;  %v11232_v47 = vadd.f32 %v10962_v60, %v4886_v39  ;;  %v4842_v7 = vadd.f32 %v6413_v1, %v4616_v32  ;;  %v4618_v4 = vpop.f32.mrb[131].mxu0  ;;  %v4837_v45 = vadd.f32 %v4836_v14, %v4611_v9 }
 0x3f0   : > { %11996 = vst [vmem:[#allocation34_spill] sm:$0xff] %v11226_v26  ;;  %v5079_v38 = vadd.f32 %v5078_v25, %v5077_v53  ;;  %v11897_v61 = vmax.f32 %v11226_v26, 0.0 }
 0x3f1   : > { %11997 = vst [vmem:[#allocation35_spill] sm:$0xff] %v11232_v47  ;;  %v11893_v63 = vmax.f32 %v11232_v47, 0.0  ;;  %v4889_v23 = vmul.f32 %v10948_v43, %v4842_v7  ;;  %v4888_v62 = vmul.f32 %v10948_v43, %v4837_v45  ;;  %v6416_v36 = vpop.f32.mrb[86].mxu1 }
 0x3f2   : > { %v5081_v8 = vadd.f32 %v5080_v0, %v5079_v38  ;;  %v4846_v39 = vpop.f32.mrb[87].mxu1  ;;  %v4621_v32 = vpop.f32.mrb[132].mxu0  ;;  %v5084_v7 = vsel %vm981_vm0, %v11897_v61, 0.0 }
 0x3f3   : > { %v5082_v1 = vsel %vm981_vm0, %v11893_v63, 0.0  ;;  %v11245_v9 = vadd.f32 %v10962_v60, %v4889_v23  ;;  %v11248_v53 = vadd.f32 %v10962_v60, %v4888_v62  ;;  %v4847_v25 = vadd.f32 %v4846_v39, %v4621_v32  ;;  %v4623_v4 = vpop.f32.mrb[133].mxu0 }
 0x3f4   : > { %v5083_v14 = vadd.f32 %v5082_v1, %v5081_v8 }
 0x3f5   : > { %11998 = vst [vmem:[#allocation36_spill] sm:$0xff] %v11245_v9  ;;  %11999 = vst [vmem:[#allocation37_spill] sm:$0xff] %v11248_v53  ;;  %v11895_v45 = vmax.f32 %v11248_v53, 0.0  ;;  %v4890_v38 = vmul.f32 %v10948_v43, %v4847_v25  ;;  %v11894_v63 = vmax.f32 %v11245_v9, 0.0  ;;  %v5202_v53 = vlaneseq }
 0x3f6   : > { %v5085_v0 = vadd.f32 %v5084_v7, %v5083_v14 }
 0x3f7   : > { %v5086_v23 = vsel %vm981_vm0, %v11895_v45, 0.0  ;;  %v11260_v8 = vadd.f32 %v10962_v60, %v4890_v38  ;;  %v4626_v39 = vpop.f32.mrb[134].mxu0  ;;  %v5088_v14 = vsel %vm981_vm0, %v11894_v63, 0.0  ;;  %v5203_v26 = vshrl.u32 %v5202_v53, 7 }
 0x3f8   : > { %v5087_v62 = vadd.f32 %v5086_v23, %v5085_v0  ;;  %v4852_v1 = vadd.f32 %v6416_v36, %v4626_v39  ;;  %v4628_v32 = vpop.f32.mrb[135].mxu0 }
 0x3f9   : > { %12000 = vst [vmem:[#allocation38_spill] sm:$0xff] %v11260_v8  ;;  %v11896_v4 = vmax.f32 %v11260_v8, 0.0 }
 0x3fa   : > { %v4891_v25 = vmul.f32 %v10948_v43, %v4852_v1  ;;  %v5089_v7 = vadd.f32 %v5088_v14, %v5087_v62 }
 0x3fb   : > { %v5090_v0 = vsel %vm981_vm0, %v11896_v4, 0.0  ;;  %v5128_v4 = vld [vmem:[%s11796_s10 + $0x1] sm:$0x1] }
 0x3fc   : > { %v11271_v38 = vadd.f32 %v10962_v60, %v4891_v25  ;;  %v5091_v23 = vadd.f32 %v5090_v0, %v5089_v7  ;;  %v5127_v25 = vld [vmem:[%s11042_s1 + $0x1] sm:$0x1]  ;;  %s11368_s1 = sand.u32 1, %s7827_s28  }
 0x3fd   : > { %s5952_s29 = sshll.u32 %s11368_s1, 1  ;;  %s5815_s19 = scalar_lea.sflag [#allocation6], %s11368_s1 }
 0x3fe   : > { %12001 = vst [vmem:[#allocation39_spill] sm:$0xff] %v11271_v38  ;;  %v11898_v36 = vmax.f32 %v11271_v38, 0.0  ;;  %s11402_s17 = scalar_lea.vmem [#allocation5], %s5952_s29  ;;  %s7745_s29 = sshll.u32 %s7844_s24, 4  ;;  %s7746_s29 = int_to_ptr.vmem [resolvable:$false] %s7745_s29 }
 0x3ff   : > { %s5844_s25 = sshll.u32 %s11402_s17, 4  ;;  %s7747_s3 = scalar_lea.vmem %s7746_s29, 64  ;;  %s5845_s25 = int_to_ptr.vmem [resolvable:$true] %s5844_s25 }
 0x400   : > { %v5092_v39 = vsel %vm981_vm0, %v11898_v36, 0.0  ;;  %s7741_s23 = scalar_lea.vmem %s5845_s25, 32  ;;  %p7748_p0 = scmp.lt.s32.totalorder %s5845_s25, %s7746_s29 }
 0x401   : > { %v5093_v32 = vadd.f32 %v5092_v39, %v5091_v23  ;;  %p7742_p11 = scmp.ne.s32.totalorder %s5845_s25, %s7741_s23  ;;  %p7749_p1 = scmp.lt.s32.totalorder %s7747_s3, %s7741_s23 }
 0x403   : > { %v5094_v63 = vrot.slane %v5093_v32, 4  ;;  %p7743_p12 = pnand %p7742_p11, %p7981_p5  ;;  %p7750_p2 = por %p7749_p1, %p7748_p0 }
 0x405   : > { %v5095_v45 = vadd.f32 %v5094_v63, %v5093_v32  ;;  %p7744_p13 = pneg %p7743_p12 }
 0x407   : > { %v5096_v43 = vrot.slane %v5095_v45, 2  ;;  %p7751_p3 = pnand %p7750_p2, %p7744_p13 }
 0x409   : > { %v5097_v1 = vadd.f32 %v5096_v43, %v5095_v45 }
 0x40b   : > { %v5098_v62 = vrot.slane %v5097_v1, 1 }
 0x40d   : > { %v5099_v14 = vadd.f32 %v5098_v62, %v5097_v1 }
 0x40f   : > { %v11280_v60 = vmul.f32 0.00390625, %v5099_v14 }
 0x411   : > { %v5130_v7 = vmul.f32 %v5128_v4, %v11280_v60 }
 0x413   : > { %v5131_v0 = vadd.f32 %v5130_v7, %v5127_v25 }
 0x415   : > { %v5132_v61 = vsel %vm5106_vm4, %v5131_v0, 0.0 }
 0x416   : > { %5133 = vadd.xlane.f32.xlu1 %v5132_v61 }
 0x45d   : > { %v5109_v23 = vpop.xlane.xlu0 %5108 }
 0x45e   : > { %v5111_v39 = vmul.f32 0.03125, %v5109_v23 }
 0x460   : > { %v5112_v63 = vsub.f32 %v11078_v49, %v5111_v39 }
 0x462   : > { %v5113_v45 = vmul.f32 %v5112_v63, %v5112_v63 }
 0x464   : > { %v5114_v32 = vsel %vm5106_vm4, %v5113_v45, 0.0  ;;  %v5103_v45 = vld [vmem:[%s11797_s11] sm:$0x3] }
 0x465   : > { %5115 = vadd.xlane.f32.xlu0 %v5114_v32 }
 0x4a3   : > { %v5134_v43 = vpop.xlane.xlu1 %5133 }
 0x4a4   : > { %v5135_v1 = vmul.f32 0.03125, %v5134_v43 }
 0x4a6   : > { %v5136_v62 = vsub.f32 %v5131_v0, %v5135_v1  ;;  %v5129_v0 = vld [vmem:[%s11798_s12] sm:$0x3] }
 0x4a8   : > { %v5137_v14 = vmul.f32 %v5136_v62, %v5136_v62 }
 0x4aa   : > { %v5138_v36 = vsel %vm5106_vm4, %v5137_v14, 0.0  ;;  %v5147_v14 = vrot.slane %v5129_v0, 1 }
 0x4ab   : > { %5139 = vadd.xlane.f32.xlu0 %v5138_v36  ;;  %v5123_v36 = vrot.slane %v5103_v45, 1 }
 0x4f2   : > { %v5116_v4 = vpop.xlane.xlu0 %5115 }
 0x4f3   : > { %v5117_v25 = vmul.f32 0.03125, %v5116_v4 }
 0x4f5   : > { %v5118_v7 = vadd.f32 1e-05, %v5117_v25 }
 0x4f7   : > { %7672 = vrsqrt.f32 %v5118_v7 }
 0x501   : > { %v7673_v49 = vpop.eup %7672 }
 0x502   : > { %v5120_v39 = vmul.f32 %v7673_v49, %v5112_v63  ;;  %v5157_v63 = vld [vmem:[%s11799_s13 + $0x1] sm:$0x1] }
 0x504   : > { %v5121_v32 = vmul.f32 %v5120_v39, %v5103_v45 }
 0x506   : > { %v5125_v4 = vadd.f32 %v5123_v36, %v5121_v32  ;;  %v7843_v32 = vmov 0   ;;  %v5306_v36 = vld [vmem:[%s11791_s5] sm:$0xff] }
 0x507   : > { %7670 = vset.pattern.permute.xlu1 %v7843_v32  ;;  %v5177_v32 = vld [vmem:[%s11802_s16] sm:$0x1] }
 0x538   : > { %v5140_v61 = vpop.xlane.xlu0 %5139 }
 0x539   : > { %v5141_v20 = vmul.f32 0.03125, %v5140_v61 }
 0x53b   : > { %v5142_v23 = vadd.f32 1e-05, %v5141_v20  ;;  %v5126_v20 = vmax.f32 %v5125_v4, 0.0 }
 0x53d   : > { %7674 = vrsqrt.f32 %v5142_v23  ;;  %v5152_v23 = vld [vmem:[%s11799_s13] sm:$0x1] }
 0x547   : > { %v7675_v43 = vpop.eup %7674 }
 0x548   : > { %v5144_v1 = vmul.f32 %v7675_v43, %v5136_v62  ;;  %v5307_v43 = vld [vmem:[%s11791_s5 + $0x8] sm:$0xff] }
 0x54a   : > { %v5145_v25 = vmul.f32 %v5144_v1, %v5129_v0  ;;  %v7842_v0 = vmov 1   ;;  %v6617_v1 = vpack.c.bf16 %v5307_v43, %v5306_v36 }
 0x54b   : > { %7671 = vset.pattern.permute.xlu0 %v7842_v0  ;;  %v5169_v0 = vld [vmem:[%s11801_s15] sm:$0x1] }
 0x54c   : > { %v5149_v7 = vadd.f32 %v5147_v14, %v5145_v25  ;;  %6618 = vmatprep.subr.bf16.mxu1 %v6617_v1  ;;  %v5166_v25 = vld [vmem:[%s11800_s14 + $0x1] sm:$0x1] }
 0x54d   : > { %6620 = vmatpush3.bf16.msra.mxu1 %v6617_v1 }
 0x54e   : > { %v5150_v61 = vmax.f32 %v5149_v7, 0.0 }
 0x550   : > { %v5151_v49 = vadd.f32 %v5150_v61, %v5126_v20 }
 0x552   : > { %v5158_v38 = vmul.f32 %v5157_v63, %v5151_v49  ;;  %v5153_v39 = vmul.f32 %v5152_v23, %v5151_v49  ;;  %v5308_v23 = vld [vmem:[%s11791_s5 + $0x10] sm:$0xff]  ;;  %v5309_v49 = vld [vmem:[%s11791_s5 + $0x18] sm:$0xff] }
 0x554   : > { %v5159_v45 = vsel %vm5106_vm4, %v5158_v38, 0.0  ;;  %v5154_v62 = vsel %vm5106_vm4, %v5153_v39, 0.0  ;;  %v5164_v38 = vld [vmem:[%s11800_s14] sm:$0x1]  ;;  %v6621_v39 = vpack.c.bf16 %v5309_v49, %v5308_v23 }
 0x555   : > { %5160 = vadd.xlane.f32.xlu0 %v5159_v45  ;;  %5155 = vadd.xlane.f32.xlu1 %v5154_v62  ;;  %v5180_v45 = vld [vmem:[%s11801_s15 + $0x1] sm:$0x1] }
 0x556   : > { %6622 = vmatprep.subr.bf16.mxu1 %v6621_v39  ;;  %v5187_v62 = vld [vmem:[%s11802_s16 + $0x1] sm:$0x1] }
 0x557   : > { %6624 = vmatpush3.bf16.msra.mxu1 %v6621_v39 }
 0x5e2   : > { %v5161_v14 = vpop.xlane.xlu0 %5160  ;;  %v5156_v4 = vpop.xlane.xlu1 %5155 }
 0x5e3   : > { %v5163_v7 = vsel %vm5162_vm5, %v5156_v4, %v5161_v14 }
 0x5e4   : > { %v5165_v20 = vmul.f32 %v5164_v38, %v5163_v7 }
 0x5e6   : > { %v5167_v61 = vadd.f32 %v5166_v25, %v5165_v20 }
 0x5e8   : > { %v5168_v63 = vmax.f32 %v5167_v61, 0.0 }
 0x5ea   : > { %5182 = vperm.xlu0 %7671, %v5168_v63   ;;  %5172 = vperm.xlu1 %7670, %v5168_v63  }
 0x669   : > { %v5183_v36 = vpop.permute.xlu0 %5182  ;;  %v5173_v43 = vpop.permute.xlu1 %5172 }
 0x66a   : > { %v5185_v1 = vmul.f32 %v5183_v36, %v5180_v45  ;;  %v5188_v38 = vmul.f32 %v5187_v62, %v5183_v36  ;;  %v5175_v14 = vmul.f32 %v5173_v43, %v5169_v0  ;;  %v5178_v4 = vmul.f32 %v5177_v32, %v5173_v43 }
 0x66b   : > { %v5204_v45 = vsub.s32 0, %v5203_v26  ;;  %v12002_v43 = vmax.f32 %v10652_v22, 0.0  ;;  %v12005_v26 = vmax.f32 %v10972_v31, 0.0  ;;  %v12007_v22 = vmax.f32 %v10998_v58, 0.0 }
 0x66c   : > { %v5186_v25 = vadd.f32 %v5185_v1, %v5175_v14  ;;  %v5189_v7 = vadd.f32 %v5188_v38, %v5178_v4  ;;  %v12003_v38 = vmax.f32 %v10649_v42, 0.0 }
 0x66e   : > { %v5190_v20 = vmax.f32 %v5186_v25, %v5189_v7 }
 0x670   : > { %v5191_v61 = vsub.f32 %v5186_v25, %v5190_v20  ;;  %v5194_v63 = vsub.f32 %v5189_v7, %v5190_v20  ;;  %v12008_v20 = vmax.f32 %v10676_v5, 0.0 }
 0x672   : > { %v5192_v23 = vmul.f32 1.442695, %v5191_v61  ;;  %v5195_v49 = vmul.f32 1.442695, %v5194_v63  ;;  %v12009_v61 = vmax.f32 %v10989_v54, 0.0  ;;  %v12010_v63 = vmax.f32 %v10687_v6, 0.0 }
 0x673   : > { %v12012_v6 = vmax.f32 %v10703_v56, 0.0 }
 0x674   : > { %7676 = vpow2.f32 %v5192_v23  ;;  %v12011_v23 = vmax.f32 %v11015_v46, 0.0  ;;  %v12013_v46 = vmax.f32 %v11006_v52, 0.0 }
 0x675   : > { %7678 = vpow2.f32 %v5195_v49 }
 0x67e   : > { %v7677_v39 = vpop.eup %7676 }
 0x67f   : > { %v7679_v8 = vpop.eup %7678 }
 0x680   : > { %v5197_v9 = vadd.f32 %v7679_v8, %v7677_v39 }
 0x682   : > { %7680 = vrcp.f32 %v5197_v9  ;;  %v12004_v9 = vmax.f32 %v10978_v24, 0.0 }
 0x68c   : > { %v7681_v47 = vpop.eup %7680 }
 0x68d   : > { %v5200_v62 = vmul.f32 %v7681_v47, %v7677_v39  ;;  %v5201_v0 = vmul.f32 %v7681_v47, %v7679_v8  ;;  %v12006_v8 = vmax.f32 %v10655_v33, 0.0 }
 0x68f   : > { %v11332_v32 = vrot.slane %v5200_v62, %v5204_v45  ;;  %v11334_v36 = vrot.slane %v5201_v0, %v5204_v45  ;;  %v5802_v5 = vmul.f32 %v5201_v0, %v11280_v60  ;;  %v5801_v56 = vmul.f32 %v5200_v62, %v11054_v21 }
 0x690   : > { %v12016_v60 = vmax.f32 %v10712_v17, 0.0  ;;  %v12020_v17 = vmax.f32 %v10725_v18, 0.0  ;;  %v12024_v18 = vmax.f32 %v10746_v35, 0.0  ;;  %v12028_v35 = vmax.f32 %v10769_v10, 0.0 }
 0x691   : > { %v5206_v1 = vmul.f32 %v11332_v32, %v12002_v43  ;;  %v5207_v14 = vmul.f32 %v11332_v32, %v12003_v38  ;;  %v5242_v53 = vmul.f32 %v11334_v36, %v12004_v9  ;;  %v5243_v47 = vmul.f32 %v11334_v36, %v12005_v26 }
 0x692   : > { %v5208_v4 = vmul.f32 %v11332_v32, %v12006_v8  ;;  %v5244_v25 = vmul.f32 %v11334_v36, %v12007_v22  ;;  %v5209_v24 = vmul.f32 %v11332_v32, %v12008_v20  ;;  %v5245_v31 = vmul.f32 %v11334_v36, %v12009_v61 }
 0x693   : > { %v5275_v7 = vadd.f32 %v5243_v47, %v5207_v14  ;;  %v5274_v42 = vadd.f32 %v5242_v53, %v5206_v1  ;;  %v5210_v33 = vmul.f32 %v11332_v32, %v12010_v63  ;;  %v5246_v58 = vmul.f32 %v11334_v36, %v12011_v23 }
 0x694   : > { %v5276_v49 = vadd.f32 %v5244_v25, %v5208_v4  ;;  %v5211_v54 = vmul.f32 %v11332_v32, %v12012_v6  ;;  %v5247_v39 = vmul.f32 %v11334_v36, %v12013_v46  ;;  %v5277_v45 = vadd.f32 %v5245_v31, %v5209_v24 }
 0x695   : > { %6425 = vmatprep.mubr.msk.f32.mxu1 %vm981_vm0, %v5274_v42  ;;  %v12014_v43 = vmax.f32 %v10706_v57, 0.0  ;;  %v12015_v38 = vmax.f32 %v11036_v28, 0.0  ;;  %v5278_v9 = vadd.f32 %v5246_v58, %v5210_v33  ;;  %v5804_v52 = vrot.slane %v5802_v5, 7 }
 0x696   : > { %6426 = vmatmul.mubr.msk.f32.vlgmr.msra.gmra.mrb[88].mxu1 %vm981_vm0, %v5275_v7  ;;  %v5213_v0 = vmul.f32 %v11332_v32, %v12016_v60  ;;  %v12017_v57 = vmax.f32 %v11027_v3, 0.0  ;;  %v5279_v28 = vadd.f32 %v5247_v39, %v5211_v54  ;;  %v12018_v26 = vmax.f32 %v10717_v13, 0.0 }
 0x697   : > { %6428 = vmatprep.mubr.msk.f32.mxu1 %vm981_vm0, %v5276_v49  ;;  %v5212_v1 = vmul.f32 %v11332_v32, %v12014_v43  ;;  %v5248_v14 = vmul.f32 %v11334_v36, %v12015_v38  ;;  %v12019_v8 = vmax.f32 %v11067_v34, 0.0  ;;  %v5807_v21 = vsel %vm5806_vm6, %v5801_v56, %v5804_v52 }
 0x698   : > { %v5249_v53 = vmul.f32 %v11334_v36, %v12017_v57  ;;  %v5214_v47 = vmul.f32 %v11332_v32, %v12018_v26  ;;  %5808 = vst.msk [vmem:[%s11402_s17] sm:$0x3] %vm986_vm1, %v5807_v21  ;;  %v5215_v13 = vmul.f32 %v11332_v32, %v12020_v17  ;;  %v12021_v3 = vmax.f32 %v11057_v51, 0.0  ;;  %v12046_v17 = vld [vmem:[#allocation30_spill] sm:$0xff] }
 0x699   : > { %v5250_v4 = vmul.f32 %v11334_v36, %v12019_v8  ;;  %v5280_v22 = vadd.f32 %v5248_v14, %v5212_v1  ;;  %v12022_v25 = vmax.f32 %v10737_v30, 0.0  ;;  %v12023_v42 = vmax.f32 %v11090_v37, 0.0 }
 0x69a   : > { %6429 = vmatmul.mubr.msk.f32.gmra.mrb[90].mxu1 %vm981_vm0, %v5277_v45  ;;  %v5251_v34 = vmul.f32 %v11334_v36, %v12021_v3  ;;  %v5281_v62 = vadd.f32 %v5249_v53, %v5213_v0  ;;  %v5217_v51 = vmul.f32 %v11332_v32, %v12024_v18  ;;  %v12025_v61 = vmax.f32 %v11081_v50, 0.0  ;;  %v12039_v0 = vld [vmem:[#allocation28_spill] sm:$0xff]  ;;  %v12052_v18 = vld [vmem:[#allocation15_spill] sm:$0xff] }
 0x69b   : > { %6431 = vmatprep.mubr.msk.f32.mxu1 %vm981_vm0, %v5278_v9  ;;  %v5216_v7 = vmul.f32 %v11332_v32, %v12022_v25  ;;  %v5252_v20 = vmul.f32 %v11334_v36, %v12023_v42  ;;  %v5282_v24 = vadd.f32 %v5250_v4, %v5214_v47  ;;  %v12026_v63 = vmax.f32 %v10757_v29, 0.0  ;;  %v12044_v4 = vld [vmem:[#allocation18_spill] sm:$0xff] }
 0x69c   : > { %v5253_v31 = vmul.f32 %v11334_v36, %v12025_v61  ;;  %v5283_v30 = vadd.f32 %v5251_v34, %v5215_v13  ;;  %v12027_v33 = vmax.f32 %v11112_v16, 0.0  ;;  %v5219_v50 = vmul.f32 %v11332_v32, %v12028_v35  ;;  %v12058_v35 = vld [vmem:[#allocation31_spill] sm:$0xff] }
 0x69d   : > { %v5218_v37 = vmul.f32 %v11332_v32, %v12026_v63  ;;  %v5284_v58 = vadd.f32 %v5252_v20, %v5216_v7  ;;  %v12029_v49 = vmax.f32 %v11103_v40, 0.0  ;;  %v12030_v6 = vmax.f32 %v10778_v19, 0.0  ;;  %v12050_v7 = vld [vmem:[#allocation29_spill] sm:$0xff] }
 0x69e   : > { %6432 = vmatmul.mubr.msk.f32.gmra.mrb[92].mxu1 %vm981_vm0, %v5279_v28  ;;  %v5254_v23 = vmul.f32 %v11334_v36, %v12027_v33  ;;  %v5285_v29 = vadd.f32 %v5253_v31, %v5217_v51  ;;  %v12031_v54 = vmax.f32 %v11130_v55, 0.0  ;;  %v12032_v10 = vmax.f32 %v10790_v48, 0.0  ;;  %v12054_v31 = vld [vmem:[#allocation32_spill] sm:$0xff]  ;;  %v12056_v33 = vld [vmem:[#allocation21_spill] sm:$0xff] }
 0x69f   : > { %6434 = vmatprep.mubr.msk.f32.mxu1 %vm981_vm0, %v5280_v22  ;;  %v5255_v5 = vmul.f32 %v11334_v36, %v12029_v49  ;;  %v5220_v16 = vmul.f32 %v11332_v32, %v12030_v6  ;;  %v12033_v45 = vmax.f32 %v11123_v27, 0.0  ;;  %v12034_v1 = vmax.f32 %v10799_v44, 0.0 }
 0x6a0   : > { %v5256_v46 = vmul.f32 %v11334_v36, %v12031_v54  ;;  %v5286_v39 = vadd.f32 %v5254_v23, %v5218_v37  ;;  %v5221_v40 = vmul.f32 %v11332_v32, %v12032_v10  ;;  %v12035_v38 = vmax.f32 %v11148_v11, 0.0  ;;  %v12062_v54 = vld [vmem:[#allocation33_spill] sm:$0xff] }
 0x6a1   : > { %v5257_v43 = vmul.f32 %v11334_v36, %v12033_v45  ;;  %v5287_v19 = vadd.f32 %v5255_v5, %v5219_v50  ;;  %v5222_v55 = vmul.f32 %v11332_v32, %v12034_v1  ;;  %v12036_v48 = vmax.f32 %v10808_v41, 0.0  ;;  %v12041_v41 = vld [vmem:[#allocation16_spill] sm:$0xff] }
 0x6a2   : > { %6435 = vmatmul.mubr.msk.f32.gmra.mrb[94].mxu1 %vm981_vm0, %v5281_v62  ;;  %v5258_v14 = vmul.f32 %v11334_v36, %v12035_v38  ;;  %v5288_v9 = vadd.f32 %v5256_v46, %v5220_v16  ;;  %v12037_v56 = vmax.f32 %v11141_v12, 0.0  ;;  %v12038_v60 = vmax.f32 %v10817_v2, 0.0  ;;  %v12048_v62 = vld [vmem:[#allocation20_spill] sm:$0xff]  ;;  %v12067_v38 = vld [vmem:[#allocation17_spill] sm:$0xff] }
 0x6a3   : > { %6437 = vmatprep.mubr.msk.f32.mxu1 %vm981_vm0, %v5282_v24  ;;  %v5223_v27 = vmul.f32 %v11332_v32, %v12036_v48  ;;  %v5289_v44 = vadd.f32 %v5257_v43, %v5221_v40  ;;  %v12040_v57 = vmax.f32 %v12039_v0, 0.0  ;;  %v12042_v26 = vmax.f32 %v12041_v41, 0.0  ;;  %v12064_v40 = vld [vmem:[#allocation19_spill] sm:$0xff] }
 0x6a4   : > { %v5259_v52 = vmul.f32 %v11334_v36, %v12037_v56  ;;  %v5224_v11 = vmul.f32 %v11332_v32, %v12038_v60  ;;  %v5290_v28 = vadd.f32 %v5258_v14, %v5222_v55  ;;  %v12043_v47 = vmax.f32 %v11159_v59, 0.0  ;;  %v12069_v48 = vld [vmem:[#allocation35_spill] sm:$0xff] }
 0x6a5   : > { %v5260_v53 = vmul.f32 %v11334_v36, %v12040_v57  ;;  %v5225_v12 = vmul.f32 %v11332_v32, %v12042_v26  ;;  %v12045_v22 = vmax.f32 %v12044_v4, 0.0  ;;  %v12047_v13 = vmax.f32 %v12046_v17, 0.0  ;;  %v12079_v4 = vld [vmem:[#allocation25_spill] sm:$0xff]  ;;  %v12081_v17 = vld [vmem:[#allocation36_spill] sm:$0xff] }
 0x6a6   : > { %6438 = vmatmul.mubr.msk.f32.gmra.mrb[96].mxu1 %vm981_vm0, %v5283_v30  ;;  %v5261_v8 = vmul.f32 %v11334_v36, %v12043_v47  ;;  %v5291_v2 = vadd.f32 %v5259_v52, %v5223_v27  ;;  %v12049_v25 = vmax.f32 %v12048_v62, 0.0  ;;  %v12051_v42 = vmax.f32 %v12050_v7, 0.0  ;;  %v12083_v62 = vld [vmem:[#allocation26_spill] sm:$0xff] }
 0x6a7   : > { %6440 = vmatprep.mubr.msk.f32.mxu1 %vm981_vm0, %v5284_v58  ;;  %v5226_v21 = vmul.f32 %v11332_v32, %v12045_v22  ;;  %v5262_v3 = vmul.f32 %v11334_v36, %v12047_v13  ;;  %v5292_v34 = vadd.f32 %v5260_v53, %v5224_v11  ;;  %v12053_v51 = vmax.f32 %v12052_v18, 0.0  ;;  %v12073_v11 = vld [vmem:[#allocation34_spill] sm:$0xff]  ;;  %v12087_v18 = vld [vmem:[#allocation27_spill] sm:$0xff] }
 0x6a8   : > { %v5227_v59 = vmul.f32 %v11332_v32, %v12049_v25  ;;  %v5263_v20 = vmul.f32 %v11334_v36, %v12051_v42  ;;  %v5293_v24 = vadd.f32 %v5261_v8, %v5225_v12  ;;  %v12055_v30 = vmax.f32 %v12054_v31, 0.0  ;;  %v12077_v12 = vld [vmem:[#allocation37_spill] sm:$0xff]  ;;  %v12085_v7 = vld [vmem:[#allocation38_spill] sm:$0xff]  ;;  %v12089_v31 = vld [vmem:[#allocation39_spill] sm:$0xff] }
 0x6a9   : > { %v5228_v61 = vmul.f32 %v11332_v32, %v12053_v51  ;;  %v5294_v37 = vadd.f32 %v5262_v3, %v5226_v21  ;;  %v12057_v23 = vmax.f32 %v12056_v33, 0.0  ;;  %v12059_v50 = vmax.f32 %v12058_v35, 0.0 }
 0x6aa   : > { %6441 = vmatmul.mubr.msk.f32.gmra.mrb[98].mxu1 %vm981_vm0, %v5285_v29  ;;  %v5264_v63 = vmul.f32 %v11334_v36, %v12055_v30  ;;  %v5295_v5 = vadd.f32 %v5263_v20, %v5227_v59  ;;  %v12060_v29 = vld [vmem:[#allocation22_spill] sm:$0xff]  ;;  %v12063_v46 = vmax.f32 %v12062_v54, 0.0  ;;  %v12065_v45 = vmax.f32 %v12064_v40, 0.0 }
 0x6ab   : > { %6443 = vmatprep.mubr.msk.f32.mxu1 %vm981_vm0, %v5286_v39  ;;  %v5229_v58 = vmul.f32 %v11332_v32, %v12057_v23  ;;  %v5265_v49 = vmul.f32 %v11334_v36, %v12059_v50  ;;  %v12061_v6 = vmax.f32 %v12060_v29, 0.0  ;;  %v12068_v14 = vmax.f32 %v12067_v38, 0.0 }
 0x6ac   : > { %v5266_v39 = vmul.f32 %v11334_v36, %v12063_v46  ;;  %v5296_v10 = vadd.f32 %v5264_v63, %v5228_v61  ;;  %v5231_v43 = vmul.f32 %v11332_v32, %v12065_v45  ;;  %v12070_v27 = vmax.f32 %v12069_v48, 0.0 }
 0x6ad   : > { %v5230_v16 = vmul.f32 %v11332_v32, %v12061_v6  ;;  %v5297_v55 = vadd.f32 %v5265_v49, %v5229_v58  ;;  %v12074_v0 = vmax.f32 %v12073_v11, 0.0  ;;  %v12078_v47 = vmax.f32 %v12077_v12, 0.0 }
 0x6ae   : > { %6444 = vmatmul.mubr.msk.f32.gmra.mrb[100].mxu1 %vm981_vm0, %v5287_v19  ;;  %v12066_v19 = vmax.f32 %v11210_v15, 0.0  ;;  %v5268_v56 = vmul.f32 %v11334_v36, %v12070_v27  ;;  %v12080_v22 = vmax.f32 %v12079_v4, 0.0  ;;  %v12082_v13 = vmax.f32 %v12081_v17, 0.0 }
 0x6af   : > { %6446 = vmatprep.mubr.msk.f32.mxu1 %vm981_vm0, %v5288_v9  ;;  %v5232_v9 = vmul.f32 %v11332_v32, %v12068_v14  ;;  %v5298_v52 = vadd.f32 %v5266_v39, %v5230_v16  ;;  %v5269_v57 = vmul.f32 %v11334_v36, %v12074_v0  ;;  %v5270_v8 = vmul.f32 %v11334_v36, %v12078_v47 }
 0x6b0   : > { %v5267_v1 = vmul.f32 %v11334_v36, %v12066_v19  ;;  %v5235_v21 = vmul.f32 %v11332_v32, %v12080_v22  ;;  %v5271_v3 = vmul.f32 %v11334_v36, %v12082_v13  ;;  %v12084_v25 = vmax.f32 %v12083_v62, 0.0 }
 0x6b1   : > { %v12086_v42 = vmax.f32 %v12085_v7, 0.0  ;;  %v12088_v51 = vmax.f32 %v12087_v18, 0.0  ;;  %v12090_v30 = vmax.f32 %v12089_v31, 0.0 }
 0x6b2   : > { %6447 = vmatmul.mubr.msk.f32.gmra.mrb[102].mxu1 %vm981_vm0, %v5289_v44  ;;  %v12071_v44 = vld [vmem:[#allocation23_spill] sm:$0xff]  ;;  %v5299_v53 = vadd.f32 %v5267_v1, %v5231_v43  ;;  %v5236_v59 = vmul.f32 %v11332_v32, %v12084_v25 }
 0x6b3   : > { %6449 = vmatprep.mubr.msk.f32.mxu1 %vm981_vm0, %v5290_v28  ;;  %v12072_v60 = vmax.f32 %v12071_v44, 0.0  ;;  %v12075_v28 = vld [vmem:[#allocation24_spill] sm:$0xff]  ;;  %v5272_v20 = vmul.f32 %v11334_v36, %v12086_v42  ;;  %v5237_v61 = vmul.f32 %v11332_v32, %v12088_v51  ;;  %v5273_v63 = vmul.f32 %v11334_v36, %v12090_v30 }
 0x6b4   : > { %v12076_v41 = vmax.f32 %v12075_v28, 0.0 }
 0x6b5   : > { %v5233_v15 = vmul.f32 %v11332_v32, %v12072_v60  ;;  %v5304_v33 = vadd.f32 %v5272_v20, %v5236_v59  ;;  %v5305_v23 = vadd.f32 %v5273_v63, %v5237_v61 }
 0x6b6   : > { %6450 = vmatmul.mubr.msk.f32.gmra.mrb[104].mxu1 %vm981_vm0, %v5291_v2  ;;  %v5234_v26 = vmul.f32 %v11332_v32, %v12076_v41  ;;  %v5300_v2 = vadd.f32 %v5268_v56, %v5232_v9 }
 0x6b7   : > { %6452 = vmatprep.mubr.msk.f32.mxu1 %vm981_vm0, %v5292_v34  ;;  %v5301_v34 = vadd.f32 %v5269_v57, %v5233_v15 }
 0x6ba   : > { %6453 = vmatmul.mubr.msk.f32.gmra.mrb[106].mxu1 %vm981_vm0, %v5293_v24  ;;  %v5302_v24 = vadd.f32 %v5270_v8, %v5234_v26 }
 0x6bb   : > { %6455 = vmatprep.mubr.msk.f32.mxu1 %vm981_vm0, %v5294_v37  ;;  %v5303_v37 = vadd.f32 %v5271_v3, %v5235_v21 }
 0x6be   : > { %6456 = vmatmul.mubr.msk.f32.gmra.mrb[108].mxu1 %vm981_vm0, %v5295_v5 }
 0x6bf   : > { %6458 = vmatprep.mubr.msk.f32.mxu1 %vm981_vm0, %v5296_v10 }
 0x6c2   : > { %6459 = vmatmul.mubr.msk.f32.gmra.mrb[110].mxu1 %vm981_vm0, %v5297_v55 }
 0x6c3   : > { %6461 = vmatprep.mubr.msk.f32.mxu1 %vm981_vm0, %v5298_v52 }
 0x6c6   : > { %6462 = vmatmul.mubr.msk.f32.gmra.mrb[112].mxu1 %vm981_vm0, %v5299_v53 }
 0x6c7   : > { %6464 = vmatprep.mubr.msk.f32.mxu1 %vm981_vm0, %v5300_v2 }
 0x6ca   : > { %6465 = vmatmul.mubr.msk.f32.gmra.mrb[114].mxu1 %vm981_vm0, %v5301_v34 }
 0x6cb   : > { %6467 = vmatprep.mubr.msk.f32.mxu1 %vm981_vm0, %v5302_v24 }
 0x6ce   : > { %6468 = vmatmul.mubr.msk.f32.gmra.mrb[116].mxu1 %vm981_vm0, %v5303_v37 }
 0x6cf   : > { %6470 = vmatprep.mubr.msk.f32.mxu1 %vm981_vm0, %v5304_v33 }
 0x6d2   : > { %6471 = vmatmul.mubr.msk.f32.gmra.mrb[118].mxu1 %vm981_vm0, %v5305_v23 }
 0x6d3   : > { %7754 = shalt.err (!%p7751_p3)
}
 0x6d4   : > { %s7755_s17 = scalar_lea.hbm %s11575_s30, 32  ;;  %s7759_s20 = scalar_lea.hbm %s11804_s18, 64 }
 0x6d5   : > { %p7756_p4 = scmp.ne.s32.totalorder %s11575_s30, %s7755_s17  ;;  %p7760_p9 = scmp.lt.u32.totalorder %s11575_s30, %s11804_s18 }
 0x6d6   : > { %p7761_p10 = scmp.lt.u32.totalorder %s7759_s20, %s7755_s17  ;;  %p7763_p12 = scmp.lt.u32.totalorder %s7755_s17, %s11575_s30 }
 0x6d7   : > { %p7757_p7 = pnand %p7756_p4, %p7981_p5 }
 0x6d8   : > { %p7762_p11 = por %p7761_p10, %p7760_p9 }
 0x6d9   : > { %p7758_p8 = pneg %p7757_p7 }
 0x6da   : > { %p7764_p13 = por %p7763_p12, %p7762_p11 }
 0x6dc   : > { %p7765_p0 = pnand %p7764_p13, %p7758_p8 }
 0x6de   : > { %7768 = shalt.err (!%p7765_p0)
}
 0x6df   : > { %6658 = dma.vmem_to_hbm [thread:$0]  (%p7981_p5), %s5845_s25, 32, %s11575_s30, %s5815_s19   ;;  %v11598_v32 = vld [vmem:[%s11795_s9] ss:$0 sm:$0xff]  ;;  %v11603_v58 = vld [vmem:[%s11795_s9 + $0x1] ss:$0 sm:$0xff]  ;;  %v7709_v16 = vld [vmem:[%s8017_s21 + $0x8] sm:$0xff] }
 0x6e0   : > { %s5951_s17 = sshll.u32 %s11368_s1, 8  ;;  %v7710_v10 = vld [vmem:[%s8017_s21] sm:$0xff]  ;;  %v7711_v14 = vld [vmem:[%s8017_s21 + $0x18] sm:$0xff]  ;;  %v7712_v56 = vld [vmem:[%s8017_s21 + $0x10] sm:$0xff]  ;;  %s6068_s30 = sshll.u32 %s7964_s0, 12 }
 0x6e1   : > { %s11616_s25 = scalar_lea.vmem [#allocation3], %s5951_s17  ;;  %v7713_v53 = vld [vmem:[%s8017_s21 + $0x28] sm:$0xff]  ;;  %v7714_v12 = vld [vmem:[%s8017_s21 + $0x20] sm:$0xff]  ;;  %v7715_v13 = vld [vmem:[%s8017_s21 + $0x38] sm:$0xff]  ;;  %s12091_s29 = sld [smem:[#allocation44_spill]] }
 0x6e2   : > { %v7716_v25 = vld [vmem:[%s8017_s21 + $0x30] sm:$0xff]  ;;  %v7717_v61 = vld [vmem:[%s8017_s21 + $0x48] sm:$0xff]  ;;  %v7718_v37 = vld [vmem:[%s8017_s21 + $0x40] sm:$0xff]  ;;  %s5828_s19 = sshll.u32 %s11616_s25, 4  ;;  %s5810_s0 = scalar_lea.sflag [#allocation4], %s11368_s1  ;;  %s11741_s19 = int_to_ptr.vmem [resolvable:$true] %s5828_s19 }
 0x6e3   : > { %s7769_s27 = scalar_lea.vmem %s11741_s19, 4096 }
 0x6e4   : > { %p7770_p1 = scmp.ne.s32.totalorder %s11741_s19, %s7769_s27 }
 0x6e6   : > { %p7771_p2 = pnand %p7770_p1, %p7981_p5 }
 0x6e7   : > { %s12092_s3 = smov %s12091_s29  ;;  %s11739_s23 = scalar_lea.hbm %s12091_s29, %s6068_s30 }
 0x6e8   : > { %p7772_p3 = pneg %p7771_p2 }
 0x769   : > { %v6427_v36 = vpop.f32.mrb[88].mxu1 }
 0x76a   : > { %v5637_v35 = vmul.f32 %v6427_v36, %v11598_v32  ;;  %v5472_v50 = vpop.f32.mrb[89].mxu1 }
 0x76b   : > { %v5636_v49 = vmul.f32 %v11598_v32, %v5472_v50 }
 0x76c   : > { %v5674_v5 = vadd.f32 %v11603_v58, %v5637_v35 }
 0x76d   : > { %v5673_v29 = vadd.f32 %v11603_v58, %v5636_v49  ;;  %v6430_v6 = vpop.f32.mrb[90].mxu1 }
 0x76e   : > { %v5706_v54 = vadd.f32 %v7709_v16, %v5674_v5  ;;  %v5639_v46 = vmul.f32 %v6430_v6, %v11598_v32  ;;  %v5482_v39 = vpop.f32.mrb[91].mxu1 }
 0x76f   : > { %v5705_v40 = vadd.f32 %v7710_v10, %v5673_v29  ;;  %v5638_v45 = vmul.f32 %v11598_v32, %v5482_v39  ;;  %v7719_v29 = vld [vmem:[%s8017_s21 + $0x58] sm:$0xff] }
 0x770   : > { %v5738_v43 = vmax.f32 %v5706_v54, 0.0  ;;  %v5676_v19 = vadd.f32 %v11603_v58, %v5639_v46  ;;  %v7720_v46 = vld [vmem:[%s8017_s21 + $0x50] sm:$0xff] }
 0x771   : > { %v5737_v1 = vmax.f32 %v5705_v40, 0.0  ;;  %v5675_v55 = vadd.f32 %v11603_v58, %v5638_v45  ;;  %v6433_v38 = vpop.f32.mrb[92].mxu1 }
 0x772   : > { %5770 = vst [vmem:[%s11616_s25 + $0x8] sm:$0xff] %v5738_v43  ;;  %v5708_v9 = vadd.f32 %v7711_v14, %v5676_v19  ;;  %v5641_v48 = vmul.f32 %v6433_v38, %v11598_v32  ;;  %v5492_v27 = vpop.f32.mrb[93].mxu1 }
 0x773   : > { %5769 = vst [vmem:[%s11616_s25] sm:$0xff] %v5737_v1  ;;  %v5707_v52 = vadd.f32 %v7712_v56, %v5675_v55  ;;  %v5640_v44 = vmul.f32 %v11598_v32, %v5492_v27  ;;  %v7721_v55 = vld [vmem:[%s8017_s21 + $0x68] sm:$0xff] }
 0x774   : > { %v5740_v60 = vmax.f32 %v5708_v9, 0.0  ;;  %v5678_v15 = vadd.f32 %v11603_v58, %v5641_v48  ;;  %v7722_v48 = vld [vmem:[%s8017_s21 + $0x60] sm:$0xff] }
 0x775   : > { %v5739_v11 = vmax.f32 %v5707_v52, 0.0  ;;  %v5677_v0 = vadd.f32 %v11603_v58, %v5640_v44  ;;  %v6436_v57 = vpop.f32.mrb[94].mxu1 }
 0x776   : > { %5772 = vst [vmem:[%s11616_s25 + $0x18] sm:$0xff] %v5740_v60  ;;  %v5710_v28 = vadd.f32 %v7713_v53, %v5678_v15  ;;  %v5643_v41 = vmul.f32 %v6436_v57, %v11598_v32  ;;  %v5502_v26 = vpop.f32.mrb[95].mxu1 }
 0x777   : > { %5771 = vst [vmem:[%s11616_s25 + $0x10] sm:$0xff] %v5739_v11  ;;  %v5709_v47 = vadd.f32 %v7714_v12, %v5677_v0  ;;  %v5642_v8 = vmul.f32 %v11598_v32, %v5502_v26  ;;  %v7723_v0 = vld [vmem:[%s8017_s21 + $0x78] sm:$0xff] }
 0x778   : > { %v5742_v2 = vmax.f32 %v5710_v28, 0.0  ;;  %v5680_v4 = vadd.f32 %v11603_v58, %v5643_v41  ;;  %v7724_v41 = vld [vmem:[%s8017_s21 + $0x70] sm:$0xff] }
 0x779   : > { %v5741_v22 = vmax.f32 %v5709_v47, 0.0  ;;  %v5679_v21 = vadd.f32 %v11603_v58, %v5642_v8  ;;  %v6439_v17 = vpop.f32.mrb[96].mxu1 }
 0x77a   : > { %5774 = vst [vmem:[%s11616_s25 + $0x28] sm:$0xff] %v5742_v2  ;;  %v5712_v3 = vadd.f32 %v7715_v13, %v5680_v4  ;;  %v5645_v34 = vmul.f32 %v6439_v17, %v11598_v32  ;;  %v5512_v62 = vpop.f32.mrb[97].mxu1 }
 0x77b   : > { %5773 = vst [vmem:[%s11616_s25 + $0x20] sm:$0xff] %v5741_v22  ;;  %v5711_v59 = vadd.f32 %v7716_v25, %v5679_v21  ;;  %v5644_v7 = vmul.f32 %v11598_v32, %v5512_v62  ;;  %v7725_v21 = vld [vmem:[%s8017_s21 + $0x88] sm:$0xff] }
 0x77c   : > { %v5744_v42 = vmax.f32 %v5712_v3, 0.0  ;;  %v5682_v20 = vadd.f32 %v11603_v58, %v5645_v34  ;;  %v7726_v34 = vld [vmem:[%s8017_s21 + $0x80] sm:$0xff] }
 0x77d   : > { %v5743_v24 = vmax.f32 %v5711_v59, 0.0  ;;  %v5681_v18 = vadd.f32 %v11603_v58, %v5644_v7  ;;  %v6442_v51 = vpop.f32.mrb[98].mxu1 }
 0x77e   : > { %5776 = vst [vmem:[%s11616_s25 + $0x38] sm:$0xff] %v5744_v42  ;;  %v5714_v31 = vadd.f32 %v7717_v61, %v5682_v20  ;;  %v5647_v30 = vmul.f32 %v6442_v51, %v11598_v32  ;;  %v5522_v63 = vpop.f32.mrb[99].mxu1 }
 0x77f   : > { %5775 = vst [vmem:[%s11616_s25 + $0x30] sm:$0xff] %v5743_v24  ;;  %v5713_v33 = vadd.f32 %v7718_v37, %v5681_v18  ;;  %v5646_v23 = vmul.f32 %v11598_v32, %v5522_v63  ;;  %v7727_v18 = vld [vmem:[%s8017_s21 + $0x98] sm:$0xff] }
 0x780   : > { %v5746_v36 = vmax.f32 %v5714_v31, 0.0  ;;  %v5684_v35 = vadd.f32 %v11603_v58, %v5647_v30  ;;  %v7728_v30 = vld [vmem:[%s8017_s21 + $0x90] sm:$0xff] }
 0x781   : > { %v5745_v50 = vmax.f32 %v5713_v33, 0.0  ;;  %v5683_v49 = vadd.f32 %v11603_v58, %v5646_v23  ;;  %v6445_v5 = vpop.f32.mrb[100].mxu1 }
 0x782   : > { %5778 = vst [vmem:[%s11616_s25 + $0x48] sm:$0xff] %v5746_v36  ;;  %v5716_v6 = vadd.f32 %v7719_v29, %v5684_v35  ;;  %v5649_v16 = vmul.f32 %v6445_v5, %v11598_v32  ;;  %v5532_v54 = vpop.f32.mrb[101].mxu1 }
 0x783   : > { %5777 = vst [vmem:[%s11616_s25 + $0x40] sm:$0xff] %v5745_v50  ;;  %v5715_v39 = vadd.f32 %v7720_v46, %v5683_v49  ;;  %v5648_v10 = vmul.f32 %v11598_v32, %v5532_v54  ;;  %v7729_v49 = vld [vmem:[%s8017_s21 + $0xa8] sm:$0xff] }
 0x784   : > { %v5748_v40 = vmax.f32 %v5716_v6, 0.0  ;;  %v5686_v45 = vadd.f32 %v11603_v58, %v5649_v16  ;;  %v7730_v16 = vld [vmem:[%s8017_s21 + $0xa0] sm:$0xff] }
 0x785   : > { %v5747_v43 = vmax.f32 %v5715_v39, 0.0  ;;  %v5685_v19 = vadd.f32 %v11603_v58, %v5648_v10  ;;  %v6448_v1 = vpop.f32.mrb[102].mxu1 }
 0x786   : > { %5780 = vst [vmem:[%s11616_s25 + $0x58] sm:$0xff] %v5748_v40  ;;  %v5718_v38 = vadd.f32 %v7721_v55, %v5686_v45  ;;  %v5651_v14 = vmul.f32 %v6448_v1, %v11598_v32  ;;  %v5542_v9 = vpop.f32.mrb[103].mxu1 }
 0x787   : > { %5779 = vst [vmem:[%s11616_s25 + $0x50] sm:$0xff] %v5747_v43  ;;  %v5717_v27 = vadd.f32 %v7722_v48, %v5685_v19  ;;  %v5650_v56 = vmul.f32 %v11598_v32, %v5542_v9  ;;  %v7731_v19 = vld [vmem:[%s8017_s21 + $0xb8] sm:$0xff] }
 0x788   : > { %v5750_v52 = vmax.f32 %v5718_v38, 0.0  ;;  %v5688_v44 = vadd.f32 %v11603_v58, %v5651_v14  ;;  %v7732_v14 = vld [vmem:[%s8017_s21 + $0xb0] sm:$0xff] }
 0x789   : > { %v5749_v60 = vmax.f32 %v5717_v27, 0.0  ;;  %v5687_v15 = vadd.f32 %v11603_v58, %v5650_v56  ;;  %v6451_v11 = vpop.f32.mrb[104].mxu1 }
 0x78a   : > { %5782 = vst [vmem:[%s11616_s25 + $0x68] sm:$0xff] %v5750_v52  ;;  %v5720_v57 = vadd.f32 %v7723_v0, %v5688_v44  ;;  %v5653_v53 = vmul.f32 %v6451_v11, %v11598_v32  ;;  %v5552_v28 = vpop.f32.mrb[105].mxu1 }
 0x78b   : > { %5781 = vst [vmem:[%s11616_s25 + $0x60] sm:$0xff] %v5749_v60  ;;  %v5719_v26 = vadd.f32 %v7724_v41, %v5687_v15  ;;  %v5652_v12 = vmul.f32 %v11598_v32, %v5552_v28  ;;  %v7733_v15 = vld [vmem:[%s8017_s21 + $0xc8] sm:$0xff] }
 0x78c   : > { %v5752_v47 = vmax.f32 %v5720_v57, 0.0  ;;  %v5690_v8 = vadd.f32 %v11603_v58, %v5653_v53  ;;  %v7734_v53 = vld [vmem:[%s8017_s21 + $0xc0] sm:$0xff] }
 0x78d   : > { %v5751_v2 = vmax.f32 %v5719_v26, 0.0  ;;  %v5689_v4 = vadd.f32 %v11603_v58, %v5652_v12  ;;  %v6454_v22 = vpop.f32.mrb[106].mxu1 }
 0x78e   : > { %5784 = vst [vmem:[%s11616_s25 + $0x78] sm:$0xff] %v5752_v47  ;;  %v5722_v17 = vadd.f32 %v7725_v21, %v5690_v8  ;;  %v5655_v13 = vmul.f32 %v6454_v22, %v11598_v32  ;;  %v5562_v3 = vpop.f32.mrb[107].mxu1 }
 0x78f   : > { %5783 = vst [vmem:[%s11616_s25 + $0x70] sm:$0xff] %v5751_v2  ;;  %v5721_v62 = vadd.f32 %v7726_v34, %v5689_v4  ;;  %v5654_v25 = vmul.f32 %v11598_v32, %v5562_v3  ;;  %v7735_v4 = vld [vmem:[%s8017_s21 + $0xd8] sm:$0xff] }
 0x790   : > { %v5754_v59 = vmax.f32 %v5722_v17, 0.0  ;;  %v5692_v7 = vadd.f32 %v11603_v58, %v5655_v13  ;;  %v7736_v13 = vld [vmem:[%s8017_s21 + $0xd0] sm:$0xff] }
 0x791   : > { %v5753_v42 = vmax.f32 %v5721_v62, 0.0  ;;  %v5691_v20 = vadd.f32 %v11603_v58, %v5654_v25  ;;  %v6457_v24 = vpop.f32.mrb[108].mxu1 }
 0x792   : > { %5786 = vst [vmem:[%s11616_s25 + $0x88] sm:$0xff] %v5754_v59  ;;  %v5724_v51 = vadd.f32 %v7727_v18, %v5692_v7  ;;  %v5657_v61 = vmul.f32 %v6457_v24, %v11598_v32  ;;  %v5572_v31 = vpop.f32.mrb[109].mxu1 }
 0x793   : > { %5785 = vst [vmem:[%s11616_s25 + $0x80] sm:$0xff] %v5753_v42  ;;  %v5723_v63 = vadd.f32 %v7728_v30, %v5691_v20  ;;  %v5656_v37 = vmul.f32 %v11598_v32, %v5572_v31  ;;  %v7737_v20 = vld [vmem:[%s8017_s21 + $0xe8] sm:$0xff] }
 0x794   : > { %v5756_v33 = vmax.f32 %v5724_v51, 0.0  ;;  %v5694_v23 = vadd.f32 %v11603_v58, %v5657_v61  ;;  %v7738_v61 = vld [vmem:[%s8017_s21 + $0xe0] sm:$0xff] }
 0x795   : > { %v5755_v36 = vmax.f32 %v5723_v63, 0.0  ;;  %v5693_v35 = vadd.f32 %v11603_v58, %v5656_v37  ;;  %v6460_v50 = vpop.f32.mrb[110].mxu1 }
 0x796   : > { %5788 = vst [vmem:[%s11616_s25 + $0x98] sm:$0xff] %v5756_v33  ;;  %v5726_v5 = vadd.f32 %v7729_v49, %v5694_v23  ;;  %v5659_v29 = vmul.f32 %v6460_v50, %v11598_v32  ;;  %v5582_v6 = vpop.f32.mrb[111].mxu1  ;;  %v7740_v50 = vld [vmem:[%s8017_s21 + $0xf0] sm:$0xff] }
 0x797   : > { %5787 = vst [vmem:[%s11616_s25 + $0x90] sm:$0xff] %v5755_v36  ;;  %v5725_v54 = vadd.f32 %v7730_v16, %v5693_v35  ;;  %v5658_v46 = vmul.f32 %v11598_v32, %v5582_v6  ;;  %v7739_v36 = vld [vmem:[%s8017_s21 + $0xf8] sm:$0xff]  ;;  %s7845_s21 = smov [#allocation3]  }
 0x798   : > { %v5758_v39 = vmax.f32 %v5726_v5, 0.0  ;;  %v5696_v10 = vadd.f32 %v11603_v58, %v5659_v29  ;;  %s7773_s22 = sshll.u32 %s7845_s21, 4  ;;  %s7774_s22 = int_to_ptr.vmem [resolvable:$false] %s7773_s22 }
 0x799   : > { %v5757_v40 = vmax.f32 %v5725_v54, 0.0  ;;  %v5695_v45 = vadd.f32 %v11603_v58, %v5658_v46  ;;  %v6463_v43 = vpop.f32.mrb[112].mxu1  ;;  %s7775_s17 = scalar_lea.vmem %s7774_s22, 8192  ;;  %p7776_p4 = scmp.lt.s32.totalorder %s11741_s19, %s7774_s22 }
 0x79a   : > { %5790 = vst [vmem:[%s11616_s25 + $0xa8] sm:$0xff] %v5758_v39  ;;  %v5728_v1 = vadd.f32 %v7731_v19, %v5696_v10  ;;  %v5661_v55 = vmul.f32 %v6463_v43, %v11598_v32  ;;  %v5592_v38 = vpop.f32.mrb[113].mxu1  ;;  %p7777_p7 = scmp.lt.s32.totalorder %s7775_s17, %s7769_s27 }
 0x79b   : > { %5789 = vst [vmem:[%s11616_s25 + $0xa0] sm:$0xff] %v5757_v40  ;;  %v5727_v9 = vadd.f32 %v7732_v14, %v5695_v45  ;;  %v5660_v48 = vmul.f32 %v11598_v32, %v5592_v38 }
 0x79c   : > { %v5760_v27 = vmax.f32 %v5728_v1, 0.0  ;;  %v5698_v56 = vadd.f32 %v11603_v58, %v5661_v55  ;;  %p7778_p8 = por %p7777_p7, %p7776_p4 }
 0x79d   : > { %v5759_v52 = vmax.f32 %v5727_v9, 0.0  ;;  %v5697_v44 = vadd.f32 %v11603_v58, %v5660_v48  ;;  %v6466_v60 = vpop.f32.mrb[114].mxu1 }
 0x79e   : > { %5792 = vst [vmem:[%s11616_s25 + $0xb8] sm:$0xff] %v5760_v27  ;;  %v5730_v11 = vadd.f32 %v7733_v15, %v5698_v56  ;;  %v5663_v0 = vmul.f32 %v6466_v60, %v11598_v32  ;;  %v5602_v57 = vpop.f32.mrb[115].mxu1  ;;  %p7779_p9 = pnand %p7778_p8, %p7772_p3 }
 0x79f   : > { %5791 = vst [vmem:[%s11616_s25 + $0xb0] sm:$0xff] %v5759_v52  ;;  %v5729_v28 = vadd.f32 %v7734_v53, %v5697_v44  ;;  %v5662_v41 = vmul.f32 %v11598_v32, %v5602_v57 }
 0x7a0   : > { %v5762_v26 = vmax.f32 %v5730_v11, 0.0  ;;  %v5700_v12 = vadd.f32 %v11603_v58, %v5663_v0 }
 0x7a1   : > { %v5761_v47 = vmax.f32 %v5729_v28, 0.0  ;;  %v5699_v8 = vadd.f32 %v11603_v58, %v5662_v41  ;;  %v6469_v2 = vpop.f32.mrb[116].mxu1 }
 0x7a2   : > { %5794 = vst [vmem:[%s11616_s25 + $0xc8] sm:$0xff] %v5762_v26  ;;  %v5732_v22 = vadd.f32 %v7735_v4, %v5700_v12  ;;  %v5665_v21 = vmul.f32 %v6469_v2, %v11598_v32  ;;  %v5612_v17 = vpop.f32.mrb[117].mxu1 }
 0x7a3   : > { %5793 = vst [vmem:[%s11616_s25 + $0xc0] sm:$0xff] %v5761_v47  ;;  %v5731_v3 = vadd.f32 %v7736_v13, %v5699_v8  ;;  %v5664_v34 = vmul.f32 %v11598_v32, %v5612_v17 }
 0x7a4   : > { %v5764_v62 = vmax.f32 %v5732_v22, 0.0  ;;  %v5702_v25 = vadd.f32 %v11603_v58, %v5665_v21 }
 0x7a5   : > { %v5763_v59 = vmax.f32 %v5731_v3, 0.0  ;;  %v5701_v7 = vadd.f32 %v11603_v58, %v5664_v34  ;;  %v6472_v42 = vpop.f32.mrb[118].mxu1 }
 0x7a6   : > { %5796 = vst [vmem:[%s11616_s25 + $0xd8] sm:$0xff] %v5764_v62  ;;  %v5734_v24 = vadd.f32 %v7737_v20, %v5702_v25  ;;  %v5667_v18 = vmul.f32 %v6472_v42, %v11598_v32  ;;  %v5622_v51 = vpop.f32.mrb[119].mxu1 }
 0x7a7   : > { %5795 = vst [vmem:[%s11616_s25 + $0xd0] sm:$0xff] %v5763_v59  ;;  %v5733_v31 = vadd.f32 %v7738_v61, %v5701_v7  ;;  %v5666_v30 = vmul.f32 %v11598_v32, %v5622_v51 }
 0x7a8   : > { %v5766_v63 = vmax.f32 %v5734_v24, 0.0  ;;  %v5704_v37 = vadd.f32 %v11603_v58, %v5667_v18 }
 0x7a9   : > { %v5765_v33 = vmax.f32 %v5733_v31, 0.0  ;;  %v5703_v23 = vadd.f32 %v11603_v58, %v5666_v30 }
 0x7aa   : > { %5798 = vst [vmem:[%s11616_s25 + $0xe8] sm:$0xff] %v5766_v63  ;;  %v5736_v35 = vadd.f32 %v7739_v36, %v5704_v37 }
 0x7ab   : > { %5797 = vst [vmem:[%s11616_s25 + $0xe0] sm:$0xff] %v5765_v33  ;;  %v5735_v49 = vadd.f32 %v7740_v50, %v5703_v23 }
 0x7ac   : > { %v5768_v5 = vmax.f32 %v5736_v35, 0.0 }
 0x7ad   : > { %v5767_v32 = vmax.f32 %v5735_v49, 0.0 }
 0x7ae   : > { %5800 = vst [vmem:[%s11616_s25 + $0xf8] sm:$0xff] %v5768_v5 }
 0x7af   : > { %5799 = vst [vmem:[%s11616_s25 + $0xf0] sm:$0xff] %v5767_v32 }
 0x7b0   : > { %7782 = shalt.err (!%p7779_p9)
}
 0x7b1   : > { %s7783_s25 = scalar_lea.hbm %s11739_s23, 4096  ;;  %s7787_s24 = scalar_lea.hbm %s12092_s3, 8192 }
 0x7b2   : > { %p7784_p10 = scmp.ne.s32.totalorder %s11739_s23, %s7783_s25  ;;  %p7788_p13 = scmp.lt.u32.totalorder %s11739_s23, %s12092_s3 }
 0x7b3   : > { %p7789_p0 = scmp.lt.u32.totalorder %s7787_s24, %s7783_s25  ;;  %p7791_p2 = scmp.lt.u32.totalorder %s7783_s25, %s11739_s23 }
 0x7b4   : > { %p7785_p11 = pnand %p7784_p10, %p7981_p5 }
 0x7b5   : > { %p7790_p1 = por %p7789_p0, %p7788_p13 }
 0x7b6   : > { %p7786_p12 = pneg %p7785_p11 }
 0x7b7   : > { %p7792_p3 = por %p7791_p2, %p7790_p1 }
 0x7b9   : > { %p7793_p4 = pnand %p7792_p3, %p7786_p12 }
 0x7bb   : > { %7796 = shalt.err (!%p7793_p4)
}
 0x7bc   : > { %s7846_s27 = smov 128   ;;  %s7847_s22 = smov 8  }
 0x7bd   : > { %6657 = dma.vmem_to_hbm [thread:$0]  (%p7981_p5), %s11741_s19, 4096, %s11739_s23, %s5810_s0, %s7846_s27, %s7846_s27, %s7847_s22  }
 0x7be PF: > { %s12093_s17 = sld [smem:[#allocation11_spill]]  ;;  %s12094_s30 = sld [smem:[#allocation9_spill]] }
 0x7c4   : > { %p6668_p7 = scmp.ge.s32.totalorder %s12093_s17, 2  ;;  %s5856_s24 = sand.u32 1, %s12094_s30  }
 0x7c5   : > { %s5857_s25 = scalar_lea.sflag [#allocation4], %s5856_s24 }
 0x7c6   : > { %p6662_p8 = pnand %p6668_p7, %p7985_p6 }
 0x7c8   : > { %7814 = dma.done.wait (!%p6662_p8), %s5857_s25, 4096  }
 0x7c9   : > { %7816 = vsyncadd (!%p6662_p8), %s5857_s25, 4294963200  ;;  %s5866_s29 = scalar_lea.sflag [#allocation6], %s5856_s24 }
 0x7ca   : > { %7818 = dma.done.wait (!%p6662_p8), %s5866_s29, 32  }
 0x7cb   : > { %7820 = vsyncadd (!%p6662_p8), %s5866_s29, 4294967264  ;;  %s12096_s30 = sld [smem:[#allocation12_spill]]  ;;  %s12097_s21 = sld [smem:[#allocation10_spill]] }
 0x7cc   : > { %s12098_s29 = sld [smem:[#allocation13_spill]]  ;;  %s12099_s27 = smov %s7827_s28 }
 0x7d1   : > { %p32_p5 = scmp.ge.s32.totalorder %s12096_s30, 4   ;;  %s12100_s28 = smov %s12097_s21 }
 0x7d3   :  { %34 = sbr.rel (!%p32_p5) target bundleno = 11 (0xb), region = 147 }
 0x7da   :  { %5871 = vsyncpa [#allocation4], 1 }
 0x7db   :  { %5873 = vsyncpa [#allocation4 + $0x1], 1 }
 0x7dc   :  { %5874 = vsyncpa [#allocation6], 1 }
 0x7dd   :  { %5876 = vsyncpa [#allocation6 + $0x1], 1 }

</bundles_post_ra>
